<compile_context>
chip_gen: v6e
topology: v6e:2x2x1
jax: 0.10.0
libtpu: 0.0.40
codegen_flags: <defaults>
</compile_context>

<pallas_src>
import jax
import jax.numpy as jnp
from jax import lax
from jax.experimental import pallas as pl
from jax.experimental.pallas import tpu as pltpu

TB = 16              # images per grid step
IMG_ROWS = 4 * 176   # patch rows per image: 4 pool planes x (169 valid -> 176 padded)
A2_ROWS = 144        # conv2 rows per image: 143 valid (oh*13+ow) -> 144 padded


# ----------------------------- fused kernel -----------------------------

def _mnist_fused_kernel(patches_ref,   # (TB*704, 9)    bf16  conv1 im2col (plane-sorted)
                        w1_ref,        # (9, 128)       bf16  conv1 weight (kh*3+kw, oc pad)
                        b1_ref,        # (1, 128)       f32
                        w2_ref,        # (9, 128, 128)  bf16  conv2 weight (tap, ic pad, oc pad)
                        b2_ref,        # (1, 128)       f32
                        wf1_ref,       # (25, 128, 128) bf16  fc1 weight (spatial, c pad, n)
                        bf1_ref,       # (1, 128)       f32
                        wf2_ref,       # (128, 128)     bf16  fc2 weight (c, n pad)
                        bf2_ref,       # (1, 128)       f32
                        out_ref,       # (TB, 128)      f32   lane-dense padded logits
                        p1_ref,        # (176, 128)     bf16  pooled conv1 (one image)
                        a2_ref):       # (TB*144, 128)  f32   conv2 activations (tile)
    f32, bf16 = jnp.float32, jnp.bfloat16
    w1 = w1_ref[...]
    b1 = b1_ref[...]
    b2 = b2_ref[...]

    # --- per image: conv1 (+ fused 2x2 max-pool) then conv2 ---
    def img_body(b, carry):
        # conv1: 4 plane matmuls reduced with max == MaxPool2d(2,2).
        # max_p(y_p) + bias == max_p(y_p + bias) and relu(max) == max(relu),
        # so bias/ReLU are applied once.  Plane pad rows (169..175) hold zeros
        # from the wrapper -> finite values everywhere, never NaN.
        m = None
        for p in range(4):
            st = pl.multiple_of(b * IMG_ROWS + p * 176, 16)
            y = jnp.dot(patches_ref[pl.ds(st, 176), :], w1,
                        preferred_element_type=f32)
            m = y if m is None else jnp.maximum(m, y)
        p1_ref[...] = jnp.maximum(m + b1, 0.0).astype(bf16)    # (176,128), row = ph*13+pw

        # conv2: 9 shifted (143,128)@(128,128) matmuls ("halo" big-M trick).
        # Output row m = oh*13 + ow; ow in {11,12} are halo garbage and the reads
        # past row 168 hit pool1's finite pad rows -- none of it is ever read by
        # pool2/fc1 (floor-mode pooling only touches oh,ow <= 9).
        acc = None
        for t in range(9):
            kh, kw = divmod(t, 3)
            d = jnp.dot(p1_ref[pl.ds(kh * 13 + kw, 143), :], w2_ref[t],
                        preferred_element_type=f32)
            acc = d if acc is None else acc + d
        abase = pl.multiple_of(b * A2_ROWS, 8)
        a2_ref[pl.ds(abase, 143), :] = jnp.maximum(acc + b2, 0.0)
        return carry

    lax.fori_loop(0, TB, img_body, 0)

    # --- pool2 fused into fc1: for each of the 25 spatial positions, gather the
    # four 2x2-window rows of every image (stride = per-image a2 pitch), max them,
    # cast once to bf16 and accumulate one (TB,128)@(128,128) matmul. ---
    h = None
    for s in range(25):
        qh, qw = divmod(s, 5)
        r = (2 * qh) * 13 + 2 * qw
        g00 = a2_ref[pl.ds(r, TB, stride=A2_ROWS), :]
        g01 = a2_ref[pl.ds(r + 1, TB, stride=A2_ROWS), :]
        g10 = a2_ref[pl.ds(r + 13, TB, stride=A2_ROWS), :]
        g11 = a2_ref[pl.ds(r + 14, TB, stride=A2_ROWS), :]
        xs = jnp.maximum(jnp.maximum(g00, g01),
                         jnp.maximum(g10, g11)).astype(bf16)
        d = jnp.dot(xs, wf1_ref[s], preferred_element_type=f32)
        h = d if h is None else h + d
    h = jnp.maximum(h + bf1_ref[...], 0.0)

    # --- fc2 (output padded to 128 lanes -> unmasked lane-dense store) ---
    out_ref[...] = jnp.dot(h.astype(bf16), wf2_ref[...],
                           preferred_element_type=f32) + bf2_ref[...]


# ----------------------------- parameters -----------------------------

def init_params():
    key = jax.random.PRNGKey(0)
    ks = jax.random.split(key, 8)
    s = 0.05
    return {
        "conv1_w": s * jax.random.normal(ks[0], (32, 1, 3, 3), jnp.float32),
        "conv1_b": s * jax.random.normal(ks[1], (32,), jnp.float32),
        "conv2_w": s * jax.random.normal(ks[2], (64, 32, 3, 3), jnp.float32),
        "conv2_b": s * jax.random.normal(ks[3], (64,), jnp.float32),
        "fc1_w": s * jax.random.normal(ks[4], (128, 64 * 5 * 5), jnp.float32),
        "fc1_b": s * jax.random.normal(ks[5], (128,), jnp.float32),
        "fc2_w": s * jax.random.normal(ks[6], (10, 128), jnp.float32),
        "fc2_b": s * jax.random.normal(ks[7], (10,), jnp.float32),
    }


def prepare_params(p):
    """One-time repack of PyTorch-layout weights into kernel layout."""
    f32, bf16 = jnp.float32, jnp.bfloat16
    # conv1 (32,1,3,3) -> (kh*3+kw, oc padded to 128)
    w1 = jnp.transpose(p["conv1_w"][:, 0], (1, 2, 0)).reshape(9, 32)
    w1 = jnp.pad(w1, ((0, 0), (0, 96))).astype(bf16)
    b1 = jnp.pad(p["conv1_b"], (0, 96)).reshape(1, 128).astype(f32)
    # conv2 (64,32,3,3) -> (kh*3+kw, ic pad 128, oc pad 128)
    w2 = jnp.transpose(p["conv2_w"], (2, 3, 1, 0)).reshape(9, 32, 64)
    w2 = jnp.pad(w2, ((0, 0), (0, 96), (0, 64))).astype(bf16)
    b2 = jnp.pad(p["conv2_b"], (0, 64)).reshape(1, 128).astype(f32)
    # fc1 (128, 1600): columns are NCHW-flat ic*25 + (qh*5+qw) -> (spatial, ic pad, n)
    wf1 = jnp.transpose(p["fc1_w"].reshape(128, 64, 25), (2, 1, 0))
    wf1 = jnp.pad(wf1, ((0, 0), (0, 64), (0, 0))).astype(bf16)
    bf1 = p["fc1_b"].reshape(1, 128).astype(f32)
    # fc2 (10, 128) -> (128, n padded to 128)
    wf2 = jnp.pad(p["fc2_w"].T, ((0, 0), (0, 118))).astype(bf16)
    bf2 = jnp.pad(p["fc2_b"], (0, 118)).reshape(1, 128).astype(f32)
    return {"w1": w1, "b1": b1, "w2": w2, "b2": b2,
            "wf1": wf1, "bf1": bf1, "wf2": wf2, "bf2": bf2}


# ----------------------------- forward pass -----------------------------

def _make_patches(x):
    """(Bp,28,28) f32 -> (Bp*704, 9) bf16 conv1 im2col with rows grouped into the
    4 positions ("planes") of each 2x2 pooling window:
        row = b*704 + (i*2+j)*176 + ph*13 + pw ,  col = kh*3 + kw
        value = x[b, 2*ph+i+kh, 2*pw+j+kw]        (rows 169..175 of a plane = 0)
    so pool1 becomes a max over 4 contiguous plane blocks inside the kernel."""
    Bp = x.shape[0]
    cols = [x[:, kh:kh + 26, kw:kw + 26] for kh in range(3) for kw in range(3)]
    p = jnp.stack(cols, axis=-1)                      # (Bp, 26, 26, 9)
    p = p.reshape(Bp, 13, 2, 13, 2, 9)                # (b, ph, i, pw, j, t)
    p = p.transpose(0, 2, 4, 1, 3, 5)                 # (b, i, j, ph, pw, t)
    p = p.reshape(Bp, 4, 169, 9)
    p = jnp.pad(p, ((0, 0), (0, 0), (0, 7), (0, 0)))  # (Bp, 4, 176, 9)
    return p.reshape(Bp * IMG_ROWS, 9).astype(jnp.bfloat16)


@jax.jit
def mnist_forward(x_nchw, packed):
    B = x_nchw.shape[0]
    Bp = ((B + TB - 1) // TB) * TB                    # pad batch to a tile multiple
    x = x_nchw[:, 0]                                  # (B, 28, 28), IC = 1
    if Bp != B:
        x = jnp.pad(x, ((0, Bp - B), (0, 0), (0, 0)))
    patches = _make_patches(x)                        # (Bp*704, 9) bf16

    const2 = lambda i: (0, 0)
    const3 = lambda i: (0, 0, 0)
    logits_pad = pl.pallas_call(
        _mnist_fused_kernel,
        out_shape=jax.ShapeDtypeStruct((Bp, 128), jnp.float32),
        grid=(Bp // TB,),
        in_specs=[
            pl.BlockSpec((TB * IMG_ROWS, 9), lambda i: (i, 0)),
            pl.BlockSpec((9, 128), const2),
            pl.BlockSpec((1, 128), const2),
            pl.BlockSpec((9, 128, 128), const3),
            pl.BlockSpec((1, 128), const2),
            pl.BlockSpec((25, 128, 128), const3),
            pl.BlockSpec((1, 128), const2),
            pl.BlockSpec((128, 128), const2),
            pl.BlockSpec((1, 128), const2),
        ],
        out_specs=pl.BlockSpec((TB, 128), lambda i: (i, 0)),
        scratch_shapes=[
            pltpu.VMEM((176, 128), jnp.bfloat16),           # pooled conv1 (per image)
            pltpu.VMEM((TB * A2_ROWS, 128), jnp.float32),   # conv2 activations (tile)
        ],
        compiler_params=pltpu.CompilerParams(
            dimension_semantics=("parallel",),              # shards batch tiles on v7x
            vmem_limit_bytes=32 * 1024 * 1024,
        ),
    )(patches, packed["w1"], packed["b1"], packed["w2"], packed["b2"],
      packed["wf1"], packed["bf1"], packed["wf2"], packed["bf2"])
    return logits_pad[:B, :10]


# ----------------------------- f32 reference -----------------------------

def _reference_forward(x, p):
    out = lax.conv_general_dilated(x, p["conv1_w"], (1, 1), "VALID",
                                   dimension_numbers=("NCHW", "OIHW", "NCHW"))
    out = jax.nn.relu(out + p["conv1_b"][None, :, None, None])
    out = lax.reduce_window(out, -jnp.inf, lax.max, (1, 1, 2, 2), (1, 1, 2, 2), "VALID")
    out = lax.conv_general_dilated(out, p["conv2_w"], (1, 1), "VALID",
                                   dimension_numbers=("NCHW", "OIHW", "NCHW"))
    out = jax.nn.relu(out + p["conv2_b"][None, :, None, None])
    out = lax.reduce_window(out, -jnp.inf, lax.max, (1, 1, 2, 2), (1, 1, 2, 2), "VALID")
    v = out.reshape(out.shape[0], -1)                 # NCHW flatten, 64*5*5
    h = jax.nn.relu(v @ p["fc1_w"].T + p["fc1_b"])
    return h @ p["fc2_w"].T + p["fc2_b"]


# ----------------------------- main -----------------------------

if __name__ == "__main__":
    params = init_params()
    packed = prepare_params(params)    # one-time weight repack (not per call)
    # 28x28 inputs are forced by the module's hard-coded 64*5*5 flatten.
    x = jax.random.normal(jax.random.PRNGKey(0), (2, 1, 28, 28), jnp.float32)
    logits = mnist_forward(x, packed)
    jax.block_until_ready(logits)
    assert logits.shape == (2, 10) and logits.dtype == jnp.float32
    ref = _reference_forward(x, params)
    assert bool(jnp.allclose(logits, ref, atol=3e-2, rtol=3e-2)), \
        "kernel output mismatch vs f32 reference"
    print("KERNEL_OK")
</pallas_src>

<mosaic_0001>
module attributes {stable_mosaic.version = 11 : i64} {
  func.func @_mnist_fused_kernel(%arg0: i32, %arg1: memref<11264x9xbf16, #tpu.memory_space<vmem>>, %arg2: memref<9x128xbf16, #tpu.memory_space<vmem>>, %arg3: memref<1x128xf32, #tpu.memory_space<vmem>>, %arg4: memref<9x128x128xbf16, #tpu.memory_space<vmem>>, %arg5: memref<1x128xf32, #tpu.memory_space<vmem>>, %arg6: memref<25x128x128xbf16, #tpu.memory_space<vmem>>, %arg7: memref<1x128xf32, #tpu.memory_space<vmem>>, %arg8: memref<128x128xbf16, #tpu.memory_space<vmem>>, %arg9: memref<1x128xf32, #tpu.memory_space<vmem>>, %arg10: memref<16x128xf32, #tpu.memory_space<vmem>>, %arg11: memref<176x128xbf16, #tpu.memory_space<vmem>>, %arg12: memref<2304x128xf32, #tpu.memory_space<vmem>>) attributes {dimension_semantics = [#tpu.dimension_semantics<parallel>], iteration_bounds = array<i64: 1>, scalar_prefetch = 0 : i64, scratch_operands = 2 : i64, tpu.core_type = #tpu.core_type<tc>, window_params = [{transform_indices = @transform_0, window_bounds = array<i64: 11264, 9>}, {pipeline_mode = #tpu.pipeline_mode<synchronous>, transform_indices = @transform_1, window_bounds = array<i64: 9, 128>}, {pipeline_mode = #tpu.pipeline_mode<synchronous>, transform_indices = @transform_2, window_bounds = array<i64: 1, 128>}, {pipeline_mode = #tpu.pipeline_mode<synchronous>, transform_indices = @transform_3, window_bounds = array<i64: 9, 128, 128>}, {pipeline_mode = #tpu.pipeline_mode<synchronous>, transform_indices = @transform_4, window_bounds = array<i64: 1, 128>}, {pipeline_mode = #tpu.pipeline_mode<synchronous>, transform_indices = @transform_5, window_bounds = array<i64: 25, 128, 128>}, {pipeline_mode = #tpu.pipeline_mode<synchronous>, transform_indices = @transform_6, window_bounds = array<i64: 1, 128>}, {pipeline_mode = #tpu.pipeline_mode<synchronous>, transform_indices = @transform_7, window_bounds = array<i64: 128, 128>}, {pipeline_mode = #tpu.pipeline_mode<synchronous>, transform_indices = @transform_8, window_bounds = array<i64: 1, 128>}, {transform_indices = @transform_9, window_bounds = array<i64: 16, 128>}]} {
    %c0 = arith.constant 0 : index
    %c0_0 = arith.constant 0 : index
    %0 = vector.load %arg2[%c0, %c0_0] : memref<9x128xbf16, #tpu.memory_space<vmem>>, vector<9x128xbf16>
    %c0_1 = arith.constant 0 : index
    %c0_2 = arith.constant 0 : index
    %1 = vector.load %arg3[%c0_1, %c0_2] : memref<1x128xf32, #tpu.memory_space<vmem>>, vector<1x128xf32>
    %c0_3 = arith.constant 0 : index
    %c0_4 = arith.constant 0 : index
    %2 = vector.load %arg5[%c0_3, %c0_4] : memref<1x128xf32, #tpu.memory_space<vmem>>, vector<1x128xf32>
    %c0_i32 = arith.constant 0 : i32
    %c16_i32 = arith.constant 16 : i32
    %3 = arith.addi %c0_i32, %c16_i32 : i32
    %c1_i32 = arith.constant 1 : i32
    scf.for %arg13 = %c0_i32 to %3 step %c1_i32  : i32 {
      %c704_i32 = arith.constant 704 : i32
      %315 = arith.muli %arg13, %c704_i32 : i32
      %c0_i32_211 = arith.constant 0 : i32
      %316 = arith.addi %315, %c0_i32_211 : i32
      %317 = tpu.assume_multiple %316, 16 : i32
      %318 = arith.index_cast %317 : i32 to index
      %c0_212 = arith.constant 0 : index
      %319 = vector.load %arg1[%318, %c0_212] : memref<11264x9xbf16, #tpu.memory_space<vmem>>, vector<176x9xbf16>
      %cst_213 = arith.constant dense<0.000000e+00> : vector<176x128xf32>
      %320 = tpu.matmul %319, %0, %cst_213 {dimension_numbers = #tpu.dot_dimension_numbers<[1], [0], [0], [1], [0, 0, 1, 1], [], []>} : vector<176x9xbf16>, vector<9x128xbf16>, vector<176x128xf32> -> vector<176x128xf32>
      %c704_i32_214 = arith.constant 704 : i32
      %321 = arith.muli %arg13, %c704_i32_214 : i32
      %c176_i32 = arith.constant 176 : i32
      %322 = arith.addi %321, %c176_i32 : i32
      %323 = tpu.assume_multiple %322, 16 : i32
      %324 = arith.index_cast %323 : i32 to index
      %c0_215 = arith.constant 0 : index
      %325 = vector.load %arg1[%324, %c0_215] : memref<11264x9xbf16, #tpu.memory_space<vmem>>, vector<176x9xbf16>
      %cst_216 = arith.constant dense<0.000000e+00> : vector<176x128xf32>
      %326 = tpu.matmul %325, %0, %cst_216 {dimension_numbers = #tpu.dot_dimension_numbers<[1], [0], [0], [1], [0, 0, 1, 1], [], []>} : vector<176x9xbf16>, vector<9x128xbf16>, vector<176x128xf32> -> vector<176x128xf32>
      %327 = arith.maximumf %320, %326 : vector<176x128xf32>
      %c704_i32_217 = arith.constant 704 : i32
      %328 = arith.muli %arg13, %c704_i32_217 : i32
      %c352_i32 = arith.constant 352 : i32
      %329 = arith.addi %328, %c352_i32 : i32
      %330 = tpu.assume_multiple %329, 16 : i32
      %331 = arith.index_cast %330 : i32 to index
      %c0_218 = arith.constant 0 : index
      %332 = vector.load %arg1[%331, %c0_218] : memref<11264x9xbf16, #tpu.memory_space<vmem>>, vector<176x9xbf16>
      %cst_219 = arith.constant dense<0.000000e+00> : vector<176x128xf32>
      %333 = tpu.matmul %332, %0, %cst_219 {dimension_numbers = #tpu.dot_dimension_numbers<[1], [0], [0], [1], [0, 0, 1, 1], [], []>} : vector<176x9xbf16>, vector<9x128xbf16>, vector<176x128xf32> -> vector<176x128xf32>
      %334 = arith.maximumf %327, %333 : vector<176x128xf32>
      %c704_i32_220 = arith.constant 704 : i32
      %335 = arith.muli %arg13, %c704_i32_220 : i32
      %c528_i32 = arith.constant 528 : i32
      %336 = arith.addi %335, %c528_i32 : i32
      %337 = tpu.assume_multiple %336, 16 : i32
      %338 = arith.index_cast %337 : i32 to index
      %c0_221 = arith.constant 0 : index
      %339 = vector.load %arg1[%338, %c0_221] : memref<11264x9xbf16, #tpu.memory_space<vmem>>, vector<176x9xbf16>
      %cst_222 = arith.constant dense<0.000000e+00> : vector<176x128xf32>
      %340 = tpu.matmul %339, %0, %cst_222 {dimension_numbers = #tpu.dot_dimension_numbers<[1], [0], [0], [1], [0, 0, 1, 1], [], []>} : vector<176x9xbf16>, vector<9x128xbf16>, vector<176x128xf32> -> vector<176x128xf32>
      %341 = arith.maximumf %334, %340 : vector<176x128xf32>
      %342 = vector.broadcast %1 : vector<1x128xf32> to vector<176x128xf32>
      %343 = arith.addf %341, %342 : vector<176x128xf32>
      %cst_223 = arith.constant 0.000000e+00 : f32
      %344 = vector.broadcast %cst_223 : f32 to vector<176x128xf32>
      %345 = arith.maximumf %343, %344 : vector<176x128xf32>
      %346 = arith.truncf %345 : vector<176x128xf32> to vector<176x128xbf16>
      %c0_224 = arith.constant 0 : index
      %c0_225 = arith.constant 0 : index
      %347 = vector.load %arg11[%c0_224, %c0_225] : memref<176x128xbf16, #tpu.memory_space<vmem>>, vector<176x128xbf16>
      tpu.vector_store %arg11[%c0_224, %c0_225], %346 {strides = array<i32>} : memref<176x128xbf16, #tpu.memory_space<vmem>>, vector<176x128xbf16>,
      %c0_226 = arith.constant 0 : index
      %c0_227 = arith.constant 0 : index
      %348 = vector.load %arg11[%c0_226, %c0_227] : memref<176x128xbf16, #tpu.memory_space<vmem>>, vector<143x128xbf16>
      %c0_228 = arith.constant 0 : index
      %c0_229 = arith.constant 0 : index
      %c0_230 = arith.constant 0 : index
      %349 = vector.load %arg4[%c0_228, %c0_229, %c0_230] : memref<9x128x128xbf16, #tpu.memory_space<vmem>>, vector<1x128x128xbf16>
      %350 = vector.shape_cast %349 : vector<1x128x128xbf16> to vector<128x128xbf16>
      %cst_231 = arith.constant dense<0.000000e+00> : vector<143x128xf32>
      %351 = tpu.matmul %348, %350, %cst_231 {dimension_numbers = #tpu.dot_dimension_numbers<[1], [0], [0], [1], [0, 0, 1, 1], [], []>} : vector<143x128xbf16>, vector<128x128xbf16>, vector<143x128xf32> -> vector<143x128xf32>
      %c1_232 = arith.constant 1 : index
      %c0_233 = arith.constant 0 : index
      %352 = vector.load %arg11[%c1_232, %c0_233] : memref<176x128xbf16, #tpu.memory_space<vmem>>, vector<143x128xbf16>
      %c1_234 = arith.constant 1 : index
      %c0_235 = arith.constant 0 : index
      %c0_236 = arith.constant 0 : index
      %353 = vector.load %arg4[%c1_234, %c0_235, %c0_236] : memref<9x128x128xbf16, #tpu.memory_space<vmem>>, vector<1x128x128xbf16>
      %354 = vector.shape_cast %353 : vector<1x128x128xbf16> to vector<128x128xbf16>
      %cst_237 = arith.constant dense<0.000000e+00> : vector<143x128xf32>
      %355 = tpu.matmul %352, %354, %cst_237 {dimension_numbers = #tpu.dot_dimension_numbers<[1], [0], [0], [1], [0, 0, 1, 1], [], []>} : vector<143x128xbf16>, vector<128x128xbf16>, vector<143x128xf32> -> vector<143x128xf32>
      %356 = arith.addf %351, %355 : vector<143x128xf32>
      %c2_238 = arith.constant 2 : index
      %c0_239 = arith.constant 0 : index
      %357 = vector.load %arg11[%c2_238, %c0_239] : memref<176x128xbf16, #tpu.memory_space<vmem>>, vector<143x128xbf16>
      %c2_240 = arith.constant 2 : index
      %c0_241 = arith.constant 0 : index
      %c0_242 = arith.constant 0 : index
      %358 = vector.load %arg4[%c2_240, %c0_241, %c0_242] : memref<9x128x128xbf16, #tpu.memory_space<vmem>>, vector<1x128x128xbf16>
      %359 = vector.shape_cast %358 : vector<1x128x128xbf16> to vector<128x128xbf16>
      %cst_243 = arith.constant dense<0.000000e+00> : vector<143x128xf32>
      %360 = tpu.matmul %357, %359, %cst_243 {dimension_numbers = #tpu.dot_dimension_numbers<[1], [0], [0], [1], [0, 0, 1, 1], [], []>} : vector<143x128xbf16>, vector<128x128xbf16>, vector<143x128xf32> -> vector<143x128xf32>
      %361 = arith.addf %356, %360 : vector<143x128xf32>
      %c13_244 = arith.constant 13 : index
      %c0_245 = arith.constant 0 : index
      %362 = vector.load %arg11[%c13_244, %c0_245] : memref<176x128xbf16, #tpu.memory_space<vmem>>, vector<143x128xbf16>
      %c3_246 = arith.constant 3 : index
      %c0_247 = arith.constant 0 : index
      %c0_248 = arith.constant 0 : index
      %363 = vector.load %arg4[%c3_246, %c0_247, %c0_248] : memref<9x128x128xbf16, #tpu.memory_space<vmem>>, vector<1x128x128xbf16>
      %364 = vector.shape_cast %363 : vector<1x128x128xbf16> to vector<128x128xbf16>
      %cst_249 = arith.constant dense<0.000000e+00> : vector<143x128xf32>
      %365 = tpu.matmul %362, %364, %cst_249 {dimension_numbers = #tpu.dot_dimension_numbers<[1], [0], [0], [1], [0, 0, 1, 1], [], []>} : vector<143x128xbf16>, vector<128x128xbf16>, vector<143x128xf32> -> vector<143x128xf32>
      %366 = arith.addf %361, %365 : vector<143x128xf32>
      %c14_250 = arith.constant 14 : index
      %c0_251 = arith.constant 0 : index
      %367 = vector.load %arg11[%c14_250, %c0_251] : memref<176x128xbf16, #tpu.memory_space<vmem>>, vector<143x128xbf16>
      %c4_252 = arith.constant 4 : index
      %c0_253 = arith.constant 0 : index
      %c0_254 = arith.constant 0 : index
      %368 = vector.load %arg4[%c4_252, %c0_253, %c0_254] : memref<9x128x128xbf16, #tpu.memory_space<vmem>>, vector<1x128x128xbf16>
      %369 = vector.shape_cast %368 : vector<1x128x128xbf16> to vector<128x128xbf16>
      %cst_255 = arith.constant dense<0.000000e+00> : vector<143x128xf32>
      %370 = tpu.matmul %367, %369, %cst_255 {dimension_numbers = #tpu.dot_dimension_numbers<[1], [0], [0], [1], [0, 0, 1, 1], [], []>} : vector<143x128xbf16>, vector<128x128xbf16>, vector<143x128xf32> -> vector<143x128xf32>
      %371 = arith.addf %366, %370 : vector<143x128xf32>
      %c15_256 = arith.constant 15 : index
      %c0_257 = arith.constant 0 : index
      %372 = vector.load %arg11[%c15_256, %c0_257] : memref<176x128xbf16, #tpu.memory_space<vmem>>, vector<143x128xbf16>
      %c5_258 = arith.constant 5 : index
      %c0_259 = arith.constant 0 : index
      %c0_260 = arith.constant 0 : index
      %373 = vector.load %arg4[%c5_258, %c0_259, %c0_260] : memref<9x128x128xbf16, #tpu.memory_space<vmem>>, vector<1x128x128xbf16>
      %374 = vector.shape_cast %373 : vector<1x128x128xbf16> to vector<128x128xbf16>
      %cst_261 = arith.constant dense<0.000000e+00> : vector<143x128xf32>
      %375 = tpu.matmul %372, %374, %cst_261 {dimension_numbers = #tpu.dot_dimension_numbers<[1], [0], [0], [1], [0, 0, 1, 1], [], []>} : vector<143x128xbf16>, vector<128x128xbf16>, vector<143x128xf32> -> vector<143x128xf32>
      %376 = arith.addf %371, %375 : vector<143x128xf32>
      %c26_262 = arith.constant 26 : index
      %c0_263 = arith.constant 0 : index
      %377 = vector.load %arg11[%c26_262, %c0_263] : memref<176x128xbf16, #tpu.memory_space<vmem>>, vector<143x128xbf16>
      %c6_264 = arith.constant 6 : index
      %c0_265 = arith.constant 0 : index
      %c0_266 = arith.constant 0 : index
      %378 = vector.load %arg4[%c6_264, %c0_265, %c0_266] : memref<9x128x128xbf16, #tpu.memory_space<vmem>>, vector<1x128x128xbf16>
      %379 = vector.shape_cast %378 : vector<1x128x128xbf16> to vector<128x128xbf16>
      %cst_267 = arith.constant dense<0.000000e+00> : vector<143x128xf32>
      %380 = tpu.matmul %377, %379, %cst_267 {dimension_numbers = #tpu.dot_dimension_numbers<[1], [0], [0], [1], [0, 0, 1, 1], [], []>} : vector<143x128xbf16>, vector<128x128xbf16>, vector<143x128xf32> -> vector<143x128xf32>
      %381 = arith.addf %376, %380 : vector<143x128xf32>
      %c27_268 = arith.constant 27 : index
      %c0_269 = arith.constant 0 : index
      %382 = vector.load %arg11[%c27_268, %c0_269] : memref<176x128xbf16, #tpu.memory_space<vmem>>, vector<143x128xbf16>
      %c7_270 = arith.constant 7 : index
      %c0_271 = arith.constant 0 : index
      %c0_272 = arith.constant 0 : index
      %383 = vector.load %arg4[%c7_270, %c0_271, %c0_272] : memref<9x128x128xbf16, #tpu.memory_space<vmem>>, vector<1x128x128xbf16>
      %384 = vector.shape_cast %383 : vector<1x128x128xbf16> to vector<128x128xbf16>
      %cst_273 = arith.constant dense<0.000000e+00> : vector<143x128xf32>
      %385 = tpu.matmul %382, %384, %cst_273 {dimension_numbers = #tpu.dot_dimension_numbers<[1], [0], [0], [1], [0, 0, 1, 1], [], []>} : vector<143x128xbf16>, vector<128x128xbf16>, vector<143x128xf32> -> vector<143x128xf32>
      %386 = arith.addf %381, %385 : vector<143x128xf32>
      %c28_274 = arith.constant 28 : index
      %c0_275 = arith.constant 0 : index
      %387 = vector.load %arg11[%c28_274, %c0_275] : memref<176x128xbf16, #tpu.memory_space<vmem>>, vector<143x128xbf16>
      %c8_276 = arith.constant 8 : index
      %c0_277 = arith.constant 0 : index
      %c0_278 = arith.constant 0 : index
      %388 = vector.load %arg4[%c8_276, %c0_277, %c0_278] : memref<9x128x128xbf16, #tpu.memory_space<vmem>>, vector<1x128x128xbf16>
      %389 = vector.shape_cast %388 : vector<1x128x128xbf16> to vector<128x128xbf16>
      %cst_279 = arith.constant dense<0.000000e+00> : vector<143x128xf32>
      %390 = tpu.matmul %387, %389, %cst_279 {dimension_numbers = #tpu.dot_dimension_numbers<[1], [0], [0], [1], [0, 0, 1, 1], [], []>} : vector<143x128xbf16>, vector<128x128xbf16>, vector<143x128xf32> -> vector<143x128xf32>
      %391 = arith.addf %386, %390 : vector<143x128xf32>
      %c144_i32 = arith.constant 144 : i32
      %392 = arith.muli %arg13, %c144_i32 : i32
      %393 = tpu.assume_multiple %392, 8 : i32
      %394 = vector.broadcast %2 : vector<1x128xf32> to vector<143x128xf32>
      %395 = arith.addf %391, %394 : vector<143x128xf32>
      %cst_280 = arith.constant 0.000000e+00 : f32
      %396 = vector.broadcast %cst_280 : f32 to vector<143x128xf32>
      %397 = arith.maximumf %395, %396 : vector<143x128xf32>
      %398 = arith.index_cast %393 : i32 to index
      %c0_281 = arith.constant 0 : index
      %399 = vector.load %arg12[%398, %c0_281] : memref<2304x128xf32, #tpu.memory_space<vmem>>, vector<143x128xf32>
      tpu.vector_store %arg12[%398, %c0_281], %397 {strides = array<i32>} : memref<2304x128xf32, #tpu.memory_space<vmem>>, vector<143x128xf32>,
    }
    %c16_i32_5 = arith.constant 16 : i32
    %c0_6 = arith.constant 0 : index
    %c0_7 = arith.constant 0 : index
    %4 = tpu.strided_load %arg12[%c0_6, %c0_7] {strides = array<i32: 144, 1>} : memref<2304x128xf32, #tpu.memory_space<vmem>>, vector<16x128xf32>
    %c1 = arith.constant 1 : index
    %c0_8 = arith.constant 0 : index
    %5 = tpu.strided_load %arg12[%c1, %c0_8] {strides = array<i32: 144, 1>} : memref<2304x128xf32, #tpu.memory_space<vmem>>, vector<16x128xf32>
    %c13 = arith.constant 13 : index
    %c0_9 = arith.constant 0 : index
    %6 = tpu.strided_load %arg12[%c13, %c0_9] {strides = array<i32: 144, 1>} : memref<2304x128xf32, #tpu.memory_space<vmem>>, vector<16x128xf32>
    %c14 = arith.constant 14 : index
    %c0_10 = arith.constant 0 : index
    %7 = tpu.strided_load %arg12[%c14, %c0_10] {strides = array<i32: 144, 1>} : memref<2304x128xf32, #tpu.memory_space<vmem>>, vector<16x128xf32>
    %8 = arith.maximumf %4, %5 : vector<16x128xf32>
    %9 = arith.maximumf %6, %7 : vector<16x128xf32>
    %10 = arith.maximumf %8, %9 : vector<16x128xf32>
    %11 = arith.truncf %10 : vector<16x128xf32> to vector<16x128xbf16>
    %c0_11 = arith.constant 0 : index
    %c0_12 = arith.constant 0 : index
    %c0_13 = arith.constant 0 : index
    %12 = vector.load %arg6[%c0_11, %c0_12, %c0_13] : memref<25x128x128xbf16, #tpu.memory_space<vmem>>, vector<1x128x128xbf16>
    %13 = vector.shape_cast %12 : vector<1x128x128xbf16> to vector<128x128xbf16>
    %cst = arith.constant dense<0.000000e+00> : vector<16x128xf32>
    %14 = tpu.matmul %11, %13, %cst {dimension_numbers = #tpu.dot_dimension_numbers<[1], [0], [0], [1], [0, 0, 1, 1], [], []>} : vector<16x128xbf16>, vector<128x128xbf16>, vector<16x128xf32> -> vector<16x128xf32>
    %c2 = arith.constant 2 : index
    %c0_14 = arith.constant 0 : index
    %15 = tpu.strided_load %arg12[%c2, %c0_14] {strides = array<i32: 144, 1>} : memref<2304x128xf32, #tpu.memory_space<vmem>>, vector<16x128xf32>
    %c3 = arith.constant 3 : index
    %c0_15 = arith.constant 0 : index
    %16 = tpu.strided_load %arg12[%c3, %c0_15] {strides = array<i32: 144, 1>} : memref<2304x128xf32, #tpu.memory_space<vmem>>, vector<16x128xf32>
    %c15 = arith.constant 15 : index
    %c0_16 = arith.constant 0 : index
    %17 = tpu.strided_load %arg12[%c15, %c0_16] {strides = array<i32: 144, 1>} : memref<2304x128xf32, #tpu.memory_space<vmem>>, vector<16x128xf32>
    %c16 = arith.constant 16 : index
    %c0_17 = arith.constant 0 : index
    %18 = tpu.strided_load %arg12[%c16, %c0_17] {strides = array<i32: 144, 1>} : memref<2304x128xf32, #tpu.memory_space<vmem>>, vector<16x128xf32>
    %19 = arith.maximumf %15, %16 : vector<16x128xf32>
    %20 = arith.maximumf %17, %18 : vector<16x128xf32>
    %21 = arith.maximumf %19, %20 : vector<16x128xf32>
    %22 = arith.truncf %21 : vector<16x128xf32> to vector<16x128xbf16>
    %c1_18 = arith.constant 1 : index
    %c0_19 = arith.constant 0 : index
    %c0_20 = arith.constant 0 : index
    %23 = vector.load %arg6[%c1_18, %c0_19, %c0_20] : memref<25x128x128xbf16, #tpu.memory_space<vmem>>, vector<1x128x128xbf16>
    %24 = vector.shape_cast %23 : vector<1x128x128xbf16> to vector<128x128xbf16>
    %cst_21 = arith.constant dense<0.000000e+00> : vector<16x128xf32>
    %25 = tpu.matmul %22, %24, %cst_21 {dimension_numbers = #tpu.dot_dimension_numbers<[1], [0], [0], [1], [0, 0, 1, 1], [], []>} : vector<16x128xbf16>, vector<128x128xbf16>, vector<16x128xf32> -> vector<16x128xf32>
    %26 = arith.addf %14, %25 : vector<16x128xf32>
    %c4 = arith.constant 4 : index
    %c0_22 = arith.constant 0 : index
    %27 = tpu.strided_load %arg12[%c4, %c0_22] {strides = array<i32: 144, 1>} : memref<2304x128xf32, #tpu.memory_space<vmem>>, vector<16x128xf32>
    %c5 = arith.constant 5 : index
    %c0_23 = arith.constant 0 : index
    %28 = tpu.strided_load %arg12[%c5, %c0_23] {strides = array<i32: 144, 1>} : memref<2304x128xf32, #tpu.memory_space<vmem>>, vector<16x128xf32>
    %c17 = arith.constant 17 : index
    %c0_24 = arith.constant 0 : index
    %29 = tpu.strided_load %arg12[%c17, %c0_24] {strides = array<i32: 144, 1>} : memref<2304x128xf32, #tpu.memory_space<vmem>>, vector<16x128xf32>
    %c18 = arith.constant 18 : index
    %c0_25 = arith.constant 0 : index
    %30 = tpu.strided_load %arg12[%c18, %c0_25] {strides = array<i32: 144, 1>} : memref<2304x128xf32, #tpu.memory_space<vmem>>, vector<16x128xf32>
    %31 = arith.maximumf %27, %28 : vector<16x128xf32>
    %32 = arith.maximumf %29, %30 : vector<16x128xf32>
    %33 = arith.maximumf %31, %32 : vector<16x128xf32>
    %34 = arith.truncf %33 : vector<16x128xf32> to vector<16x128xbf16>
    %c2_26 = arith.constant 2 : index
    %c0_27 = arith.constant 0 : index
    %c0_28 = arith.constant 0 : index
    %35 = vector.load %arg6[%c2_26, %c0_27, %c0_28] : memref<25x128x128xbf16, #tpu.memory_space<vmem>>, vector<1x128x128xbf16>
    %36 = vector.shape_cast %35 : vector<1x128x128xbf16> to vector<128x128xbf16>
    %cst_29 = arith.constant dense<0.000000e+00> : vector<16x128xf32>
    %37 = tpu.matmul %34, %36, %cst_29 {dimension_numbers = #tpu.dot_dimension_numbers<[1], [0], [0], [1], [0, 0, 1, 1], [], []>} : vector<16x128xbf16>, vector<128x128xbf16>, vector<16x128xf32> -> vector<16x128xf32>
    %38 = arith.addf %26, %37 : vector<16x128xf32>
    %c6 = arith.constant 6 : index
    %c0_30 = arith.constant 0 : index
    %39 = tpu.strided_load %arg12[%c6, %c0_30] {strides = array<i32: 144, 1>} : memref<2304x128xf32, #tpu.memory_space<vmem>>, vector<16x128xf32>
    %c7 = arith.constant 7 : index
    %c0_31 = arith.constant 0 : index
    %40 = tpu.strided_load %arg12[%c7, %c0_31] {strides = array<i32: 144, 1>} : memref<2304x128xf32, #tpu.memory_space<vmem>>, vector<16x128xf32>
    %c19 = arith.constant 19 : index
    %c0_32 = arith.constant 0 : index
    %41 = tpu.strided_load %arg12[%c19, %c0_32] {strides = array<i32: 144, 1>} : memref<2304x128xf32, #tpu.memory_space<vmem>>, vector<16x128xf32>
    %c20 = arith.constant 20 : index
    %c0_33 = arith.constant 0 : index
    %42 = tpu.strided_load %arg12[%c20, %c0_33] {strides = array<i32: 144, 1>} : memref<2304x128xf32, #tpu.memory_space<vmem>>, vector<16x128xf32>
    %43 = arith.maximumf %39, %40 : vector<16x128xf32>
    %44 = arith.maximumf %41, %42 : vector<16x128xf32>
    %45 = arith.maximumf %43, %44 : vector<16x128xf32>
    %46 = arith.truncf %45 : vector<16x128xf32> to vector<16x128xbf16>
    %c3_34 = arith.constant 3 : index
    %c0_35 = arith.constant 0 : index
    %c0_36 = arith.constant 0 : index
    %47 = vector.load %arg6[%c3_34, %c0_35, %c0_36] : memref<25x128x128xbf16, #tpu.memory_space<vmem>>, vector<1x128x128xbf16>
    %48 = vector.shape_cast %47 : vector<1x128x128xbf16> to vector<128x128xbf16>
    %cst_37 = arith.constant dense<0.000000e+00> : vector<16x128xf32>
    %49 = tpu.matmul %46, %48, %cst_37 {dimension_numbers = #tpu.dot_dimension_numbers<[1], [0], [0], [1], [0, 0, 1, 1], [], []>} : vector<16x128xbf16>, vector<128x128xbf16>, vector<16x128xf32> -> vector<16x128xf32>
    %50 = arith.addf %38, %49 : vector<16x128xf32>
    %c8 = arith.constant 8 : index
    %c0_38 = arith.constant 0 : index
    %51 = tpu.strided_load %arg12[%c8, %c0_38] {strides = array<i32: 144, 1>} : memref<2304x128xf32, #tpu.memory_space<vmem>>, vector<16x128xf32>
    %c9 = arith.constant 9 : index
    %c0_39 = arith.constant 0 : index
    %52 = tpu.strided_load %arg12[%c9, %c0_39] {strides = array<i32: 144, 1>} : memref<2304x128xf32, #tpu.memory_space<vmem>>, vector<16x128xf32>
    %c21 = arith.constant 21 : index
    %c0_40 = arith.constant 0 : index
    %53 = tpu.strided_load %arg12[%c21, %c0_40] {strides = array<i32: 144, 1>} : memref<2304x128xf32, #tpu.memory_space<vmem>>, vector<16x128xf32>
    %c22 = arith.constant 22 : index
    %c0_41 = arith.constant 0 : index
    %54 = tpu.strided_load %arg12[%c22, %c0_41] {strides = array<i32: 144, 1>} : memref<2304x128xf32, #tpu.memory_space<vmem>>, vector<16x128xf32>
    %55 = arith.maximumf %51, %52 : vector<16x128xf32>
    %56 = arith.maximumf %53, %54 : vector<16x128xf32>
    %57 = arith.maximumf %55, %56 : vector<16x128xf32>
    %58 = arith.truncf %57 : vector<16x128xf32> to vector<16x128xbf16>
    %c4_42 = arith.constant 4 : index
    %c0_43 = arith.constant 0 : index
    %c0_44 = arith.constant 0 : index
    %59 = vector.load %arg6[%c4_42, %c0_43, %c0_44] : memref<25x128x128xbf16, #tpu.memory_space<vmem>>, vector<1x128x128xbf16>
    %60 = vector.shape_cast %59 : vector<1x128x128xbf16> to vector<128x128xbf16>
    %cst_45 = arith.constant dense<0.000000e+00> : vector<16x128xf32>
    %61 = tpu.matmul %58, %60, %cst_45 {dimension_numbers = #tpu.dot_dimension_numbers<[1], [0], [0], [1], [0, 0, 1, 1], [], []>} : vector<16x128xbf16>, vector<128x128xbf16>, vector<16x128xf32> -> vector<16x128xf32>
    %62 = arith.addf %50, %61 : vector<16x128xf32>
    %c26 = arith.constant 26 : index
    %c0_46 = arith.constant 0 : index
    %63 = tpu.strided_load %arg12[%c26, %c0_46] {strides = array<i32: 144, 1>} : memref<2304x128xf32, #tpu.memory_space<vmem>>, vector<16x128xf32>
    %c27 = arith.constant 27 : index
    %c0_47 = arith.constant 0 : index
    %64 = tpu.strided_load %arg12[%c27, %c0_47] {strides = array<i32: 144, 1>} : memref<2304x128xf32, #tpu.memory_space<vmem>>, vector<16x128xf32>
    %c39 = arith.constant 39 : index
    %c0_48 = arith.constant 0 : index
    %65 = tpu.strided_load %arg12[%c39, %c0_48] {strides = array<i32: 144, 1>} : memref<2304x128xf32, #tpu.memory_space<vmem>>, vector<16x128xf32>
    %c40 = arith.constant 40 : index
    %c0_49 = arith.constant 0 : index
    %66 = tpu.strided_load %arg12[%c40, %c0_49] {strides = array<i32: 144, 1>} : memref<2304x128xf32, #tpu.memory_space<vmem>>, vector<16x128xf32>
    %67 = arith.maximumf %63, %64 : vector<16x128xf32>
    %68 = arith.maximumf %65, %66 : vector<16x128xf32>
    %69 = arith.maximumf %67, %68 : vector<16x128xf32>
    %70 = arith.truncf %69 : vector<16x128xf32> to vector<16x128xbf16>
    %c5_50 = arith.constant 5 : index
    %c0_51 = arith.constant 0 : index
    %c0_52 = arith.constant 0 : index
    %71 = vector.load %arg6[%c5_50, %c0_51, %c0_52] : memref<25x128x128xbf16, #tpu.memory_space<vmem>>, vector<1x128x128xbf16>
    %72 = vector.shape_cast %71 : vector<1x128x128xbf16> to vector<128x128xbf16>
    %cst_53 = arith.constant dense<0.000000e+00> : vector<16x128xf32>
    %73 = tpu.matmul %70, %72, %cst_53 {dimension_numbers = #tpu.dot_dimension_numbers<[1], [0], [0], [1], [0, 0, 1, 1], [], []>} : vector<16x128xbf16>, vector<128x128xbf16>, vector<16x128xf32> -> vector<16x128xf32>
    %74 = arith.addf %62, %73 : vector<16x128xf32>
    %c28 = arith.constant 28 : index
    %c0_54 = arith.constant 0 : index
    %75 = tpu.strided_load %arg12[%c28, %c0_54] {strides = array<i32: 144, 1>} : memref<2304x128xf32, #tpu.memory_space<vmem>>, vector<16x128xf32>
    %c29 = arith.constant 29 : index
    %c0_55 = arith.constant 0 : index
    %76 = tpu.strided_load %arg12[%c29, %c0_55] {strides = array<i32: 144, 1>} : memref<2304x128xf32, #tpu.memory_space<vmem>>, vector<16x128xf32>
    %c41 = arith.constant 41 : index
    %c0_56 = arith.constant 0 : index
    %77 = tpu.strided_load %arg12[%c41, %c0_56] {strides = array<i32: 144, 1>} : memref<2304x128xf32, #tpu.memory_space<vmem>>, vector<16x128xf32>
    %c42 = arith.constant 42 : index
    %c0_57 = arith.constant 0 : index
    %78 = tpu.strided_load %arg12[%c42, %c0_57] {strides = array<i32: 144, 1>} : memref<2304x128xf32, #tpu.memory_space<vmem>>, vector<16x128xf32>
    %79 = arith.maximumf %75, %76 : vector<16x128xf32>
    %80 = arith.maximumf %77, %78 : vector<16x128xf32>
    %81 = arith.maximumf %79, %80 : vector<16x128xf32>
    %82 = arith.truncf %81 : vector<16x128xf32> to vector<16x128xbf16>
    %c6_58 = arith.constant 6 : index
    %c0_59 = arith.constant 0 : index
    %c0_60 = arith.constant 0 : index
    %83 = vector.load %arg6[%c6_58, %c0_59, %c0_60] : memref<25x128x128xbf16, #tpu.memory_space<vmem>>, vector<1x128x128xbf16>
    %84 = vector.shape_cast %83 : vector<1x128x128xbf16> to vector<128x128xbf16>
    %cst_61 = arith.constant dense<0.000000e+00> : vector<16x128xf32>
    %85 = tpu.matmul %82, %84, %cst_61 {dimension_numbers = #tpu.dot_dimension_numbers<[1], [0], [0], [1], [0, 0, 1, 1], [], []>} : vector<16x128xbf16>, vector<128x128xbf16>, vector<16x128xf32> -> vector<16x128xf32>
    %86 = arith.addf %74, %85 : vector<16x128xf32>
    %c30 = arith.constant 30 : index
    %c0_62 = arith.constant 0 : index
    %87 = tpu.strided_load %arg12[%c30, %c0_62] {strides = array<i32: 144, 1>} : memref<2304x128xf32, #tpu.memory_space<vmem>>, vector<16x128xf32>
    %c31 = arith.constant 31 : index
    %c0_63 = arith.constant 0 : index
    %88 = tpu.strided_load %arg12[%c31, %c0_63] {strides = array<i32: 144, 1>} : memref<2304x128xf32, #tpu.memory_space<vmem>>, vector<16x128xf32>
    %c43 = arith.constant 43 : index
    %c0_64 = arith.constant 0 : index
    %89 = tpu.strided_load %arg12[%c43, %c0_64] {strides = array<i32: 144, 1>} : memref<2304x128xf32, #tpu.memory_space<vmem>>, vector<16x128xf32>
    %c44 = arith.constant 44 : index
    %c0_65 = arith.constant 0 : index
    %90 = tpu.strided_load %arg12[%c44, %c0_65] {strides = array<i32: 144, 1>} : memref<2304x128xf32, #tpu.memory_space<vmem>>, vector<16x128xf32>
    %91 = arith.maximumf %87, %88 : vector<16x128xf32>
    %92 = arith.maximumf %89, %90 : vector<16x128xf32>
    %93 = arith.maximumf %91, %92 : vector<16x128xf32>
    %94 = arith.truncf %93 : vector<16x128xf32> to vector<16x128xbf16>
    %c7_66 = arith.constant 7 : index
    %c0_67 = arith.constant 0 : index
    %c0_68 = arith.constant 0 : index
    %95 = vector.load %arg6[%c7_66, %c0_67, %c0_68] : memref<25x128x128xbf16, #tpu.memory_space<vmem>>, vector<1x128x128xbf16>
    %96 = vector.shape_cast %95 : vector<1x128x128xbf16> to vector<128x128xbf16>
    %cst_69 = arith.constant dense<0.000000e+00> : vector<16x128xf32>
    %97 = tpu.matmul %94, %96, %cst_69 {dimension_numbers = #tpu.dot_dimension_numbers<[1], [0], [0], [1], [0, 0, 1, 1], [], []>} : vector<16x128xbf16>, vector<128x128xbf16>, vector<16x128xf32> -> vector<16x128xf32>
    %98 = arith.addf %86, %97 : vector<16x128xf32>
    %c32 = arith.constant 32 : index
    %c0_70 = arith.constant 0 : index
    %99 = tpu.strided_load %arg12[%c32, %c0_70] {strides = array<i32: 144, 1>} : memref<2304x128xf32, #tpu.memory_space<vmem>>, vector<16x128xf32>
    %c33 = arith.constant 33 : index
    %c0_71 = arith.constant 0 : index
    %100 = tpu.strided_load %arg12[%c33, %c0_71] {strides = array<i32: 144, 1>} : memref<2304x128xf32, #tpu.memory_space<vmem>>, vector<16x128xf32>
    %c45 = arith.constant 45 : index
    %c0_72 = arith.constant 0 : index
    %101 = tpu.strided_load %arg12[%c45, %c0_72] {strides = array<i32: 144, 1>} : memref<2304x128xf32, #tpu.memory_space<vmem>>, vector<16x128xf32>
    %c46 = arith.constant 46 : index
    %c0_73 = arith.constant 0 : index
    %102 = tpu.strided_load %arg12[%c46, %c0_73] {strides = array<i32: 144, 1>} : memref<2304x128xf32, #tpu.memory_space<vmem>>, vector<16x128xf32>
    %103 = arith.maximumf %99, %100 : vector<16x128xf32>
    %104 = arith.maximumf %101, %102 : vector<16x128xf32>
    %105 = arith.maximumf %103, %104 : vector<16x128xf32>
    %106 = arith.truncf %105 : vector<16x128xf32> to vector<16x128xbf16>
    %c8_74 = arith.constant 8 : index
    %c0_75 = arith.constant 0 : index
    %c0_76 = arith.constant 0 : index
    %107 = vector.load %arg6[%c8_74, %c0_75, %c0_76] : memref<25x128x128xbf16, #tpu.memory_space<vmem>>, vector<1x128x128xbf16>
    %108 = vector.shape_cast %107 : vector<1x128x128xbf16> to vector<128x128xbf16>
    %cst_77 = arith.constant dense<0.000000e+00> : vector<16x128xf32>
    %109 = tpu.matmul %106, %108, %cst_77 {dimension_numbers = #tpu.dot_dimension_numbers<[1], [0], [0], [1], [0, 0, 1, 1], [], []>} : vector<16x128xbf16>, vector<128x128xbf16>, vector<16x128xf32> -> vector<16x128xf32>
    %110 = arith.addf %98, %109 : vector<16x128xf32>
    %c34 = arith.constant 34 : index
    %c0_78 = arith.constant 0 : index
    %111 = tpu.strided_load %arg12[%c34, %c0_78] {strides = array<i32: 144, 1>} : memref<2304x128xf32, #tpu.memory_space<vmem>>, vector<16x128xf32>
    %c35 = arith.constant 35 : index
    %c0_79 = arith.constant 0 : index
    %112 = tpu.strided_load %arg12[%c35, %c0_79] {strides = array<i32: 144, 1>} : memref<2304x128xf32, #tpu.memory_space<vmem>>, vector<16x128xf32>
    %c47 = arith.constant 47 : index
    %c0_80 = arith.constant 0 : index
    %113 = tpu.strided_load %arg12[%c47, %c0_80] {strides = array<i32: 144, 1>} : memref<2304x128xf32, #tpu.memory_space<vmem>>, vector<16x128xf32>
    %c48 = arith.constant 48 : index
    %c0_81 = arith.constant 0 : index
    %114 = tpu.strided_load %arg12[%c48, %c0_81] {strides = array<i32: 144, 1>} : memref<2304x128xf32, #tpu.memory_space<vmem>>, vector<16x128xf32>
    %115 = arith.maximumf %111, %112 : vector<16x128xf32>
    %116 = arith.maximumf %113, %114 : vector<16x128xf32>
    %117 = arith.maximumf %115, %116 : vector<16x128xf32>
    %118 = arith.truncf %117 : vector<16x128xf32> to vector<16x128xbf16>
    %c9_82 = arith.constant 9 : index
    %c0_83 = arith.constant 0 : index
    %c0_84 = arith.constant 0 : index
    %119 = vector.load %arg6[%c9_82, %c0_83, %c0_84] : memref<25x128x128xbf16, #tpu.memory_space<vmem>>, vector<1x128x128xbf16>
    %120 = vector.shape_cast %119 : vector<1x128x128xbf16> to vector<128x128xbf16>
    %cst_85 = arith.constant dense<0.000000e+00> : vector<16x128xf32>
    %121 = tpu.matmul %118, %120, %cst_85 {dimension_numbers = #tpu.dot_dimension_numbers<[1], [0], [0], [1], [0, 0, 1, 1], [], []>} : vector<16x128xbf16>, vector<128x128xbf16>, vector<16x128xf32> -> vector<16x128xf32>
    %122 = arith.addf %110, %121 : vector<16x128xf32>
    %c52 = arith.constant 52 : index
    %c0_86 = arith.constant 0 : index
    %123 = tpu.strided_load %arg12[%c52, %c0_86] {strides = array<i32: 144, 1>} : memref<2304x128xf32, #tpu.memory_space<vmem>>, vector<16x128xf32>
    %c53 = arith.constant 53 : index
    %c0_87 = arith.constant 0 : index
    %124 = tpu.strided_load %arg12[%c53, %c0_87] {strides = array<i32: 144, 1>} : memref<2304x128xf32, #tpu.memory_space<vmem>>, vector<16x128xf32>
    %c65 = arith.constant 65 : index
    %c0_88 = arith.constant 0 : index
    %125 = tpu.strided_load %arg12[%c65, %c0_88] {strides = array<i32: 144, 1>} : memref<2304x128xf32, #tpu.memory_space<vmem>>, vector<16x128xf32>
    %c66 = arith.constant 66 : index
    %c0_89 = arith.constant 0 : index
    %126 = tpu.strided_load %arg12[%c66, %c0_89] {strides = array<i32: 144, 1>} : memref<2304x128xf32, #tpu.memory_space<vmem>>, vector<16x128xf32>
    %127 = arith.maximumf %123, %124 : vector<16x128xf32>
    %128 = arith.maximumf %125, %126 : vector<16x128xf32>
    %129 = arith.maximumf %127, %128 : vector<16x128xf32>
    %130 = arith.truncf %129 : vector<16x128xf32> to vector<16x128xbf16>
    %c10 = arith.constant 10 : index
    %c0_90 = arith.constant 0 : index
    %c0_91 = arith.constant 0 : index
    %131 = vector.load %arg6[%c10, %c0_90, %c0_91] : memref<25x128x128xbf16, #tpu.memory_space<vmem>>, vector<1x128x128xbf16>
    %132 = vector.shape_cast %131 : vector<1x128x128xbf16> to vector<128x128xbf16>
    %cst_92 = arith.constant dense<0.000000e+00> : vector<16x128xf32>
    %133 = tpu.matmul %130, %132, %cst_92 {dimension_numbers = #tpu.dot_dimension_numbers<[1], [0], [0], [1], [0, 0, 1, 1], [], []>} : vector<16x128xbf16>, vector<128x128xbf16>, vector<16x128xf32> -> vector<16x128xf32>
    %134 = arith.addf %122, %133 : vector<16x128xf32>
    %c54 = arith.constant 54 : index
    %c0_93 = arith.constant 0 : index
    %135 = tpu.strided_load %arg12[%c54, %c0_93] {strides = array<i32: 144, 1>} : memref<2304x128xf32, #tpu.memory_space<vmem>>, vector<16x128xf32>
    %c55 = arith.constant 55 : index
    %c0_94 = arith.constant 0 : index
    %136 = tpu.strided_load %arg12[%c55, %c0_94] {strides = array<i32: 144, 1>} : memref<2304x128xf32, #tpu.memory_space<vmem>>, vector<16x128xf32>
    %c67 = arith.constant 67 : index
    %c0_95 = arith.constant 0 : index
    %137 = tpu.strided_load %arg12[%c67, %c0_95] {strides = array<i32: 144, 1>} : memref<2304x128xf32, #tpu.memory_space<vmem>>, vector<16x128xf32>
    %c68 = arith.constant 68 : index
    %c0_96 = arith.constant 0 : index
    %138 = tpu.strided_load %arg12[%c68, %c0_96] {strides = array<i32: 144, 1>} : memref<2304x128xf32, #tpu.memory_space<vmem>>, vector<16x128xf32>
    %139 = arith.maximumf %135, %136 : vector<16x128xf32>
    %140 = arith.maximumf %137, %138 : vector<16x128xf32>
    %141 = arith.maximumf %139, %140 : vector<16x128xf32>
    %142 = arith.truncf %141 : vector<16x128xf32> to vector<16x128xbf16>
    %c11 = arith.constant 11 : index
    %c0_97 = arith.constant 0 : index
    %c0_98 = arith.constant 0 : index
    %143 = vector.load %arg6[%c11, %c0_97, %c0_98] : memref<25x128x128xbf16, #tpu.memory_space<vmem>>, vector<1x128x128xbf16>
    %144 = vector.shape_cast %143 : vector<1x128x128xbf16> to vector<128x128xbf16>
    %cst_99 = arith.constant dense<0.000000e+00> : vector<16x128xf32>
    %145 = tpu.matmul %142, %144, %cst_99 {dimension_numbers = #tpu.dot_dimension_numbers<[1], [0], [0], [1], [0, 0, 1, 1], [], []>} : vector<16x128xbf16>, vector<128x128xbf16>, vector<16x128xf32> -> vector<16x128xf32>
    %146 = arith.addf %134, %145 : vector<16x128xf32>
    %c56 = arith.constant 56 : index
    %c0_100 = arith.constant 0 : index
    %147 = tpu.strided_load %arg12[%c56, %c0_100] {strides = array<i32: 144, 1>} : memref<2304x128xf32, #tpu.memory_space<vmem>>, vector<16x128xf32>
    %c57 = arith.constant 57 : index
    %c0_101 = arith.constant 0 : index
    %148 = tpu.strided_load %arg12[%c57, %c0_101] {strides = array<i32: 144, 1>} : memref<2304x128xf32, #tpu.memory_space<vmem>>, vector<16x128xf32>
    %c69 = arith.constant 69 : index
    %c0_102 = arith.constant 0 : index
    %149 = tpu.strided_load %arg12[%c69, %c0_102] {strides = array<i32: 144, 1>} : memref<2304x128xf32, #tpu.memory_space<vmem>>, vector<16x128xf32>
    %c70 = arith.constant 70 : index
    %c0_103 = arith.constant 0 : index
    %150 = tpu.strided_load %arg12[%c70, %c0_103] {strides = array<i32: 144, 1>} : memref<2304x128xf32, #tpu.memory_space<vmem>>, vector<16x128xf32>
    %151 = arith.maximumf %147, %148 : vector<16x128xf32>
    %152 = arith.maximumf %149, %150 : vector<16x128xf32>
    %153 = arith.maximumf %151, %152 : vector<16x128xf32>
    %154 = arith.truncf %153 : vector<16x128xf32> to vector<16x128xbf16>
    %c12 = arith.constant 12 : index
    %c0_104 = arith.constant 0 : index
    %c0_105 = arith.constant 0 : index
    %155 = vector.load %arg6[%c12, %c0_104, %c0_105] : memref<25x128x128xbf16, #tpu.memory_space<vmem>>, vector<1x128x128xbf16>
    %156 = vector.shape_cast %155 : vector<1x128x128xbf16> to vector<128x128xbf16>
    %cst_106 = arith.constant dense<0.000000e+00> : vector<16x128xf32>
    %157 = tpu.matmul %154, %156, %cst_106 {dimension_numbers = #tpu.dot_dimension_numbers<[1], [0], [0], [1], [0, 0, 1, 1], [], []>} : vector<16x128xbf16>, vector<128x128xbf16>, vector<16x128xf32> -> vector<16x128xf32>
    %158 = arith.addf %146, %157 : vector<16x128xf32>
    %c58 = arith.constant 58 : index
    %c0_107 = arith.constant 0 : index
    %159 = tpu.strided_load %arg12[%c58, %c0_107] {strides = array<i32: 144, 1>} : memref<2304x128xf32, #tpu.memory_space<vmem>>, vector<16x128xf32>
    %c59 = arith.constant 59 : index
    %c0_108 = arith.constant 0 : index
    %160 = tpu.strided_load %arg12[%c59, %c0_108] {strides = array<i32: 144, 1>} : memref<2304x128xf32, #tpu.memory_space<vmem>>, vector<16x128xf32>
    %c71 = arith.constant 71 : index
    %c0_109 = arith.constant 0 : index
    %161 = tpu.strided_load %arg12[%c71, %c0_109] {strides = array<i32: 144, 1>} : memref<2304x128xf32, #tpu.memory_space<vmem>>, vector<16x128xf32>
    %c72 = arith.constant 72 : index
    %c0_110 = arith.constant 0 : index
    %162 = tpu.strided_load %arg12[%c72, %c0_110] {strides = array<i32: 144, 1>} : memref<2304x128xf32, #tpu.memory_space<vmem>>, vector<16x128xf32>
    %163 = arith.maximumf %159, %160 : vector<16x128xf32>
    %164 = arith.maximumf %161, %162 : vector<16x128xf32>
    %165 = arith.maximumf %163, %164 : vector<16x128xf32>
    %166 = arith.truncf %165 : vector<16x128xf32> to vector<16x128xbf16>
    %c13_111 = arith.constant 13 : index
    %c0_112 = arith.constant 0 : index
    %c0_113 = arith.constant 0 : index
    %167 = vector.load %arg6[%c13_111, %c0_112, %c0_113] : memref<25x128x128xbf16, #tpu.memory_space<vmem>>, vector<1x128x128xbf16>
    %168 = vector.shape_cast %167 : vector<1x128x128xbf16> to vector<128x128xbf16>
    %cst_114 = arith.constant dense<0.000000e+00> : vector<16x128xf32>
    %169 = tpu.matmul %166, %168, %cst_114 {dimension_numbers = #tpu.dot_dimension_numbers<[1], [0], [0], [1], [0, 0, 1, 1], [], []>} : vector<16x128xbf16>, vector<128x128xbf16>, vector<16x128xf32> -> vector<16x128xf32>
    %170 = arith.addf %158, %169 : vector<16x128xf32>
    %c60 = arith.constant 60 : index
    %c0_115 = arith.constant 0 : index
    %171 = tpu.strided_load %arg12[%c60, %c0_115] {strides = array<i32: 144, 1>} : memref<2304x128xf32, #tpu.memory_space<vmem>>, vector<16x128xf32>
    %c61 = arith.constant 61 : index
    %c0_116 = arith.constant 0 : index
    %172 = tpu.strided_load %arg12[%c61, %c0_116] {strides = array<i32: 144, 1>} : memref<2304x128xf32, #tpu.memory_space<vmem>>, vector<16x128xf32>
    %c73 = arith.constant 73 : index
    %c0_117 = arith.constant 0 : index
    %173 = tpu.strided_load %arg12[%c73, %c0_117] {strides = array<i32: 144, 1>} : memref<2304x128xf32, #tpu.memory_space<vmem>>, vector<16x128xf32>
    %c74 = arith.constant 74 : index
    %c0_118 = arith.constant 0 : index
    %174 = tpu.strided_load %arg12[%c74, %c0_118] {strides = array<i32: 144, 1>} : memref<2304x128xf32, #tpu.memory_space<vmem>>, vector<16x128xf32>
    %175 = arith.maximumf %171, %172 : vector<16x128xf32>
    %176 = arith.maximumf %173, %174 : vector<16x128xf32>
    %177 = arith.maximumf %175, %176 : vector<16x128xf32>
    %178 = arith.truncf %177 : vector<16x128xf32> to vector<16x128xbf16>
    %c14_119 = arith.constant 14 : index
    %c0_120 = arith.constant 0 : index
    %c0_121 = arith.constant 0 : index
    %179 = vector.load %arg6[%c14_119, %c0_120, %c0_121] : memref<25x128x128xbf16, #tpu.memory_space<vmem>>, vector<1x128x128xbf16>
    %180 = vector.shape_cast %179 : vector<1x128x128xbf16> to vector<128x128xbf16>
    %cst_122 = arith.constant dense<0.000000e+00> : vector<16x128xf32>
    %181 = tpu.matmul %178, %180, %cst_122 {dimension_numbers = #tpu.dot_dimension_numbers<[1], [0], [0], [1], [0, 0, 1, 1], [], []>} : vector<16x128xbf16>, vector<128x128xbf16>, vector<16x128xf32> -> vector<16x128xf32>
    %182 = arith.addf %170, %181 : vector<16x128xf32>
    %c78 = arith.constant 78 : index
    %c0_123 = arith.constant 0 : index
    %183 = tpu.strided_load %arg12[%c78, %c0_123] {strides = array<i32: 144, 1>} : memref<2304x128xf32, #tpu.memory_space<vmem>>, vector<16x128xf32>
    %c79 = arith.constant 79 : index
    %c0_124 = arith.constant 0 : index
    %184 = tpu.strided_load %arg12[%c79, %c0_124] {strides = array<i32: 144, 1>} : memref<2304x128xf32, #tpu.memory_space<vmem>>, vector<16x128xf32>
    %c91 = arith.constant 91 : index
    %c0_125 = arith.constant 0 : index
    %185 = tpu.strided_load %arg12[%c91, %c0_125] {strides = array<i32: 144, 1>} : memref<2304x128xf32, #tpu.memory_space<vmem>>, vector<16x128xf32>
    %c92 = arith.constant 92 : index
    %c0_126 = arith.constant 0 : index
    %186 = tpu.strided_load %arg12[%c92, %c0_126] {strides = array<i32: 144, 1>} : memref<2304x128xf32, #tpu.memory_space<vmem>>, vector<16x128xf32>
    %187 = arith.maximumf %183, %184 : vector<16x128xf32>
    %188 = arith.maximumf %185, %186 : vector<16x128xf32>
    %189 = arith.maximumf %187, %188 : vector<16x128xf32>
    %190 = arith.truncf %189 : vector<16x128xf32> to vector<16x128xbf16>
    %c15_127 = arith.constant 15 : index
    %c0_128 = arith.constant 0 : index
    %c0_129 = arith.constant 0 : index
    %191 = vector.load %arg6[%c15_127, %c0_128, %c0_129] : memref<25x128x128xbf16, #tpu.memory_space<vmem>>, vector<1x128x128xbf16>
    %192 = vector.shape_cast %191 : vector<1x128x128xbf16> to vector<128x128xbf16>
    %cst_130 = arith.constant dense<0.000000e+00> : vector<16x128xf32>
    %193 = tpu.matmul %190, %192, %cst_130 {dimension_numbers = #tpu.dot_dimension_numbers<[1], [0], [0], [1], [0, 0, 1, 1], [], []>} : vector<16x128xbf16>, vector<128x128xbf16>, vector<16x128xf32> -> vector<16x128xf32>
    %194 = arith.addf %182, %193 : vector<16x128xf32>
    %c80 = arith.constant 80 : index
    %c0_131 = arith.constant 0 : index
    %195 = tpu.strided_load %arg12[%c80, %c0_131] {strides = array<i32: 144, 1>} : memref<2304x128xf32, #tpu.memory_space<vmem>>, vector<16x128xf32>
    %c81 = arith.constant 81 : index
    %c0_132 = arith.constant 0 : index
    %196 = tpu.strided_load %arg12[%c81, %c0_132] {strides = array<i32: 144, 1>} : memref<2304x128xf32, #tpu.memory_space<vmem>>, vector<16x128xf32>
    %c93 = arith.constant 93 : index
    %c0_133 = arith.constant 0 : index
    %197 = tpu.strided_load %arg12[%c93, %c0_133] {strides = array<i32: 144, 1>} : memref<2304x128xf32, #tpu.memory_space<vmem>>, vector<16x128xf32>
    %c94 = arith.constant 94 : index
    %c0_134 = arith.constant 0 : index
    %198 = tpu.strided_load %arg12[%c94, %c0_134] {strides = array<i32: 144, 1>} : memref<2304x128xf32, #tpu.memory_space<vmem>>, vector<16x128xf32>
    %199 = arith.maximumf %195, %196 : vector<16x128xf32>
    %200 = arith.maximumf %197, %198 : vector<16x128xf32>
    %201 = arith.maximumf %199, %200 : vector<16x128xf32>
    %202 = arith.truncf %201 : vector<16x128xf32> to vector<16x128xbf16>
    %c16_135 = arith.constant 16 : index
    %c0_136 = arith.constant 0 : index
    %c0_137 = arith.constant 0 : index
    %203 = vector.load %arg6[%c16_135, %c0_136, %c0_137] : memref<25x128x128xbf16, #tpu.memory_space<vmem>>, vector<1x128x128xbf16>
    %204 = vector.shape_cast %203 : vector<1x128x128xbf16> to vector<128x128xbf16>
    %cst_138 = arith.constant dense<0.000000e+00> : vector<16x128xf32>
    %205 = tpu.matmul %202, %204, %cst_138 {dimension_numbers = #tpu.dot_dimension_numbers<[1], [0], [0], [1], [0, 0, 1, 1], [], []>} : vector<16x128xbf16>, vector<128x128xbf16>, vector<16x128xf32> -> vector<16x128xf32>
    %206 = arith.addf %194, %205 : vector<16x128xf32>
    %c82 = arith.constant 82 : index
    %c0_139 = arith.constant 0 : index
    %207 = tpu.strided_load %arg12[%c82, %c0_139] {strides = array<i32: 144, 1>} : memref<2304x128xf32, #tpu.memory_space<vmem>>, vector<16x128xf32>
    %c83 = arith.constant 83 : index
    %c0_140 = arith.constant 0 : index
    %208 = tpu.strided_load %arg12[%c83, %c0_140] {strides = array<i32: 144, 1>} : memref<2304x128xf32, #tpu.memory_space<vmem>>, vector<16x128xf32>
    %c95 = arith.constant 95 : index
    %c0_141 = arith.constant 0 : index
    %209 = tpu.strided_load %arg12[%c95, %c0_141] {strides = array<i32: 144, 1>} : memref<2304x128xf32, #tpu.memory_space<vmem>>, vector<16x128xf32>
    %c96 = arith.constant 96 : index
    %c0_142 = arith.constant 0 : index
    %210 = tpu.strided_load %arg12[%c96, %c0_142] {strides = array<i32: 144, 1>} : memref<2304x128xf32, #tpu.memory_space<vmem>>, vector<16x128xf32>
    %211 = arith.maximumf %207, %208 : vector<16x128xf32>
    %212 = arith.maximumf %209, %210 : vector<16x128xf32>
    %213 = arith.maximumf %211, %212 : vector<16x128xf32>
    %214 = arith.truncf %213 : vector<16x128xf32> to vector<16x128xbf16>
    %c17_143 = arith.constant 17 : index
    %c0_144 = arith.constant 0 : index
    %c0_145 = arith.constant 0 : index
    %215 = vector.load %arg6[%c17_143, %c0_144, %c0_145] : memref<25x128x128xbf16, #tpu.memory_space<vmem>>, vector<1x128x128xbf16>
    %216 = vector.shape_cast %215 : vector<1x128x128xbf16> to vector<128x128xbf16>
    %cst_146 = arith.constant dense<0.000000e+00> : vector<16x128xf32>
    %217 = tpu.matmul %214, %216, %cst_146 {dimension_numbers = #tpu.dot_dimension_numbers<[1], [0], [0], [1], [0, 0, 1, 1], [], []>} : vector<16x128xbf16>, vector<128x128xbf16>, vector<16x128xf32> -> vector<16x128xf32>
    %218 = arith.addf %206, %217 : vector<16x128xf32>
    %c84 = arith.constant 84 : index
    %c0_147 = arith.constant 0 : index
    %219 = tpu.strided_load %arg12[%c84, %c0_147] {strides = array<i32: 144, 1>} : memref<2304x128xf32, #tpu.memory_space<vmem>>, vector<16x128xf32>
    %c85 = arith.constant 85 : index
    %c0_148 = arith.constant 0 : index
    %220 = tpu.strided_load %arg12[%c85, %c0_148] {strides = array<i32: 144, 1>} : memref<2304x128xf32, #tpu.memory_space<vmem>>, vector<16x128xf32>
    %c97 = arith.constant 97 : index
    %c0_149 = arith.constant 0 : index
    %221 = tpu.strided_load %arg12[%c97, %c0_149] {strides = array<i32: 144, 1>} : memref<2304x128xf32, #tpu.memory_space<vmem>>, vector<16x128xf32>
    %c98 = arith.constant 98 : index
    %c0_150 = arith.constant 0 : index
    %222 = tpu.strided_load %arg12[%c98, %c0_150] {strides = array<i32: 144, 1>} : memref<2304x128xf32, #tpu.memory_space<vmem>>, vector<16x128xf32>
    %223 = arith.maximumf %219, %220 : vector<16x128xf32>
    %224 = arith.maximumf %221, %222 : vector<16x128xf32>
    %225 = arith.maximumf %223, %224 : vector<16x128xf32>
    %226 = arith.truncf %225 : vector<16x128xf32> to vector<16x128xbf16>
    %c18_151 = arith.constant 18 : index
    %c0_152 = arith.constant 0 : index
    %c0_153 = arith.constant 0 : index
    %227 = vector.load %arg6[%c18_151, %c0_152, %c0_153] : memref<25x128x128xbf16, #tpu.memory_space<vmem>>, vector<1x128x128xbf16>
    %228 = vector.shape_cast %227 : vector<1x128x128xbf16> to vector<128x128xbf16>
    %cst_154 = arith.constant dense<0.000000e+00> : vector<16x128xf32>
    %229 = tpu.matmul %226, %228, %cst_154 {dimension_numbers = #tpu.dot_dimension_numbers<[1], [0], [0], [1], [0, 0, 1, 1], [], []>} : vector<16x128xbf16>, vector<128x128xbf16>, vector<16x128xf32> -> vector<16x128xf32>
    %230 = arith.addf %218, %229 : vector<16x128xf32>
    %c86 = arith.constant 86 : index
    %c0_155 = arith.constant 0 : index
    %231 = tpu.strided_load %arg12[%c86, %c0_155] {strides = array<i32: 144, 1>} : memref<2304x128xf32, #tpu.memory_space<vmem>>, vector<16x128xf32>
    %c87 = arith.constant 87 : index
    %c0_156 = arith.constant 0 : index
    %232 = tpu.strided_load %arg12[%c87, %c0_156] {strides = array<i32: 144, 1>} : memref<2304x128xf32, #tpu.memory_space<vmem>>, vector<16x128xf32>
    %c99 = arith.constant 99 : index
    %c0_157 = arith.constant 0 : index
    %233 = tpu.strided_load %arg12[%c99, %c0_157] {strides = array<i32: 144, 1>} : memref<2304x128xf32, #tpu.memory_space<vmem>>, vector<16x128xf32>
    %c100 = arith.constant 100 : index
    %c0_158 = arith.constant 0 : index
    %234 = tpu.strided_load %arg12[%c100, %c0_158] {strides = array<i32: 144, 1>} : memref<2304x128xf32, #tpu.memory_space<vmem>>, vector<16x128xf32>
    %235 = arith.maximumf %231, %232 : vector<16x128xf32>
    %236 = arith.maximumf %233, %234 : vector<16x128xf32>
    %237 = arith.maximumf %235, %236 : vector<16x128xf32>
    %238 = arith.truncf %237 : vector<16x128xf32> to vector<16x128xbf16>
    %c19_159 = arith.constant 19 : index
    %c0_160 = arith.constant 0 : index
    %c0_161 = arith.constant 0 : index
    %239 = vector.load %arg6[%c19_159, %c0_160, %c0_161] : memref<25x128x128xbf16, #tpu.memory_space<vmem>>, vector<1x128x128xbf16>
    %240 = vector.shape_cast %239 : vector<1x128x128xbf16> to vector<128x128xbf16>
    %cst_162 = arith.constant dense<0.000000e+00> : vector<16x128xf32>
    %241 = tpu.matmul %238, %240, %cst_162 {dimension_numbers = #tpu.dot_dimension_numbers<[1], [0], [0], [1], [0, 0, 1, 1], [], []>} : vector<16x128xbf16>, vector<128x128xbf16>, vector<16x128xf32> -> vector<16x128xf32>
    %242 = arith.addf %230, %241 : vector<16x128xf32>
    %c104 = arith.constant 104 : index
    %c0_163 = arith.constant 0 : index
    %243 = tpu.strided_load %arg12[%c104, %c0_163] {strides = array<i32: 144, 1>} : memref<2304x128xf32, #tpu.memory_space<vmem>>, vector<16x128xf32>
    %c105 = arith.constant 105 : index
    %c0_164 = arith.constant 0 : index
    %244 = tpu.strided_load %arg12[%c105, %c0_164] {strides = array<i32: 144, 1>} : memref<2304x128xf32, #tpu.memory_space<vmem>>, vector<16x128xf32>
    %c117 = arith.constant 117 : index
    %c0_165 = arith.constant 0 : index
    %245 = tpu.strided_load %arg12[%c117, %c0_165] {strides = array<i32: 144, 1>} : memref<2304x128xf32, #tpu.memory_space<vmem>>, vector<16x128xf32>
    %c118 = arith.constant 118 : index
    %c0_166 = arith.constant 0 : index
    %246 = tpu.strided_load %arg12[%c118, %c0_166] {strides = array<i32: 144, 1>} : memref<2304x128xf32, #tpu.memory_space<vmem>>, vector<16x128xf32>
    %247 = arith.maximumf %243, %244 : vector<16x128xf32>
    %248 = arith.maximumf %245, %246 : vector<16x128xf32>
    %249 = arith.maximumf %247, %248 : vector<16x128xf32>
    %250 = arith.truncf %249 : vector<16x128xf32> to vector<16x128xbf16>
    %c20_167 = arith.constant 20 : index
    %c0_168 = arith.constant 0 : index
    %c0_169 = arith.constant 0 : index
    %251 = vector.load %arg6[%c20_167, %c0_168, %c0_169] : memref<25x128x128xbf16, #tpu.memory_space<vmem>>, vector<1x128x128xbf16>
    %252 = vector.shape_cast %251 : vector<1x128x128xbf16> to vector<128x128xbf16>
    %cst_170 = arith.constant dense<0.000000e+00> : vector<16x128xf32>
    %253 = tpu.matmul %250, %252, %cst_170 {dimension_numbers = #tpu.dot_dimension_numbers<[1], [0], [0], [1], [0, 0, 1, 1], [], []>} : vector<16x128xbf16>, vector<128x128xbf16>, vector<16x128xf32> -> vector<16x128xf32>
    %254 = arith.addf %242, %253 : vector<16x128xf32>
    %c106 = arith.constant 106 : index
    %c0_171 = arith.constant 0 : index
    %255 = tpu.strided_load %arg12[%c106, %c0_171] {strides = array<i32: 144, 1>} : memref<2304x128xf32, #tpu.memory_space<vmem>>, vector<16x128xf32>
    %c107 = arith.constant 107 : index
    %c0_172 = arith.constant 0 : index
    %256 = tpu.strided_load %arg12[%c107, %c0_172] {strides = array<i32: 144, 1>} : memref<2304x128xf32, #tpu.memory_space<vmem>>, vector<16x128xf32>
    %c119 = arith.constant 119 : index
    %c0_173 = arith.constant 0 : index
    %257 = tpu.strided_load %arg12[%c119, %c0_173] {strides = array<i32: 144, 1>} : memref<2304x128xf32, #tpu.memory_space<vmem>>, vector<16x128xf32>
    %c120 = arith.constant 120 : index
    %c0_174 = arith.constant 0 : index
    %258 = tpu.strided_load %arg12[%c120, %c0_174] {strides = array<i32: 144, 1>} : memref<2304x128xf32, #tpu.memory_space<vmem>>, vector<16x128xf32>
    %259 = arith.maximumf %255, %256 : vector<16x128xf32>
    %260 = arith.maximumf %257, %258 : vector<16x128xf32>
    %261 = arith.maximumf %259, %260 : vector<16x128xf32>
    %262 = arith.truncf %261 : vector<16x128xf32> to vector<16x128xbf16>
    %c21_175 = arith.constant 21 : index
    %c0_176 = arith.constant 0 : index
    %c0_177 = arith.constant 0 : index
    %263 = vector.load %arg6[%c21_175, %c0_176, %c0_177] : memref<25x128x128xbf16, #tpu.memory_space<vmem>>, vector<1x128x128xbf16>
    %264 = vector.shape_cast %263 : vector<1x128x128xbf16> to vector<128x128xbf16>
    %cst_178 = arith.constant dense<0.000000e+00> : vector<16x128xf32>
    %265 = tpu.matmul %262, %264, %cst_178 {dimension_numbers = #tpu.dot_dimension_numbers<[1], [0], [0], [1], [0, 0, 1, 1], [], []>} : vector<16x128xbf16>, vector<128x128xbf16>, vector<16x128xf32> -> vector<16x128xf32>
    %266 = arith.addf %254, %265 : vector<16x128xf32>
    %c108 = arith.constant 108 : index
    %c0_179 = arith.constant 0 : index
    %267 = tpu.strided_load %arg12[%c108, %c0_179] {strides = array<i32: 144, 1>} : memref<2304x128xf32, #tpu.memory_space<vmem>>, vector<16x128xf32>
    %c109 = arith.constant 109 : index
    %c0_180 = arith.constant 0 : index
    %268 = tpu.strided_load %arg12[%c109, %c0_180] {strides = array<i32: 144, 1>} : memref<2304x128xf32, #tpu.memory_space<vmem>>, vector<16x128xf32>
    %c121 = arith.constant 121 : index
    %c0_181 = arith.constant 0 : index
    %269 = tpu.strided_load %arg12[%c121, %c0_181] {strides = array<i32: 144, 1>} : memref<2304x128xf32, #tpu.memory_space<vmem>>, vector<16x128xf32>
    %c122 = arith.constant 122 : index
    %c0_182 = arith.constant 0 : index
    %270 = tpu.strided_load %arg12[%c122, %c0_182] {strides = array<i32: 144, 1>} : memref<2304x128xf32, #tpu.memory_space<vmem>>, vector<16x128xf32>
    %271 = arith.maximumf %267, %268 : vector<16x128xf32>
    %272 = arith.maximumf %269, %270 : vector<16x128xf32>
    %273 = arith.maximumf %271, %272 : vector<16x128xf32>
    %274 = arith.truncf %273 : vector<16x128xf32> to vector<16x128xbf16>
    %c22_183 = arith.constant 22 : index
    %c0_184 = arith.constant 0 : index
    %c0_185 = arith.constant 0 : index
    %275 = vector.load %arg6[%c22_183, %c0_184, %c0_185] : memref<25x128x128xbf16, #tpu.memory_space<vmem>>, vector<1x128x128xbf16>
    %276 = vector.shape_cast %275 : vector<1x128x128xbf16> to vector<128x128xbf16>
    %cst_186 = arith.constant dense<0.000000e+00> : vector<16x128xf32>
    %277 = tpu.matmul %274, %276, %cst_186 {dimension_numbers = #tpu.dot_dimension_numbers<[1], [0], [0], [1], [0, 0, 1, 1], [], []>} : vector<16x128xbf16>, vector<128x128xbf16>, vector<16x128xf32> -> vector<16x128xf32>
    %278 = arith.addf %266, %277 : vector<16x128xf32>
    %c110 = arith.constant 110 : index
    %c0_187 = arith.constant 0 : index
    %279 = tpu.strided_load %arg12[%c110, %c0_187] {strides = array<i32: 144, 1>} : memref<2304x128xf32, #tpu.memory_space<vmem>>, vector<16x128xf32>
    %c111 = arith.constant 111 : index
    %c0_188 = arith.constant 0 : index
    %280 = tpu.strided_load %arg12[%c111, %c0_188] {strides = array<i32: 144, 1>} : memref<2304x128xf32, #tpu.memory_space<vmem>>, vector<16x128xf32>
    %c123 = arith.constant 123 : index
    %c0_189 = arith.constant 0 : index
    %281 = tpu.strided_load %arg12[%c123, %c0_189] {strides = array<i32: 144, 1>} : memref<2304x128xf32, #tpu.memory_space<vmem>>, vector<16x128xf32>
    %c124 = arith.constant 124 : index
    %c0_190 = arith.constant 0 : index
    %282 = tpu.strided_load %arg12[%c124, %c0_190] {strides = array<i32: 144, 1>} : memref<2304x128xf32, #tpu.memory_space<vmem>>, vector<16x128xf32>
    %283 = arith.maximumf %279, %280 : vector<16x128xf32>
    %284 = arith.maximumf %281, %282 : vector<16x128xf32>
    %285 = arith.maximumf %283, %284 : vector<16x128xf32>
    %286 = arith.truncf %285 : vector<16x128xf32> to vector<16x128xbf16>
    %c23 = arith.constant 23 : index
    %c0_191 = arith.constant 0 : index
    %c0_192 = arith.constant 0 : index
    %287 = vector.load %arg6[%c23, %c0_191, %c0_192] : memref<25x128x128xbf16, #tpu.memory_space<vmem>>, vector<1x128x128xbf16>
    %288 = vector.shape_cast %287 : vector<1x128x128xbf16> to vector<128x128xbf16>
    %cst_193 = arith.constant dense<0.000000e+00> : vector<16x128xf32>
    %289 = tpu.matmul %286, %288, %cst_193 {dimension_numbers = #tpu.dot_dimension_numbers<[1], [0], [0], [1], [0, 0, 1, 1], [], []>} : vector<16x128xbf16>, vector<128x128xbf16>, vector<16x128xf32> -> vector<16x128xf32>
    %290 = arith.addf %278, %289 : vector<16x128xf32>
    %c112 = arith.constant 112 : index
    %c0_194 = arith.constant 0 : index
    %291 = tpu.strided_load %arg12[%c112, %c0_194] {strides = array<i32: 144, 1>} : memref<2304x128xf32, #tpu.memory_space<vmem>>, vector<16x128xf32>
    %c113 = arith.constant 113 : index
    %c0_195 = arith.constant 0 : index
    %292 = tpu.strided_load %arg12[%c113, %c0_195] {strides = array<i32: 144, 1>} : memref<2304x128xf32, #tpu.memory_space<vmem>>, vector<16x128xf32>
    %c125 = arith.constant 125 : index
    %c0_196 = arith.constant 0 : index
    %293 = tpu.strided_load %arg12[%c125, %c0_196] {strides = array<i32: 144, 1>} : memref<2304x128xf32, #tpu.memory_space<vmem>>, vector<16x128xf32>
    %c126 = arith.constant 126 : index
    %c0_197 = arith.constant 0 : index
    %294 = tpu.strided_load %arg12[%c126, %c0_197] {strides = array<i32: 144, 1>} : memref<2304x128xf32, #tpu.memory_space<vmem>>, vector<16x128xf32>
    %295 = arith.maximumf %291, %292 : vector<16x128xf32>
    %296 = arith.maximumf %293, %294 : vector<16x128xf32>
    %297 = arith.maximumf %295, %296 : vector<16x128xf32>
    %298 = arith.truncf %297 : vector<16x128xf32> to vector<16x128xbf16>
    %c24 = arith.constant 24 : index
    %c0_198 = arith.constant 0 : index
    %c0_199 = arith.constant 0 : index
    %299 = vector.load %arg6[%c24, %c0_198, %c0_199] : memref<25x128x128xbf16, #tpu.memory_space<vmem>>, vector<1x128x128xbf16>
    %300 = vector.shape_cast %299 : vector<1x128x128xbf16> to vector<128x128xbf16>
    %cst_200 = arith.constant dense<0.000000e+00> : vector<16x128xf32>
    %301 = tpu.matmul %298, %300, %cst_200 {dimension_numbers = #tpu.dot_dimension_numbers<[1], [0], [0], [1], [0, 0, 1, 1], [], []>} : vector<16x128xbf16>, vector<128x128xbf16>, vector<16x128xf32> -> vector<16x128xf32>
    %302 = arith.addf %290, %301 : vector<16x128xf32>
    %c0_201 = arith.constant 0 : index
    %c0_202 = arith.constant 0 : index
    %303 = vector.load %arg7[%c0_201, %c0_202] : memref<1x128xf32, #tpu.memory_space<vmem>>, vector<1x128xf32>
    %304 = vector.broadcast %303 : vector<1x128xf32> to vector<16x128xf32>
    %305 = arith.addf %302, %304 : vector<16x128xf32>
    %cst_203 = arith.constant 0.000000e+00 : f32
    %306 = vector.broadcast %cst_203 : f32 to vector<16x128xf32>
    %307 = arith.maximumf %305, %306 : vector<16x128xf32>
    %308 = arith.truncf %307 : vector<16x128xf32> to vector<16x128xbf16>
    %c0_204 = arith.constant 0 : index
    %c0_205 = arith.constant 0 : index
    %309 = vector.load %arg8[%c0_204, %c0_205] : memref<128x128xbf16, #tpu.memory_space<vmem>>, vector<128x128xbf16>
    %cst_206 = arith.constant dense<0.000000e+00> : vector<16x128xf32>
    %310 = tpu.matmul %308, %309, %cst_206 {dimension_numbers = #tpu.dot_dimension_numbers<[1], [0], [0], [1], [0, 0, 1, 1], [], []>} : vector<16x128xbf16>, vector<128x128xbf16>, vector<16x128xf32> -> vector<16x128xf32>
    %c0_207 = arith.constant 0 : index
    %c0_208 = arith.constant 0 : index
    %311 = vector.load %arg9[%c0_207, %c0_208] : memref<1x128xf32, #tpu.memory_space<vmem>>, vector<1x128xf32>
    %312 = vector.broadcast %311 : vector<1x128xf32> to vector<16x128xf32>
    %313 = arith.addf %310, %312 : vector<16x128xf32>
    %c0_209 = arith.constant 0 : index
    %c0_210 = arith.constant 0 : index
    %314 = vector.load %arg10[%c0_209, %c0_210] : memref<16x128xf32, #tpu.memory_space<vmem>>, vector<16x128xf32>
    tpu.vector_store %arg10[%c0_209, %c0_210], %313 {strides = array<i32>} : memref<16x128xf32, #tpu.memory_space<vmem>>, vector<16x128xf32>,
    return
  }
  func.func @transform_0(%arg0: i32) -> (i32, i32) {
    %c0_i32 = arith.constant 0 : i32
    %c0_i32_0 = arith.constant 0 : i32
    return %arg0, %c0_i32 : i32, i32
  }
  func.func @transform_1(%arg0: i32) -> (i32, i32) {
    %c0_i32 = arith.constant 0 : i32
    %c0_i32_0 = arith.constant 0 : i32
    %c0_i32_1 = arith.constant 0 : i32
    return %c0_i32, %c0_i32_0 : i32, i32
  }
  func.func @transform_2(%arg0: i32) -> (i32, i32) {
    %c0_i32 = arith.constant 0 : i32
    %c0_i32_0 = arith.constant 0 : i32
    %c0_i32_1 = arith.constant 0 : i32
    return %c0_i32, %c0_i32_0 : i32, i32
  }
  func.func @transform_3(%arg0: i32) -> (i32, i32, i32) {
    %c0_i32 = arith.constant 0 : i32
    %c0_i32_0 = arith.constant 0 : i32
    %c0_i32_1 = arith.constant 0 : i32
    %c0_i32_2 = arith.constant 0 : i32
    return %c0_i32, %c0_i32_0, %c0_i32_1 : i32, i32, i32
  }
  func.func @transform_4(%arg0: i32) -> (i32, i32) {
    %c0_i32 = arith.constant 0 : i32
    %c0_i32_0 = arith.constant 0 : i32
    %c0_i32_1 = arith.constant 0 : i32
    return %c0_i32, %c0_i32_0 : i32, i32
  }
  func.func @transform_5(%arg0: i32) -> (i32, i32, i32) {
    %c0_i32 = arith.constant 0 : i32
    %c0_i32_0 = arith.constant 0 : i32
    %c0_i32_1 = arith.constant 0 : i32
    %c0_i32_2 = arith.constant 0 : i32
    return %c0_i32, %c0_i32_0, %c0_i32_1 : i32, i32, i32
  }
  func.func @transform_6(%arg0: i32) -> (i32, i32) {
    %c0_i32 = arith.constant 0 : i32
    %c0_i32_0 = arith.constant 0 : i32
    %c0_i32_1 = arith.constant 0 : i32
    return %c0_i32, %c0_i32_0 : i32, i32
  }
  func.func @transform_7(%arg0: i32) -> (i32, i32) {
    %c0_i32 = arith.constant 0 : i32
    %c0_i32_0 = arith.constant 0 : i32
    %c0_i32_1 = arith.constant 0 : i32
    return %c0_i32, %c0_i32_0 : i32, i32
  }
  func.func @transform_8(%arg0: i32) -> (i32, i32) {
    %c0_i32 = arith.constant 0 : i32
    %c0_i32_0 = arith.constant 0 : i32
    %c0_i32_1 = arith.constant 0 : i32
    return %c0_i32, %c0_i32_0 : i32, i32
  }
  func.func @transform_9(%arg0: i32) -> (i32, i32) {
    %c0_i32 = arith.constant 0 : i32
    %c0_i32_0 = arith.constant 0 : i32
    return %arg0, %c0_i32 : i32, i32
  }
}

</mosaic_0001>

<bundles_post_ra>
// kernel: mnist_forward.1
= control target key start
LH: loop header
LB: loop body
LE: loop exit
PB: predicated region body
PF: predicated region fallthrough
CT: control target
= control target key end

     0   :  { %s11412_s17 = smov 0   ;;  %s13849_s0 = inlined_call_operand.vmem [shape: bf16[11264,9], index: 0, kind: input, shape index: {}]   ;;  %s13850_s1 = inlined_call_operand.vmem [shape: bf16[9,128], index: 1, kind: input, shape index: {}]   ;;  %s13851_s2 = inlined_call_operand.vmem [shape: f32[1,128], index: 2, kind: input, shape index: {}]   ;;  %s13852_s3 = inlined_call_operand.vmem [shape: bf16[9,128,128], index: 3, kind: input, shape index: {}]   ;;  %s13853_s4 = inlined_call_operand.vmem [shape: f32[1,128], index: 4, kind: input, shape index: {}]   ;;  %s13854_s5 = inlined_call_operand.vmem [shape: bf16[25,128,128], index: 5, kind: input, shape index: {}]   ;;  %s13855_s6 = inlined_call_operand.vmem [shape: f32[1,128], index: 6, kind: input, shape index: {}]   ;;  %s13856_s7 = inlined_call_operand.vmem [shape: bf16[128,128], index: 7, kind: input, shape index: {}]   ;;  %s13857_s8 = inlined_call_operand.vmem [shape: f32[1,128], index: 8, kind: input, shape index: {}]   ;;  %s13858_s9 = inlined_call_operand.vmem [shape: f32[16,128], index: 9, kind: output, shape index: {}]  }
   0x1   :  { %v11395_v0 = vld [vmem:[%s13850_s1] sm:$0xf]  ;;  %v11400_v1 = vld [vmem:[%s13850_s1 + $0x4] sm:$0x1] }
   0x2   :  { %v11405_v2 = vld [vmem:[%s13851_s2] ss:$0 sm:$0xff] }
   0x3   :  { %v11410_v3 = vld [vmem:[%s13853_s4] ss:$0 sm:$0xff] }
   0x4 LB: > { %v8311_v4 = vcombine.low %v11395_v0, %v11400_v1  ;;  %vm164_vm0 = vcmask 1043456   ;;  %vm165_vm1 = vcmask 1044480   ;;  %v13859_v5 = vmov 0.0   ;;  %s11426_s1 = smul.u32 704, %s11335_s17  ;;  %v11006_v46 = vld [vmem:[%s13852_s3 + $0x78] sm:$0xff]   ;;  %v11007_v48 = vld [vmem:[%s13852_s3 + $0x70] sm:$0xff]   ;;  %s11335_s17 = sphi %s11412_s17, %s42_s17  }
   0x5   : > { %10947 = vmatprep.subr.bf16.mxu1 %v13859_v5  ;;  %9775 = vmatprep.subr.bf16.mxu0 %v13859_v5  ;;  %v11338_v6 = vmov 65535   ;;  %vm11339_vm2 = vmmov 0   ;;  %vm130_vm3 = vcmask 72704   ;;  %v11008_v50 = vld [vmem:[%s13852_s3 + $0x68] sm:$0xff]   ;;  %v11009_v53 = vld [vmem:[%s13852_s3 + $0x60] sm:$0xff]   ;;  %v11011_v55 = vld [vmem:[%s13852_s3 + $0x38] sm:$0xff]  }
   0x6   : > { %v166_v7 = vsel %vm164_vm0, 4294967295, %v11338_v6  ;;  %9777 = vmatprep.mubr.msk.bf16.mxu0 %vm11339_vm2, %v13859_v5  ;;  %9805 = vmatprep.mubr.msk.bf16.mxu1 %vm11339_vm2, %v13859_v5  ;;  %s44_s2 = sshra.s32 %s11426_s1, 3  ;;  %s292_s21 = sadd.s32 176, %s11426_s1  ;;  %v11010_v56 = vld [vmem:[%s13852_s3 + $0x58] sm:$0xff]   ;;  %v11012_v57 = vld [vmem:[%s13852_s3 + $0x30] sm:$0xff]   ;;  %v11013_v59 = vld [vmem:[%s13852_s3 + $0x28] sm:$0xff]  }
   0x7   : > { %v167_v8 = vsel %vm165_vm1, %v166_v7, 0  ;;  %s8299_s4 = sshll.u32 %s44_s2, 2  ;;  %s293_s22 = sshra.s32 %s292_s21, 3  ;;  %v11015_v60 = vld [vmem:[%s13852_s3 + $0x20] sm:$0xff]   ;;  %v11014_v62 = vld [vmem:[%s13852_s3 + $0x50] sm:$0xff]   ;;  %v11016_v63 = vld [vmem:[%s13852_s3 + $0x18] sm:$0xff]  }
   0x8   : > { %v169_v9 = vand.u32 %v8311_v4, %v167_v8  ;;  %s11433_s20 = scalar_lea.vmem %s13849_s0, %s8299_s4  ;;  %s8323_s23 = sshll.u32 %s293_s22, 2  ;;  %v11017_v8 = vld [vmem:[%s13852_s3 + $0x10] sm:$0xff]   ;;  %vm1322_vm4 = vsmask.f32 7424  ;;  %vm2598_vm5 = vsmask.f32 4352 }
   0x9   : > { %v10962_v10 = vld [vmem:[%s11433_s20] sm:$0xff]   ;;  %v10963_v11 = vld [vmem:[%s11433_s20 + $0x38] sm:$0xff]   ;;  %s550_s24 = sadd.s32 352, %s11426_s1  ;;  %v10964_v12 = vld [vmem:[%s11433_s20 + $0x8] sm:$0xff]   ;;  %s11454_s27 = scalar_lea.vmem %s13849_s0, %s8323_s23  ;;  %vm2086_vm6 = vsmask.f32 5376 }
   0xa   : > { %10948 = vmatpush3.bf16.msra.mxu1 %v169_v9  ;;  %9776 = vmatpush3.bf16.msra.mxu0 %v169_v9  ;;  %v10965_v13 = vld [vmem:[%s11433_s20 + $0x40] sm:$0xff]   ;;  %s551_s28 = sshra.s32 %s550_s24, 3  ;;  %v10966_v14 = vld [vmem:[%s11433_s20 + $0x10] sm:$0xff]   ;;  %v10967_v15 = vld [vmem:[%s11433_s20 + $0x48] sm:$0xff]   ;;  %s808_s12 = sadd.s32 528, %s11426_s1  ;;  %vm1802_vm7 = vcmask 1046528  }
   0xb   : > { %9821 = vmatprep.subr.bf16.mxu1 %v13859_v5  ;;  %9867 = vmatprep.subr.bf16.mxu0 %v13859_v5  ;;  %s8346_s29 = sshll.u32 %s551_s28, 2  ;;  %v10968_v16 = vld [vmem:[%s11433_s20 + $0x18] sm:$0xff]   ;;  %v10969_v17 = vld [vmem:[%s11433_s20 + $0x50] sm:$0xff]   ;;  %s809_s13 = sshra.s32 %s808_s12, 3  ;;  %v10970_v18 = vld [vmem:[%s11433_s20 + $0x20] sm:$0xff]   ;;  %vm3423_vm8 = vcmask 1045504  }
   0xc   : > { %s11466_s11 = scalar_lea.vmem %s13849_s0, %s8346_s29  ;;  %s8369_s14 = sshll.u32 %s809_s13, 2  ;;  %v10971_v19 = vld [vmem:[%s11454_s27] sm:$0xff]   ;;  %v10972_v20 = vld [vmem:[%s11433_s20 + $0x28] sm:$0xff]   ;;  %v10974_v22 = vld [vmem:[%s11433_s20 + $0x30] sm:$0xff]   ;;  %vm3128_vm9 = vsmask.f32 6400 }
   0xd   : > { %9778 = vmatmul.mubr.msk.bf16.vlgmr.msra.gmra.mxu0 %vm130_vm3, %v10962_v10  ;;  %9806 = vmatmul.mubr.msk.bf16.vlgmr.msra.gmra.mxu1 %vm130_vm3, %v10963_v11  ;;  %s11488_s1 = scalar_lea.vmem %s13849_s0, %s8369_s14  ;;  %v10973_v21 = vld [vmem:[%s11454_s27 + $0x8] sm:$0xff]   ;;  %v10975_v23 = vld [vmem:[%s11454_s27 + $0x10] sm:$0xff]   ;;  %v10977_v24 = vld [vmem:[%s11466_s11] sm:$0xff]   ;;  %s3623_s22 = smul.u32 144, %s11335_s17 }
   0xe   : > { %9781 = vmatprep.mubr.msk.bf16.mxu0 %vm11339_vm2, %v13859_v5  ;;  %9822 = vmatpush3.bf16.msra.mxu1 %v169_v9  ;;  %v10976_v25 = vld [vmem:[%s11454_s27 + $0x18] sm:$0xff]   ;;  %v10979_v26 = vld [vmem:[%s11466_s11 + $0x8] sm:$0xff]   ;;  %v10978_v27 = vld [vmem:[%s11454_s27 + $0x20] sm:$0xff]   ;;  %s42_s17 = sadd.s32 1, %s11335_s17  }
   0xf   : > { %9809 = vmatprep.mubr.msk.bf16.mxu1 %vm11339_vm2, %v13859_v5  ;;  %9913 = vmatprep.subr.bf16.mxu1 %v13859_v5  ;;  %v10981_v28 = vld [vmem:[%s11466_s11 + $0x10] sm:$0xff]   ;;  %v10980_v29 = vld [vmem:[%s11454_s27 + $0x28] sm:$0xff]   ;;  %v10983_v30 = vld [vmem:[%s11466_s11 + $0x18] sm:$0xff]   ;;  %s12852_s23 = scalar_lea.vmem [#allocation3], %s3623_s22  ;;  %p39_p0 = scmp.ge.s32.totalorder %s42_s17, 16  }
  0x10   : > { %9868 = vmatpush3.bf16.msra.mxu0 %v169_v9  ;;  %v10982_v31 = vld [vmem:[%s11454_s27 + $0x30] sm:$0xff]   ;;  %v10985_v32 = vld [vmem:[%s11466_s11 + $0x20] sm:$0xff]   ;;  %v10984_v33 = vld [vmem:[%s11454_s27 + $0x38] sm:$0xff]   ;;  %vm11341_vm10 = vmmov (%p39_p0), 0  }
  0x11   : > { %9959 = vmatprep.subr.bf16.mxu0 %v13859_v5  ;;  %v10987_v34 = vld [vmem:[%s11466_s11 + $0x28] sm:$0xff]   ;;  %v10986_v35 = vld [vmem:[%s11454_s27 + $0x40] sm:$0xff]   ;;  %v10989_v36 = vld [vmem:[%s11466_s11 + $0x30] sm:$0xff]  }
  0x12   : > { %v10988_v37 = vld [vmem:[%s11454_s27 + $0x48] sm:$0xff]   ;;  %v10991_v38 = vld [vmem:[%s11466_s11 + $0x38] sm:$0xff]   ;;  %v10990_v39 = vld [vmem:[%s11454_s27 + $0x50] sm:$0xff]  }
  0x13   : > { %v10992_v40 = vld [vmem:[%s11466_s11 + $0x40] sm:$0xff]   ;;  %v10994_v42 = vld [vmem:[%s11466_s11 + $0x48] sm:$0xff]   ;;  %v10996_v44 = vld [vmem:[%s11466_s11 + $0x50] sm:$0xff]  }
  0x14   : > { %v10993_v41 = vld [vmem:[%s11488_s1] sm:$0xff]   ;;  %v10995_v43 = vld [vmem:[%s11488_s1 + $0x8] sm:$0xff]   ;;  %v10997_v45 = vld [vmem:[%s11488_s1 + $0x10] sm:$0xff]  }
  0x15   : > { %9782 = vmatmul.mubr.msk.bf16.gmra.mxu0 %vm130_vm3, %v10964_v12  ;;  %9810 = vmatmul.mubr.msk.bf16.gmra.mxu1 %vm130_vm3, %v10965_v13  ;;  %v10998_v47 = vld [vmem:[%s11488_s1 + $0x18] sm:$0xff]   ;;  %v10999_v49 = vld [vmem:[%s11488_s1 + $0x20] sm:$0xff]   ;;  %v11000_v51 = vld [vmem:[%s11488_s1 + $0x28] sm:$0xff]  }
  0x16   : > { %9785 = vmatprep.mubr.msk.bf16.mxu0 %vm11339_vm2, %v13859_v5  ;;  %9813 = vmatprep.mubr.msk.bf16.mxu1 %vm11339_vm2, %v13859_v5  ;;  %v11001_v52 = vld [vmem:[%s11488_s1 + $0x30] sm:$0xff]   ;;  %v11002_v54 = vld [vmem:[%s11488_s1 + $0x38] sm:$0xff]   ;;  %v11003_v58 = vld [vmem:[%s11488_s1 + $0x40] sm:$0xff]  }
  0x17   : > { %v11004_v61 = vld [vmem:[%s11488_s1 + $0x48] sm:$0xff]   ;;  %v11005_v12 = vld [vmem:[%s11488_s1 + $0x50] sm:$0xff]  }
  0x18   :  { %v11124_v0 = vld [vmem:[%s13854_s5 + $0x30] sm:$0xff] (%p39_p0)   ;;  %v11125_v1 = vld [vmem:[%s13854_s5 + $0x68] sm:$0xff] (%p39_p0)  }
  0x1d   : > { %9786 = vmatmul.mubr.msk.bf16.gmra.mxu0 %vm130_vm3, %v10966_v14  ;;  %9814 = vmatmul.mubr.msk.bf16.gmra.mxu1 %vm130_vm3, %v10967_v15  ;;  %v11019_v14 = vld [vmem:[%s13852_s3 + $0x8] sm:$0xff]  }
  0x1e   : > { %9789 = vmatprep.mubr.msk.bf16.mxu0 %vm11339_vm2, %v13859_v5  ;;  %9817 = vmatprep.mubr.msk.bf16.mxu1 %vm11339_vm2, %v13859_v5 }
  0x25   : > { %9790 = vmatmul.mubr.msk.bf16.gmra.mxu0 %vm130_vm3, %v10968_v16  ;;  %9818 = vmatmul.mubr.msk.bf16.gmra.mxu1 %vm130_vm3, %v10969_v17 }
  0x26   : > { %9793 = vmatprep.mubr.msk.bf16.mxu0 %vm11339_vm2, %v13859_v5  ;;  %9823 = vmatprep.mubr.msk.bf16.mxu1 %vm11339_vm2, %v13859_v5 }
  0x2d   : > { %9794 = vmatmul.mubr.msk.bf16.gmra.mxu0 %vm130_vm3, %v10970_v18  ;;  %9824 = vmatmul.mubr.msk.bf16.vlgmr.msra.gmra.mxu1 %vm130_vm3, %v10971_v19  ;;  %v11020_v19 = vld [vmem:[%s13852_s3] sm:$0xff]  }
  0x2e   : > { %9797 = vmatprep.mubr.msk.bf16.mxu0 %vm11339_vm2, %v13859_v5  ;;  %9914 = vmatpush3.bf16.msra.mxu1 %v169_v9 }
  0x2f   : > { %9827 = vmatprep.mubr.msk.bf16.mxu1 %vm11339_vm2, %v13859_v5  ;;  %10011 = vmatprep.subr.bf16.mxu1 %v13859_v5 }
  0x35   : > { %9798 = vmatmul.mubr.msk.bf16.gmra.mxu0 %vm130_vm3, %v10972_v20  ;;  %9828 = vmatmul.mubr.msk.bf16.gmra.mxu1 %vm130_vm3, %v10973_v21 }
  0x36   : > { %9801 = vmatprep.mubr.msk.bf16.mxu0 %vm11339_vm2, %v13859_v5  ;;  %9831 = vmatprep.mubr.msk.bf16.mxu1 %vm11339_vm2, %v13859_v5 }
  0x3d   : > { %9802 = vmatmul.mubr.msk.bf16.gmra.mxu0 %vm130_vm3, %v10974_v22  ;;  %9832 = vmatmul.mubr.msk.bf16.gmra.mxu1 %vm130_vm3, %v10975_v23 }
  0x3e   : > { %9869 = vmatprep.mubr.msk.bf16.mxu0 %vm11339_vm2, %v13859_v5  ;;  %9835 = vmatprep.mubr.msk.bf16.mxu1 %vm11339_vm2, %v13859_v5 }
  0x45   : > { %9870 = vmatmul.mubr.msk.bf16.vlgmr.msra.gmra.mxu0 %vm130_vm3, %v10977_v24  ;;  %9836 = vmatmul.mubr.msk.bf16.gmra.mxu1 %vm130_vm3, %v10976_v25  ;;  %v11018_v24 = vld [vmem:[%s13852_s3 + $0x48] sm:$0xff]  }
  0x46   : > { %9873 = vmatprep.mubr.msk.bf16.mxu0 %vm11339_vm2, %v13859_v5  ;;  %9839 = vmatprep.mubr.msk.bf16.mxu1 %vm11339_vm2, %v13859_v5 }
  0x47   : > { %9960 = vmatpush3.bf16.msra.mxu0 %v11006_v46 }
  0x48   : > { %9961 = vmatprep.subr.bf16.mxu0 %v13859_v5 }
  0x4b   : > { %9962 = vmatpush3.bf16.msra.mxu0 %v11007_v48 }
  0x4c   : > { %9963 = vmatprep.subr.bf16.mxu0 %v13859_v5 }
  0x4d   : > { %9874 = vmatmul.mubr.msk.bf16.gmra.mxu0 %vm130_vm3, %v10979_v26  ;;  %9840 = vmatmul.mubr.msk.bf16.gmra.mxu1 %vm130_vm3, %v10978_v27 }
  0x4e   : > { %9877 = vmatprep.mubr.msk.bf16.mxu0 %vm11339_vm2, %v13859_v5  ;;  %9843 = vmatprep.mubr.msk.bf16.mxu1 %vm11339_vm2, %v13859_v5 }
  0x4f   : > { %9964 = vmatpush3.bf16.msra.mxu0 %v11008_v50 }
  0x50   : > { %9965 = vmatprep.subr.bf16.mxu0 %v13859_v5 }
  0x53   : > { %9966 = vmatpush3.bf16.msra.mxu0 %v11009_v53 }
  0x54   : > { %9967 = vmatprep.subr.bf16.mxu0 %v13859_v5 }
  0x55   : > { %9878 = vmatmul.mubr.msk.bf16.gmra.mxu0 %vm130_vm3, %v10981_v28  ;;  %9844 = vmatmul.mubr.msk.bf16.gmra.mxu1 %vm130_vm3, %v10980_v29 }
  0x56   : > { %9881 = vmatprep.mubr.msk.bf16.mxu0 %vm11339_vm2, %v13859_v5  ;;  %9847 = vmatprep.mubr.msk.bf16.mxu1 %vm11339_vm2, %v13859_v5 }
  0x57   : > { %9968 = vmatpush3.bf16.msra.mxu0 %v11010_v56 }
  0x58   : > { %9969 = vmatprep.subr.bf16.mxu0 %v13859_v5 }
  0x5b   : > { %9970 = vmatpush3.bf16.msra.mxu0 %v11014_v62 }
  0x5c   : > { %9971 = vmatprep.subr.bf16.mxu0 %v13859_v5 }
  0x5d   : > { %9882 = vmatmul.mubr.msk.bf16.gmra.mxu0 %vm130_vm3, %v10983_v30  ;;  %9848 = vmatmul.mubr.msk.bf16.gmra.mxu1 %vm130_vm3, %v10982_v31 }
  0x5e   : > { %9885 = vmatprep.mubr.msk.bf16.mxu0 %vm11339_vm2, %v13859_v5  ;;  %9851 = vmatprep.mubr.msk.bf16.mxu1 %vm11339_vm2, %v13859_v5 }
  0x5f   : > { %9972 = vmatpush3.bf16.msra.mxu0 %v11018_v24 }
  0x60   : > { %9973 = vmatprep.subr.bf16.mxu0 %v13859_v5 }
  0x65   : > { %9886 = vmatmul.mubr.msk.bf16.gmra.mxu0 %vm130_vm3, %v10985_v32  ;;  %9852 = vmatmul.mubr.msk.bf16.gmra.mxu1 %vm130_vm3, %v10984_v33  ;;  %v11022_v33 = vld [vmem:[%s13852_s3 + $0x40] sm:$0xff]  }
  0x66   : > { %9889 = vmatprep.mubr.msk.bf16.mxu0 %vm11339_vm2, %v13859_v5  ;;  %9855 = vmatprep.mubr.msk.bf16.mxu1 %vm11339_vm2, %v13859_v5 }
  0x67   : > { %9974 = vmatpush3.bf16.msra.mxu0 %v11022_v33 }
  0x68   : > { %10063 = vmatprep.subr.bf16.mxu0 %v13859_v5 }
  0x6d   : > { %9890 = vmatmul.mubr.msk.bf16.gmra.mxu0 %vm130_vm3, %v10987_v34  ;;  %9856 = vmatmul.mubr.msk.bf16.gmra.mxu1 %vm130_vm3, %v10986_v35 }
  0x6e   : > { %9893 = vmatprep.mubr.msk.bf16.mxu0 %vm11339_vm2, %v13859_v5  ;;  %9859 = vmatprep.mubr.msk.bf16.mxu1 %vm11339_vm2, %v13859_v5 }
  0x75   : > { %9894 = vmatmul.mubr.msk.bf16.gmra.mxu0 %vm130_vm3, %v10989_v36  ;;  %9860 = vmatmul.mubr.msk.bf16.gmra.mxu1 %vm130_vm3, %v10988_v37 }
  0x76   : > { %9897 = vmatprep.mubr.msk.bf16.mxu0 %vm11339_vm2, %v13859_v5  ;;  %9863 = vmatprep.mubr.msk.bf16.mxu1 %vm11339_vm2, %v13859_v5 }
  0x7d   : > { %9898 = vmatmul.mubr.msk.bf16.gmra.mxu0 %vm130_vm3, %v10991_v38  ;;  %9864 = vmatmul.mubr.msk.bf16.gmra.mxu1 %vm130_vm3, %v10990_v39 }
  0x7e   : > { %9901 = vmatprep.mubr.msk.bf16.mxu0 %vm11339_vm2, %v13859_v5  ;;  %9915 = vmatprep.mubr.msk.bf16.mxu1 %vm11339_vm2, %v13859_v5 }
  0x85   : > { %9902 = vmatmul.mubr.msk.bf16.gmra.mxu0 %vm130_vm3, %v10992_v40  ;;  %9916 = vmatmul.mubr.msk.bf16.vlgmr.msra.gmra.mxu1 %vm130_vm3, %v10993_v41 }
  0x86   : > { %9905 = vmatprep.mubr.msk.bf16.mxu0 %vm11339_vm2, %v13859_v5  ;;  %9919 = vmatprep.mubr.msk.bf16.mxu1 %vm11339_vm2, %v13859_v5 }
  0x87   : > { %10012 = vmatpush3.bf16.msra.mxu1 %v11011_v55 }
  0x88   : > { %10013 = vmatprep.subr.bf16.mxu1 %v13859_v5 }
  0x8b   : > { %10014 = vmatpush3.bf16.msra.mxu1 %v11012_v57 }
  0x8c   : > { %10015 = vmatprep.subr.bf16.mxu1 %v13859_v5 }
  0x8d   : > { %9906 = vmatmul.mubr.msk.bf16.gmra.mxu0 %vm130_vm3, %v10994_v42  ;;  %9920 = vmatmul.mubr.msk.bf16.gmra.mxu1 %vm130_vm3, %v10995_v43 }
  0x8e   : > { %9909 = vmatprep.mubr.msk.bf16.mxu0 %vm11339_vm2, %v13859_v5  ;;  %9923 = vmatprep.mubr.msk.bf16.mxu1 %vm11339_vm2, %v13859_v5 }
  0x8f   : > { %10016 = vmatpush3.bf16.msra.mxu1 %v11013_v59 }
  0x90   : > { %10017 = vmatprep.subr.bf16.mxu1 %v13859_v5 }
  0x93   : > { %10018 = vmatpush3.bf16.msra.mxu1 %v11015_v60 }
  0x94   : > { %10019 = vmatprep.subr.bf16.mxu1 %v13859_v5 }
  0x95   : > { %9910 = vmatmul.mubr.msk.bf16.gmra.mxu0 %vm130_vm3, %v10996_v44  ;;  %9924 = vmatmul.mubr.msk.bf16.gmra.mxu1 %vm130_vm3, %v10997_v45 }
  0x96   : > { %9927 = vmatprep.mubr.msk.bf16.mxu1 %vm11339_vm2, %v13859_v5  ;;  %9975 = vmatprep.mubr.msk.bf16.mxu0 %vm11339_vm2, %v13859_v5 }
  0x97   : > { %10020 = vmatpush3.bf16.msra.mxu1 %v11016_v63 }
  0x98   : > { %10021 = vmatprep.subr.bf16.mxu1 %v13859_v5 }
  0x9b   : > { %10022 = vmatpush3.bf16.msra.mxu1 %v11017_v8 }
  0x9c   : > { %10023 = vmatprep.subr.bf16.mxu1 %v13859_v5 }
  0x9d   : > { %9928 = vmatmul.mubr.msk.bf16.gmra.mxu1 %vm130_vm3, %v10998_v47 }
  0x9e   : > { %9931 = vmatprep.mubr.msk.bf16.mxu1 %vm11339_vm2, %v13859_v5 }
  0x9f   : > { %10024 = vmatpush3.bf16.msra.mxu1 %v11019_v14 }
  0xa0   : > { %10025 = vmatprep.subr.bf16.mxu1 %v13859_v5 }
  0xa3   : > { %10026 = vmatpush3.bf16.msra.mxu1 %v11020_v19 }
  0xa4   : > { %10115 = vmatprep.subr.bf16.mxu1 %v13859_v5 }
  0xa5   : > { %9932 = vmatmul.mubr.msk.bf16.gmra.mxu1 %vm130_vm3, %v10999_v49 }
  0xa6   : > { %9935 = vmatprep.mubr.msk.bf16.mxu1 %vm11339_vm2, %v13859_v5 }
  0xad   : > { %9936 = vmatmul.mubr.msk.bf16.gmra.mxu1 %vm130_vm3, %v11000_v51 }
  0xae   : > { %9939 = vmatprep.mubr.msk.bf16.mxu1 %vm11339_vm2, %v13859_v5 }
  0xb5   : > { %9940 = vmatmul.mubr.msk.bf16.gmra.mxu1 %vm130_vm3, %v11001_v52 }
  0xb6   : > { %9943 = vmatprep.mubr.msk.bf16.mxu1 %vm11339_vm2, %v13859_v5 }
  0xbd   : > { %9944 = vmatmul.mubr.msk.bf16.gmra.mxu1 %vm130_vm3, %v11002_v54 }
  0xbe   : > { %9947 = vmatprep.mubr.msk.bf16.mxu1 %vm11339_vm2, %v13859_v5 }
  0xc5   : > { %9948 = vmatmul.mubr.msk.bf16.gmra.mxu1 %vm130_vm3, %v11003_v58 }
  0xc6   : > { %9951 = vmatprep.mubr.msk.bf16.mxu1 %vm11339_vm2, %v13859_v5 }
  0xcd   : > { %v11669_v4 = vpop.f32.mrf.mxu0  ;;  %v11671_v6 = vpop.f32.mrf.mxu1  ;;  %9952 = vmatmul.mubr.msk.bf16.gmra.mxu1 %vm130_vm3, %v11004_v61 }
  0xce   : > { %9955 = vmatprep.mubr.msk.bf16.mxu1 %vm11339_vm2, %v13859_v5 }
  0xcf   : > { %v9779_v7 = vpop.f32.mrf.mxu0  ;;  %v9807_v9 = vpop.f32.mrf.mxu1 }
  0xd1   : > { %v11681_v10 = vpop.f32.mrf.mxu0  ;;  %v11683_v11 = vpop.f32.mrf.mxu1 }
  0xd3   : > { %v9780_v13 = vpop.f32.mrf.mxu0  ;;  %v9808_v15 = vpop.f32.mrf.mxu1 }
  0xd5   : > { %v11690_v16 = vpop.f32.mrf.mxu0  ;;  %v11692_v17 = vpop.f32.mrf.mxu1  ;;  %9956 = vmatmul.mubr.msk.bf16.gmra.mxu1 %vm130_vm3, %v11005_v12 }
  0xd6   : > { %10027 = vmatprep.mubr.msk.bf16.mxu1 %vm11339_vm2, %v13859_v5 }
  0xd7   : > { %v9783_v18 = vpop.f32.mrf.mxu0  ;;  %v9811_v20 = vpop.f32.mrf.mxu1 }
  0xd9   : > { %v11701_v21 = vpop.f32.mrf.mxu0  ;;  %v11703_v22 = vpop.f32.mrf.mxu1 }
  0xdb   : > { %v9784_v23 = vpop.f32.mrf.mxu0  ;;  %v9812_v25 = vpop.f32.mrf.mxu1 }
  0xdd   : > { %v11709_v26 = vpop.f32.mrf.mxu0  ;;  %v11711_v27 = vpop.f32.mrf.mxu1 }
  0xdf   : > { %v9787_v28 = vpop.f32.mrf.mxu0  ;;  %v9815_v29 = vpop.f32.mrf.mxu1 }
  0xe1   : > { %v11714_v30 = vpop.f32.mrf.mxu0  ;;  %v11716_v31 = vpop.f32.mrf.mxu1 }
  0xe3   : > { %v9788_v32 = vpop.f32.mrf.mxu0  ;;  %v9816_v34 = vpop.f32.mrf.mxu1 }
  0xe5   : > { %v11721_v35 = vpop.f32.mrf.mxu0  ;;  %v11723_v36 = vpop.f32.mrf.mxu1 }
  0xe7   : > { %v9791_v37 = vpop.f32.mrf.mxu0  ;;  %v9819_v38 = vpop.f32.mrf.mxu1 }
  0xe9   : > { %v11726_v39 = vpop.f32.mrf.mxu0  ;;  %v11728_v40 = vpop.f32.mrf.mxu1 }
  0xeb   : > { %v9792_v41 = vpop.f32.mrf.mxu0  ;;  %v9820_v42 = vpop.f32.mrf.mxu1 }
  0xed   : > { %v11730_v43 = vpop.f32.mrf.mxu0  ;;  %v441_v44 = vpop.f32.mrf.mxu1 }
  0xee   : > { %v528_v45 = vmax.f32 %v11669_v4, %v441_v44 }
  0xef   : > { %v9795_v46 = vpop.f32.mrf.mxu0  ;;  %v9825_v47 = vpop.f32.mrf.mxu1 }
  0xf1   : > { %v11733_v48 = vpop.f32.mrf.mxu0  ;;  %v11735_v49 = vpop.f32.mrf.mxu1 }
  0xf2   : > { %v529_v50 = vmax.f32 %v11681_v10, %v11735_v49 }
  0xf3   : > { %v9796_v51 = vpop.f32.mrf.mxu0  ;;  %v9826_v52 = vpop.f32.mrf.mxu1 }
  0xf5   : > { %v11739_v53 = vpop.f32.mrf.mxu0  ;;  %v449_v54 = vpop.f32.mrf.mxu1 }
  0xf6   : > { %v530_v55 = vmax.f32 %v11690_v16, %v449_v54 }
  0xf7   : > { %v9799_v56 = vpop.f32.mrf.mxu0  ;;  %v9829_v57 = vpop.f32.mrf.mxu1 }
  0xf9   : > { %v11742_v58 = vpop.f32.mrf.mxu0  ;;  %v11744_v59 = vpop.f32.mrf.mxu1 }
  0xfa   : > { %v531_v60 = vmax.f32 %v11701_v21, %v11744_v59 }
  0xfb   : > { %v9800_v61 = vpop.f32.mrf.mxu0  ;;  %v9830_v62 = vpop.f32.mrf.mxu1 }
  0xfd   : > { %v11748_v63 = vpop.f32.mrf.mxu0  ;;  %v457_v4 = vpop.f32.mrf.mxu1 }
  0xfe   : > { %v532_v7 = vmax.f32 %v11709_v26, %v457_v4 }
  0xff   : > { %v9803_v8 = vpop.f32.mrf.mxu0  ;;  %v9833_v9 = vpop.f32.mrf.mxu1 }
 0x101   : > { %v11751_v12 = vpop.f32.mrf.mxu0  ;;  %v11753_v13 = vpop.f32.mrf.mxu1 }
 0x102   : > { %v533_v14 = vmax.f32 %v11714_v30, %v11753_v13  ;;  %v13863_v30 = vmov 0.0   ;;  %v11033_v13 = vld [vmem:[%s13852_s3 + $0xf0] sm:$0xff]  }
 0x103   : > { %v9804_v15 = vpop.f32.mrf.mxu0  ;;  %v9834_v16 = vpop.f32.mrf.mxu1 }
 0x105   : > { %v699_v18 = vpop.f32.mrf.mxu0  ;;  %v465_v19 = vpop.f32.mrf.mxu1 }
 0x106   : > { %v11757_v20 = vmax.f32 %v528_v45, %v699_v18  ;;  %v534_v23 = vmax.f32 %v11721_v35, %v465_v19 }
 0x107   : > { %v9871_v24 = vpop.f32.mrf.mxu0  ;;  %v9837_v25 = vpop.f32.mrf.mxu1 }
 0x109   : > { %v11760_v26 = vpop.f32.mrf.mxu0  ;;  %v11762_v28 = vpop.f32.mrf.mxu1 }
 0x10b   : > { %v9872_v32 = vpop.f32.mrf.mxu0  ;;  %v9838_v33 = vpop.f32.mrf.mxu1 }
 0x10d   : > { %v707_v34 = vpop.f32.mrf.mxu0  ;;  %v473_v37 = vpop.f32.mrf.mxu1 }
 0x10e   : > { %v11766_v38 = vmax.f32 %v530_v55, %v707_v34  ;;  %v536_v41 = vmax.f32 %v11730_v43, %v473_v37 }
 0x10f   : > { %v9875_v42 = vpop.f32.mrf.mxu0  ;;  %v9841_v44 = vpop.f32.mrf.mxu1 }
 0x111   : > { %v11769_v35 = vpop.f32.mrf.mxu0  ;;  %v11771_v45 = vpop.f32.mrf.mxu1 }
 0x113   : > { %v9876_v47 = vpop.f32.mrf.mxu0  ;;  %v9842_v51 = vpop.f32.mrf.mxu1 }
 0x115   : > { %v715_v52 = vpop.f32.mrf.mxu0  ;;  %v481_v54 = vpop.f32.mrf.mxu1 }
 0x116   : > { %v11775_v56 = vmax.f32 %v532_v7, %v715_v52  ;;  %v538_v55 = vmax.f32 %v11739_v53, %v481_v54 }
 0x117   : > { %v9879_v57 = vpop.f32.mrf.mxu0  ;;  %v9845_v61 = vpop.f32.mrf.mxu1 }
 0x119   : > { %v11778_v43 = vpop.f32.mrf.mxu0  ;;  %v11780_v62 = vpop.f32.mrf.mxu1 }
 0x11b   : > { %v9880_v8 = vpop.f32.mrf.mxu0  ;;  %v9846_v9 = vpop.f32.mrf.mxu1 }
 0x11d   : > { %v723_v15 = vpop.f32.mrf.mxu0  ;;  %v489_v16 = vpop.f32.mrf.mxu1 }
 0x11e   : > { %v11784_v18 = vmax.f32 %v534_v23, %v723_v15  ;;  %v540_v7 = vmax.f32 %v11748_v63, %v489_v16 }
 0x11f   : > { %v9883_v19 = vpop.f32.mrf.mxu0  ;;  %v9849_v24 = vpop.f32.mrf.mxu1 }
 0x121   : > { %v11787_v53 = vpop.f32.mrf.mxu0  ;;  %v11789_v25 = vpop.f32.mrf.mxu1 }
 0x123   : > { %v9884_v33 = vpop.f32.mrf.mxu0  ;;  %v9850_v34 = vpop.f32.mrf.mxu1 }
 0x125   : > { %v731_v37 = vpop.f32.mrf.mxu0  ;;  %v497_v42 = vpop.f32.mrf.mxu1 }
 0x126   : > { %v11793_v44 = vmax.f32 %v536_v41, %v731_v37 }
 0x127   : > { %v9887_v47 = vpop.f32.mrf.mxu0  ;;  %v9853_v23 = vpop.f32.mrf.mxu1 }
 0x129   : > { %v11795_v51 = vpop.f32.mrf.mxu0  ;;  %v11797_v63 = vpop.f32.mrf.mxu1 }
 0x12b   : > { %v9888_v52 = vpop.f32.mrf.mxu0  ;;  %v9854_v54 = vpop.f32.mrf.mxu1 }
 0x12d   : > { %v739_v57 = vpop.f32.mrf.mxu0  ;;  %v505_v61 = vpop.f32.mrf.mxu1 }
 0x12e   : > { %v11799_v8 = vmax.f32 %v538_v55, %v739_v57  ;;  %v542_v57 = vmax.f32 %v11671_v6, %v497_v42 }
 0x12f   : > { %v9891_v9 = vpop.f32.mrf.mxu0  ;;  %v9857_v15 = vpop.f32.mrf.mxu1 }
 0x131   : > { %v11801_v16 = vpop.f32.mrf.mxu0  ;;  %v11803_v19 = vpop.f32.mrf.mxu1 }
 0x133   : > { %v9892_v41 = vpop.f32.mrf.mxu0  ;;  %v9858_v24 = vpop.f32.mrf.mxu1 }
 0x135   : > { %v747_v33 = vpop.f32.mrf.mxu0  ;;  %v513_v34 = vpop.f32.mrf.mxu1 }
 0x136   : > { %v11805_v37 = vmax.f32 %v540_v7, %v747_v33 }
 0x137   : > { %v9895_v47 = vpop.f32.mrf.mxu0  ;;  %v9861_v23 = vpop.f32.mrf.mxu1 }
 0x138   : > { %v544_v47 = vmax.f32 %v11692_v17, %v505_v61 }
 0x139   : > { %v11807_v52 = vpop.f32.mrf.mxu0  ;;  %v11809_v54 = vpop.f32.mrf.mxu1 }
 0x13b   : > { %v9896_v55 = vpop.f32.mrf.mxu0  ;;  %v9862_v9 = vpop.f32.mrf.mxu1 }
 0x13d   : > { %v755_v15 = vpop.f32.mrf.mxu0  ;;  %v521_v32 = vpop.f32.mrf.mxu1 }
 0x13e   : > { %v11812_v4 = vmax.f32 %v542_v57, %v755_v15  ;;  %v787_v57 = vmax.f32 %v529_v50, %v11760_v26  ;;  %v789_v26 = vmax.f32 %v531_v60, %v11769_v35 }
 0x13f   : > { %v9899_v41 = vpop.f32.mrf.mxu0  ;;  %v9865_v24 = vpop.f32.mrf.mxu1 }
 0x141   : > { %v11814_v46 = vpop.f32.mrf.mxu0  ;;  %v11816_v7 = vpop.f32.mrf.mxu1 }
 0x143   : > { %v9900_v33 = vpop.f32.mrf.mxu0  ;;  %v9866_v23 = vpop.f32.mrf.mxu1 }
 0x145   : > { %v763_v29 = vpop.f32.mrf.mxu0  ;;  %v957_v55 = vpop.f32.mrf.mxu1 }
 0x146   : > { %v11819_v5 = vmax.f32 %v544_v47, %v763_v29  ;;  %v1044_v6 = vmax.f32 %v11757_v20, %v957_v55  ;;  %v546_v29 = vmax.f32 %v11711_v27, %v513_v34 }
 0x147   : > { %v9903_v42 = vpop.f32.mrf.mxu0  ;;  %v9917_v9 = vpop.f32.mrf.mxu1 }
 0x148   : > { %v1072_v24 = vadd.f32 %v11405_v2, %v1044_v6 }
 0x149   : > { %v11826_v15 = vpop.f32.mrf.mxu0  ;;  %v960_v41 = vpop.f32.mrf.mxu1 }
 0x14a   : > { %v1045_v17 = vmax.f32 %v787_v57, %v960_v41  ;;  %v1094_v42 = vmax.f32 %v1072_v24, 0.0  ;;  %v548_v24 = vmax.f32 %v11723_v36, %v521_v32  ;;  %v11032_v32 = vld [vmem:[%s13852_s3 + $0xf8] sm:$0xff]  }
 0x14b   : > { %v9904_v61 = vpop.f32.mrf.mxu0  ;;  %v9918_v33 = vpop.f32.mrf.mxu1 }
 0x14c   : > { %v1073_v47 = vadd.f32 %v11405_v2, %v1045_v17 }
 0x14d   : > { %v771_v20 = vpop.f32.mrf.mxu0  ;;  %v965_v55 = vpop.f32.mrf.mxu1 }
 0x14e   : > { %v11831_v23 = vmax.f32 %v546_v29, %v771_v20  ;;  %v1095_v9 = vmax.f32 %v1073_v47, 0.0  ;;  %v1046_v10 = vmax.f32 %v11766_v38, %v965_v55  ;;  %v791_v55 = vmax.f32 %v533_v14, %v11778_v43 }
 0x14f   : > { %v9907_v49 = vpop.f32.mrf.mxu0  ;;  %v9921_v50 = vpop.f32.mrf.mxu1 }
 0x150   : > { %v9278_v6 = vpack.c.bf16 %v1095_v9, %v1094_v42  ;;  %v1074_v57 = vadd.f32 %v11405_v2, %v1046_v10 }
 0x151   : > { %v11838_v27 = vpop.f32.mrf.mxu0  ;;  %v968_v34 = vpop.f32.mrf.mxu1 }
 0x152   : > { %9279 = vst [vmem:[#allocation2] sm:$0xff] %v9278_v6   ;;  %v1047_v41 = vmax.f32 %v789_v26, %v968_v34  ;;  %v1096_v21 = vmax.f32 %v1074_v57, 0.0 }
 0x153   : > { %v9908_v17 = vpop.f32.mrf.mxu0  ;;  %v9922_v61 = vpop.f32.mrf.mxu1 }
 0x154   : > { %v1075_v38 = vadd.f32 %v11405_v2, %v1047_v41 }
 0x155   : > { %v779_v29 = vpop.f32.mrf.mxu0  ;;  %v973_v47 = vpop.f32.mrf.mxu1 }
 0x156   : > { %v11843_v33 = vmax.f32 %v548_v24, %v779_v29  ;;  %v1097_v59 = vmax.f32 %v1075_v38, 0.0  ;;  %v1048_v60 = vmax.f32 %v11775_v56, %v973_v47  ;;  %v13864_v24 = vmax.f32 %v11726_v39, %v11762_v28  ;;  %v11036_v29 = vld [vmem:[%s13852_s3 + $0xe8] sm:$0xff]  }
 0x157   : > { %v9911_v35 = vpop.f32.mrf.mxu0  ;;  %v9925_v20 = vpop.f32.mrf.mxu1 }
 0x158   : > { %v9283_v42 = vpack.c.bf16 %v1097_v59, %v1096_v21  ;;  %v1076_v49 = vadd.f32 %v11405_v2, %v1048_v60  ;;  %v793_v61 = vmax.f32 %v13864_v24, %v11787_v53 }
 0x159   : > { %v11850_v36 = vpop.f32.mrf.mxu0  ;;  %v976_v9 = vpop.f32.mrf.mxu1  ;;  %v11021_v10 = vld [vmem:[#allocation2] sm:$0xff]  }
 0x15a   : > { %9330 = vst [vmem:[#allocation2 + $0x8] sm:$0xff] %v9283_v42   ;;  %v1049_v56 = vmax.f32 %v791_v55, %v976_v9  ;;  %10028 = vmatmul.mubr.bf16.vlgmr.msra.gmra.mxu1 %v11021_v10  ;;  %v1326_v43 = vshll.u32 %v11021_v10, 16  ;;  %v1098_v34 = vmax.f32 %v1076_v49, 0.0  ;;  %v2356_v20 = vld [vmem:[#allocation2 + $0x4] sm:$0x8]  ;;  %v1324_v53 = vshrl.u32 %v11021_v10, 16 }
 0x15b   : > { %v9912_v50 = vpop.f32.mrf.mxu0  ;;  %v9926_v26 = vpop.f32.mrf.mxu1  ;;  %10031 = vmatprep.mubr.msk.bf16.mxu1 %vm11339_vm2, %v13863_v30  ;;  %10116 = vmatpush3.bf16.msra.mxu1 %v11032_v32  ;;  %v11037_v42 = vld [vmem:[%s13852_s3 + $0xe0] sm:$0xff]   ;;  %v11024_v10 = vld [vmem:[%s13852_s3 + $0xb8] sm:$0xff]  }
 0x15c   : > { %v1077_v6 = vadd.f32 %v11405_v2, %v1049_v56  ;;  %10117 = vmatprep.subr.bf16.mxu1 %v13863_v30  ;;  %v1328_v59 = vrot.slane %v1326_v43, 1  ;;  %v13865_v43 = vmax.f32 %v11733_v48, %v11771_v45 }
 0x15d   : > { %v981_v14 = vpop.f32.mrf.mxu1 }
 0x15e   : > { %v1099_v57 = vmax.f32 %v1077_v6, 0.0  ;;  %v1050_v41 = vmax.f32 %v11784_v18, %v981_v14  ;;  %v1329_v56 = vor.u32 %v1328_v59, %v1324_v53 }
 0x15f   : > { %v9929_v17 = vpop.f32.mrf.mxu1  ;;  %10118 = vmatpush3.bf16.msra.mxu1 %v11033_v13 }
 0x160   : > { %v9288_v38 = vpack.c.bf16 %v1099_v57, %v1098_v34  ;;  %10119 = vmatprep.subr.bf16.mxu1 %v13863_v30  ;;  %v1078_v18 = vadd.f32 %v11405_v2, %v1050_v41  ;;  %v795_v34 = vmax.f32 %v13865_v43, %v11795_v51  ;;  %v11026_v41 = vld [vmem:[%s13852_s3 + $0xb0] sm:$0xff]   ;;  %v11039_v17 = vld [vmem:[%s13852_s3 + $0xd8] sm:$0xff]   ;;  %v13866_v43 = vmax.f32 %v11742_v58, %v11780_v62 }
 0x161   : > { %v984_v47 = vpop.f32.mrf.mxu1  ;;  %v11023_v21 = vld [vmem:[#allocation2 + $0x8] sm:$0xff]  }
 0x162   : > { %9331 = vst [vmem:[#allocation2 + $0x10] sm:$0xff] %v9288_v38   ;;  %v1051_v60 = vmax.f32 %v793_v61, %v984_v47  ;;  %v11873_v35 = vld [vmem:[#allocation2 + $0x8] sm:$0xf]  ;;  %v1331_v28 = vshll.u32 %v11023_v21, 16  ;;  %10032 = vmatmul.mubr.bf16.gmra.mxu1 %v11023_v21  ;;  %v1100_v50 = vmax.f32 %v1078_v18, 0.0  ;;  %v1335_v38 = vshrl.u32 %v11023_v21, 16 }
 0x163   : > { %v9930_v39 = vpop.f32.mrf.mxu1  ;;  %10035 = vmatprep.mubr.msk.bf16.mxu1 %vm11339_vm2, %v13863_v30  ;;  %10120 = vmatpush3.bf16.msra.mxu1 %v11036_v29  ;;  %v11882_v32 = vcombine.low %v2356_v20, %v11873_v35  ;;  %v11028_v21 = vld [vmem:[%s13852_s3 + $0xa8] sm:$0xff]   ;;  %v11041_v20 = vld [vmem:[%s13852_s3 + $0xd0] sm:$0xff]  }
 0x164   : > { %v1079_v55 = vadd.f32 %v11405_v2, %v1051_v60  ;;  %v1333_v9 = vrot.slane %v1331_v28, 1  ;;  %10121 = vmatprep.subr.bf16.mxu1 %v13863_v30 }
 0x165   : > { %v989_v49 = vpop.f32.mrf.mxu1  ;;  %v2603_v48 = vshll.u32 %v11882_v32, 16 }
 0x166   : > { %v1101_v26 = vmax.f32 %v1079_v55, 0.0  ;;  %v1052_v6 = vmax.f32 %v11793_v44, %v989_v49  ;;  %v1334_v14 = vsel %vm1322_vm4, %v1329_v56, %v1333_v9  ;;  %v2600_v44 = vshrl.u32 %v11882_v32, 16 }
 0x167   : > { %v9933_v13 = vpop.f32.mrf.mxu1  ;;  %9976 = vmatmul.mubr.bf16.vlgmr.msra.gmra.mxu0 %v1334_v14  ;;  %10122 = vmatpush3.bf16.msra.mxu1 %v11037_v42  ;;  %v1337_v60 = vor.u32 %v1335_v38, %v1333_v9  ;;  %v2605_v9 = vrot.slane %v2603_v48, 4  ;;  %v2382_v14 = vrot.slane %v11882_v32, 3 }
 0x168   : > { %v9293_v57 = vpack.c.bf16 %v1101_v26, %v1100_v50  ;;  %10064 = vmatpush3.bf16.msra.mxu0 %v11024_v10  ;;  %9979 = vmatprep.mubr.msk.bf16.mxu0 %vm11339_vm2, %v13863_v30  ;;  %v1080_v45 = vadd.f32 %v11405_v2, %v1052_v6  ;;  %v2602_v42 = vrot.slane %v2600_v44, 3 }
 0x169   : > { %v992_v24 = vpop.f32.mrf.mxu1  ;;  %v11901_v61 = vld [vmem:[#allocation2 + $0x10] sm:$0xff]   ;;  %10065 = vmatprep.subr.bf16.mxu0 %v13863_v30  ;;  %10123 = vmatprep.subr.bf16.mxu1 %v13863_v30 }
 0x16a   : > { %9332 = vst [vmem:[#allocation2 + $0x18] sm:$0xff] %v9293_v57   ;;  %v1053_v51 = vmax.f32 %v795_v34, %v992_v24  ;;  %v11909_v29 = vld [vmem:[#allocation2 + $0xc] sm:$0xff]   ;;  %10036 = vmatmul.mubr.bf16.gmra.mxu1 %v11901_v61  ;;  %v1339_v59 = vshll.u32 %v11901_v61, 16  ;;  %v1102_v56 = vmax.f32 %v1080_v45, 0.0  ;;  %v797_v34 = vmax.f32 %v13866_v43, %v11801_v16 }
 0x16b   : > { %v9934_v47 = vpop.f32.mrf.mxu1  ;;  %10039 = vmatprep.mubr.msk.bf16.mxu1 %vm11339_vm2, %v13863_v30  ;;  %10124 = vmatpush3.bf16.msra.mxu1 %v11039_v17  ;;  %v2096_v39 = vshrl.u32 %v11909_v29, 16  ;;  %v2099_v28 = vshll.u32 %v11909_v29, 16  ;;  %v2383_v49 = vrot.slane %v11909_v29, 3  ;;  %v2606_v58 = vor.u32 %v2605_v9, %v2602_v42  ;;  %v11035_v9 = vld [vmem:[%s13852_s3 + $0x98] sm:$0xff]  }
 0x16c   : > { %v1081_v18 = vadd.f32 %v11405_v2, %v1053_v51  ;;  %v1341_v55 = vrot.slane %v1339_v59, 1  ;;  %10066 = vmatpush3.bf16.msra.mxu0 %v11026_v41  ;;  %10125 = vmatprep.subr.bf16.mxu1 %v13863_v30  ;;  %v11043_v41 = vld [vmem:[%s13852_s3 + $0xc8] sm:$0xff]   ;;  %v1343_v38 = vshrl.u32 %v11901_v61, 16 }
 0x16d   : > { %v997_v53 = vpop.f32.mrf.mxu1  ;;  %10067 = vmatprep.subr.bf16.mxu0 %v13863_v30  ;;  %v2607_v13 = vrot.slane %v2096_v39, 3  ;;  %v2608_v32 = vrot.slane %v2099_v28, 4  ;;  %v11951_v62 = vsel %vm165_vm1, %v2382_v14, %v2383_v49  ;;  %v13867_v14 = vmax.f32 %v11751_v12, %v11789_v25 }
 0x16e   : > { %v1103_v10 = vmax.f32 %v1081_v18, 0.0  ;;  %v1054_v50 = vmax.f32 %v11799_v8, %v997_v53  ;;  %v1342_v6 = vsel %vm1322_vm4, %v1337_v60, %v1341_v55  ;;  %v11031_v8 = vld [vmem:[%s13852_s3 + $0xa0] sm:$0xff]   ;;  %v1345_v53 = vor.u32 %v1343_v38, %v1341_v55 }
 0x16f   : > { %v9937_v26 = vpop.f32.mrf.mxu1  ;;  %9980 = vmatmul.mubr.bf16.gmra.mxu0 %v1342_v6  ;;  %10126 = vmatpush3.bf16.msra.mxu1 %v11041_v20  ;;  %v2609_v45 = vor.u32 %v2608_v32, %v2607_v13  ;;  %v11045_v18 = vld [vmem:[%s13852_s3 + $0xc0] sm:$0xff]   ;;  %v799_v43 = vmax.f32 %v13867_v14, %v11807_v52 }
 0x170   : > { %v9298_v57 = vpack.c.bf16 %v1103_v10, %v1102_v56  ;;  %9983 = vmatprep.mubr.msk.bf16.mxu0 %vm11339_vm2, %v13863_v30  ;;  %10068 = vmatpush3.bf16.msra.mxu0 %v11028_v21  ;;  %v1082_v16 = vadd.f32 %v11405_v2, %v1054_v50 }
 0x171   : > { %v1000_v17 = vpop.f32.mrf.mxu1  ;;  %v11944_v44 = vld [vmem:[#allocation2 + $0x18] sm:$0xff]   ;;  %10069 = vmatprep.subr.bf16.mxu0 %v13863_v30  ;;  %10127 = vmatprep.subr.bf16.mxu1 %v13863_v30  ;;  %v11970_v20 = vsel %vm2598_vm5, %v2606_v58, %v2609_v45 }
 0x172   : > { %9333 = vst [vmem:[#allocation2 + $0x20] sm:$0xff] %v9298_v57   ;;  %v1055_v24 = vmax.f32 %v797_v34, %v1000_v17  ;;  %v11956_v48 = vld [vmem:[#allocation2 + $0x14] sm:$0xff]   ;;  %10040 = vmatmul.mubr.bf16.gmra.mxu1 %v11944_v44  ;;  %v1347_v47 = vshll.u32 %v11944_v44, 16  ;;  %v1104_v10 = vmax.f32 %v1082_v16, 0.0  ;;  %v1351_v16 = vshrl.u32 %v11944_v44, 16  ;;  %v11044_v44 = vld [vmem:[%s13852_s3 + $0x88] sm:$0xff]  }
 0x173   : > { %v9938_v51 = vpop.f32.mrf.mxu1  ;;  %10043 = vmatprep.mubr.msk.bf16.mxu1 %vm11339_vm2, %v13863_v30  ;;  %10128 = vmatpush3.bf16.msra.mxu1 %v11043_v41  ;;  %v2105_v60 = vshrl.u32 %v11956_v48, 16  ;;  %v2108_v21 = vshll.u32 %v11956_v48, 16  ;;  %v2385_v56 = vrot.slane %v11956_v48, 3  ;;  %v11040_v57 = vld [vmem:[%s13852_s3 + $0x90] sm:$0xff]  }
 0x174   : > { %v1083_v59 = vadd.f32 %v11405_v2, %v1055_v24  ;;  %v1349_v42 = vrot.slane %v1347_v47, 1  ;;  %10070 = vmatpush3.bf16.msra.mxu0 %v11031_v8  ;;  %10129 = vmatprep.subr.bf16.mxu1 %v13863_v30 }
 0x175   : > { %v1005_v61 = vpop.f32.mrf.mxu1  ;;  %10071 = vmatprep.subr.bf16.mxu0 %v13863_v30  ;;  %v2611_v55 = vrot.slane %v2105_v60, 3  ;;  %v11996_v12 = vsel %vm165_vm1, %v2383_v49, %v2385_v56 }
 0x176   : > { %v1105_v50 = vmax.f32 %v1083_v59, 0.0  ;;  %v1056_v26 = vmax.f32 %v11805_v37, %v1005_v61  ;;  %v1350_v13 = vsel %vm1322_vm4, %v1345_v53, %v1349_v42  ;;  %v2612_v37 = vrot.slane %v2108_v21, 4 }
 0x177   : > { %v9941_v6 = vpop.f32.mrf.mxu1  ;;  %9984 = vmatmul.mubr.bf16.gmra.mxu0 %v1350_v13  ;;  %10130 = vmatpush3.bf16.msra.mxu1 %v11045_v18  ;;  %v1353_v18 = vor.u32 %v1351_v16, %v1349_v42 }
 0x178   : > { %v9303_v34 = vpack.c.bf16 %v1105_v50, %v1104_v10  ;;  %9987 = vmatprep.mubr.msk.bf16.mxu0 %vm11339_vm2, %v13863_v30  ;;  %10072 = vmatpush3.bf16.msra.mxu0 %v11035_v9  ;;  %v1084_v25 = vadd.f32 %v11405_v2, %v1056_v26  ;;  %v2613_v17 = vor.u32 %v2612_v37, %v2611_v55 }
 0x179   : > { %v1008_v8 = vpop.f32.mrf.mxu1  ;;  %v11029_v41 = vld [vmem:[#allocation2 + $0x20] sm:$0xff]   ;;  %10073 = vmatprep.subr.bf16.mxu0 %v13863_v30  ;;  %10219 = vmatprep.subr.bf16.mxu1 %v13863_v30  ;;  %v543_v9 = vmax.f32 %v11683_v11, %v11797_v63 }
 0x17a   : > { %9334 = vst [vmem:[#allocation2 + $0x28] sm:$0xff] %v9303_v34   ;;  %v1057_v52 = vmax.f32 %v799_v43, %v1008_v8  ;;  %v12000_v32 = vld [vmem:[#allocation2 + $0x1c] sm:$0xff]   ;;  %10044 = vmatmul.mubr.bf16.gmra.mxu1 %v11029_v41  ;;  %v1355_v24 = vshll.u32 %v11029_v41, 16  ;;  %v12010_v47 = vsel %vm2598_vm5, %v2609_v45, %v2613_v17  ;;  %v1106_v10 = vmax.f32 %v1084_v25, 0.0 }
 0x17b   : > { %v9942_v58 = vpop.f32.mrf.mxu1  ;;  %10047 = vmatprep.mubr.msk.bf16.mxu1 %vm11339_vm2, %v13863_v30  ;;  %v2114_v49 = vshrl.u32 %v12000_v32, 16  ;;  %v2117_v38 = vshll.u32 %v12000_v32, 16  ;;  %v2387_v53 = vrot.slane %v12000_v32, 3  ;;  %v801_v13 = vmax.f32 %v543_v9, %v11814_v46  ;;  %v11049_v11 = vld [vmem:[%s13852_s3 + $0x80] sm:$0xff]  }
 0x17c   : > { %v1085_v51 = vadd.f32 %v11405_v2, %v1057_v52  ;;  %v1357_v61 = vrot.slane %v1355_v24, 1  ;;  %10074 = vmatpush3.bf16.msra.mxu0 %v11040_v57  ;;  %v1359_v25 = vshrl.u32 %v11029_v41, 16  ;;  %v545_v41 = vmax.f32 %v11703_v22, %v11803_v19  ;;  %v11071_v32 = vld [vmem:[%s13852_s3 + $0x160] sm:$0xff]  }
 0x17d   : > { %v1013_v59 = vpop.f32.mrf.mxu1  ;;  %10075 = vmatprep.subr.bf16.mxu0 %v13863_v30  ;;  %v2615_v6 = vrot.slane %v2114_v49, 3  ;;  %v2616_v63 = vrot.slane %v2117_v38, 4  ;;  %v12032_v43 = vsel %vm165_vm1, %v2385_v56, %v2387_v53 }
 0x17e   : > { %v1107_v50 = vmax.f32 %v1085_v51, 0.0  ;;  %v1058_v26 = vmax.f32 %v11812_v4, %v1013_v59  ;;  %v1358_v42 = vsel %vm1322_vm4, %v1353_v18, %v1357_v61  ;;  %v1361_v59 = vor.u32 %v1359_v25, %v1357_v61 }
 0x17f   : > { %v9945_v45 = vpop.f32.mrf.mxu1  ;;  %9988 = vmatmul.mubr.bf16.gmra.mxu0 %v1358_v42  ;;  %v2617_v37 = vor.u32 %v2616_v63, %v2615_v6  ;;  %v803_v61 = vmax.f32 %v545_v41, %v11826_v15 }
 0x180   : > { %v9308_v55 = vpack.c.bf16 %v1107_v50, %v1106_v10  ;;  %9991 = vmatprep.mubr.msk.bf16.mxu0 %vm11339_vm2, %v13863_v30  ;;  %10076 = vmatpush3.bf16.msra.mxu0 %v11044_v44  ;;  %v1086_v46 = vadd.f32 %v11405_v2, %v1058_v26 }
 0x181   : > { %v1016_v4 = vpop.f32.mrf.mxu1  ;;  %v11030_v14 = vld [vmem:[#allocation2 + $0x28] sm:$0xff]   ;;  %10077 = vmatprep.subr.bf16.mxu0 %v13863_v30  ;;  %v12044_v24 = vsel %vm2598_vm5, %v2613_v17, %v2617_v37 }
 0x182   : > { %9335 = vst [vmem:[#allocation2 + $0x30] sm:$0xff] %v9308_v55   ;;  %v1059_v34 = vmax.f32 %v801_v13, %v1016_v4  ;;  %v12036_v57 = vld [vmem:[#allocation2 + $0x24] sm:$0xff]   ;;  %10048 = vmatmul.mubr.bf16.gmra.mxu1 %v11030_v14  ;;  %v1363_v52 = vshll.u32 %v11030_v14, 16  ;;  %v1108_v9 = vmax.f32 %v1086_v46, 0.0  ;;  %v1367_v4 = vshrl.u32 %v11030_v14, 16 }
 0x183   : > { %v9946_v8 = vpop.f32.mrf.mxu1  ;;  %10051 = vmatprep.mubr.msk.bf16.mxu1 %vm11339_vm2, %v13863_v30  ;;  %v2123_v56 = vshrl.u32 %v12036_v57, 16  ;;  %v2126_v16 = vshll.u32 %v12036_v57, 16  ;;  %v2389_v44 = vrot.slane %v12036_v57, 3  ;;  %v12224_v57 = vld [vmem:[#allocation2 + $0x18] sm:$0xff]  }
 0x184   : > { %v1087_v58 = vadd.f32 %v11405_v2, %v1059_v34  ;;  %v1365_v18 = vrot.slane %v1363_v52, 1  ;;  %10078 = vmatpush3.bf16.msra.mxu0 %v11049_v11  ;;  %v2002_v8 = vld [vmem:[#allocation2 + $0x4] sm:$0xc] }
 0x185   : > { %v1021_v51 = vpop.f32.mrf.mxu1  ;;  %10167 = vmatprep.subr.bf16.mxu0 %v13863_v30  ;;  %v2619_v17 = vrot.slane %v2123_v56, 3  ;;  %v2620_v6 = vrot.slane %v2126_v16, 4  ;;  %v8506_v41 = vcombine.low %v2002_v8, %v11873_v35 }
 0x186   : > { %v1109_v10 = vmax.f32 %v1087_v58, 0.0  ;;  %v1060_v50 = vmax.f32 %v11819_v5, %v1021_v51  ;;  %v1366_v45 = vsel %vm1322_vm4, %v1361_v59, %v1365_v18  ;;  %v12060_v5 = vsel %vm165_vm1, %v2387_v53, %v2389_v44 }
 0x187   : > { %v9949_v26 = vpop.f32.mrf.mxu1  ;;  %9992 = vmatmul.mubr.bf16.gmra.mxu0 %v1366_v45  ;;  %v2621_v15 = vor.u32 %v2620_v6, %v2619_v17  ;;  %v1369_v51 = vor.u32 %v1367_v4, %v1365_v18 }
 0x188   : > { %v9313_v42 = vpack.c.bf16 %v1109_v10, %v1108_v9  ;;  %9995 = vmatprep.mubr.msk.bf16.mxu0 %vm11339_vm2, %v13863_v30  ;;  %v1088_v13 = vadd.f32 %v11405_v2, %v1060_v50  ;;  %v547_v9 = vmax.f32 %v11716_v31, %v11809_v54  ;;  %v2088_v31 = vshrl.u32 %v8506_v41, 16 }
 0x189   : > { %v1024_v22 = vpop.f32.mrf.mxu1  ;;  %v11034_v19 = vld [vmem:[#allocation2 + $0x30] sm:$0xff]   ;;  %v12071_v52 = vsel %vm2598_vm5, %v2617_v37, %v2621_v15 }
 0x18a   : > { %9336 = vst [vmem:[#allocation2 + $0x38] sm:$0xff] %v9313_v42   ;;  %v1061_v55 = vmax.f32 %v803_v61, %v1024_v22  ;;  %v12063_v11 = vld [vmem:[#allocation2 + $0x2c] sm:$0xff]   ;;  %10052 = vmatmul.mubr.bf16.gmra.mxu1 %v11034_v19  ;;  %v1371_v46 = vshll.u32 %v11034_v19, 16  ;;  %v1110_v10 = vmax.f32 %v1088_v13, 0.0  ;;  %v805_v18 = vmax.f32 %v547_v9, %v11838_v27 }
 0x18b   : > { %v9950_v63 = vpop.f32.mrf.mxu1  ;;  %10055 = vmatprep.mubr.msk.bf16.mxu1 %vm11339_vm2, %v13863_v30  ;;  %v2132_v53 = vshrl.u32 %v12063_v11, 16  ;;  %v2135_v25 = vshll.u32 %v12063_v11, 16  ;;  %v2391_v14 = vrot.slane %v12063_v11, 3  ;;  %v2091_v13 = vshll.u32 %v8506_v41, 16 }
 0x18c   : > { %v1089_v34 = vadd.f32 %v11405_v2, %v1061_v55  ;;  %v1373_v59 = vrot.slane %v1371_v46, 1  ;;  %v1375_v4 = vshrl.u32 %v11034_v19, 16 }
 0x18d   : > { %v1029_v58 = vpop.f32.mrf.mxu1  ;;  %v2623_v37 = vrot.slane %v2132_v53, 3  ;;  %v2624_v35 = vrot.slane %v2135_v25, 4  ;;  %v12087_v54 = vsel %vm165_vm1, %v2389_v44, %v2391_v14 }
 0x18e   : > { %v1111_v50 = vmax.f32 %v1089_v34, 0.0  ;;  %v1062_v26 = vmax.f32 %v11831_v23, %v1029_v58  ;;  %v1374_v17 = vsel %vm1322_vm4, %v1369_v51, %v1373_v59  ;;  %v549_v51 = vmax.f32 %v11728_v40, %v11816_v7 }
 0x18f   : > { %v9953_v45 = vpop.f32.mrf.mxu1  ;;  %9996 = vmatmul.mubr.bf16.gmra.mxu0 %v1374_v17  ;;  %v2625_v55 = vor.u32 %v2624_v35, %v2623_v37  ;;  %v1377_v9 = vor.u32 %v1375_v4, %v1373_v59  ;;  %v2090_v40 = vrot.slane %v2088_v31, 2  ;;  %v2093_v7 = vrot.slane %v2091_v13, 3 }
 0x190   : > { %v9318_v61 = vpack.c.bf16 %v1111_v50, %v1110_v10  ;;  %9999 = vmatprep.mubr.msk.bf16.mxu0 %vm11339_vm2, %v13863_v30  ;;  %v1090_v23 = vadd.f32 %v11405_v2, %v1062_v26  ;;  %v807_v17 = vmax.f32 %v549_v51, %v11850_v36  ;;  %v2101_v31 = vrot.slane %v2099_v28, 3 }
 0x191   : > { %v1032_v42 = vpop.f32.mrf.mxu1  ;;  %v11038_v6 = vld [vmem:[#allocation2 + $0x38] sm:$0xff]   ;;  %v12098_v58 = vsel %vm2598_vm5, %v2621_v15, %v2625_v55 }
 0x192   : > { %9337 = vst [vmem:[#allocation2 + $0x40] sm:$0xff] %v9318_v61   ;;  %v1063_v22 = vmax.f32 %v805_v18, %v1032_v42  ;;  %v12090_v27 = vld [vmem:[#allocation2 + $0x34] sm:$0xff]   ;;  %10056 = vmatmul.mubr.bf16.gmra.mxu1 %v11038_v6  ;;  %v1379_v46 = vshll.u32 %v11038_v6, 16  ;;  %v1112_v50 = vmax.f32 %v1090_v23, 0.0  ;;  %v1383_v4 = vshrl.u32 %v11038_v6, 16 }
 0x193   : > { %v9954_v63 = vpop.f32.mrf.mxu1  ;;  %10059 = vmatprep.mubr.msk.bf16.mxu1 %vm11339_vm2, %v13863_v30  ;;  %v2141_v44 = vshrl.u32 %v12090_v27, 16  ;;  %v2144_v8 = vshll.u32 %v12090_v27, 16  ;;  %v2393_v19 = vrot.slane %v12090_v27, 3 }
 0x194   : > { %v1091_v34 = vadd.f32 %v11405_v2, %v1063_v22  ;;  %v1381_v10 = vrot.slane %v1379_v46, 1 }
 0x195   : > { %v1037_v41 = vpop.f32.mrf.mxu1  ;;  %v2627_v15 = vrot.slane %v2141_v44, 3  ;;  %v2628_v59 = vrot.slane %v2144_v8, 4  ;;  %v12115_v36 = vsel %vm165_vm1, %v2391_v14, %v2393_v19 }
 0x196   : > { %v1113_v26 = vmax.f32 %v1091_v34, 0.0  ;;  %v1064_v45 = vmax.f32 %v11843_v33, %v1037_v41  ;;  %v1382_v18 = vsel %vm1322_vm4, %v1377_v9, %v1381_v10  ;;  %v2098_v33 = vrot.slane %v2096_v39, 2 }
 0x197   : > { %v9957_v37 = vpop.f32.mrf.mxu1  ;;  %10000 = vmatmul.mubr.bf16.gmra.mxu0 %v1382_v18  ;;  %v2629_v63 = vor.u32 %v2628_v59, %v2627_v15  ;;  %v1385_v29 = vor.u32 %v1383_v4, %v1381_v10  ;;  %v11064_v10 = vld [vmem:[%s13852_s3 + $0x178] sm:$0xff]  }
 0x198   : > { %v9323_v61 = vpack.c.bf16 %v1113_v26, %v1112_v50  ;;  %10003 = vmatprep.mubr.msk.bf16.mxu0 %vm11339_vm2, %v13863_v30  ;;  %v1092_v23 = vadd.f32 %v11405_v2, %v1064_v45  ;;  %v2102_v26 = vor.u32 %v2101_v31, %v2098_v33  ;;  %v2107_v33 = vrot.slane %v2105_v60, 2  ;;  %v11066_v60 = vld [vmem:[%s13852_s3 + $0x170] sm:$0xff]  }
 0x199   : > { %v1040_v35 = vpop.f32.mrf.mxu1  ;;  %v11042_v42 = vld [vmem:[#allocation2 + $0x40] sm:$0xff]   ;;  %v12128_v41 = vsel %vm2598_vm5, %v2625_v55, %v2629_v63  ;;  %v2094_v55 = vor.u32 %v2093_v7, %v2090_v40  ;;  %v2110_v40 = vrot.slane %v2108_v21, 3 }
 0x19a   : > { %9338 = vst [vmem:[#allocation2 + $0x48] sm:$0xff] %v9323_v61   ;;  %v1065_v22 = vmax.f32 %v807_v17, %v1040_v35  ;;  %v12120_v13 = vld [vmem:[#allocation2 + $0x3c] sm:$0xff]   ;;  %10060 = vmatmul.mubr.bf16.gmra.mxu1 %v11042_v42  ;;  %v1387_v46 = vshll.u32 %v11042_v42, 16  ;;  %v1114_v50 = vmax.f32 %v1092_v23, 0.0 }
 0x19b   : > { %v9958_v34 = vpop.f32.mrf.mxu1  ;;  %10131 = vmatprep.mubr.msk.bf16.mxu1 %vm11339_vm2, %v13863_v30  ;;  %v2150_v39 = vshrl.u32 %v12120_v13, 16  ;;  %v2153_v14 = vshll.u32 %v12120_v13, 16  ;;  %v2395_v9 = vrot.slane %v12120_v13, 3  ;;  %v2103_v35 = vsel %vm2086_vm6, %v2094_v55, %v2102_v26 }
 0x19c   : > { %v1093_v51 = vadd.f32 %v11405_v2, %v1065_v22  ;;  %v1389_v28 = vrot.slane %v1387_v46, 1  ;;  %v1391_v22 = vshrl.u32 %v11042_v42, 16  ;;  %v2111_v4 = vor.u32 %v2110_v40, %v2107_v33  ;;  %v12174_v34 = vld [vmem:[#allocation2 + $0x8] sm:$0xff]   ;;  %v12206_v40 = vld [vmem:[#allocation2 + $0x10] sm:$0xff]  }
 0x19d   : > { %v2631_v17 = vrot.slane %v2150_v39, 3  ;;  %v2632_v37 = vrot.slane %v2153_v14, 4  ;;  %v12140_v15 = vsel %vm165_vm1, %v2393_v19, %v2395_v9  ;;  %v11126_v2 = vld [vmem:[%s13854_s5 + $0x28] sm:$0xff] (%p39_p0)  }
 0x19e   : > { %v1115_v6 = vmax.f32 %v1093_v51, 0.0  ;;  %v1390_v45 = vsel %vm1322_vm4, %v1385_v29, %v1389_v28  ;;  %v1393_v31 = vor.u32 %v1391_v22, %v1389_v28  ;;  %v11069_v51 = vld [vmem:[%s13852_s3 + $0x168] sm:$0xff]   ;;  %v2125_v22 = vrot.slane %v2123_v56, 2 }
 0x19f   : > { %10004 = vmatmul.mubr.bf16.gmra.mxu0 %v1390_v45  ;;  %v2633_v59 = vor.u32 %v2632_v37, %v2631_v17  ;;  %v2119_v45 = vrot.slane %v2117_v38, 3  ;;  %v2112_v17 = vsel %vm2086_vm6, %v2102_v26, %v2111_v4  ;;  %v11053_v26 = vld [vmem:[%s13852_s3 + $0x138] sm:$0xff]  }
 0x1a0   : > { %v9328_v18 = vpack.c.bf16 %v1115_v6, %v1114_v50  ;;  %10007 = vmatprep.mubr.msk.bf16.mxu0 %vm11339_vm2, %v13863_v30  ;;  %v11051_v6 = vld [vmem:[#allocation2] sm:$0xfe]  }
 0x1a1   : > { %v12144_v61 = vld [vmem:[#allocation2 + $0x44] sm:$0xff]   ;;  %v12154_v23 = vsel %vm2598_vm5, %v2629_v63, %v2633_v59  ;;  %v12167_v63 = vld [vmem:[#allocation2 + $0x4c] ss:$0 sps:$4 sm:$0x77]   ;;  %v1803_v38 = vrot.slane %v11051_v6, 1 }
 0x1a2   : > { %9339 = vst [vmem:[#allocation2 + $0x50] sm:$0xff] %v9328_v18   ;;  %10132 = vmatmul.mubr.bf16.vlgmr.msra.gmra.mxu1 %v2103_v35  ;;  %v2159_v7 = vshrl.u32 %v12144_v61, 16  ;;  %v13862_v19 = vshll.u32 %v12144_v61, 16  ;;  %v13861_v48 = vrot.slane %v12144_v61, 3  ;;  %v2640_v28 = vshrl.u32 %v12167_v63, 16  ;;  %v12240_v6 = vld [vmem:[#allocation2 + $0x24] sm:$0xff]  }
 0x1a3   : > { %10135 = vmatprep.mubr.msk.bf16.mxu1 %vm11339_vm2, %v13863_v30  ;;  %10220 = vmatpush3.bf16.msra.mxu1 %v11064_v10  ;;  %v2643_v50 = vshll.u32 %v12167_v63, 16  ;;  %v1804_v10 = vrot.slane %v12174_v34, 1  ;;  %v1806_v34 = vrot.slane %v12206_v40, 1 }
 0x1a4   : > { %10221 = vmatprep.subr.bf16.mxu1 %v13863_v30  ;;  %v2635_v21 = vrot.slane %v2159_v7, 3  ;;  %v2636_v42 = vrot.slane %v13862_v19, 4  ;;  %v12172_v46 = vsel %vm165_vm1, %v2395_v9, %v13861_v48  ;;  %v2116_v9 = vrot.slane %v2114_v49, 2 }
 0x1a5   : > { %v2642_v18 = vrot.slane %v2640_v28, 3  ;;  %v2645_v55 = vrot.slane %v2643_v50, 4  ;;  %v1805_v33 = vsel %vm1802_vm7, %v1803_v38, %v1804_v10  ;;  %v12233_v28 = vld [vmem:[#allocation2 + $0x1c] sm:$0xff]   ;;  %v1807_v38 = vsel %vm1802_vm7, %v1804_v10, %v1806_v34 }
 0x1a6   : > { %v2637_v29 = vor.u32 %v2636_v42, %v2635_v21  ;;  %v11073_v21 = vld [vmem:[%s13852_s3 + $0x158] sm:$0xff]   ;;  %v11056_v42 = vld [vmem:[%s13852_s3 + $0x130] sm:$0xff]   ;;  %v3427_v40 = vrot.slane %v12233_v28, 2  ;;  %v2137_v48 = vrot.slane %v2135_v25, 3 }
 0x1a7   : > { %10008 = vmatmul.mubr.bf16.gmra.mxu0 %v1393_v31  ;;  %10222 = vmatpush3.bf16.msra.mxu1 %v11066_v60  ;;  %v2646_v49 = vor.u32 %v2645_v55, %v2642_v18  ;;  %v2128_v60 = vrot.slane %v2126_v16, 3  ;;  %v12215_v31 = vld [vmem:[#allocation2 + $0x10] sm:$0xf]  ;;  %v3398_v16 = vld [vmem:[#allocation2 + $0xc] sm:$0xc]  ;;  %v12250_v18 = vld [vmem:[#allocation2 + $0x3c] sm:$0xff]  }
 0x1a8   : > { %10079 = vmatprep.mubr.msk.bf16.mxu0 %vm11339_vm2, %v13863_v30  ;;  %10223 = vmatprep.subr.bf16.mxu1 %v13863_v30  ;;  %v12190_v37 = vsel %vm2598_vm5, %v2633_v59, %v2637_v29  ;;  %v2120_v59 = vor.u32 %v2119_v45, %v2116_v9  ;;  %v12242_v9 = vld [vmem:[#allocation2 + $0x2c] sm:$0xff]   ;;  %v12244_v45 = vld [vmem:[#allocation2 + $0x34] sm:$0xff]   ;;  %v1808_v55 = vrot.slane %v12224_v57, 1  ;;  %v2155_v57 = vrot.slane %v2153_v14, 3 }
 0x1a9   : > { %v12203_v35 = vsel %vm2598_vm5, %v2637_v29, %v2646_v49  ;;  %v12231_v29 = vld [vmem:[#allocation2 + $0x14] sm:$0xff]   ;;  %v12238_v50 = vor.u32 %v2128_v60, %v2125_v22  ;;  %v12256_v49 = vld [vmem:[#allocation2 + $0x4c] sm:$0xff]   ;;  %v3433_v10 = vrot.slane %v12244_v45, 2  ;;  %v13868_v14 = vshll.u32 %v12144_v61, 16 }
 0x1aa   : > { %10136 = vmatmul.mubr.bf16.gmra.mxu1 %v2112_v17  ;;  %v2121_v56 = vsel %vm2086_vm6, %v2111_v4, %v2120_v59  ;;  %v8648_v4 = vcombine.low %v3398_v16, %v12215_v31  ;;  %v11059_v17 = vld [vmem:[%s13852_s3 + $0x128] sm:$0xff]   ;;  %v11120_v22 = vld [vmem:[#allocation2 + $0x54] ss:$0 sps:$4 sm:$0x33]   ;;  %v2134_v16 = vrot.slane %v2132_v53, 2  ;;  %v3439_v11 = vrot.slane %v12256_v49, 2 }
 0x1ab   : > { %10139 = vmatprep.mubr.msk.bf16.mxu1 %vm11339_vm2, %v13863_v30  ;;  %10224 = vmatpush3.bf16.msra.mxu1 %v11069_v51  ;;  %v11076_v51 = vld [vmem:[%s13852_s3 + $0x150] sm:$0xff]   ;;  %v2130_v60 = vsel %vm2086_vm6, %v2120_v59, %v12238_v50  ;;  %v11063_v59 = vld [vmem:[%s13852_s3 + $0x120] sm:$0xff]   ;;  %v3441_v25 = vrot.slane %v11120_v22, 2 }
 0x1ac   : > { %10225 = vmatprep.subr.bf16.mxu1 %v13863_v30 }
 0x1af   : > { %10080 = vmatmul.mubr.bf16.vlgmr.msra.gmra.mxu0 %v1805_v33  ;;  %10226 = vmatpush3.bf16.msra.mxu1 %v11071_v32  ;;  %v12254_v32 = vld [vmem:[#allocation2 + $0x44] sm:$0xff]   ;;  %v3425_v33 = vrot.slane %v12231_v29, 2 }
 0x1b0   : > { %10168 = vmatpush3.bf16.msra.mxu0 %v11053_v26  ;;  %10083 = vmatprep.mubr.msk.bf16.mxu0 %vm11339_vm2, %v13863_v30  ;;  %v3424_v26 = vrot.slane %v8648_v4, 2 }
 0x1b1   : > { %10169 = vmatprep.subr.bf16.mxu0 %v13863_v30  ;;  %10227 = vmatprep.subr.bf16.mxu1 %v13863_v30  ;;  %v12280_v4 = vsel %vm3423_vm8, %v3425_v33, %v3427_v40 }
 0x1b2   : > { %10140 = vmatmul.mubr.bf16.gmra.mxu1 %v2121_v56  ;;  %v3431_v56 = vrot.slane %v12242_v9, 2 }
 0x1b3   : > { %10143 = vmatprep.mubr.msk.bf16.mxu1 %vm11339_vm2, %v13863_v30  ;;  %10228 = vmatpush3.bf16.msra.mxu1 %v11073_v21  ;;  %v11078_v21 = vld [vmem:[%s13852_s3 + $0x148] sm:$0xff]  }
 0x1b4   : > { %10170 = vmatpush3.bf16.msra.mxu0 %v11056_v42  ;;  %10229 = vmatprep.subr.bf16.mxu1 %v13863_v30  ;;  %v3429_v42 = vrot.slane %v12240_v6, 2 }
 0x1b5   : > { %10171 = vmatprep.subr.bf16.mxu0 %v13863_v30 }
 0x1b6   : > { %v12288_v53 = vsel %vm3423_vm8, %v3427_v40, %v3429_v42  ;;  %v11081_v40 = vld [vmem:[%s13852_s3 + $0x140] sm:$0xff]  }
 0x1b7   : > { %10084 = vmatmul.mubr.bf16.gmra.mxu0 %v1807_v38  ;;  %10230 = vmatpush3.bf16.msra.mxu1 %v11076_v51  ;;  %v12277_v51 = vsel %vm3423_vm8, %v3424_v26, %v3425_v33  ;;  %v3435_v38 = vrot.slane %v12250_v18, 2  ;;  %v3437_v26 = vrot.slane %v12254_v32, 2  ;;  %v12295_v33 = vsel %vm3423_vm8, %v3431_v56, %v3433_v10 }
 0x1b8   : > { %10087 = vmatprep.mubr.msk.bf16.mxu0 %vm11339_vm2, %v13863_v30  ;;  %10172 = vmatpush3.bf16.msra.mxu0 %v11059_v17  ;;  %v12291_v17 = vsel %vm3423_vm8, %v3429_v42, %v3431_v56  ;;  %v12317_v56 = vsel %vm3423_vm8, %v3439_v11, %v3441_v25 }
 0x1b9   : > { %10173 = vmatprep.subr.bf16.mxu0 %v13863_v30  ;;  %10231 = vmatprep.subr.bf16.mxu1 %v13863_v30  ;;  %v12298_v19 = vsel %vm3423_vm8, %v3433_v10, %v3435_v38  ;;  %v12307_v42 = vsel %vm3423_vm8, %v3435_v38, %v3437_v26  ;;  %v12314_v22 = vsel %vm3423_vm8, %v3437_v26, %v3439_v11  ;;  %v11074_v38 = vld [vmem:[%s13852_s3 + $0x110] sm:$0xff]  }
 0x1ba   : > { %10144 = vmatmul.mubr.bf16.gmra.mxu1 %v2130_v60  ;;  %v11068_v60 = vld [vmem:[%s13852_s3 + $0x118] sm:$0xff]   ;;  %v1809_v10 = vsel %vm1802_vm7, %v1806_v34, %v1808_v55  ;;  %v2146_v34 = vrot.slane %v2144_v8, 3  ;;  %v11082_v8 = vld [vmem:[%s13852_s3 + $0x100] sm:$0xff]  }
 0x1bb   : > { %10147 = vmatprep.mubr.msk.bf16.mxu1 %vm11339_vm2, %v13863_v30  ;;  %10232 = vmatpush3.bf16.msra.mxu1 %v11078_v21  ;;  %v2138_v21 = vor.u32 %v2137_v48, %v2134_v16  ;;  %v2143_v16 = vrot.slane %v2141_v44, 2  ;;  %v11065_v44 = vld [vmem:[#allocation2 + $0x28] sm:$0xff]  }
 0x1bc   : > { %10174 = vmatpush3.bf16.msra.mxu0 %v11063_v59  ;;  %10233 = vmatprep.subr.bf16.mxu1 %v13863_v30  ;;  %v11061_v59 = vld [vmem:[#allocation2 + $0x20] sm:$0xff]  }
 0x1bd   : > { %10175 = vmatprep.subr.bf16.mxu0 %v13863_v30  ;;  %v2139_v48 = vsel %vm2086_vm6, %v12238_v50, %v2138_v21  ;;  %v1810_v26 = vrot.slane %v11061_v59, 1  ;;  %v11079_v50 = vld [vmem:[%s13852_s3 + $0x108] sm:$0xff]   ;;  %v2147_v11 = vor.u32 %v2146_v34, %v2143_v16  ;;  %v2164_v59 = vrot.slane %v13868_v14, 3  ;;  %v11089_v14 = vld [vmem:[%s13852_s3 + $0x1f0] sm:$0xff]  }
 0x1bf   : > { %10088 = vmatmul.mubr.bf16.gmra.mxu0 %v1809_v10  ;;  %10234 = vmatpush3.bf16.msra.mxu1 %v11081_v40  ;;  %v1811_v27 = vsel %vm1802_vm7, %v1808_v55, %v1810_v26  ;;  %v2148_v25 = vsel %vm2086_vm6, %v2138_v21, %v2147_v11  ;;  %v2152_v40 = vrot.slane %v2150_v39, 2  ;;  %v1812_v55 = vrot.slane %v11065_v44, 1  ;;  %v11070_v21 = vld [vmem:[#allocation2 + $0x30] sm:$0xff]  }
 0x1c0   : > { %10091 = vmatprep.mubr.msk.bf16.mxu0 %vm11339_vm2, %v13863_v30  ;;  %10176 = vmatpush3.bf16.msra.mxu0 %v11068_v60  ;;  %v2161_v39 = vrot.slane %v2159_v7, 2 }
 0x1c1   : > { %10177 = vmatprep.subr.bf16.mxu0 %v13863_v30  ;;  %10323 = vmatprep.subr.bf16.mxu1 %v13863_v30  ;;  %v2156_v60 = vor.u32 %v2155_v57, %v2152_v40  ;;  %v1813_v10 = vsel %vm1802_vm7, %v1810_v26, %v1812_v55  ;;  %v11080_v57 = vld [vmem:[#allocation2 + $0x40] sm:$0xff]  }
 0x1c2   : > { %10148 = vmatmul.mubr.bf16.gmra.mxu1 %v2139_v48  ;;  %v1814_v48 = vrot.slane %v11070_v21, 1  ;;  %v2165_v16 = vor.u32 %v2164_v59, %v2161_v39  ;;  %v11083_v21 = vld [vmem:[#allocation2 + $0x48] ss:$0 sps:$4 sm:$0x11]  }
 0x1c3   : > { %10151 = vmatprep.mubr.msk.bf16.mxu1 %vm11339_vm2, %v13863_v30  ;;  %v2157_v13 = vsel %vm2086_vm6, %v2147_v11, %v2156_v60  ;;  %v1820_v39 = vrot.slane %v11083_v21, 1 }
 0x1c4   : > { %10178 = vmatpush3.bf16.msra.mxu0 %v11074_v38  ;;  %v11077_v38 = vld [vmem:[#allocation2 + $0x4c] ss:$0 sps:$4 sm:$0x33]   ;;  %v2166_v7 = vsel %vm2086_vm6, %v2156_v60, %v2165_v16 }
 0x1c5   : > { %10179 = vmatprep.subr.bf16.mxu0 %v13863_v30  ;;  %v2168_v34 = vshrl.u32 %v11077_v38, 16  ;;  %v2171_v26 = vshll.u32 %v11077_v38, 16  ;;  %v11091_v38 = vld [vmem:[%s13852_s3 + $0x1e8] sm:$0xff]  }
 0x1c7   : > { %10092 = vmatmul.mubr.bf16.gmra.mxu0 %v1811_v27  ;;  %v11075_v27 = vld [vmem:[#allocation2 + $0x38] sm:$0xff]   ;;  %v2170_v11 = vrot.slane %v2168_v34, 2  ;;  %v2173_v44 = vrot.slane %v2171_v26, 3  ;;  %v11086_v34 = vld [vmem:[%s13852_s3 + $0x1a8] sm:$0xff]   ;;  %v11087_v26 = vld [vmem:[%s13852_s3 + $0x1a0] sm:$0xff]  }
 0x1c8   : > { %10095 = vmatprep.mubr.msk.bf16.mxu0 %vm11339_vm2, %v13863_v30  ;;  %10180 = vmatpush3.bf16.msra.mxu0 %v11079_v50  ;;  %v1815_v50 = vsel %vm1802_vm7, %v1812_v55, %v1814_v48 }
 0x1c9   : > { %10181 = vmatprep.subr.bf16.mxu0 %v13863_v30 }
 0x1ca   : > { %10152 = vmatmul.mubr.bf16.gmra.mxu1 %v2148_v25  ;;  %v2174_v25 = vor.u32 %v2173_v44, %v2170_v11 }
 0x1cb   : > { %10155 = vmatprep.mubr.msk.bf16.mxu1 %vm11339_vm2, %v13863_v30 }
 0x1cc   : > { %10182 = vmatpush3.bf16.msra.mxu0 %v11082_v8  ;;  %v1816_v8 = vrot.slane %v11075_v27, 1  ;;  %v2175_v55 = vsel %vm2086_vm6, %v2165_v16, %v2174_v25  ;;  %v11085_v16 = vld [vmem:[%s13852_s3 + $0x1b0] sm:$0xff]   ;;  %v3141_v25 = vshll.u32 %v12231_v29, 16 }
 0x1cd   : > { %10271 = vmatprep.subr.bf16.mxu0 %v13863_v30 }
 0x1ce   : > { %v1817_v40 = vsel %vm1802_vm7, %v1814_v48, %v1816_v8  ;;  %v11084_v48 = vld [vmem:[%s13852_s3 + $0x1b8] sm:$0xff]   ;;  %v3143_v21 = vrot.slane %v3141_v25, 2  ;;  %v13869_v25 = vrot.slane %v12144_v61, 3 }
 0x1cf   : > { %10096 = vmatmul.mubr.bf16.gmra.mxu0 %v1813_v10  ;;  %v1818_v10 = vrot.slane %v11080_v57, 1 }
 0x1d0   : > { %10099 = vmatprep.mubr.msk.bf16.mxu0 %vm11339_vm2, %v13863_v30 }
 0x1d1   : > { %v1819_v60 = vsel %vm1802_vm7, %v1816_v8, %v1818_v10  ;;  %v1821_v59 = vsel %vm1802_vm7, %v1818_v10, %v1820_v39  ;;  %v3138_v8 = vshrl.u32 %v12231_v29, 16 }
 0x1d2   : > { %10156 = vmatmul.mubr.bf16.gmra.mxu1 %v2157_v13  ;;  %v11088_v13 = vld [vmem:[%s13852_s3 + $0x1f8] sm:$0xff]  }
 0x1d3   : > { %10159 = vmatprep.mubr.msk.bf16.mxu1 %vm11339_vm2, %v13863_v30 }
 0x1d7   : > { %10100 = vmatmul.mubr.bf16.gmra.mxu0 %v1815_v50  ;;  %v11090_v50 = vld [vmem:[%s13852_s3 + $0x198] sm:$0xff]  }
 0x1d8   : > { %10103 = vmatprep.mubr.msk.bf16.mxu0 %vm11339_vm2, %v13863_v30 }
 0x1da   : > { %10160 = vmatmul.mubr.bf16.gmra.mxu1 %v2166_v7 }
 0x1db   : > { %10163 = vmatprep.mubr.msk.bf16.mxu1 %vm11339_vm2, %v13863_v30 }
 0x1df   : > { %10104 = vmatmul.mubr.bf16.gmra.mxu0 %v1817_v40 }
 0x1e0   : > { %10107 = vmatprep.mubr.msk.bf16.mxu0 %vm11339_vm2, %v13863_v30 }
 0x1e2   : > { %10164 = vmatmul.mubr.bf16.gmra.mxu1 %v2175_v55 }
 0x1e3   : > { %10235 = vmatprep.mubr.msk.bf16.mxu1 %vm11339_vm2, %v13863_v30 }
 0x1e7   : > { %10108 = vmatmul.mubr.bf16.gmra.mxu0 %v1819_v60  ;;  %v3140_v60 = vrot.slane %v3138_v8, 1 }
 0x1e8   : > { %10111 = vmatprep.mubr.msk.bf16.mxu0 %vm11339_vm2, %v13863_v30 }
 0x1ea   : > { %10236 = vmatmul.mubr.bf16.vlgmr.msra.gmra.mxu1 %v11970_v20  ;;  %v11092_v20 = vld [vmem:[%s13852_s3 + $0x1e0] sm:$0xff]  }
 0x1eb   : > { %10239 = vmatprep.mubr.msk.bf16.mxu1 %vm11339_vm2, %v13863_v30  ;;  %10324 = vmatpush3.bf16.msra.mxu1 %v11088_v13 }
 0x1ec   : > { %10325 = vmatprep.subr.bf16.mxu1 %v13863_v30 }
 0x1ef   : > { %10112 = vmatmul.mubr.bf16.gmra.mxu0 %v1821_v59  ;;  %10326 = vmatpush3.bf16.msra.mxu1 %v11089_v14 }
 0x1f0   : > { %10183 = vmatprep.mubr.msk.bf16.mxu0 %vm11339_vm2, %v13863_v30  ;;  %10327 = vmatprep.subr.bf16.mxu1 %v13863_v30 }
 0x1f2   : > { %10240 = vmatmul.mubr.bf16.gmra.mxu1 %v12010_v47  ;;  %v11093_v47 = vld [vmem:[%s13852_s3 + $0x1d8] sm:$0xff]  }
 0x1f3   : > { %10243 = vmatprep.mubr.msk.bf16.mxu1 %vm11339_vm2, %v13863_v30  ;;  %10328 = vmatpush3.bf16.msra.mxu1 %v11091_v38 }
 0x1f4   : > { %10329 = vmatprep.subr.bf16.mxu1 %v13863_v30 }
 0x1f7   : > { %10184 = vmatmul.mubr.bf16.vlgmr.msra.gmra.mxu0 %v11951_v62  ;;  %10330 = vmatpush3.bf16.msra.mxu1 %v11092_v20  ;;  %v11095_v62 = vld [vmem:[%s13852_s3 + $0x1d0] sm:$0xff]  }
 0x1f8   : > { %10272 = vmatpush3.bf16.msra.mxu0 %v11084_v48  ;;  %10187 = vmatprep.mubr.msk.bf16.mxu0 %vm11339_vm2, %v13863_v30  ;;  %v3144_v48 = vor.u32 %v3143_v21, %v3140_v60 }
 0x1f9   : > { %10273 = vmatprep.subr.bf16.mxu0 %v13863_v30  ;;  %10331 = vmatprep.subr.bf16.mxu1 %v13863_v30 }
 0x1fa   : > { %10244 = vmatmul.mubr.bf16.gmra.mxu1 %v12044_v24  ;;  %v11097_v24 = vld [vmem:[%s13852_s3 + $0x1c8] sm:$0xff]  }
 0x1fb   : > { %10247 = vmatprep.mubr.msk.bf16.mxu1 %vm11339_vm2, %v13863_v30  ;;  %10332 = vmatpush3.bf16.msra.mxu1 %v11093_v47  ;;  %v3147_v47 = vshrl.u32 %v12233_v28, 16 }
 0x1fc   : > { %10274 = vmatpush3.bf16.msra.mxu0 %v11085_v16  ;;  %10333 = vmatprep.subr.bf16.mxu1 %v13863_v30  ;;  %v3150_v16 = vshll.u32 %v12233_v28, 16 }
 0x1fd   : > { %10275 = vmatprep.subr.bf16.mxu0 %v13863_v30 }
 0x1ff   : > { %10188 = vmatmul.mubr.bf16.gmra.mxu0 %v11996_v12  ;;  %10334 = vmatpush3.bf16.msra.mxu1 %v11095_v62  ;;  %v11099_v12 = vld [vmem:[%s13852_s3 + $0x1c0] sm:$0xff]  }
 0x200   : > { %10191 = vmatprep.mubr.msk.bf16.mxu0 %vm11339_vm2, %v13863_v30  ;;  %10276 = vmatpush3.bf16.msra.mxu0 %v11086_v34 }
 0x201   : > { %10277 = vmatprep.subr.bf16.mxu0 %v13863_v30  ;;  %10335 = vmatprep.subr.bf16.mxu1 %v13863_v30 }
 0x202   : > { %10248 = vmatmul.mubr.bf16.gmra.mxu1 %v12071_v52  ;;  %v11094_v52 = vld [vmem:[%s13852_s3 + $0x190] sm:$0xff]  }
 0x203   : > { %10251 = vmatprep.mubr.msk.bf16.mxu1 %vm11339_vm2, %v13863_v30  ;;  %10336 = vmatpush3.bf16.msra.mxu1 %v11097_v24 }
 0x204   : > { %10278 = vmatpush3.bf16.msra.mxu0 %v11087_v26  ;;  %10337 = vmatprep.subr.bf16.mxu1 %v13863_v30 }
 0x205   : > { %10279 = vmatprep.subr.bf16.mxu0 %v13863_v30 }
 0x207   : > { %10192 = vmatmul.mubr.bf16.gmra.mxu0 %v12032_v43  ;;  %10338 = vmatpush3.bf16.msra.mxu1 %v11099_v12  ;;  %v11098_v43 = vld [vmem:[%s13852_s3 + $0x188] sm:$0xff]  }
 0x208   : > { %10195 = vmatprep.mubr.msk.bf16.mxu0 %vm11339_vm2, %v13863_v30  ;;  %10280 = vmatpush3.bf16.msra.mxu0 %v11090_v50 }
 0x209   : > { %10281 = vmatprep.subr.bf16.mxu0 %v13863_v30 }
 0x20a   : > { %10252 = vmatmul.mubr.bf16.gmra.mxu1 %v12098_v58  ;;  %v11102_v58 = vld [vmem:[%s13852_s3 + $0x180] sm:$0xff]  }
 0x20b   : > { %10255 = vmatprep.mubr.msk.bf16.mxu1 %vm11339_vm2, %v13863_v30 }
 0x20c   : > { %10282 = vmatpush3.bf16.msra.mxu0 %v11094_v52  ;;  %v3149_v52 = vrot.slane %v3147_v47, 1  ;;  %v3165_v47 = vshrl.u32 %v12242_v9, 16 }
 0x20d   : > { %10283 = vmatprep.subr.bf16.mxu0 %v13863_v30 }
 0x20f   : > { %10196 = vmatmul.mubr.bf16.gmra.mxu0 %v12060_v5 }
 0x210   : > { %10199 = vmatprep.mubr.msk.bf16.mxu0 %vm11339_vm2, %v13863_v30  ;;  %10284 = vmatpush3.bf16.msra.mxu0 %v11098_v43  ;;  %v3152_v43 = vrot.slane %v3150_v16, 2  ;;  %v3168_v16 = vshll.u32 %v12242_v9, 16 }
 0x211   : > { %10285 = vmatprep.subr.bf16.mxu0 %v13863_v30 }
 0x212   : > { %10256 = vmatmul.mubr.bf16.gmra.mxu1 %v12128_v41 }
 0x213   : > { %10259 = vmatprep.mubr.msk.bf16.mxu1 %vm11339_vm2, %v13863_v30 }
 0x214   : > { %10286 = vmatpush3.bf16.msra.mxu0 %v11102_v58 }
 0x215   : > { %10375 = vmatprep.subr.bf16.mxu0 %v13863_v30 }
 0x217   : > { %10200 = vmatmul.mubr.bf16.gmra.mxu0 %v12087_v54  ;;  %v2828_v54 = vld [vmem:[#allocation2 + $0xc] sm:$0xe] }
 0x218   : > { %10203 = vmatprep.mubr.msk.bf16.mxu0 %vm11339_vm2, %v13863_v30 }
 0x21a   : > { %v1647_v5 = vpop.f32.mrf.mxu1  ;;  %10260 = vmatmul.mubr.bf16.gmra.mxu1 %v12154_v23  ;;  %v12493_v23 = vcombine.low %v2828_v54, %v12215_v31  ;;  %v3156_v54 = vshrl.u32 %v12240_v6, 16 }
 0x21b   : > { %10263 = vmatprep.mubr.msk.bf16.mxu1 %vm11339_vm2, %v13863_v30 }
 0x21c   : > { %v10029_v27 = vpop.f32.mrf.mxu1  ;;  %v3130_v57 = vshrl.u32 %v12493_v23, 16 }
 0x21e   : > { %v1650_v7 = vpop.f32.mrf.mxu1 }
 0x21f   : > { %10204 = vmatmul.mubr.bf16.gmra.mxu0 %v12115_v36 }
 0x220   : > { %v10030_v41 = vpop.f32.mrf.mxu1  ;;  %10207 = vmatprep.mubr.msk.bf16.mxu0 %vm11339_vm2, %v13863_v30 }
 0x222   : > { %v1655_v11 = vpop.f32.mrf.mxu1  ;;  %10264 = vmatmul.mubr.bf16.gmra.mxu1 %v12190_v37  ;;  %v3133_v37 = vshll.u32 %v12493_v23, 16 }
 0x223   : > { %10267 = vmatprep.mubr.msk.bf16.mxu1 %vm11339_vm2, %v13863_v30 }
 0x224   : > { %v10033_v44 = vpop.f32.mrf.mxu1  ;;  %v3135_v14 = vrot.slane %v3133_v37, 2 }
 0x225   : > { %v3159_v44 = vshll.u32 %v12240_v6, 16 }
 0x226   : > { %v1658_v36 = vpop.f32.mrf.mxu1 }
 0x227   : > { %v1485_v40 = vpop.f32.mrf.mxu0  ;;  %10208 = vmatmul.mubr.bf16.gmra.mxu0 %v12140_v15  ;;  %v3132_v15 = vrot.slane %v3130_v57, 1  ;;  %v3161_v60 = vrot.slane %v3159_v44, 2 }
 0x228   : > { %v12500_v55 = vadd.f32 %v1647_v5, %v1485_v40  ;;  %v10034_v10 = vpop.f32.mrf.mxu1  ;;  %10211 = vmatprep.mubr.msk.bf16.mxu0 %vm11339_vm2, %v13863_v30  ;;  %v2399_v5 = vrot.slane %v12167_v63, 3 }
 0x229   : > { %v9977_v31 = vpop.f32.mrf.mxu0 }
 0x22a   : > { %v1663_v13 = vpop.f32.mrf.mxu1  ;;  %10268 = vmatmul.mubr.bf16.gmra.mxu1 %v12203_v35  ;;  %v3136_v35 = vor.u32 %v3135_v14, %v3132_v15  ;;  %v2400_v40 = vsel %vm165_vm1, %v13869_v25, %v2399_v5  ;;  %v3158_v31 = vrot.slane %v3156_v54, 1  ;;  %v2912_v14 = vrot.slane %v12493_v23, 1  ;;  %v11106_v23 = vld [vmem:[%s13852_s3 + $0x230] sm:$0xff]  }
 0x22b   : > { %v1488_v39 = vpop.f32.mrf.mxu0  ;;  %10339 = vmatprep.mubr.msk.bf16.mxu1 %vm11339_vm2, %v13863_v30  ;;  %v3174_v25 = vshrl.u32 %v12244_v45, 16 }
 0x22c   : > { %v12507_v59 = vadd.f32 %v1650_v7, %v1488_v39  ;;  %v10037_v38 = vpop.f32.mrf.mxu1  ;;  %v3145_v50 = vsel %vm3128_vm9, %v3136_v35, %v3144_v48  ;;  %v2913_v39 = vrot.slane %v12231_v29, 1 }
 0x22d   : > { %v9978_v20 = vpop.f32.mrf.mxu0  ;;  %v11104_v38 = vld [vmem:[%s13852_s3 + $0x238] sm:$0xff]  }
 0x22e   : > { %v1666_v62 = vpop.f32.mrf.mxu1 }
 0x22f   : > { %v1493_v34 = vpop.f32.mrf.mxu0  ;;  %10212 = vmatmul.mubr.bf16.gmra.mxu0 %v12172_v46 }
 0x230   : > { %v12512_v24 = vadd.f32 %v1655_v11, %v1493_v34  ;;  %v10038_v26 = vpop.f32.mrf.mxu1  ;;  %10215 = vmatprep.mubr.msk.bf16.mxu0 %vm11339_vm2, %v13863_v30  ;;  %v3153_v11 = vor.u32 %v3152_v43, %v3149_v52  ;;  %v2914_v34 = vsel %vm1802_vm7, %v2912_v14, %v2913_v39  ;;  %v3167_v52 = vrot.slane %v3165_v47, 1 }
 0x231   : > { %v9981_v12 = vpop.f32.mrf.mxu0  ;;  %v3170_v43 = vrot.slane %v3168_v16, 2 }
 0x232   : > { %v1671_v58 = vpop.f32.mrf.mxu1  ;;  %10340 = vmatmul.mubr.bf16.vlgmr.msra.gmra.mxu1 %v3145_v50  ;;  %v3154_v10 = vsel %vm3128_vm9, %v3144_v48, %v3153_v11  ;;  %v3162_v48 = vor.u32 %v3161_v60, %v3158_v31 }
 0x233   : > { %v1496_v27 = vpop.f32.mrf.mxu0  ;;  %10343 = vmatprep.mubr.msk.bf16.mxu1 %vm11339_vm2, %v13863_v30  ;;  %v3171_v44 = vor.u32 %v3170_v43, %v3167_v52 }
 0x234   : > { %v12520_v46 = vadd.f32 %v1658_v36, %v1496_v27  ;;  %v10041_v7 = vpop.f32.mrf.mxu1  ;;  %v3163_v50 = vsel %vm3128_vm9, %v3153_v11, %v3162_v48  ;;  %v11108_v11 = vld [vmem:[%s13852_s3 + $0x228] sm:$0xff]  }
 0x235   : > { %v9982_v41 = vpop.f32.mrf.mxu0  ;;  %v3172_v60 = vsel %vm3128_vm9, %v3162_v48, %v3171_v44  ;;  %v11113_v48 = vld [vmem:[%s13852_s3 + $0x218] sm:$0xff]  }
 0x236   : > { %v1674_v8 = vpop.f32.mrf.mxu1 }
 0x237   : > { %v1501_v57 = vpop.f32.mrf.mxu0  ;;  %10216 = vmatmul.mubr.bf16.gmra.mxu0 %v2400_v40 }
 0x238   : > { %v12527_v63 = vadd.f32 %v1663_v13, %v1501_v57  ;;  %v10042_v37 = vpop.f32.mrf.mxu1  ;;  %10287 = vmatprep.mubr.msk.bf16.mxu0 %vm11339_vm2, %v13863_v30 }
 0x239   : > { %v9985_v36 = vpop.f32.mrf.mxu0 }
 0x23a   : > { %v1679_v21 = vpop.f32.mrf.mxu1  ;;  %10344 = vmatmul.mubr.bf16.gmra.mxu1 %v3154_v10  ;;  %v11111_v10 = vld [vmem:[%s13852_s3 + $0x220] sm:$0xff]  }
 0x23b   : > { %v1504_v61 = vpop.f32.mrf.mxu0  ;;  %10347 = vmatprep.mubr.msk.bf16.mxu1 %vm11339_vm2, %v13863_v30 }
 0x23c   : > { %v12535_v15 = vadd.f32 %v1666_v62, %v1504_v61  ;;  %v10045_v13 = vpop.f32.mrf.mxu1  ;;  %v3176_v61 = vrot.slane %v3174_v25, 1 }
 0x23d   : > { %v9986_v20 = vpop.f32.mrf.mxu0 }
 0x23e   : > { %v1682_v29 = vpop.f32.mrf.mxu1 }
 0x23f   : > { %v1509_v35 = vpop.f32.mrf.mxu0  ;;  %10288 = vmatmul.mubr.bf16.vlgmr.msra.gmra.mxu0 %v2914_v34  ;;  %v3183_v34 = vshrl.u32 %v12250_v18, 16 }
 0x240   : > { %v12544_v62 = vadd.f32 %v1671_v58, %v1509_v35  ;;  %10376 = vmatpush3.bf16.msra.mxu0 %v11104_v38  ;;  %v10046_v26 = vpop.f32.mrf.mxu1  ;;  %10291 = vmatprep.mubr.msk.bf16.mxu0 %vm11339_vm2, %v13863_v30  ;;  %v2915_v58 = vrot.slane %v12233_v28, 1  ;;  %v3177_v28 = vshll.u32 %v12244_v45, 16  ;;  %v3186_v35 = vshll.u32 %v12250_v18, 16 }
 0x241   : > { %v9989_v12 = vpop.f32.mrf.mxu0  ;;  %10377 = vmatprep.subr.bf16.mxu0 %v13863_v30 }
 0x242   : > { %v1687_v5 = vpop.f32.mrf.mxu1  ;;  %10348 = vmatmul.mubr.bf16.gmra.mxu1 %v3163_v50  ;;  %v2916_v57 = vsel %vm1802_vm7, %v2913_v39, %v2915_v58  ;;  %v3179_v13 = vrot.slane %v3177_v28, 2  ;;  %v11115_v50 = vld [vmem:[%s13852_s3 + $0x210] sm:$0xff]  }
 0x243   : > { %v1512_v27 = vpop.f32.mrf.mxu0  ;;  %10351 = vmatprep.mubr.msk.bf16.mxu1 %vm11339_vm2, %v13863_v30 }
 0x244   : > { %v12556_v7 = vadd.f32 %v1674_v8, %v1512_v27  ;;  %v10049_v41 = vpop.f32.mrf.mxu1  ;;  %10378 = vmatpush3.bf16.msra.mxu0 %v11106_v23  ;;  %v3180_v16 = vor.u32 %v3179_v13, %v3176_v61  ;;  %v3185_v27 = vrot.slane %v3183_v34, 1  ;;  %v11118_v61 = vld [vmem:[%s13852_s3 + $0x200] sm:$0xff]  }
 0x245   : > { %v9990_v54 = vpop.f32.mrf.mxu0  ;;  %10379 = vmatprep.subr.bf16.mxu0 %v13863_v30  ;;  %v3188_v41 = vrot.slane %v3186_v35, 2 }
 0x246   : > { %v1690_v40 = vpop.f32.mrf.mxu1  ;;  %v3181_v43 = vsel %vm3128_vm9, %v3171_v44, %v3180_v16  ;;  %v11117_v44 = vld [vmem:[%s13852_s3 + $0x208] sm:$0xff]  }
 0x247   : > { %v1517_v37 = vpop.f32.mrf.mxu0  ;;  %10292 = vmatmul.mubr.bf16.gmra.mxu0 %v2916_v57  ;;  %v3189_v57 = vor.u32 %v3188_v41, %v3185_v27 }
 0x248   : > { %v12565_v8 = vadd.f32 %v1679_v21, %v1517_v37  ;;  %v10050_v36 = vpop.f32.mrf.mxu1  ;;  %10295 = vmatprep.mubr.msk.bf16.mxu0 %vm11339_vm2, %v13863_v30  ;;  %10380 = vmatpush3.bf16.msra.mxu0 %v11108_v11  ;;  %v2917_v21 = vrot.slane %v12240_v6, 1  ;;  %v3192_v37 = vshrl.u32 %v12254_v32, 16 }
 0x249   : > { %v9993_v31 = vpop.f32.mrf.mxu0  ;;  %10381 = vmatprep.subr.bf16.mxu0 %v13863_v30  ;;  %v3195_v36 = vshll.u32 %v12254_v32, 16 }
 0x24a   : > { %v1695_v39 = vpop.f32.mrf.mxu1  ;;  %10352 = vmatmul.mubr.bf16.gmra.mxu1 %v3172_v60  ;;  %v2918_v26 = vsel %vm1802_vm7, %v2915_v58, %v2917_v21 }
 0x24b   : > { %v1520_v14 = vpop.f32.mrf.mxu0  ;;  %10355 = vmatprep.mubr.msk.bf16.mxu1 %vm11339_vm2, %v13863_v30 }
 0x24c   : > { %v12577_v38 = vadd.f32 %v1682_v29, %v1520_v14  ;;  %v10053_v20 = vpop.f32.mrf.mxu1  ;;  %10382 = vmatpush3.bf16.msra.mxu0 %v11111_v10  ;;  %v3190_v14 = vsel %vm3128_vm9, %v3180_v16, %v3189_v57  ;;  %v3201_v16 = vshrl.u32 %v12256_v49, 16 }
 0x24d   : > { %v9994_v47 = vpop.f32.mrf.mxu0  ;;  %10383 = vmatprep.subr.bf16.mxu0 %v13863_v30  ;;  %v3194_v20 = vrot.slane %v3192_v37, 1  ;;  %v2923_v37 = vrot.slane %v12250_v18, 1 }
 0x24e   : > { %v1698_v6 = vpop.f32.mrf.mxu1 }
 0x24f   : > { %v1525_v23 = vpop.f32.mrf.mxu0  ;;  %10296 = vmatmul.mubr.bf16.gmra.mxu0 %v2918_v26 }
 0x250   : > { %v12586_v29 = vadd.f32 %v1687_v5, %v1525_v23  ;;  %v10054_v12 = vpop.f32.mrf.mxu1  ;;  %10299 = vmatprep.mubr.msk.bf16.mxu0 %vm11339_vm2, %v13863_v30  ;;  %10384 = vmatpush3.bf16.msra.mxu0 %v11113_v48  ;;  %v2919_v5 = vrot.slane %v12242_v9, 1  ;;  %v3197_v48 = vrot.slane %v3195_v36, 2 }
 0x251   : > { %v9997_v52 = vpop.f32.mrf.mxu0  ;;  %10385 = vmatprep.subr.bf16.mxu0 %v13863_v30  ;;  %v3204_v12 = vshll.u32 %v12256_v49, 16 }
 0x252   : > { %v1703_v58 = vpop.f32.mrf.mxu1  ;;  %10356 = vmatmul.mubr.bf16.gmra.mxu1 %v3181_v43  ;;  %v2920_v10 = vsel %vm1802_vm7, %v2917_v21, %v2919_v5  ;;  %v3198_v23 = vor.u32 %v3197_v48, %v3194_v20 }
 0x253   : > { %v1528_v11 = vpop.f32.mrf.mxu0  ;;  %10359 = vmatprep.mubr.msk.bf16.mxu1 %vm11339_vm2, %v13863_v30 }
 0x254   : > { %v12598_v54 = vadd.f32 %v1690_v40, %v1528_v11  ;;  %v10057_v25 = vpop.f32.mrf.mxu1  ;;  %10386 = vmatpush3.bf16.msra.mxu0 %v11115_v50  ;;  %v3199_v41 = vsel %vm3128_vm9, %v3189_v57, %v3198_v23  ;;  %v3203_v11 = vrot.slane %v3201_v16, 1  ;;  %v2925_v16 = vrot.slane %v12254_v32, 1 }
 0x255   : > { %v9998_v28 = vpop.f32.mrf.mxu0  ;;  %10387 = vmatprep.subr.bf16.mxu0 %v13863_v30  ;;  %v3206_v25 = vrot.slane %v3204_v12, 2 }
 0x256   : > { %v1706_v9 = vpop.f32.mrf.mxu1 }
 0x257   : > { %v1533_v31 = vpop.f32.mrf.mxu0  ;;  %10300 = vmatmul.mubr.bf16.gmra.mxu0 %v2920_v10 }
 0x258   : > { %v12607_v40 = vadd.f32 %v1695_v39, %v1533_v31  ;;  %v10058_v60 = vpop.f32.mrf.mxu1  ;;  %10303 = vmatprep.mubr.msk.bf16.mxu0 %vm11339_vm2, %v13863_v30  ;;  %10388 = vmatpush3.bf16.msra.mxu0 %v11117_v44  ;;  %v2921_v39 = vrot.slane %v12244_v45, 1  ;;  %v12629_v44 = vld [vmem:[#allocation2 + $0x54] ss:$0 sps:$4 sm:$0x11]   ;;  %v3207_v31 = vor.u32 %v3206_v25, %v3203_v11 }
 0x259   : > { %v10001_v13 = vpop.f32.mrf.mxu0  ;;  %10389 = vmatprep.subr.bf16.mxu0 %v13863_v30  ;;  %v3210_v60 = vshrl.u32 %v12629_v44, 16  ;;  %v3213_v57 = vshll.u32 %v12629_v44, 16 }
 0x25a   : > { %v1711_v21 = vpop.f32.mrf.mxu1  ;;  %10360 = vmatmul.mubr.bf16.gmra.mxu1 %v3190_v14  ;;  %v2922_v52 = vsel %vm1802_vm7, %v2919_v5, %v2921_v39  ;;  %v2924_v13 = vsel %vm1802_vm7, %v2921_v39, %v2923_v37  ;;  %v3208_v48 = vsel %vm3128_vm9, %v3198_v23, %v3207_v31 }
 0x25b   : > { %v1536_v47 = vpop.f32.mrf.mxu0  ;;  %10363 = vmatprep.mubr.msk.bf16.mxu1 %vm11339_vm2, %v13863_v30 }
 0x25c   : > { %v12619_v34 = vadd.f32 %v1698_v6, %v1536_v47  ;;  %v10061_v35 = vpop.f32.mrf.mxu1  ;;  %10390 = vmatpush3.bf16.msra.mxu0 %v11118_v61  ;;  %v3212_v47 = vrot.slane %v3210_v60, 1 }
 0x25d   : > { %v10002_v26 = vpop.f32.mrf.mxu0  ;;  %v3215_v35 = vrot.slane %v3213_v57, 2 }
 0x25e   : > { %v1714_v50 = vpop.f32.mrf.mxu1 }
 0x25f   : > { %v1541_v43 = vpop.f32.mrf.mxu0  ;;  %10304 = vmatmul.mubr.bf16.gmra.mxu0 %v2922_v52 }
 0x260   : > { %v12624_v45 = vadd.f32 %v1703_v58, %v1541_v43  ;;  %v10062_v27 = vpop.f32.mrf.mxu1  ;;  %10307 = vmatprep.mubr.msk.bf16.mxu0 %vm11339_vm2, %v13863_v30  ;;  %v3216_v43 = vor.u32 %v3215_v35, %v3212_v47 }
 0x261   : > { %v10005_v6 = vpop.f32.mrf.mxu0 }
 0x262   : > { %v2267_v28 = vpop.f32.mrf.mxu1  ;;  %10364 = vmatmul.mubr.bf16.gmra.mxu1 %v3199_v41  ;;  %v2926_v6 = vsel %vm1802_vm7, %v2923_v37, %v2925_v16  ;;  %v3217_v25 = vsel %vm3128_vm9, %v3207_v31, %v3216_v43 }
 0x263   : > { %v1544_v5 = vpop.f32.mrf.mxu0  ;;  %10367 = vmatprep.mubr.msk.bf16.mxu1 %vm11339_vm2, %v13863_v30 }
 0x264   : > { %v12634_v58 = vadd.f32 %v1706_v9, %v1544_v5  ;;  %v10133_v36 = vpop.f32.mrf.mxu1 }
 0x265   : > { %v10006_v10 = vpop.f32.mrf.mxu0 }
 0x266   : > { %v2270_v61 = vpop.f32.mrf.mxu1 }
 0x267   : > { %v1549_v14 = vpop.f32.mrf.mxu0  ;;  %10308 = vmatmul.mubr.bf16.gmra.mxu0 %v2924_v13 }
 0x268   : > { %v12639_v20 = vadd.f32 %v1711_v21, %v1549_v14  ;;  %v10134_v18 = vpop.f32.mrf.mxu1  ;;  %10311 = vmatprep.mubr.msk.bf16.mxu0 %vm11339_vm2, %v13863_v30 }
 0x269   : > { %v10009_v9 = vpop.f32.mrf.mxu0 }
 0x26a   : > { %v2275_v26 = vpop.f32.mrf.mxu1  ;;  %10368 = vmatmul.mubr.bf16.gmra.mxu1 %v3208_v48  ;;  %v2929_v48 = vrot.slane %v12629_v44, 1 }
 0x26b   : > { %v1552_v12 = vpop.f32.mrf.mxu0  ;;  %10371 = vmatprep.mubr.msk.bf16.mxu1 %vm11339_vm2, %v13863_v30 }
 0x26c   : > { %v12647_v39 = vadd.f32 %v1714_v50, %v1552_v12  ;;  %v10137_v21 = vpop.f32.mrf.mxu1  ;;  %v2927_v50 = vrot.slane %v12256_v49, 1 }
 0x26d   : > { %v10010_v52 = vpop.f32.mrf.mxu0 }
 0x26e   : > { %v2278_v27 = vpop.f32.mrf.mxu1  ;;  %v2930_v21 = vsel %vm1802_vm7, %v2927_v50, %v2929_v48 }
 0x26f   : > { %v1913_v41 = vpop.f32.mrf.mxu0  ;;  %10312 = vmatmul.mubr.bf16.gmra.mxu0 %v2926_v6 }
 0x270   : > { %v1984_v23 = vadd.f32 %v1913_v41, %v12500_v55  ;;  %v10138_v11 = vpop.f32.mrf.mxu1  ;;  %10315 = vmatprep.mubr.msk.bf16.mxu0 %vm11339_vm2, %v13863_v30  ;;  %v2928_v55 = vsel %vm1802_vm7, %v2925_v16, %v2927_v50 }
 0x271   : > { %v10081_v32 = vpop.f32.mrf.mxu0 }
 0x272   : > { %v2283_v5 = vpop.f32.mrf.mxu1  ;;  %10372 = vmatmul.mubr.bf16.gmra.mxu1 %v3217_v25  ;;  %v12655_v36 = vadd.f32 %v2267_v28, %v1984_v23 }
 0x273   : > { %v1916_v10 = vpop.f32.mrf.mxu0 }
 0x274   : > { %v1985_v37 = vadd.f32 %v1916_v10, %v12507_v59  ;;  %v10141_v60 = vpop.f32.mrf.mxu1 }
 0x275   : > { %v10082_v57 = vpop.f32.mrf.mxu0 }
 0x276   : > { %v2286_v13 = vpop.f32.mrf.mxu1  ;;  %v12659_v14 = vadd.f32 %v2270_v61, %v1985_v37 }
 0x277   : > { %v1921_v18 = vpop.f32.mrf.mxu0  ;;  %10316 = vmatmul.mubr.bf16.gmra.mxu0 %v2928_v55 }
 0x278   : > { %v1986_v31 = vadd.f32 %v1921_v18, %v12512_v24  ;;  %v10142_v9 = vpop.f32.mrf.mxu1  ;;  %10319 = vmatprep.mubr.msk.bf16.mxu0 %vm11339_vm2, %v13863_v30 }
 0x279   : > { %v10085_v49 = vpop.f32.mrf.mxu0 }
 0x27a   : > { %v2291_v28 = vpop.f32.mrf.mxu1  ;;  %v12665_v59 = vadd.f32 %v2275_v26, %v1986_v31 }
 0x27b   : > { %v1924_v47 = vpop.f32.mrf.mxu0 }
 0x27c   : > { %v1987_v35 = vadd.f32 %v1924_v47, %v12520_v46  ;;  %v10145_v16 = vpop.f32.mrf.mxu1 }
 0x27d   : > { %v10086_v61 = vpop.f32.mrf.mxu0 }
 0x27e   : > { %v2294_v12 = vpop.f32.mrf.mxu1  ;;  %v12669_v52 = vadd.f32 %v2278_v27, %v1987_v35 }
 0x27f   : > { %v1929_v24 = vpop.f32.mrf.mxu0  ;;  %10320 = vmatmul.mubr.bf16.gmra.mxu0 %v2930_v21 }
 0x280   : > { %v1988_v43 = vadd.f32 %v1929_v24, %v12527_v63  ;;  %v10146_v6 = vpop.f32.mrf.mxu1  ;;  %10391 = vmatprep.mubr.msk.bf16.mxu0 %vm11339_vm2, %v13863_v30 }
 0x281   : > { %v10089_v44 = vpop.f32.mrf.mxu0 }
 0x282   : > { %v2299_v26 = vpop.f32.mrf.mxu1  ;;  %v12674_v41 = vadd.f32 %v2283_v5, %v1988_v43 }
 0x283   : > { %v1932_v46 = vpop.f32.mrf.mxu0 }
 0x284   : > { %v1989_v23 = vadd.f32 %v1932_v46, %v12535_v15  ;;  %v10149_v11 = vpop.f32.mrf.mxu1 }
 0x285   : > { %v10090_v32 = vpop.f32.mrf.mxu0 }
 0x286   : > { %v2302_v25 = vpop.f32.mrf.mxu1  ;;  %v12677_v27 = vadd.f32 %v2286_v13, %v1989_v23 }
 0x287   : > { %v1937_v50 = vpop.f32.mrf.mxu0  ;;  %10392 = vmatmul.mubr.bf16.vlgmr.msra.gmra.mxu0 %v12277_v51 }
 0x288   : > { %v1990_v63 = vadd.f32 %v1937_v50, %v12544_v62  ;;  %v10150_v10 = vpop.f32.mrf.mxu1  ;;  %10395 = vmatprep.mubr.msk.bf16.mxu0 %vm11339_vm2, %v13863_v30 }
 0x289   : > { %v10093_v37 = vpop.f32.mrf.mxu0 }
 0x28a   : > { %v2307_v5 = vpop.f32.mrf.mxu1  ;;  %v12683_v60 = vadd.f32 %v2291_v28, %v1990_v63 }
 0x28b   : > { %v1940_v57 = vpop.f32.mrf.mxu0 }
 0x28c   : > { %v1991_v15 = vadd.f32 %v1940_v57, %v12556_v7  ;;  %v10153_v55 = vpop.f32.mrf.mxu1 }
 0x28d   : > { %v10094_v18 = vpop.f32.mrf.mxu0 }
 0x28e   : > { %v2310_v13 = vpop.f32.mrf.mxu1  ;;  %v12686_v31 = vadd.f32 %v2294_v12, %v1991_v15 }
 0x28f   : > { %v1945_v9 = vpop.f32.mrf.mxu0  ;;  %10396 = vmatmul.mubr.bf16.gmra.mxu0 %v12280_v4 }
 0x290   : > { %v1992_v51 = vadd.f32 %v1945_v9, %v12565_v8  ;;  %v10154_v62 = vpop.f32.mrf.mxu1  ;;  %10399 = vmatprep.mubr.msk.bf16.mxu0 %vm11339_vm2, %v13863_v30 }
 0x291   : > { %v10097_v49 = vpop.f32.mrf.mxu0 }
 0x292   : > { %v2315_v28 = vpop.f32.mrf.mxu1  ;;  %v12692_v48 = vadd.f32 %v2299_v26, %v1992_v51 }
 0x293   : > { %v1948_v47 = vpop.f32.mrf.mxu0 }
 0x294   : > { %v1993_v7 = vadd.f32 %v1948_v47, %v12577_v38  ;;  %v10157_v35 = vpop.f32.mrf.mxu1 }
 0x295   : > { %v10098_v16 = vpop.f32.mrf.mxu0 }
 0x296   : > { %v2318_v61 = vpop.f32.mrf.mxu1  ;;  %v12695_v12 = vadd.f32 %v2302_v25, %v1993_v7 }
 0x297   : > { %v1953_v21 = vpop.f32.mrf.mxu0  ;;  %10400 = vmatmul.mubr.bf16.gmra.mxu0 %v12288_v53 }
 0x298   : > { %v1994_v4 = vadd.f32 %v1953_v21, %v12586_v29  ;;  %v10158_v8 = vpop.f32.mrf.mxu1  ;;  %10403 = vmatprep.mubr.msk.bf16.mxu0 %vm11339_vm2, %v13863_v30 }
 0x299   : > { %v10101_v24 = vpop.f32.mrf.mxu0 }
 0x29a   : > { %v2323_v43 = vpop.f32.mrf.mxu1  ;;  %v12701_v6 = vadd.f32 %v2307_v5, %v1994_v4 }
 0x29b   : > { %v1956_v44 = vpop.f32.mrf.mxu0 }
 0x29c   : > { %v1995_v38 = vadd.f32 %v1956_v44, %v12598_v54  ;;  %v10161_v26 = vpop.f32.mrf.mxu1 }
 0x29d   : > { %v10102_v46 = vpop.f32.mrf.mxu0 }
 0x29e   : > { %v2326_v23 = vpop.f32.mrf.mxu1  ;;  %v12704_v11 = vadd.f32 %v2310_v13, %v1995_v38 }
 0x29f   : > { %v1961_v32 = vpop.f32.mrf.mxu0  ;;  %10404 = vmatmul.mubr.bf16.gmra.mxu0 %v12291_v17 }
 0x2a0   : > { %v1996_v53 = vadd.f32 %v1961_v32, %v12607_v40  ;;  %v10162_v29 = vpop.f32.mrf.mxu1  ;;  %10407 = vmatprep.mubr.msk.bf16.mxu0 %vm11339_vm2, %v13863_v30 }
 0x2a1   : > { %v10105_v25 = vpop.f32.mrf.mxu0 }
 0x2a2   : > { %v2331_v50 = vpop.f32.mrf.mxu1  ;;  %v12710_v63 = vadd.f32 %v2315_v28, %v1996_v53 }
 0x2a3   : > { %v1964_v10 = vpop.f32.mrf.mxu0 }
 0x2a4   : > { %v1997_v54 = vadd.f32 %v1964_v10, %v12619_v34  ;;  %v10165_v37 = vpop.f32.mrf.mxu1 }
 0x2a5   : > { %v10106_v5 = vpop.f32.mrf.mxu0 }
 0x2a6   : > { %v2334_v57 = vpop.f32.mrf.mxu1  ;;  %v12713_v15 = vadd.f32 %v2318_v61, %v1997_v54 }
 0x2a7   : > { %v1969_v55 = vpop.f32.mrf.mxu0  ;;  %10408 = vmatmul.mubr.bf16.gmra.mxu0 %v12295_v33 }
 0x2a8   : > { %v1998_v17 = vadd.f32 %v1969_v55, %v12624_v45  ;;  %v10166_v40 = vpop.f32.mrf.mxu1  ;;  %10411 = vmatprep.mubr.msk.bf16.mxu0 %vm11339_vm2, %v13863_v30 }
 0x2a9   : > { %v10109_v18 = vpop.f32.mrf.mxu0 }
 0x2aa   : > { %v2739_v13 = vpop.f32.mrf.mxu1  ;;  %v12719_v9 = vadd.f32 %v2323_v43, %v1998_v17 }
 0x2ab   : > { %v1972_v51 = vpop.f32.mrf.mxu0 }
 0x2ac   : > { %v1999_v34 = vadd.f32 %v1972_v51, %v12634_v58  ;;  %v10237_v62 = vpop.f32.mrf.mxu1 }
 0x2ad   : > { %v10110_v49 = vpop.f32.mrf.mxu0 }
 0x2ae   : > { %v2742_v28 = vpop.f32.mrf.mxu1  ;;  %v12722_v47 = vadd.f32 %v2326_v23, %v1999_v34 }
 0x2af   : > { %v1977_v7 = vpop.f32.mrf.mxu0  ;;  %10412 = vmatmul.mubr.bf16.gmra.mxu0 %v12298_v19 }
 0x2b0   : > { %v2000_v33 = vadd.f32 %v1977_v7, %v12639_v20  ;;  %v10238_v45 = vpop.f32.mrf.mxu1  ;;  %10415 = vmatprep.mubr.msk.bf16.mxu0 %vm11339_vm2, %v13863_v30 }
 0x2b1   : > { %v10113_v35 = vpop.f32.mrf.mxu0 }
 0x2b2   : > { %v2747_v16 = vpop.f32.mrf.mxu1  ;;  %v12728_v61 = vadd.f32 %v2331_v50, %v2000_v33 }
 0x2b3   : > { %v1980_v21 = vpop.f32.mrf.mxu0 }
 0x2b4   : > { %v2001_v58 = vadd.f32 %v1980_v21, %v12647_v39  ;;  %v10241_v4 = vpop.f32.mrf.mxu1 }
 0x2b5   : > { %v10114_v8 = vpop.f32.mrf.mxu0 }
 0x2b6   : > { %v2750_v24 = vpop.f32.mrf.mxu1  ;;  %v12731_v43 = vadd.f32 %v2334_v57, %v2001_v58 }
 0x2b7   : > { %v2492_v44 = vpop.f32.mrf.mxu0  ;;  %10416 = vmatmul.mubr.bf16.gmra.mxu0 %v12307_v42 }
 0x2b8   : > { %v2563_v19 = vadd.f32 %v2492_v44, %v12655_v36  ;;  %v10242_v20 = vpop.f32.mrf.mxu1  ;;  %10419 = vmatprep.mubr.msk.bf16.mxu0 %vm11339_vm2, %v13863_v30 }
 0x2b9   : > { %v10185_v38 = vpop.f32.mrf.mxu0 }
 0x2ba   : > { %v2755_v26 = vpop.f32.mrf.mxu1  ;;  %v12737_v46 = vadd.f32 %v2739_v13, %v2563_v19 }
 0x2bb   : > { %v2495_v23 = vpop.f32.mrf.mxu0 }
 0x2bc   : > { %v2564_v39 = vadd.f32 %v2495_v23, %v12659_v14  ;;  %v10245_v32 = vpop.f32.mrf.mxu1 }
 0x2bd   : > { %v10186_v53 = vpop.f32.mrf.mxu0 }
 0x2be   : > { %v2758_v29 = vpop.f32.mrf.mxu1  ;;  %v12740_v25 = vadd.f32 %v2742_v28, %v2564_v39 }
 0x2bf   : > { %v2500_v50 = vpop.f32.mrf.mxu0  ;;  %10420 = vmatmul.mubr.bf16.gmra.mxu0 %v12314_v22 }
 0x2c0   : > { %v2565_v42 = vadd.f32 %v2500_v50, %v12665_v59  ;;  %v10246_v36 = vpop.f32.mrf.mxu1  ;;  %10423 = vmatprep.mubr.msk.bf16.mxu0 %vm11339_vm2, %v13863_v30 }
 0x2c1   : > { %v10189_v10 = vpop.f32.mrf.mxu0 }
 0x2c2   : > { %v2763_v54 = vpop.f32.mrf.mxu1  ;;  %v12746_v37 = vadd.f32 %v2747_v16, %v2565_v42 }
 0x2c3   : > { %v2503_v5 = vpop.f32.mrf.mxu0 }
 0x2c4   : > { %v2566_v14 = vadd.f32 %v2503_v5, %v12669_v52  ;;  %v10249_v57 = vpop.f32.mrf.mxu1 }
 0x2c5   : > { %v10190_v55 = vpop.f32.mrf.mxu0 }
 0x2c6   : > { %v2766_v17 = vpop.f32.mrf.mxu1  ;;  %v12749_v40 = vadd.f32 %v2750_v24, %v2566_v14 }
 0x2c7   : > { %v2508_v18 = vpop.f32.mrf.mxu0  ;;  %10424 = vmatmul.mubr.bf16.gmra.mxu0 %v12317_v56 }
 0x2c8   : > { %v2567_v22 = vadd.f32 %v2508_v18, %v12674_v41  ;;  %v10250_v59 = vpop.f32.mrf.mxu1 }
 0x2c9   : > { %v10193_v13 = vpop.f32.mrf.mxu0 }
 0x2ca   : > { %v2771_v30 = vpop.f32.mrf.mxu1  ;;  %v12753_v51 = vadd.f32 %v2755_v26, %v2567_v22 }
 0x2cb   : > { %v2511_v34 = vpop.f32.mrf.mxu0 }
 0x2cc   : > { %v2568_v62 = vadd.f32 %v2511_v34, %v12677_v27  ;;  %v10253_v49 = vpop.f32.mrf.mxu1 }
 0x2cd   : > { %v10194_v52 = vpop.f32.mrf.mxu0 }
 0x2ce   : > { %v2774_v28 = vpop.f32.mrf.mxu1  ;;  %v12756_v7 = vadd.f32 %v2758_v29, %v2568_v62 }
 0x2cf   : > { %v2516_v33 = vpop.f32.mrf.mxu0 }
 0x2d0   : > { %v2569_v45 = vadd.f32 %v2516_v33, %v12683_v60  ;;  %v10254_v35 = vpop.f32.mrf.mxu1 }
 0x2d1   : > { %v10197_v56 = vpop.f32.mrf.mxu0 }
 0x2d2   : > { %v2779_v16 = vpop.f32.mrf.mxu1  ;;  %v12759_v41 = vadd.f32 %v2763_v54, %v2569_v45 }
 0x2d3   : > { %v2519_v21 = vpop.f32.mrf.mxu0 }
 0x2d4   : > { %v2570_v58 = vadd.f32 %v2519_v21, %v12686_v31  ;;  %v10257_v4 = vpop.f32.mrf.mxu1 }
 0x2d5   : > { %v10198_v8 = vpop.f32.mrf.mxu0 }
 0x2d6   : > { %v2782_v24 = vpop.f32.mrf.mxu1  ;;  %v12762_v27 = vadd.f32 %v2766_v17, %v2570_v58 }
 0x2d7   : > { %v2524_v44 = vpop.f32.mrf.mxu0 }
 0x2d8   : > { %v2571_v19 = vadd.f32 %v2524_v44, %v12692_v48  ;;  %v10258_v20 = vpop.f32.mrf.mxu1 }
 0x2d9   : > { %v10201_v38 = vpop.f32.mrf.mxu0 }
 0x2da   : > { %v2787_v26 = vpop.f32.mrf.mxu1  ;;  %v12765_v60 = vadd.f32 %v2771_v30, %v2571_v19 }
 0x2db   : > { %v2527_v23 = vpop.f32.mrf.mxu0 }
 0x2dc   : > { %v2572_v39 = vadd.f32 %v2527_v23, %v12695_v12  ;;  %v10261_v32 = vpop.f32.mrf.mxu1 }
 0x2dd   : > { %v10202_v53 = vpop.f32.mrf.mxu0 }
 0x2de   : > { %v2790_v29 = vpop.f32.mrf.mxu1  ;;  %v12768_v31 = vadd.f32 %v2774_v28, %v2572_v39 }
 0x2df   : > { %v2532_v50 = vpop.f32.mrf.mxu0 }
 0x2e0   : > { %v2573_v42 = vadd.f32 %v2532_v50, %v12701_v6  ;;  %v10262_v36 = vpop.f32.mrf.mxu1 }
 0x2e1   : > { %v10205_v10 = vpop.f32.mrf.mxu0 }
 0x2e2   : > { %v2795_v54 = vpop.f32.mrf.mxu1  ;;  %v12771_v48 = vadd.f32 %v2779_v16, %v2573_v42 }
 0x2e3   : > { %v2535_v5 = vpop.f32.mrf.mxu0 }
 0x2e4   : > { %v2574_v14 = vadd.f32 %v2535_v5, %v12704_v11  ;;  %v10265_v57 = vpop.f32.mrf.mxu1 }
 0x2e5   : > { %v10206_v55 = vpop.f32.mrf.mxu0 }
 0x2e6   : > { %v2798_v17 = vpop.f32.mrf.mxu1  ;;  %v12774_v12 = vadd.f32 %v2782_v24, %v2574_v14 }
 0x2e7   : > { %v2540_v18 = vpop.f32.mrf.mxu0 }
 0x2e8   : > { %v2575_v22 = vadd.f32 %v2540_v18, %v12710_v63  ;;  %v10266_v59 = vpop.f32.mrf.mxu1 }
 0x2e9   : > { %v10209_v13 = vpop.f32.mrf.mxu0 }
 0x2ea   : > { %v2803_v30 = vpop.f32.mrf.mxu1  ;;  %v12777_v6 = vadd.f32 %v2787_v26, %v2575_v22 }
 0x2eb   : > { %v2543_v34 = vpop.f32.mrf.mxu0 }
 0x2ec   : > { %v2576_v62 = vadd.f32 %v2543_v34, %v12713_v15  ;;  %v10269_v49 = vpop.f32.mrf.mxu1 }
 0x2ed   : > { %v10210_v52 = vpop.f32.mrf.mxu0 }
 0x2ee   : > { %v2806_v28 = vpop.f32.mrf.mxu1  ;;  %v12780_v11 = vadd.f32 %v2790_v29, %v2576_v62 }
 0x2ef   : > { %v2548_v33 = vpop.f32.mrf.mxu0 }
 0x2f0   : > { %v2577_v45 = vadd.f32 %v2548_v33, %v12719_v9  ;;  %v10270_v35 = vpop.f32.mrf.mxu1 }
 0x2f1   : > { %v10213_v56 = vpop.f32.mrf.mxu0 }
 0x2f2   : > { %v3309_v16 = vpop.f32.mrf.mxu1  ;;  %v12783_v63 = vadd.f32 %v2795_v54, %v2577_v45 }
 0x2f3   : > { %v2551_v21 = vpop.f32.mrf.mxu0 }
 0x2f4   : > { %v2578_v58 = vadd.f32 %v2551_v21, %v12722_v47  ;;  %v10341_v4 = vpop.f32.mrf.mxu1 }
 0x2f5   : > { %v10214_v8 = vpop.f32.mrf.mxu0 }
 0x2f6   : > { %v3312_v24 = vpop.f32.mrf.mxu1  ;;  %v12786_v15 = vadd.f32 %v2798_v17, %v2578_v58 }
 0x2f7   : > { %v2556_v44 = vpop.f32.mrf.mxu0 }
 0x2f8   : > { %v2579_v19 = vadd.f32 %v2556_v44, %v12728_v61  ;;  %v10342_v20 = vpop.f32.mrf.mxu1 }
 0x2f9   : > { %v10217_v38 = vpop.f32.mrf.mxu0 }
 0x2fa   : > { %v3317_v26 = vpop.f32.mrf.mxu1  ;;  %v12789_v9 = vadd.f32 %v2803_v30, %v2579_v19 }
 0x2fb   : > { %v2559_v23 = vpop.f32.mrf.mxu0 }
 0x2fc   : > { %v2580_v39 = vadd.f32 %v2559_v23, %v12731_v43  ;;  %v10345_v32 = vpop.f32.mrf.mxu1 }
 0x2fd   : > { %v10218_v53 = vpop.f32.mrf.mxu0 }
 0x2fe   : > { %v3320_v29 = vpop.f32.mrf.mxu1  ;;  %v12792_v47 = vadd.f32 %v2806_v28, %v2580_v39 }
 0x2ff   : > { %v3022_v50 = vpop.f32.mrf.mxu0 }
 0x300   : > { %v3093_v42 = vadd.f32 %v3022_v50, %v12737_v46  ;;  %v10346_v36 = vpop.f32.mrf.mxu1 }
 0x301   : > { %v10289_v10 = vpop.f32.mrf.mxu0 }
 0x302   : > { %v3325_v54 = vpop.f32.mrf.mxu1  ;;  %v12795_v61 = vadd.f32 %v3309_v16, %v3093_v42 }
 0x303   : > { %v3025_v5 = vpop.f32.mrf.mxu0 }
 0x304   : > { %v3094_v14 = vadd.f32 %v3025_v5, %v12740_v25  ;;  %v10349_v57 = vpop.f32.mrf.mxu1 }
 0x305   : > { %v10290_v55 = vpop.f32.mrf.mxu0 }
 0x306   : > { %v3328_v17 = vpop.f32.mrf.mxu1  ;;  %v12798_v43 = vadd.f32 %v3312_v24, %v3094_v14 }
 0x307   : > { %v3030_v18 = vpop.f32.mrf.mxu0 }
 0x308   : > { %v3095_v22 = vadd.f32 %v3030_v18, %v12746_v37  ;;  %v10350_v59 = vpop.f32.mrf.mxu1 }
 0x309   : > { %v10293_v13 = vpop.f32.mrf.mxu0 }
 0x30a   : > { %v3333_v30 = vpop.f32.mrf.mxu1  ;;  %v12801_v46 = vadd.f32 %v3317_v26, %v3095_v22 }
 0x30b   : > { %v3033_v34 = vpop.f32.mrf.mxu0 }
 0x30c   : > { %v3096_v62 = vadd.f32 %v3033_v34, %v12749_v40  ;;  %v10353_v49 = vpop.f32.mrf.mxu1 }
 0x30d   : > { %v10294_v52 = vpop.f32.mrf.mxu0 }
 0x30e   : > { %v3336_v28 = vpop.f32.mrf.mxu1  ;;  %v12804_v25 = vadd.f32 %v3320_v29, %v3096_v62 }
 0x30f   : > { %v3038_v33 = vpop.f32.mrf.mxu0 }
 0x310   : > { %v3097_v45 = vadd.f32 %v3038_v33, %v12753_v51  ;;  %v10354_v35 = vpop.f32.mrf.mxu1 }
 0x311   : > { %v10297_v56 = vpop.f32.mrf.mxu0 }
 0x312   : > { %v3341_v16 = vpop.f32.mrf.mxu1  ;;  %v12807_v37 = vadd.f32 %v3325_v54, %v3097_v45 }
 0x313   : > { %v3041_v21 = vpop.f32.mrf.mxu0 }
 0x314   : > { %v3098_v58 = vadd.f32 %v3041_v21, %v12756_v7  ;;  %v10357_v4 = vpop.f32.mrf.mxu1 }
 0x315   : > { %v10298_v8 = vpop.f32.mrf.mxu0 }
 0x316   : > { %v3344_v24 = vpop.f32.mrf.mxu1  ;;  %v12810_v40 = vadd.f32 %v3328_v17, %v3098_v58 }
 0x317   : > { %v3046_v44 = vpop.f32.mrf.mxu0 }
 0x318   : > { %v3099_v19 = vadd.f32 %v3046_v44, %v12759_v41  ;;  %v10358_v20 = vpop.f32.mrf.mxu1 }
 0x319   : > { %v10301_v38 = vpop.f32.mrf.mxu0 }
 0x31a   : > { %v3349_v26 = vpop.f32.mrf.mxu1  ;;  %v12813_v51 = vadd.f32 %v3333_v30, %v3099_v19 }
 0x31b   : > { %v3049_v23 = vpop.f32.mrf.mxu0 }
 0x31c   : > { %v3100_v39 = vadd.f32 %v3049_v23, %v12762_v27  ;;  %v10361_v32 = vpop.f32.mrf.mxu1 }
 0x31d   : > { %v10302_v53 = vpop.f32.mrf.mxu0 }
 0x31e   : > { %v3352_v29 = vpop.f32.mrf.mxu1  ;;  %v12816_v7 = vadd.f32 %v3336_v28, %v3100_v39 }
 0x31f   : > { %v3054_v50 = vpop.f32.mrf.mxu0 }
 0x320   : > { %v3101_v42 = vadd.f32 %v3054_v50, %v12765_v60  ;;  %v10362_v36 = vpop.f32.mrf.mxu1 }
 0x321   : > { %v10305_v10 = vpop.f32.mrf.mxu0 }
 0x322   : > { %v3357_v54 = vpop.f32.mrf.mxu1  ;;  %v12819_v41 = vadd.f32 %v3341_v16, %v3101_v42 }
 0x323   : > { %v3057_v5 = vpop.f32.mrf.mxu0 }
 0x324   : > { %v3102_v14 = vadd.f32 %v3057_v5, %v12768_v31  ;;  %v10365_v57 = vpop.f32.mrf.mxu1 }
 0x325   : > { %v10306_v55 = vpop.f32.mrf.mxu0 }
 0x326   : > { %v3360_v17 = vpop.f32.mrf.mxu1  ;;  %v12822_v27 = vadd.f32 %v3344_v24, %v3102_v14 }
 0x327   : > { %v3062_v18 = vpop.f32.mrf.mxu0 }
 0x328   : > { %v3103_v22 = vadd.f32 %v3062_v18, %v12771_v48  ;;  %v10366_v59 = vpop.f32.mrf.mxu1 }
 0x329   : > { %v10309_v13 = vpop.f32.mrf.mxu0 }
 0x32a   : > { %v3365_v30 = vpop.f32.mrf.mxu1  ;;  %v12825_v60 = vadd.f32 %v3349_v26, %v3103_v22 }
 0x32b   : > { %v3065_v34 = vpop.f32.mrf.mxu0 }
 0x32c   : > { %v3104_v62 = vadd.f32 %v3065_v34, %v12774_v12  ;;  %v10369_v49 = vpop.f32.mrf.mxu1 }
 0x32d   : > { %v10310_v52 = vpop.f32.mrf.mxu0 }
 0x32e   : > { %v3368_v28 = vpop.f32.mrf.mxu1  ;;  %v12828_v31 = vadd.f32 %v3352_v29, %v3104_v62 }
 0x32f   : > { %v3070_v33 = vpop.f32.mrf.mxu0 }
 0x330   : > { %v3105_v45 = vadd.f32 %v3070_v33, %v12777_v6  ;;  %v10370_v35 = vpop.f32.mrf.mxu1 }
 0x331   : > { %v10313_v56 = vpop.f32.mrf.mxu0 }
 0x332   : > { %v3373_v16 = vpop.f32.mrf.mxu1  ;;  %v12831_v48 = vadd.f32 %v3357_v54, %v3105_v45 }
 0x333   : > { %v3073_v21 = vpop.f32.mrf.mxu0 }
 0x334   : > { %v3106_v58 = vadd.f32 %v3073_v21, %v12780_v11  ;;  %v10373_v4 = vpop.f32.mrf.mxu1 }
 0x335   : > { %v10314_v8 = vpop.f32.mrf.mxu0 }
 0x336   : > { %v3376_v24 = vpop.f32.mrf.mxu1  ;;  %v12834_v12 = vadd.f32 %v3360_v17, %v3106_v58 }
 0x337   : > { %v3078_v44 = vpop.f32.mrf.mxu0 }
 0x338   : > { %v3107_v19 = vadd.f32 %v3078_v44, %v12783_v63  ;;  %v10374_v20 = vpop.f32.mrf.mxu1 }
 0x339   : > { %v10317_v38 = vpop.f32.mrf.mxu0 }
 0x33a   : > { %v12837_v6 = vadd.f32 %v3365_v30, %v3107_v19 }
 0x33b   : > { %v3081_v26 = vpop.f32.mrf.mxu0 }
 0x33c   : > { %v3108_v23 = vadd.f32 %v3081_v26, %v12786_v15 }
 0x33d   : > { %v10318_v39 = vpop.f32.mrf.mxu0 }
 0x33e   : > { %v12840_v32 = vadd.f32 %v3368_v28, %v3108_v23 }
 0x33f   : > { %v3086_v11 = vpop.f32.mrf.mxu0 }
 0x340   : > { %v3109_v53 = vadd.f32 %v3086_v11, %v12789_v9 }
 0x341   : > { %v10321_v29 = vpop.f32.mrf.mxu0 }
 0x342   : > { %v12843_v50 = vadd.f32 %v3373_v16, %v3109_v53 }
 0x343   : > { %v3089_v42 = vpop.f32.mrf.mxu0 }
 0x344   : > { %v3110_v63 = vadd.f32 %v3089_v42, %v12792_v47 }
 0x345   : > { %v10322_v36 = vpop.f32.mrf.mxu0 }
 0x346   : > { %v12846_v10 = vadd.f32 %v3376_v24, %v3110_v63 }
 0x347   : > { %v3534_v54 = vpop.f32.mrf.mxu0 }
 0x348   : > { %v3605_v5 = vadd.f32 %v3534_v54, %v12795_v61 }
 0x349   : > { %v10393_v15 = vpop.f32.mrf.mxu0 }
 0x34a   : > { %v3630_v14 = vadd.f32 %v11410_v3, %v3605_v5 }
 0x34b   : > { %v3537_v57 = vpop.f32.mrf.mxu0 }
 0x34c   : > { %v3648_v55 = vmax.f32 %v3630_v14, 0.0  ;;  %v3606_v9 = vadd.f32 %v3537_v57, %v12798_v43 }
 0x34d   : > { %v10394_v17 = vpop.f32.mrf.mxu0 }
 0x34e   : > { %3667 = vst [vmem:[%s12852_s23] sm:$0xff] %v3648_v55  ;;  %v3631_v47 = vadd.f32 %v11410_v3, %v3606_v9 }
 0x34f   : > { %v3542_v18 = vpop.f32.mrf.mxu0 }
 0x350   : > { %v3649_v22 = vmax.f32 %v3631_v47, 0.0  ;;  %v3607_v61 = vadd.f32 %v3542_v18, %v12801_v46 }
 0x351   : > { %v10397_v59 = vpop.f32.mrf.mxu0 }
 0x352   : > { %3668 = vst [vmem:[%s12852_s23 + $0x8] sm:$0xff] %v3649_v22  ;;  %v3632_v13 = vadd.f32 %v11410_v3, %v3607_v61 }
 0x353   : > { %v3545_v30 = vpop.f32.mrf.mxu0 }
 0x354   : > { %v3650_v43 = vmax.f32 %v3632_v13, 0.0  ;;  %v3608_v34 = vadd.f32 %v3545_v30, %v12804_v25 }
 0x355   : > { %v10398_v62 = vpop.f32.mrf.mxu0 }
 0x356   : > { %3669 = vst [vmem:[%s12852_s23 + $0x10] sm:$0xff] %v3650_v43  ;;  %v3633_v49 = vadd.f32 %v11410_v3, %v3608_v34 }
 0x357   : > { %v3550_v52 = vpop.f32.mrf.mxu0 }
 0x358   : > { %v3651_v28 = vmax.f32 %v3633_v49, 0.0  ;;  %v3609_v33 = vadd.f32 %v3550_v52, %v12807_v37 }
 0x359   : > { %v10401_v45 = vpop.f32.mrf.mxu0 }
 0x35a   : > { %3670 = vst [vmem:[%s12852_s23 + $0x18] sm:$0xff] %v3651_v28  ;;  %v3634_v46 = vadd.f32 %v11410_v3, %v3609_v33 }
 0x35b   : > { %v3553_v35 = vpop.f32.mrf.mxu0 }
 0x35c   : > { %v3652_v56 = vmax.f32 %v3634_v46, 0.0  ;;  %v3610_v16 = vadd.f32 %v3553_v35, %v12810_v40 }
 0x35d   : > { %v10402_v21 = vpop.f32.mrf.mxu0 }
 0x35e   : > { %3671 = vst [vmem:[%s12852_s23 + $0x20] sm:$0xff] %v3652_v56  ;;  %v3635_v25 = vadd.f32 %v11410_v3, %v3610_v16 }
 0x35f   : > { %v3558_v58 = vpop.f32.mrf.mxu0 }
 0x360   : > { %v3653_v4 = vmax.f32 %v3635_v25, 0.0  ;;  %v3611_v8 = vadd.f32 %v3558_v58, %v12813_v51 }
 0x361   : > { %v10405_v24 = vpop.f32.mrf.mxu0 }
 0x362   : > { %3672 = vst [vmem:[%s12852_s23 + $0x28] sm:$0xff] %v3653_v4  ;;  %v3636_v37 = vadd.f32 %v11410_v3, %v3611_v8  ;;  %v11340_v24 = vmov (%p39_p0), 0.0  }
 0x363   : > { %v3561_v44 = vpop.f32.mrf.mxu0  ;;  %10427 = vmatprep.subr.bf16.mxu0 (%p39_p0), %v11340_v24  ;;  %10447 = vmatprep.subr.bf16.mxu1 (%p39_p0), %v11340_v24 }
 0x364   : > { %v3654_v19 = vmax.f32 %v3636_v37, 0.0  ;;  %v3612_v20 = vadd.f32 %v3561_v44, %v12816_v7  ;;  %v11123_v37 = vld [vmem:[%s13854_s5 + $0x70] sm:$0xff] (%p39_p0)   ;;  %10443 = vmatprep.mubr.msk.bf16.mxu0 (%p39_p0), %vm11341_vm10, %v11340_v24  ;;  %10463 = vmatprep.mubr.msk.bf16.mxu1 (%p39_p0), %vm11341_vm10, %v11340_v24  ;;  %v11128_v44 = vld [vmem:[%s13854_s5 + $0x20] sm:$0xff] (%p39_p0)  }
 0x365   : > { %v10406_v38 = vpop.f32.mrf.mxu0 }
 0x366   : > { %3673 = vst [vmem:[%s12852_s23 + $0x30] sm:$0xff] %v3654_v19  ;;  %v3637_v40 = vadd.f32 %v11410_v3, %v3612_v20  ;;  %v11129_v19 = vld [vmem:[%s13854_s5 + $0x58] sm:$0xff] (%p39_p0)   ;;  %v11131_v38 = vld [vmem:[%s13854_s5 + $0x50] sm:$0xff] (%p39_p0)  }
 0x367   : > { %v3566_v26 = vpop.f32.mrf.mxu0  ;;  %v11130_v20 = vld [vmem:[%s13854_s5 + $0x18] sm:$0xff] (%p39_p0)  }
 0x368   : > { %v3655_v23 = vmax.f32 %v3637_v40, 0.0  ;;  %v3613_v39 = vadd.f32 %v3566_v26, %v12819_v41  ;;  %v11132_v40 = vld [vmem:[%s13854_s5 + $0x10] sm:$0xff] (%p39_p0)  }
 0x369   : > { %v10409_v11 = vpop.f32.mrf.mxu0 }
 0x36a   : > { %3674 = vst [vmem:[%s12852_s23 + $0x38] sm:$0xff] %v3655_v23  ;;  %v3638_v51 = vadd.f32 %v11410_v3, %v3613_v39 }
 0x36b   : > { %v3569_v53 = vpop.f32.mrf.mxu0 }
 0x36c   : > { %v3656_v29 = vmax.f32 %v3638_v51, 0.0  ;;  %v3614_v42 = vadd.f32 %v3569_v53, %v12822_v27  ;;  %v11133_v51 = vld [vmem:[%s13854_s5 + $0x48] sm:$0xff] (%p39_p0)  }
 0x36d   : > { %v10410_v63 = vpop.f32.mrf.mxu0 }
 0x36e   : > { %3675 = vst [vmem:[%s12852_s23 + $0x40] sm:$0xff] %v3656_v29  ;;  %v3639_v7 = vadd.f32 %v11410_v3, %v3614_v42  ;;  %v11134_v42 = vld [vmem:[%s13854_s5 + $0x8] sm:$0xff] (%p39_p0)  }
 0x36f   : > { %v3574_v36 = vpop.f32.mrf.mxu0 }
 0x370   : > { %v3657_v54 = vmax.f32 %v3639_v7, 0.0  ;;  %v3615_v5 = vadd.f32 %v3574_v36, %v12825_v60 }
 0x371   : > { %v10413_v15 = vpop.f32.mrf.mxu0 }
 0x372   : > { %3676 = vst [vmem:[%s12852_s23 + $0x48] sm:$0xff] %v3657_v54  ;;  %v3640_v41 = vadd.f32 %v11410_v3, %v3615_v5 }
 0x373   : > { %v3577_v14 = vpop.f32.mrf.mxu0 }
 0x374   : > { %v3658_v57 = vmax.f32 %v3640_v41, 0.0  ;;  %v3616_v55 = vadd.f32 %v3577_v14, %v12828_v31 }
 0x375   : > { %v10414_v9 = vpop.f32.mrf.mxu0 }
 0x376   : > { %3677 = vst [vmem:[%s12852_s23 + $0x50] sm:$0xff] %v3658_v57  ;;  %v3641_v27 = vadd.f32 %v11410_v3, %v3616_v55  ;;  %v11135_v9 = vld [vmem:[%s13854_s5 + $0x40] sm:$0xff] (%p39_p0)  }
 0x377   : > { %v3582_v17 = vpop.f32.mrf.mxu0 }
 0x378   : > { %v3659_v47 = vmax.f32 %v3641_v27, 0.0  ;;  %v3617_v18 = vadd.f32 %v3582_v17, %v12831_v48 }
 0x379   : > { %v10417_v22 = vpop.f32.mrf.mxu0 }
 0x37a   : > { %3678 = vst [vmem:[%s12852_s23 + $0x58] sm:$0xff] %v3659_v47  ;;  %v3642_v60 = vadd.f32 %v11410_v3, %v3617_v18  ;;  %v11136_v22 = vld [vmem:[%s13854_s5] sm:$0xff] (%p39_p0)  }
 0x37b   : > { %v3585_v61 = vpop.f32.mrf.mxu0 }
 0x37c   : > { %v3660_v59 = vmax.f32 %v3642_v60, 0.0  ;;  %v3618_v13 = vadd.f32 %v3585_v61, %v12834_v12 }
 0x37d   : > { %v10418_v30 = vpop.f32.mrf.mxu0 }
 0x37e   : > { %3679 = vst [vmem:[%s12852_s23 + $0x60] sm:$0xff] %v3660_v59  ;;  %v3643_v31 = vadd.f32 %v11410_v3, %v3618_v13 }
 0x37f   : > { %v3590_v43 = vpop.f32.mrf.mxu0 }
 0x380   : > { %v3661_v34 = vmax.f32 %v3643_v31, 0.0  ;;  %v3619_v62 = vadd.f32 %v3590_v43, %v12837_v6 }
 0x381   : > { %v10421_v49 = vpop.f32.mrf.mxu0 }
 0x382   : > { %3680 = vst [vmem:[%s12852_s23 + $0x68] sm:$0xff] %v3661_v34  ;;  %v3644_v48 = vadd.f32 %v11410_v3, %v3619_v62 }
 0x383   : > { %v3593_v52 = vpop.f32.mrf.mxu0 }
 0x384   : > { %v3662_v28 = vmax.f32 %v3644_v48, 0.0  ;;  %v3620_v33 = vadd.f32 %v3593_v52, %v12840_v32 }
 0x385   : > { %v10422_v45 = vpop.f32.mrf.mxu0 }
 0x386   : > { %3681 = vst [vmem:[%s12852_s23 + $0x70] sm:$0xff] %v3662_v28  ;;  %v3645_v12 = vadd.f32 %v11410_v3, %v3620_v33 }
 0x387   : > { %v3598_v46 = vpop.f32.mrf.mxu0 }
 0x388   : > { %v3663_v35 = vmax.f32 %v3645_v12, 0.0  ;;  %v3621_v56 = vadd.f32 %v3598_v46, %v12843_v50  ;;  %v11121_v50 = vld [vmem:[%s13854_s5 + $0x78] sm:$0xff] (%p39_p0)  }
 0x389   : > { %v10425_v16 = vpop.f32.mrf.mxu0  ;;  %10428 = vmatpush3.bf16.msra.mxu0 (%p39_p0), %v11121_v50 }
 0x38a   : > { %3682 = vst [vmem:[%s12852_s23 + $0x78] sm:$0xff] %v3663_v35  ;;  %v3646_v6 = vadd.f32 %v11410_v3, %v3621_v56  ;;  %10429 = vmatprep.subr.bf16.mxu0 (%p39_p0), %v11340_v24 }
 0x38b   : > { %v3601_v21 = vpop.f32.mrf.mxu0 }
 0x38c   : > { %v3664_v25 = vmax.f32 %v3646_v6, 0.0  ;;  %v3622_v58 = vadd.f32 %v3601_v21, %v12846_v10  ;;  %v11122_v10 = vld [vmem:[%s13854_s5 + $0x38] sm:$0xff] (%p39_p0)  }
 0x38d   : > { %v10426_v4 = vpop.f32.mrf.mxu0  ;;  %10448 = vmatpush3.bf16.msra.mxu1 (%p39_p0), %v11122_v10  ;;  %10430 = vmatpush3.bf16.msra.mxu0 (%p39_p0), %v11123_v37 }
 0x38e   : > { %3683 = vst [vmem:[%s12852_s23 + $0x80] sm:$0xff] %v3664_v25  ;;  %v3647_v32 = vadd.f32 %v11410_v3, %v3622_v58  ;;  %41 = sbr.rel (!%p39_p0) target bundleno = 4 (0x4), region = 299  ;;  %10449 = vmatprep.subr.bf16.mxu1 (%p39_p0), %v11340_v24  ;;  %10431 = vmatprep.subr.bf16.mxu0 (%p39_p0), %v11340_v24  ;;  %v11127_v3 = vld [vmem:[%s13854_s5 + $0x60] sm:$0xff] (%p39_p0)  }
 0x390   : > { %v3665_v8 = vmax.f32 %v3647_v32, 0.0 }
 0x391   :  { %10450 = vmatpush3.bf16.msra.mxu1 (%p39_p0), %v11124_v0  ;;  %10432 = vmatpush3.bf16.msra.mxu0 (%p39_p0), %v11125_v1 }
 0x392   : > { %3684 = vst [vmem:[%s12852_s23 + $0x88] sm:$0x7f] %v3665_v8  ;;  %10451 = vmatprep.subr.bf16.mxu1 (%p39_p0), %v11340_v24  ;;  %10433 = vmatprep.subr.bf16.mxu0 (%p39_p0), %v11340_v24 }
 0x395   :  { %10452 = vmatpush3.bf16.msra.mxu1 %v11126_v2  ;;  %10434 = vmatpush3.bf16.msra.mxu0 %v11127_v3 }
 0x396   :  { %10453 = vmatprep.subr.bf16.mxu1 %v11340_v24  ;;  %10435 = vmatprep.subr.bf16.mxu0 %v11340_v24 }
 0x399   :  { %10454 = vmatpush3.bf16.msra.mxu1 %v11128_v44  ;;  %10436 = vmatpush3.bf16.msra.mxu0 %v11129_v19  ;;  %v3772_v26 = vld [vmem:[#allocation3 + $0x2] ss:$144 sm:$0x3]  ;;  %v3788_v53 = vld [vmem:[#allocation3 + $0x3] ss:$144 sm:$0x3] }
 0x39a   :  { %10455 = vmatprep.subr.bf16.mxu1 %v11340_v24  ;;  %v3773_v23 = vld [vmem:[#allocation3 + $0x2] ss:$144 sm:$0xc]  ;;  %10437 = vmatprep.subr.bf16.mxu0 %v11340_v24  ;;  %v3789_v29 = vld [vmem:[#allocation3 + $0x3] ss:$144 sm:$0xc] }
 0x39b   :  { %v3780_v39 = vld [vmem:[#allocation3 + $0x482] ss:$144 sm:$0x3]  ;;  %v3774_v63 = vor.u32 %v3773_v23, %v3772_v26  ;;  %v3790_v36 = vor.u32 %v3789_v29, %v3788_v53  ;;  %v3791_v54 = vld [vmem:[#allocation3 + $0x3] ss:$144 sm:$0x30] }
 0x39c   :  { %v3781_v11 = vld [vmem:[#allocation3 + $0x482] ss:$144 sm:$0xc]  ;;  %v3796_v15 = vld [vmem:[#allocation3 + $0x483] ss:$144 sm:$0x3] }
 0x39d   :  { %10456 = vmatpush3.bf16.msra.mxu1 %v11130_v20  ;;  %v3775_v7 = vld [vmem:[#allocation3 + $0x2] ss:$144 sm:$0x30]  ;;  %10438 = vmatpush3.bf16.msra.mxu0 %v11131_v38  ;;  %v3782_v5 = vor.u32 %v3781_v11, %v3780_v39  ;;  %v3797_v41 = vld [vmem:[#allocation3 + $0x483] ss:$144 sm:$0xc]  ;;  %v3792_v59 = vor.u32 %v3791_v54, %v3790_v36 }
 0x39e   :  { %10457 = vmatprep.subr.bf16.mxu1 %v11340_v24  ;;  %10439 = vmatprep.subr.bf16.mxu0 %v11340_v24  ;;  %v3783_v14 = vld [vmem:[#allocation3 + $0x482] ss:$144 sm:$0x30]  ;;  %v3798_v57 = vor.u32 %v3797_v41, %v3796_v15  ;;  %v3799_v55 = vld [vmem:[#allocation3 + $0x483] ss:$144 sm:$0x30]  ;;  %v3776_v60 = vor.u32 %v3775_v7, %v3774_v63 }
 0x39f   :  { %v3777_v27 = vld [vmem:[#allocation3 + $0x2] ss:$144 sm:$0xc0]  ;;  %v3793_v17 = vld [vmem:[#allocation3 + $0x3] ss:$144 sm:$0xc0]  ;;  %v3784_v43 = vor.u32 %v3783_v14, %v3782_v5 }
 0x3a0   :  { %v3804_v47 = vld [vmem:[#allocation3 + $0xf] ss:$144 sm:$0x3]  ;;  %v3785_v61 = vld [vmem:[#allocation3 + $0x482] ss:$144 sm:$0xc0]  ;;  %v3800_v34 = vor.u32 %v3799_v55, %v3798_v57  ;;  %v3778_v35 = vor.u32 %v3777_v27, %v3776_v60  ;;  %v3794_v56 = vor.u32 %v3793_v17, %v3792_v59 }
 0x3a1   :  { %10458 = vmatpush3.bf16.msra.mxu1 %v11132_v40  ;;  %v3805_v18 = vld [vmem:[#allocation3 + $0xf] ss:$144 sm:$0xc]  ;;  %v3801_v13 = vld [vmem:[#allocation3 + $0x483] ss:$144 sm:$0xc0]  ;;  %10440 = vmatpush3.bf16.msra.mxu0 %v11133_v51  ;;  %v3786_v58 = vor.u32 %v3785_v61, %v3784_v43 }
 0x3a2   :  { %10459 = vmatprep.subr.bf16.mxu1 %v11340_v24  ;;  %v3806_v30 = vor.u32 %v3805_v18, %v3804_v47  ;;  %v3807_v31 = vld [vmem:[#allocation3 + $0xf] ss:$144 sm:$0x30]  ;;  %10441 = vmatprep.subr.bf16.mxu0 %v11340_v24  ;;  %v3820_v12 = vld [vmem:[#allocation3 + $0x10] ss:$144 sm:$0x3]  ;;  %v3802_v4 = vor.u32 %v3801_v13, %v3800_v34  ;;  %v3835_v19 = vmax.f32 %v3778_v35, %v3794_v56 }
 0x3a3   :  { %v3812_v62 = vld [vmem:[#allocation3 + $0x48f] ss:$144 sm:$0x3]  ;;  %v3821_v46 = vld [vmem:[#allocation3 + $0x10] ss:$144 sm:$0xc] }
 0x3a4   :  { %v3813_v49 = vld [vmem:[#allocation3 + $0x48f] ss:$144 sm:$0xc]  ;;  %v3808_v48 = vor.u32 %v3807_v31, %v3806_v30  ;;  %v3822_v6 = vor.u32 %v3821_v46, %v3820_v12  ;;  %v3823_v21 = vld [vmem:[#allocation3 + $0x10] ss:$144 sm:$0x30]  ;;  %v3836_v26 = vmax.f32 %v3786_v58, %v3802_v4 }
 0x3a5   :  { %10460 = vmatpush3.bf16.msra.mxu1 %v11134_v42  ;;  %v3809_v52 = vld [vmem:[#allocation3 + $0xf] ss:$144 sm:$0xc0]  ;;  %v3814_v28 = vor.u32 %v3813_v49, %v3812_v62  ;;  %v3825_v25 = vld [vmem:[#allocation3 + $0x10] ss:$144 sm:$0xc0]  ;;  %10442 = vmatpush3.bf16.msra.mxu0 %v11135_v9 }
 0x3a6   :  { %v3815_v33 = vld [vmem:[#allocation3 + $0x48f] ss:$144 sm:$0x30]  ;;  %10461 = vmatprep.subr.bf16.mxu1 %v11340_v24  ;;  %v3828_v32 = vld [vmem:[#allocation3 + $0x490] ss:$144 sm:$0x3]  ;;  %v3810_v50 = vor.u32 %v3809_v52, %v3808_v48  ;;  %v3824_v10 = vor.u32 %v3823_v21, %v3822_v6  ;;  %10467 = vmatprep.subr.bf16.mxu0 %v11340_v24 }
 0x3a7   :  { %v3817_v45 = vld [vmem:[#allocation3 + $0x48f] ss:$144 sm:$0xc0]  ;;  %v3816_v16 = vor.u32 %v3815_v33, %v3814_v28  ;;  %v3829_v8 = vld [vmem:[#allocation3 + $0x490] ss:$144 sm:$0xc] }
 0x3a8   :  { %v3830_v37 = vor.u32 %v3829_v8, %v3828_v32  ;;  %v3831_v0 = vld [vmem:[#allocation3 + $0x490] ss:$144 sm:$0x30]  ;;  %v3826_v3 = vor.u32 %v3825_v25, %v3824_v10  ;;  %v3701_v51 = vld [vmem:[#allocation3 + $0x1] ss:$144 sm:$0x3] }
 0x3a9   :  { %10462 = vmatpush3.bf16.msra.mxu1 %v11136_v22  ;;  %v3833_v1 = vld [vmem:[#allocation3 + $0x490] ss:$144 sm:$0xc0]  ;;  %v3818_v2 = vor.u32 %v3817_v45, %v3816_v16  ;;  %v3702_v53 = vld [vmem:[#allocation3 + $0x1] ss:$144 sm:$0xc] }
 0x3aa   :  { %10487 = vmatprep.subr.bf16.mxu1 %v11340_v24  ;;  %v3832_v44 = vor.u32 %v3831_v0, %v3830_v37  ;;  %v3685_v20 = vld [vmem:[#allocation3] ss:$144 sm:$0x3]  ;;  %v3837_v23 = vmax.f32 %v3810_v50, %v3826_v3  ;;  %v3704_v36 = vld [vmem:[#allocation3 + $0x1] ss:$144 sm:$0x30]  ;;  %v3703_v5 = vor.u32 %v3702_v53, %v3701_v51 }
 0x3ab   :  { %v3686_v38 = vld [vmem:[#allocation3] ss:$144 sm:$0xc]  ;;  %v3709_v15 = vld [vmem:[#allocation3 + $0x481] ss:$144 sm:$0x3] }
 0x3ac   :  { %v3834_v40 = vor.u32 %v3833_v1, %v3832_v44  ;;  %v3693_v39 = vld [vmem:[#allocation3 + $0x480] ss:$144 sm:$0x3]  ;;  %v3839_v42 = vmax.f32 %v3835_v19, %v3837_v23  ;;  %v3687_v63 = vor.u32 %v3686_v38, %v3685_v20  ;;  %v3710_v41 = vld [vmem:[#allocation3 + $0x481] ss:$144 sm:$0xc]  ;;  %v3705_v61 = vor.u32 %v3704_v36, %v3703_v5 }
 0x3ad   :  { %v3694_v11 = vld [vmem:[#allocation3 + $0x480] ss:$144 sm:$0xc]  ;;  %v3711_v55 = vor.u32 %v3710_v41, %v3709_v15  ;;  %v3712_v9 = vld [vmem:[#allocation3 + $0x481] ss:$144 sm:$0x30] }
 0x3ae   :  { %v3838_v29 = vmax.f32 %v3818_v2, %v3834_v40  ;;  %v3688_v7 = vld [vmem:[#allocation3] ss:$144 sm:$0x30]  ;;  %v3695_v54 = vor.u32 %v3694_v11, %v3693_v39  ;;  %v3717_v17 = vld [vmem:[#allocation3 + $0xd] ss:$144 sm:$0x3] }
 0x3af   :  { %v3696_v57 = vld [vmem:[#allocation3 + $0x480] ss:$144 sm:$0x30]  ;;  %v3718_v47 = vld [vmem:[#allocation3 + $0xd] ss:$144 sm:$0xc]  ;;  %v3689_v22 = vor.u32 %v3688_v7, %v3687_v63  ;;  %v3713_v49 = vor.u32 %v3712_v9, %v3711_v55 }
 0x3b0   :  { %v3840_v14 = vmax.f32 %v3836_v26, %v3838_v29  ;;  %v3690_v27 = vld [vmem:[#allocation3] ss:$144 sm:$0xc0]  ;;  %v3706_v59 = vld [vmem:[#allocation3 + $0x1] ss:$144 sm:$0xc0]  ;;  %v3719_v13 = vor.u32 %v3718_v47, %v3717_v17  ;;  %v3697_v31 = vor.u32 %v3696_v57, %v3695_v54 }
 0x3b1   :  { %v3698_v60 = vld [vmem:[#allocation3 + $0x480] ss:$144 sm:$0xc0]  ;;  %v3720_v30 = vld [vmem:[#allocation3 + $0xd] ss:$144 sm:$0x30]  ;;  %v3691_v35 = vor.u32 %v3690_v27, %v3689_v22  ;;  %v3707_v56 = vor.u32 %v3706_v59, %v3705_v61 }
 0x3b2   :  { %v3841_v18 = vpack.c.bf16 %v3840_v14, %v3839_v42  ;;  %v3714_v43 = vld [vmem:[#allocation3 + $0x481] ss:$144 sm:$0xc0]  ;;  %v3725_v34 = vld [vmem:[#allocation3 + $0x48d] ss:$144 sm:$0x3]  ;;  %v3721_v48 = vor.u32 %v3720_v30, %v3719_v13  ;;  %v3699_v58 = vor.u32 %v3698_v60, %v3697_v31 }
 0x3b3   :  { %v3726_v62 = vld [vmem:[#allocation3 + $0x48d] ss:$144 sm:$0xc]  ;;  %v3733_v12 = vld [vmem:[#allocation3 + $0xe] ss:$144 sm:$0x3]  ;;  %v3715_v8 = vor.u32 %v3714_v43, %v3713_v49  ;;  %v3748_v20 = vmax.f32 %v3691_v35, %v3707_v56 }
 0x3b4   :  { %10444 = vmatmul.mubr.bf16.vlgmr.msra.gmra.mxu0 %v3841_v18  ;;  %v3722_v52 = vld [vmem:[#allocation3 + $0xd] ss:$144 sm:$0xc0]  ;;  %v3727_v28 = vor.u32 %v3726_v62, %v3725_v34  ;;  %v3734_v46 = vld [vmem:[#allocation3 + $0xe] ss:$144 sm:$0xc] }
 0x3b5   :  { %v3728_v33 = vld [vmem:[#allocation3 + $0x48d] ss:$144 sm:$0x30]  ;;  %10483 = vmatprep.mubr.msk.bf16.mxu0 %vm11341_vm10, %v11340_v24  ;;  %v3735_v6 = vor.u32 %v3734_v46, %v3733_v12  ;;  %v3736_v21 = vld [vmem:[#allocation3 + $0xe] ss:$144 sm:$0x30]  ;;  %v3723_v50 = vor.u32 %v3722_v52, %v3721_v48  ;;  %v3749_v26 = vmax.f32 %v3699_v58, %v3715_v8 }
 0x3b6   :  { %v3730_v45 = vld [vmem:[#allocation3 + $0x48d] ss:$144 sm:$0xc0]  ;;  %v3729_v16 = vor.u32 %v3728_v33, %v3727_v28  ;;  %v3738_v25 = vld [vmem:[#allocation3 + $0xe] ss:$144 sm:$0xc0] }
 0x3b7   :  { %v3741_v4 = vld [vmem:[#allocation3 + $0x48e] ss:$144 sm:$0x3]  ;;  %v3737_v10 = vor.u32 %v3736_v21, %v3735_v6  ;;  %v11137_v2 = vld [vmem:[%s13854_s5 + $0xb8] sm:$0xff]   ;;  %v11141_v51 = vld [vmem:[%s13854_s5 + $0xa8] sm:$0xff]  }
 0x3b8   :  { %v3742_v32 = vld [vmem:[#allocation3 + $0x48e] ss:$144 sm:$0xc]  ;;  %v3731_v3 = vor.u32 %v3730_v45, %v3729_v16  ;;  %10468 = vmatpush3.bf16.msra.mxu0 %v11137_v2  ;;  %v11138_v29 = vld [vmem:[%s13854_s5 + $0xf8] sm:$0xff]   ;;  %v11142_v54 = vld [vmem:[%s13854_s5 + $0xe8] sm:$0xff]  }
 0x3b9   :  { %v3743_v37 = vor.u32 %v3742_v32, %v3741_v4  ;;  %v3744_v0 = vld [vmem:[#allocation3 + $0x48e] ss:$144 sm:$0x30]  ;;  %v3739_v44 = vor.u32 %v3738_v25, %v3737_v10  ;;  %10469 = vmatprep.subr.bf16.mxu0 %v11340_v24  ;;  %v11145_v36 = vld [vmem:[%s13854_s5 + $0x98] sm:$0xff]   ;;  %v11149_v9 = vld [vmem:[%s13854_s5 + $0x88] sm:$0xff]  }
 0x3ba   :  { %v3746_v1 = vld [vmem:[#allocation3 + $0x48e] ss:$144 sm:$0xc0]  ;;  %v4038_v41 = vld [vmem:[#allocation3 + $0x4] ss:$144 sm:$0x3] }
 0x3bb   :  { %v3745_v19 = vor.u32 %v3744_v0, %v3743_v37  ;;  %v11139_v38 = vld [vmem:[%s13854_s5 + $0xb0] sm:$0xff]   ;;  %v3750_v23 = vmax.f32 %v3723_v50, %v3739_v44  ;;  %v11143_v63 = vld [vmem:[%s13854_s5 + $0xa0] sm:$0xff]   ;;  %v4039_v14 = vld [vmem:[#allocation3 + $0x4] ss:$144 sm:$0xc] }
 0x3bc   :  { %10470 = vmatpush3.bf16.msra.mxu0 %v11139_v38  ;;  %v11140_v7 = vld [vmem:[%s13854_s5 + $0xf0] sm:$0xff]   ;;  %v11144_v15 = vld [vmem:[%s13854_s5 + $0xe0] sm:$0xff]   ;;  %v4046_v57 = vld [vmem:[#allocation3 + $0x484] ss:$144 sm:$0x3]  ;;  %v4040_v47 = vor.u32 %v4039_v14, %v4038_v41 }
 0x3bd   :  { %v3747_v40 = vor.u32 %v3746_v1, %v3745_v19  ;;  %v3752_v11 = vmax.f32 %v3748_v20, %v3750_v23  ;;  %10471 = vmatprep.subr.bf16.mxu0 %v11340_v24  ;;  %v11147_v5 = vld [vmem:[%s13854_s5 + $0x90] sm:$0xff]   ;;  %v4047_v55 = vld [vmem:[#allocation3 + $0x484] ss:$144 sm:$0xc]  ;;  %v11151_v62 = vld [vmem:[%s13854_s5 + $0x80] sm:$0xff]  }
 0x3be   :  { %v4054_v27 = vld [vmem:[#allocation3 + $0x5] ss:$144 sm:$0x3]  ;;  %v4041_v18 = vld [vmem:[#allocation3 + $0x4] ss:$144 sm:$0x30]  ;;  %v4048_v59 = vor.u32 %v4047_v55, %v4046_v57 }
 0x3bf   :  { %v3751_v39 = vmax.f32 %v3731_v3, %v3747_v40  ;;  %v4055_v17 = vld [vmem:[#allocation3 + $0x5] ss:$144 sm:$0xc]  ;;  %v4049_v31 = vld [vmem:[#allocation3 + $0x484] ss:$144 sm:$0x30]  ;;  %v4042_v28 = vor.u32 %v4041_v18, %v4040_v47 }
 0x3c0   :  { %10472 = vmatpush3.bf16.msra.mxu0 %v11141_v51  ;;  %v4056_v22 = vor.u32 %v4055_v17, %v4054_v27  ;;  %v4057_v60 = vld [vmem:[#allocation3 + $0x5] ss:$144 sm:$0x30]  ;;  %v4043_v49 = vld [vmem:[#allocation3 + $0x4] ss:$144 sm:$0xc0]  ;;  %v4050_v16 = vor.u32 %v4049_v31, %v4048_v59 }
 0x3c1   :  { %v3753_v53 = vmax.f32 %v3749_v26, %v3751_v39  ;;  %10473 = vmatprep.subr.bf16.mxu0 %v11340_v24  ;;  %v11146_v61 = vld [vmem:[%s13854_s5 + $0xd8] sm:$0xff]   ;;  %v11148_v56 = vld [vmem:[%s13854_s5 + $0xd0] sm:$0xff]   ;;  %v4044_v1 = vor.u32 %v4043_v49, %v4042_v28 }
 0x3c2   :  { %v4062_v13 = vld [vmem:[#allocation3 + $0x485] ss:$144 sm:$0x3]  ;;  %v4070_v48 = vld [vmem:[#allocation3 + $0x11] ss:$144 sm:$0x3]  ;;  %v4058_v45 = vor.u32 %v4057_v60, %v4056_v22 }
 0x3c3   :  { %v3754_v42 = vpack.c.bf16 %v3753_v53, %v3752_v11  ;;  %v4063_v30 = vld [vmem:[#allocation3 + $0x485] ss:$144 sm:$0xc]  ;;  %v4071_v52 = vld [vmem:[#allocation3 + $0x11] ss:$144 sm:$0xc] }
 0x3c4   :  { %10474 = vmatpush3.bf16.msra.mxu0 %v11143_v63  ;;  %v4064_v43 = vor.u32 %v4063_v30, %v4062_v13  ;;  %v4065_v34 = vld [vmem:[#allocation3 + $0x485] ss:$144 sm:$0x30]  ;;  %v4051_v33 = vld [vmem:[#allocation3 + $0x484] ss:$144 sm:$0xc0]  ;;  %v4072_v46 = vor.u32 %v4071_v52, %v4070_v48 }
 0x3c5   :  { %10464 = vmatmul.mubr.bf16.vlgmr.msra.gmra.mxu1 %v3754_v42  ;;  %10475 = vmatprep.subr.bf16.mxu0 %v11340_v24  ;;  %v4059_v12 = vld [vmem:[#allocation3 + $0x5] ss:$144 sm:$0xc0]  ;;  %v4073_v35 = vld [vmem:[#allocation3 + $0x11] ss:$144 sm:$0x30]  ;;  %v4052_v38 = vor.u32 %v4051_v33, %v4050_v16 }
 0x3c6   :  { %10488 = vmatpush3.bf16.msra.mxu1 %v11138_v29  ;;  %10503 = vmatprep.mubr.msk.bf16.mxu1 %vm11341_vm10, %v11340_v24  ;;  %v4067_v6 = vld [vmem:[#allocation3 + $0x485] ss:$144 sm:$0xc0]  ;;  %v4078_v21 = vld [vmem:[#allocation3 + $0x491] ss:$144 sm:$0x3]  ;;  %v4066_v58 = vor.u32 %v4065_v34, %v4064_v43  ;;  %v4074_v4 = vor.u32 %v4073_v35, %v4072_v46  ;;  %v4060_v2 = vor.u32 %v4059_v12, %v4058_v45 }
 0x3c7   :  { %10489 = vmatprep.subr.bf16.mxu1 %v11340_v24  ;;  %v4079_v25 = vld [vmem:[#allocation3 + $0x491] ss:$144 sm:$0xc]  ;;  %v4086_v37 = vld [vmem:[#allocation3 + $0x12] ss:$144 sm:$0x3] }
 0x3c8   :  { %10476 = vmatpush3.bf16.msra.mxu0 %v11145_v36  ;;  %v4075_v32 = vld [vmem:[#allocation3 + $0x11] ss:$144 sm:$0xc0]  ;;  %v4080_v8 = vor.u32 %v4079_v25, %v4078_v21  ;;  %v4087_v0 = vld [vmem:[#allocation3 + $0x12] ss:$144 sm:$0xc]  ;;  %v4068_v23 = vor.u32 %v4067_v6, %v4066_v58 }
 0x3c9   :  { %10477 = vmatprep.subr.bf16.mxu0 %v11340_v24  ;;  %v4081_v50 = vld [vmem:[#allocation3 + $0x491] ss:$144 sm:$0x30]  ;;  %v4088_v44 = vor.u32 %v4087_v0, %v4086_v37  ;;  %v4089_v19 = vld [vmem:[#allocation3 + $0x12] ss:$144 sm:$0x30]  ;;  %v4076_v39 = vor.u32 %v4075_v32, %v4074_v4 }
 0x3ca   :  { %10490 = vmatpush3.bf16.msra.mxu1 %v11140_v7  ;;  %v4083_v10 = vld [vmem:[#allocation3 + $0x491] ss:$144 sm:$0xc0]  ;;  %v4082_v3 = vor.u32 %v4081_v50, %v4080_v8  ;;  %v4091_v20 = vld [vmem:[#allocation3 + $0x12] ss:$144 sm:$0xc0]  ;;  %v4102_v41 = vmax.f32 %v4052_v38, %v4068_v23 }
 0x3cb   :  { %10491 = vmatprep.subr.bf16.mxu1 %v11340_v24  ;;  %v4094_v40 = vld [vmem:[#allocation3 + $0x492] ss:$144 sm:$0x3]  ;;  %v4090_v11 = vor.u32 %v4089_v19, %v4088_v44  ;;  %v4217_v57 = vld [vmem:[#allocation3 + $0x6] ss:$144 sm:$0x3] }
 0x3cc   :  { %10478 = vmatpush3.bf16.msra.mxu0 %v11147_v5  ;;  %v4095_v26 = vld [vmem:[#allocation3 + $0x492] ss:$144 sm:$0xc]  ;;  %v4084_v63 = vor.u32 %v4083_v10, %v4082_v3  ;;  %v11152_v5 = vld [vmem:[%s13854_s5 + $0xc0] sm:$0xff]  }
 0x3cd   :  { %10479 = vmatprep.subr.bf16.mxu0 %v11340_v24  ;;  %v4096_v51 = vor.u32 %v4095_v26, %v4094_v40  ;;  %v4097_v53 = vld [vmem:[#allocation3 + $0x492] ss:$144 sm:$0x30]  ;;  %v4092_v7 = vor.u32 %v4091_v20, %v4090_v11  ;;  %v4218_v55 = vld [vmem:[#allocation3 + $0x6] ss:$144 sm:$0xc] }
 0x3ce   :  { %10492 = vmatpush3.bf16.msra.mxu1 %v11142_v54  ;;  %v4099_v29 = vld [vmem:[#allocation3 + $0x492] ss:$144 sm:$0xc0]  ;;  %v4101_v54 = vmax.f32 %v4044_v1, %v4060_v2  ;;  %v4226_v27 = vld [vmem:[#allocation3 + $0x486] ss:$144 sm:$0xc] }
 0x3cf   :  { %10493 = vmatprep.subr.bf16.mxu1 %v11340_v24  ;;  %v11150_v42 = vld [vmem:[%s13854_s5 + $0xc8] sm:$0xff]   ;;  %v4098_v36 = vor.u32 %v4097_v53, %v4096_v51  ;;  %v4103_v14 = vmax.f32 %v4076_v39, %v4092_v7  ;;  %v11153_v60 = vld [vmem:[%s13854_s5 + $0x138] sm:$0xff]  }
 0x3d0   :  { %10480 = vmatpush3.bf16.msra.mxu0 %v11149_v9  ;;  %v4225_v9 = vld [vmem:[#allocation3 + $0x486] ss:$144 sm:$0x3]  ;;  %v4233_v18 = vld [vmem:[#allocation3 + $0x7] ss:$144 sm:$0x3] }
 0x3d1   :  { %10481 = vmatprep.subr.bf16.mxu0 %v11340_v24  ;;  %v4105_v47 = vmax.f32 %v4101_v54, %v4103_v14  ;;  %v4234_v22 = vld [vmem:[#allocation3 + $0x7] ss:$144 sm:$0xc]  ;;  %v4220_v59 = vld [vmem:[#allocation3 + $0x6] ss:$144 sm:$0x30]  ;;  %v4227_v43 = vor.u32 %v4226_v27, %v4225_v9 }
 0x3d2   :  { %10494 = vmatpush3.bf16.msra.mxu1 %v11144_v15  ;;  %v4100_v15 = vor.u32 %v4099_v29, %v4098_v36  ;;  %v4235_v13 = vor.u32 %v4234_v22, %v4233_v18  ;;  %v4236_v30 = vld [vmem:[#allocation3 + $0x7] ss:$144 sm:$0x30]  ;;  %v4228_v49 = vld [vmem:[#allocation3 + $0x486] ss:$144 sm:$0x30] }
 0x3d3   :  { %10495 = vmatprep.subr.bf16.mxu1 %v11340_v24  ;;  %v4241_v34 = vld [vmem:[#allocation3 + $0x487] ss:$144 sm:$0x3]  ;;  %v4222_v33 = vld [vmem:[#allocation3 + $0x6] ss:$144 sm:$0xc0]  ;;  %v4229_v25 = vor.u32 %v4228_v49, %v4227_v43 }
 0x3d4   :  { %10482 = vmatpush3.bf16.msra.mxu0 %v11151_v62  ;;  %v4104_v17 = vmax.f32 %v4084_v63, %v4100_v15  ;;  %v4242_v62 = vld [vmem:[#allocation3 + $0x487] ss:$144 sm:$0xc]  ;;  %v4249_v45 = vld [vmem:[#allocation3 + $0x13] ss:$144 sm:$0x3] }
 0x3d5   :  { %10507 = vmatprep.subr.bf16.mxu0 %v11340_v24  ;;  %v4243_v48 = vor.u32 %v4242_v62, %v4241_v34  ;;  %v4244_v52 = vld [vmem:[#allocation3 + $0x487] ss:$144 sm:$0x30]  ;;  %v4250_v12 = vld [vmem:[#allocation3 + $0x13] ss:$144 sm:$0xc] }
 0x3d6   :  { %10496 = vmatpush3.bf16.msra.mxu1 %v11146_v61  ;;  %v4219_v61 = vor.u32 %v4218_v55, %v4217_v57  ;;  %v4106_v31 = vmax.f32 %v4102_v41, %v4104_v17  ;;  %v4230_v35 = vld [vmem:[#allocation3 + $0x486] ss:$144 sm:$0xc0]  ;;  %v4238_v16 = vld [vmem:[#allocation3 + $0x7] ss:$144 sm:$0xc0]  ;;  %v4251_v6 = vor.u32 %v4250_v12, %v4249_v45 }
 0x3d7   :  { %10497 = vmatprep.subr.bf16.mxu1 %v11340_v24  ;;  %v4252_v21 = vld [vmem:[#allocation3 + $0x13] ss:$144 sm:$0x30]  ;;  %v4246_v58 = vld [vmem:[#allocation3 + $0x487] ss:$144 sm:$0xc0]  ;;  %v4245_v8 = vor.u32 %v4244_v52, %v4243_v48  ;;  %v4231_v23 = vor.u32 %v4230_v35, %v4229_v25 }
 0x3d8   :  { %v4107_v28 = vpack.c.bf16 %v4106_v31, %v4105_v47  ;;  %v4221_v46 = vor.u32 %v4220_v59, %v4219_v61  ;;  %v4257_v4 = vld [vmem:[#allocation3 + $0x493] ss:$144 sm:$0x3]  ;;  %v4253_v50 = vor.u32 %v4252_v21, %v4251_v6  ;;  %v4265_v2 = vld [vmem:[#allocation3 + $0x14] ss:$144 sm:$0x3] }
 0x3d9   :  { %v4258_v32 = vld [vmem:[#allocation3 + $0x493] ss:$144 sm:$0xc]  ;;  %v4266_v3 = vld [vmem:[#allocation3 + $0x14] ss:$144 sm:$0xc]  ;;  %v4247_v51 = vor.u32 %v4246_v58, %v4245_v8 }
 0x3da   :  { %10498 = vmatpush3.bf16.msra.mxu1 %v11148_v56  ;;  %v4237_v56 = vor.u32 %v4236_v30, %v4235_v13  ;;  %10484 = vmatmul.mubr.bf16.vlgmr.msra.gmra.mxu0 %v4107_v28  ;;  %v4254_v10 = vld [vmem:[#allocation3 + $0x13] ss:$144 sm:$0xc0]  ;;  %v4259_v37 = vor.u32 %v4258_v32, %v4257_v4  ;;  %v4223_v44 = vor.u32 %v4222_v33, %v4221_v46  ;;  %v4268_v40 = vld [vmem:[#allocation3 + $0x14] ss:$144 sm:$0x30] }
 0x3db   :  { %10499 = vmatprep.subr.bf16.mxu1 %v11340_v24  ;;  %10508 = vmatpush3.bf16.msra.mxu0 %v11153_v60  ;;  %v4260_v0 = vld [vmem:[#allocation3 + $0x493] ss:$144 sm:$0x30]  ;;  %v4267_v38 = vor.u32 %v4266_v3, %v4265_v2  ;;  %v4270_v26 = vld [vmem:[#allocation3 + $0x14] ss:$144 sm:$0xc0]  ;;  %v4255_v53 = vor.u32 %v4254_v10, %v4253_v50  ;;  %v4281_v57 = vmax.f32 %v4231_v23, %v4247_v51 }
 0x3dc   :  { %v4262_v1 = vld [vmem:[#allocation3 + $0x493] ss:$144 sm:$0xc0]  ;;  %10509 = vmatprep.subr.bf16.mxu0 %v11340_v24  ;;  %10523 = vmatprep.mubr.msk.bf16.mxu0 %vm11341_vm10, %v11340_v24  ;;  %v4239_v19 = vor.u32 %v4238_v16, %v4237_v56  ;;  %v4261_v20 = vor.u32 %v4260_v0, %v4259_v37  ;;  %v4273_v39 = vld [vmem:[#allocation3 + $0x494] ss:$144 sm:$0x3] }
 0x3dd   :  { %v4274_v11 = vld [vmem:[#allocation3 + $0x494] ss:$144 sm:$0xc]  ;;  %v4269_v29 = vor.u32 %v4268_v40, %v4267_v38  ;;  %v11155_v41 = vld [vmem:[%s13854_s5 + $0x130] sm:$0xff]   ;;  %v11159_v18 = vld [vmem:[%s13854_s5 + $0x120] sm:$0xff]  }
 0x3de   :  { %10500 = vmatpush3.bf16.msra.mxu1 %v11150_v42  ;;  %v4275_v42 = vor.u32 %v4274_v11, %v4273_v39  ;;  %v4276_v63 = vld [vmem:[#allocation3 + $0x494] ss:$144 sm:$0x30]  ;;  %v4263_v36 = vor.u32 %v4262_v1, %v4261_v20  ;;  %v4280_v15 = vmax.f32 %v4223_v44, %v4239_v19  ;;  %v11156_v59 = vld [vmem:[%s13854_s5 + $0x170] sm:$0xff]   ;;  %v11160_v62 = vld [vmem:[%s13854_s5 + $0x160] sm:$0xff]  }
 0x3df   :  { %10501 = vmatprep.subr.bf16.mxu1 %v11340_v24  ;;  %v4278_v7 = vld [vmem:[#allocation3 + $0x494] ss:$144 sm:$0xc0]  ;;  %v4271_v54 = vor.u32 %v4270_v26, %v4269_v29  ;;  %10510 = vmatpush3.bf16.msra.mxu0 %v11155_v41  ;;  %v11163_v13 = vld [vmem:[%s13854_s5 + $0x110] sm:$0xff]   ;;  %v11167_v35 = vld [vmem:[%s13854_s5 + $0x100] sm:$0xff]  }
 0x3e0   :  { %v11157_v9 = vld [vmem:[%s13854_s5 + $0x128] sm:$0xff]   ;;  %10511 = vmatprep.subr.bf16.mxu0 %v11340_v24  ;;  %v11154_v22 = vld [vmem:[%s13854_s5 + $0x178] sm:$0xff]   ;;  %v4396_v43 = vld [vmem:[#allocation3 + $0x8] ss:$144 sm:$0x3] }
 0x3e1   :  { %v4282_v55 = vmax.f32 %v4255_v53, %v4271_v54  ;;  %v11161_v61 = vld [vmem:[%s13854_s5 + $0x118] sm:$0xff]   ;;  %v11158_v30 = vld [vmem:[%s13854_s5 + $0x168] sm:$0xff]   ;;  %v4397_v34 = vld [vmem:[#allocation3 + $0x8] ss:$144 sm:$0xc] }
 0x3e2   :  { %10502 = vmatpush3.bf16.msra.mxu1 %v11152_v5  ;;  %v4277_v5 = vor.u32 %v4276_v63, %v4275_v42  ;;  %v11165_v31 = vld [vmem:[%s13854_s5 + $0x108] sm:$0xff]   ;;  %v4404_v49 = vld [vmem:[#allocation3 + $0x488] ss:$144 sm:$0x3]  ;;  %v4398_v33 = vor.u32 %v4397_v34, %v4396_v43  ;;  %v11162_v21 = vld [vmem:[%s13854_s5 + $0x158] sm:$0xff]  }
 0x3e3   :  { %10527 = vmatprep.subr.bf16.mxu1 %v11340_v24  ;;  %v4284_v17 = vmax.f32 %v4280_v15, %v4282_v55  ;;  %10512 = vmatpush3.bf16.msra.mxu0 %v11157_v9  ;;  %v4405_v48 = vld [vmem:[#allocation3 + $0x488] ss:$144 sm:$0xc]  ;;  %v4412_v52 = vld [vmem:[#allocation3 + $0x9] ss:$144 sm:$0x3] }
 0x3e4   :  { %v4279_v14 = vor.u32 %v4278_v7, %v4277_v5  ;;  %10513 = vmatprep.subr.bf16.mxu0 %v11340_v24  ;;  %v4413_v28 = vld [vmem:[#allocation3 + $0x9] ss:$144 sm:$0xc]  ;;  %v4399_v45 = vld [vmem:[#allocation3 + $0x8] ss:$144 sm:$0x30]  ;;  %v4406_v56 = vor.u32 %v4405_v48, %v4404_v49 }
 0x3e5   :  { %v4414_v12 = vor.u32 %v4413_v28, %v4412_v52  ;;  %v4415_v46 = vld [vmem:[#allocation3 + $0x9] ss:$144 sm:$0x30]  ;;  %v4407_v25 = vld [vmem:[#allocation3 + $0x488] ss:$144 sm:$0x30]  ;;  %v4400_v10 = vor.u32 %v4399_v45, %v4398_v33 }
 0x3e6   :  { %v4283_v27 = vmax.f32 %v4263_v36, %v4279_v14  ;;  %v4420_v16 = vld [vmem:[#allocation3 + $0x489] ss:$144 sm:$0x3]  ;;  %v4401_v32 = vld [vmem:[#allocation3 + $0x8] ss:$144 sm:$0xc0]  ;;  %v4408_v44 = vor.u32 %v4407_v25, %v4406_v56 }
 0x3e7   :  { %10514 = vmatpush3.bf16.msra.mxu0 %v11159_v18  ;;  %v4421_v6 = vld [vmem:[#allocation3 + $0x489] ss:$144 sm:$0xc]  ;;  %v4428_v8 = vld [vmem:[#allocation3 + $0x15] ss:$144 sm:$0x3]  ;;  %v4416_v0 = vor.u32 %v4415_v46, %v4414_v12  ;;  %v4402_v63 = vor.u32 %v4401_v32, %v4400_v10 }
 0x3e8   :  { %v4285_v47 = vmax.f32 %v4281_v57, %v4283_v27  ;;  %10515 = vmatprep.subr.bf16.mxu0 %v11340_v24  ;;  %v4422_v58 = vor.u32 %v4421_v6, %v4420_v16  ;;  %v4423_v4 = vld [vmem:[#allocation3 + $0x489] ss:$144 sm:$0x30]  ;;  %v4429_v50 = vld [vmem:[#allocation3 + $0x15] ss:$144 sm:$0xc] }
 0x3e9   :  { %v4409_v37 = vld [vmem:[#allocation3 + $0x488] ss:$144 sm:$0xc0]  ;;  %v4417_v1 = vld [vmem:[#allocation3 + $0x9] ss:$144 sm:$0xc0]  ;;  %v4430_v2 = vor.u32 %v4429_v50, %v4428_v8 }
 0x3ea   :  { %v4286_v60 = vpack.c.bf16 %v4285_v47, %v4284_v17  ;;  %v4431_v3 = vld [vmem:[#allocation3 + $0x15] ss:$144 sm:$0x30]  ;;  %v4425_v19 = vld [vmem:[#allocation3 + $0x489] ss:$144 sm:$0xc0]  ;;  %v4424_v26 = vor.u32 %v4423_v4, %v4422_v58  ;;  %v4418_v7 = vor.u32 %v4417_v1, %v4416_v0  ;;  %v4410_v41 = vor.u32 %v4409_v37, %v4408_v44 }
 0x3eb   :  { %10516 = vmatpush3.bf16.msra.mxu0 %v11161_v61  ;;  %v4436_v20 = vld [vmem:[#allocation3 + $0x495] ss:$144 sm:$0x3]  ;;  %v11164_v40 = vld [vmem:[%s13854_s5 + $0x150] sm:$0xff]   ;;  %v4432_v23 = vor.u32 %v4431_v3, %v4430_v2 }
 0x3ec   :  { %10504 = vmatmul.mubr.bf16.vlgmr.msra.gmra.mxu1 %v4286_v60  ;;  %10517 = vmatprep.subr.bf16.mxu0 %v11340_v24  ;;  %v4437_v38 = vld [vmem:[#allocation3 + $0x495] ss:$144 sm:$0xc]  ;;  %v4444_v29 = vld [vmem:[#allocation3 + $0x16] ss:$144 sm:$0x3]  ;;  %v4426_v55 = vor.u32 %v4425_v19, %v4424_v26 }
 0x3ed   :  { %10528 = vmatpush3.bf16.msra.mxu1 %v11154_v22  ;;  %10543 = vmatprep.mubr.msk.bf16.mxu1 %vm11341_vm10, %v11340_v24  ;;  %v4433_v39 = vld [vmem:[#allocation3 + $0x15] ss:$144 sm:$0xc0]  ;;  %v4438_v11 = vor.u32 %v4437_v38, %v4436_v20  ;;  %v4445_v42 = vld [vmem:[#allocation3 + $0x16] ss:$144 sm:$0xc] }
 0x3ee   :  { %10529 = vmatprep.subr.bf16.mxu1 %v11340_v24  ;;  %v4439_v51 = vld [vmem:[#allocation3 + $0x495] ss:$144 sm:$0x30]  ;;  %v4446_v54 = vor.u32 %v4445_v42, %v4444_v29  ;;  %v4447_v5 = vld [vmem:[#allocation3 + $0x16] ss:$144 sm:$0x30]  ;;  %v4434_v9 = vor.u32 %v4433_v39, %v4432_v23  ;;  %v4460_v43 = vmax.f32 %v4410_v41, %v4426_v55 }
 0x3ef   :  { %10518 = vmatpush3.bf16.msra.mxu0 %v11163_v13  ;;  %v4441_v53 = vld [vmem:[#allocation3 + $0x495] ss:$144 sm:$0xc0]  ;;  %v4440_v36 = vor.u32 %v4439_v51, %v4438_v11  ;;  %v4449_v15 = vld [vmem:[#allocation3 + $0x16] ss:$144 sm:$0xc0]  ;;  %v4459_v13 = vmax.f32 %v4402_v63, %v4418_v7 }
 0x3f0   :  { %10519 = vmatprep.subr.bf16.mxu0 %v11340_v24  ;;  %v4452_v14 = vld [vmem:[#allocation3 + $0x496] ss:$144 sm:$0x3]  ;;  %v4448_v27 = vor.u32 %v4447_v5, %v4446_v54  ;;  %v4576_v49 = vld [vmem:[#allocation3 + $0x1a] ss:$144 sm:$0xc] }
 0x3f1   :  { %10530 = vmatpush3.bf16.msra.mxu1 %v11156_v59  ;;  %v4453_v57 = vld [vmem:[#allocation3 + $0x496] ss:$144 sm:$0xc]  ;;  %v4442_v60 = vor.u32 %v4441_v53, %v4440_v36  ;;  %v4583_v48 = vld [vmem:[#allocation3 + $0x49a] ss:$144 sm:$0x3] }
 0x3f2   :  { %10531 = vmatprep.subr.bf16.mxu1 %v11340_v24  ;;  %v4454_v17 = vor.u32 %v4453_v57, %v4452_v14  ;;  %v4455_v47 = vld [vmem:[#allocation3 + $0x496] ss:$144 sm:$0x30]  ;;  %v4450_v61 = vor.u32 %v4449_v15, %v4448_v27  ;;  %v4584_v52 = vld [vmem:[#allocation3 + $0x49a] ss:$144 sm:$0xc] }
 0x3f3   :  { %10520 = vmatpush3.bf16.msra.mxu0 %v11165_v31  ;;  %v4457_v18 = vld [vmem:[#allocation3 + $0x496] ss:$144 sm:$0xc0]  ;;  %v4591_v45 = vld [vmem:[#allocation3 + $0x1b] ss:$144 sm:$0x3]  ;;  %v4585_v25 = vor.u32 %v4584_v52, %v4583_v48 }
 0x3f4   :  { %10521 = vmatprep.subr.bf16.mxu0 %v11340_v24  ;;  %v11166_v22 = vld [vmem:[%s13854_s5 + $0x148] sm:$0xff]   ;;  %v4456_v59 = vor.u32 %v4455_v47, %v4454_v17  ;;  %v4461_v34 = vmax.f32 %v4434_v9, %v4450_v61  ;;  %v4592_v12 = vld [vmem:[#allocation3 + $0x1b] ss:$144 sm:$0xc]  ;;  %v11169_v46 = vld [vmem:[%s13854_s5 + $0x1b8] sm:$0xff]  }
 0x3f5   :  { %10532 = vmatpush3.bf16.msra.mxu1 %v11158_v30  ;;  %v11168_v30 = vld [vmem:[%s13854_s5 + $0x140] sm:$0xff]   ;;  %v4593_v16 = vor.u32 %v4592_v12, %v4591_v45  ;;  %v4607_v0 = vld [vmem:[#allocation3 + $0x27] ss:$144 sm:$0x3] }
 0x3f6   :  { %10533 = vmatprep.subr.bf16.mxu1 %v11340_v24  ;;  %v4458_v31 = vor.u32 %v4457_v18, %v4456_v59  ;;  %v4463_v33 = vmax.f32 %v4459_v13, %v4461_v34  ;;  %v4578_v56 = vld [vmem:[#allocation3 + $0x1a] ss:$144 sm:$0x30]  ;;  %v4594_v6 = vld [vmem:[#allocation3 + $0x1b] ss:$144 sm:$0x30] }
 0x3f7   :  { %10522 = vmatpush3.bf16.msra.mxu0 %v11167_v35  ;;  %v4599_v58 = vld [vmem:[#allocation3 + $0x49b] ss:$144 sm:$0x3]  ;;  %v4586_v32 = vld [vmem:[#allocation3 + $0x49a] ss:$144 sm:$0x30]  ;;  %v4595_v44 = vor.u32 %v4594_v6, %v4593_v16 }
 0x3f8   :  { %10547 = vmatprep.subr.bf16.mxu0 %v11340_v24  ;;  %v4462_v28 = vmax.f32 %v4442_v60, %v4458_v31  ;;  %v4600_v4 = vld [vmem:[#allocation3 + $0x49b] ss:$144 sm:$0xc]  ;;  %v4580_v37 = vld [vmem:[#allocation3 + $0x1a] ss:$144 sm:$0xc0] }
 0x3f9   :  { %10534 = vmatpush3.bf16.msra.mxu1 %v11160_v62  ;;  %v4575_v62 = vld [vmem:[#allocation3 + $0x1a] ss:$144 sm:$0x3]  ;;  %v4601_v8 = vor.u32 %v4600_v4, %v4599_v58  ;;  %v4602_v50 = vld [vmem:[#allocation3 + $0x49b] ss:$144 sm:$0x30] }
 0x3fa   :  { %10535 = vmatprep.subr.bf16.mxu1 %v11340_v24  ;;  %v4577_v35 = vor.u32 %v4576_v49, %v4575_v62  ;;  %v4608_v1 = vld [vmem:[#allocation3 + $0x27] ss:$144 sm:$0xc]  ;;  %v4588_v3 = vld [vmem:[#allocation3 + $0x49a] ss:$144 sm:$0xc0] }
 0x3fb   :  { %v4596_v19 = vld [vmem:[#allocation3 + $0x1b] ss:$144 sm:$0xc0]  ;;  %v4609_v20 = vor.u32 %v4608_v1, %v4607_v0  ;;  %v4610_v38 = vld [vmem:[#allocation3 + $0x27] ss:$144 sm:$0x30]  ;;  %v4603_v11 = vor.u32 %v4602_v50, %v4601_v8 }
 0x3fc   :  { %v4579_v2 = vor.u32 %v4578_v56, %v4577_v35  ;;  %v4604_v26 = vld [vmem:[#allocation3 + $0x49b] ss:$144 sm:$0xc0]  ;;  %v4615_v23 = vld [vmem:[#allocation3 + $0x4a7] ss:$144 sm:$0x3]  ;;  %v4597_v5 = vor.u32 %v4596_v19, %v4595_v44 }
 0x3fd   :  { %10536 = vmatpush3.bf16.msra.mxu1 %v11162_v21  ;;  %v4464_v21 = vmax.f32 %v4460_v43, %v4462_v28  ;;  %v4616_v39 = vld [vmem:[#allocation3 + $0x4a7] ss:$144 sm:$0xc]  ;;  %v4611_v51 = vor.u32 %v4610_v38, %v4609_v20  ;;  %v4623_v7 = vld [vmem:[#allocation3 + $0x28] ss:$144 sm:$0x3]  ;;  %v4605_v17 = vor.u32 %v4604_v26, %v4603_v11 }
 0x3fe   :  { %10537 = vmatprep.subr.bf16.mxu1 %v11340_v24  ;;  %v4612_v53 = vld [vmem:[#allocation3 + $0x27] ss:$144 sm:$0xc0]  ;;  %v4617_v29 = vor.u32 %v4616_v39, %v4615_v23  ;;  %v4624_v36 = vld [vmem:[#allocation3 + $0x28] ss:$144 sm:$0xc]  ;;  %v4581_v54 = vor.u32 %v4580_v37, %v4579_v2 }
 0x3ff   :  { %v4465_v10 = vpack.c.bf16 %v4464_v21, %v4463_v33  ;;  %v4618_v42 = vld [vmem:[#allocation3 + $0x4a7] ss:$144 sm:$0x30]  ;;  %v4625_v41 = vor.u32 %v4624_v36, %v4623_v7  ;;  %v4626_v14 = vld [vmem:[#allocation3 + $0x28] ss:$144 sm:$0x30]  ;;  %v4613_v47 = vor.u32 %v4612_v53, %v4611_v51 }
 0x400   :  { %v4620_v63 = vld [vmem:[#allocation3 + $0x4a7] ss:$144 sm:$0xc0]  ;;  %v4619_v15 = vor.u32 %v4618_v42, %v4617_v29  ;;  %v4628_v57 = vld [vmem:[#allocation3 + $0x28] ss:$144 sm:$0xc0]  ;;  %v4638_v31 = vmax.f32 %v4581_v54, %v4597_v5 }
 0x401   :  { %10538 = vmatpush3.bf16.msra.mxu1 %v11164_v40  ;;  %10524 = vmatmul.mubr.bf16.vlgmr.msra.gmra.mxu0 %v4465_v10  ;;  %v4587_v40 = vor.u32 %v4586_v32, %v4585_v25  ;;  %v4631_v9 = vld [vmem:[#allocation3 + $0x4a8] ss:$144 sm:$0x3]  ;;  %v4627_v18 = vor.u32 %v4626_v14, %v4625_v41  ;;  %v11173_v48 = vld [vmem:[%s13854_s5 + $0x1a8] sm:$0xff]   ;;  %v11170_v12 = vld [vmem:[%s13854_s5 + $0x1f8] sm:$0xff]  }
 0x402   :  { %10539 = vmatprep.subr.bf16.mxu1 %v11340_v24  ;;  %10548 = vmatpush3.bf16.msra.mxu0 %v11169_v46  ;;  %v4632_v27 = vld [vmem:[#allocation3 + $0x4a8] ss:$144 sm:$0xc]  ;;  %v4621_v59 = vor.u32 %v4620_v63, %v4619_v15  ;;  %v11177_v35 = vld [vmem:[%s13854_s5 + $0x198] sm:$0xff]   ;;  %v11174_v6 = vld [vmem:[%s13854_s5 + $0x1e8] sm:$0xff]  }
 0x403   :  { %10549 = vmatprep.subr.bf16.mxu0 %v11340_v24  ;;  %10563 = vmatprep.mubr.msk.bf16.mxu0 %vm11341_vm10, %v11340_v24  ;;  %v4589_v55 = vor.u32 %v4588_v3, %v4587_v40  ;;  %v4634_v60 = vld [vmem:[#allocation3 + $0x4a8] ss:$144 sm:$0x30]  ;;  %v4629_v13 = vor.u32 %v4628_v57, %v4627_v18  ;;  %v11181_v21 = vld [vmem:[%s13854_s5 + $0x188] sm:$0xff]   ;;  %v11178_v38 = vld [vmem:[%s13854_s5 + $0x1d8] sm:$0xff]  }
 0x404   :  { %v4636_v61 = vld [vmem:[#allocation3 + $0x4a8] ss:$144 sm:$0xc0]  ;;  %v4754_v25 = vld [vmem:[#allocation3 + $0x1c] ss:$144 sm:$0x3] }
 0x405   :  { %10540 = vmatpush3.bf16.msra.mxu1 %v11166_v22  ;;  %v4633_v22 = vor.u32 %v4632_v27, %v4631_v9  ;;  %v11171_v43 = vld [vmem:[%s13854_s5 + $0x1b0] sm:$0xff]   ;;  %v4639_v62 = vmax.f32 %v4589_v55, %v4605_v17  ;;  %v4640_v49 = vmax.f32 %v4613_v47, %v4629_v13  ;;  %v11175_v45 = vld [vmem:[%s13854_s5 + $0x1a0] sm:$0xff]  }
 0x406   :  { %10541 = vmatprep.subr.bf16.mxu1 %v11340_v24  ;;  %10550 = vmatpush3.bf16.msra.mxu0 %v11171_v43  ;;  %v11172_v56 = vld [vmem:[%s13854_s5 + $0x1f0] sm:$0xff]   ;;  %v11176_v4 = vld [vmem:[%s13854_s5 + $0x1e0] sm:$0xff]  }
 0x407   :  { %10551 = vmatprep.subr.bf16.mxu0 %v11340_v24  ;;  %v4642_v28 = vmax.f32 %v4638_v31, %v4640_v49  ;;  %v11179_v16 = vld [vmem:[%s13854_s5 + $0x190] sm:$0xff]   ;;  %v11183_v3 = vld [vmem:[%s13854_s5 + $0x180] sm:$0xff]  }
 0x408   :  { %v4755_v58 = vld [vmem:[#allocation3 + $0x1c] ss:$144 sm:$0xc]  ;;  %v4770_v50 = vld [vmem:[#allocation3 + $0x1d] ss:$144 sm:$0x3] }
 0x409   :  { %10542 = vmatpush3.bf16.msra.mxu1 %v11168_v30  ;;  %v4635_v30 = vor.u32 %v4634_v60, %v4633_v22  ;;  %v4762_v32 = vld [vmem:[#allocation3 + $0x49c] ss:$144 sm:$0x3]  ;;  %v4771_v10 = vld [vmem:[#allocation3 + $0x1d] ss:$144 sm:$0xc]  ;;  %v4756_v37 = vor.u32 %v4755_v58, %v4754_v25 }
 0x40a   :  { %10567 = vmatprep.subr.bf16.mxu1 %v11340_v24  ;;  %10552 = vmatpush3.bf16.msra.mxu0 %v11173_v48  ;;  %v4763_v8 = vld [vmem:[#allocation3 + $0x49c] ss:$144 sm:$0xc]  ;;  %v4772_v1 = vor.u32 %v4771_v10, %v4770_v50  ;;  %v4773_v2 = vld [vmem:[#allocation3 + $0x1d] ss:$144 sm:$0x30] }
 0x40b   :  { %v4637_v34 = vor.u32 %v4636_v61, %v4635_v30  ;;  %10553 = vmatprep.subr.bf16.mxu0 %v11340_v24  ;;  %v4757_v0 = vld [vmem:[#allocation3 + $0x1c] ss:$144 sm:$0x30]  ;;  %v4764_v44 = vor.u32 %v4763_v8, %v4762_v32  ;;  %v4778_v19 = vld [vmem:[#allocation3 + $0x49d] ss:$144 sm:$0x3] }
 0x40c   :  { %v4779_v20 = vld [vmem:[#allocation3 + $0x49d] ss:$144 sm:$0xc]  ;;  %v4765_v40 = vld [vmem:[#allocation3 + $0x49c] ss:$144 sm:$0x30]  ;;  %v4758_v53 = vor.u32 %v4757_v0, %v4756_v37  ;;  %v4774_v42 = vor.u32 %v4773_v2, %v4772_v1 }
 0x40d   :  { %v4641_v52 = vmax.f32 %v4621_v59, %v4637_v34  ;;  %v4780_v26 = vor.u32 %v4779_v20, %v4778_v19  ;;  %v4781_v23 = vld [vmem:[#allocation3 + $0x49d] ss:$144 sm:$0x30]  ;;  %v4759_v39 = vld [vmem:[#allocation3 + $0x1c] ss:$144 sm:$0xc0]  ;;  %v4766_v54 = vor.u32 %v4765_v40, %v4764_v44 }
 0x40e   :  { %10554 = vmatpush3.bf16.msra.mxu0 %v11175_v45  ;;  %v4786_v11 = vld [vmem:[#allocation3 + $0x29] ss:$144 sm:$0x3]  ;;  %v4767_v29 = vld [vmem:[#allocation3 + $0x49c] ss:$144 sm:$0xc0]  ;;  %v4760_v60 = vor.u32 %v4759_v39, %v4758_v53 }
 0x40f   :  { %v4643_v33 = vmax.f32 %v4639_v62, %v4641_v52  ;;  %10555 = vmatprep.subr.bf16.mxu0 %v11340_v24  ;;  %v4787_v51 = vld [vmem:[#allocation3 + $0x29] ss:$144 sm:$0xc]  ;;  %v4775_v63 = vld [vmem:[#allocation3 + $0x1d] ss:$144 sm:$0xc0]  ;;  %v4782_v57 = vor.u32 %v4781_v23, %v4780_v26  ;;  %v4768_v43 = vor.u32 %v4767_v29, %v4766_v54 }
 0x410   :  { %v4788_v7 = vor.u32 %v4787_v51, %v4786_v11  ;;  %v4789_v36 = vld [vmem:[#allocation3 + $0x29] ss:$144 sm:$0x30]  ;;  %v4783_v5 = vld [vmem:[#allocation3 + $0x49d] ss:$144 sm:$0xc0]  ;;  %v4776_v61 = vor.u32 %v4775_v63, %v4774_v42 }
 0x411   :  { %v4644_v46 = vpack.c.bf16 %v4643_v33, %v4642_v28  ;;  %v4794_v15 = vld [vmem:[#allocation3 + $0x4a9] ss:$144 sm:$0x3]  ;;  %v4802_v18 = vld [vmem:[#allocation3 + $0x2a] ss:$144 sm:$0x3]  ;;  %v4784_v49 = vor.u32 %v4783_v5, %v4782_v57 }
 0x412   :  { %10556 = vmatpush3.bf16.msra.mxu0 %v11177_v35  ;;  %v4795_v41 = vld [vmem:[#allocation3 + $0x4a9] ss:$144 sm:$0xc]  ;;  %v4790_v55 = vor.u32 %v4789_v36, %v4788_v7  ;;  %v4803_v22 = vld [vmem:[#allocation3 + $0x2a] ss:$144 sm:$0xc] }
 0x413   :  { %10544 = vmatmul.mubr.bf16.vlgmr.msra.gmra.mxu1 %v4644_v46  ;;  %10557 = vmatprep.subr.bf16.mxu0 %v11340_v24  ;;  %v11180_v14 = vld [vmem:[%s13854_s5 + $0x1d0] sm:$0xff]   ;;  %v4796_v27 = vor.u32 %v4795_v41, %v4794_v15  ;;  %v4804_v13 = vor.u32 %v4803_v22, %v4802_v18  ;;  %v4818_v25 = vmax.f32 %v4768_v43, %v4784_v49  ;;  %v11185_v2 = vld [vmem:[%s13854_s5 + $0x238] sm:$0xff]  }
 0x414   :  { %10568 = vmatpush3.bf16.msra.mxu1 %v11170_v12  ;;  %10583 = vmatprep.mubr.msk.bf16.mxu1 %vm11341_vm10, %v11340_v24  ;;  %v4791_v9 = vld [vmem:[#allocation3 + $0x29] ss:$144 sm:$0xc0]  ;;  %v4805_v30 = vld [vmem:[#allocation3 + $0x2a] ss:$144 sm:$0x30] }
 0x415   :  { %10569 = vmatprep.subr.bf16.mxu1 %v11340_v24  ;;  %v4797_v17 = vld [vmem:[#allocation3 + $0x4a9] ss:$144 sm:$0x30]  ;;  %v4807_v31 = vld [vmem:[#allocation3 + $0x2a] ss:$144 sm:$0xc0]  ;;  %v4792_v48 = vor.u32 %v4791_v9, %v4790_v55  ;;  %v4806_v52 = vor.u32 %v4805_v30, %v4804_v13 }
 0x416   :  { %10558 = vmatpush3.bf16.msra.mxu0 %v11179_v16  ;;  %v4799_v47 = vld [vmem:[#allocation3 + $0x4a9] ss:$144 sm:$0xc0]  ;;  %v4798_v59 = vor.u32 %v4797_v17, %v4796_v27  ;;  %v4810_v34 = vld [vmem:[#allocation3 + $0x4aa] ss:$144 sm:$0x3]  ;;  %v4817_v16 = vmax.f32 %v4760_v60, %v4776_v61 }
 0x417   :  { %10559 = vmatprep.subr.bf16.mxu0 %v11340_v24  ;;  %v4811_v62 = vld [vmem:[#allocation3 + $0x4aa] ss:$144 sm:$0xc]  ;;  %v11182_v12 = vld [vmem:[%s13854_s5 + $0x1c8] sm:$0xff]   ;;  %v4808_v35 = vor.u32 %v4807_v31, %v4806_v52 }
 0x418   :  { %10570 = vmatpush3.bf16.msra.mxu1 %v11172_v56  ;;  %v4812_v28 = vor.u32 %v4811_v62, %v4810_v34  ;;  %v4813_v33 = vld [vmem:[#allocation3 + $0x4aa] ss:$144 sm:$0x30]  ;;  %v4800_v46 = vor.u32 %v4799_v47, %v4798_v59  ;;  %v4934_v32 = vld [vmem:[#allocation3 + $0x1e] ss:$144 sm:$0xc] }
 0x419   :  { %10571 = vmatprep.subr.bf16.mxu1 %v11340_v24  ;;  %v4815_v45 = vld [vmem:[#allocation3 + $0x4aa] ss:$144 sm:$0xc0]  ;;  %v4819_v58 = vmax.f32 %v4792_v48, %v4808_v35  ;;  %v4941_v8 = vld [vmem:[#allocation3 + $0x49e] ss:$144 sm:$0x3] }
 0x41a   :  { %10560 = vmatpush3.bf16.msra.mxu0 %v11181_v21  ;;  %v4814_v56 = vor.u32 %v4813_v33, %v4812_v28  ;;  %v4942_v50 = vld [vmem:[#allocation3 + $0x49e] ss:$144 sm:$0xc]  ;;  %v4949_v0 = vld [vmem:[#allocation3 + $0x1f] ss:$144 sm:$0x3] }
 0x41b   :  { %10561 = vmatprep.subr.bf16.mxu0 %v11340_v24  ;;  %v4821_v37 = vmax.f32 %v4817_v16, %v4819_v58  ;;  %v4950_v1 = vld [vmem:[#allocation3 + $0x1f] ss:$144 sm:$0xc]  ;;  %v4936_v44 = vld [vmem:[#allocation3 + $0x1e] ss:$144 sm:$0x30]  ;;  %v4943_v40 = vor.u32 %v4942_v50, %v4941_v8 }
 0x41c   :  { %10572 = vmatpush3.bf16.msra.mxu1 %v11174_v6  ;;  %v11184_v6 = vld [vmem:[%s13854_s5 + $0x1c0] sm:$0xff]   ;;  %v4816_v21 = vor.u32 %v4815_v45, %v4814_v56  ;;  %v4951_v19 = vor.u32 %v4950_v1, %v4949_v0  ;;  %v11189_v8 = vld [vmem:[%s13854_s5 + $0x228] sm:$0xff]   ;;  %v11186_v1 = vld [vmem:[%s13854_s5 + $0x278] sm:$0xff]  }
 0x41d   :  { %10573 = vmatprep.subr.bf16.mxu1 %v11340_v24  ;;  %v4952_v20 = vld [vmem:[#allocation3 + $0x1f] ss:$144 sm:$0x30]  ;;  %v4944_v39 = vld [vmem:[#allocation3 + $0x49e] ss:$144 sm:$0x30] }
 0x41e   :  { %10562 = vmatpush3.bf16.msra.mxu0 %v11183_v3  ;;  %v4820_v10 = vmax.f32 %v4800_v46, %v4816_v21  ;;  %v4957_v26 = vld [vmem:[#allocation3 + $0x49f] ss:$144 sm:$0x3]  ;;  %v4938_v29 = vld [vmem:[#allocation3 + $0x1e] ss:$144 sm:$0xc0]  ;;  %v4953_v54 = vor.u32 %v4952_v20, %v4951_v19 }
 0x41f   :  { %10587 = vmatprep.subr.bf16.mxu0 %v11340_v24  ;;  %v4958_v23 = vld [vmem:[#allocation3 + $0x49f] ss:$144 sm:$0xc]  ;;  %v4965_v42 = vld [vmem:[#allocation3 + $0x2b] ss:$144 sm:$0x3] }
 0x420   :  { %10574 = vmatpush3.bf16.msra.mxu1 %v11176_v4  ;;  %v4933_v4 = vld [vmem:[#allocation3 + $0x1e] ss:$144 sm:$0x3]  ;;  %v4959_v11 = vor.u32 %v4958_v23, %v4957_v26  ;;  %v4960_v51 = vld [vmem:[#allocation3 + $0x49f] ss:$144 sm:$0x30] }
 0x421   :  { %10575 = vmatprep.subr.bf16.mxu1 %v11340_v24  ;;  %v4935_v3 = vor.u32 %v4934_v32, %v4933_v4  ;;  %v4966_v63 = vld [vmem:[#allocation3 + $0x2b] ss:$144 sm:$0xc]  ;;  %v4946_v36 = vld [vmem:[#allocation3 + $0x49e] ss:$144 sm:$0xc0] }
 0x422   :  { %v4954_v5 = vld [vmem:[#allocation3 + $0x1f] ss:$144 sm:$0xc0]  ;;  %v4967_v15 = vor.u32 %v4966_v63, %v4965_v42  ;;  %v4968_v41 = vld [vmem:[#allocation3 + $0x2b] ss:$144 sm:$0x30]  ;;  %v4961_v27 = vor.u32 %v4960_v51, %v4959_v11 }
 0x423   :  { %v4937_v7 = vor.u32 %v4936_v44, %v4935_v3  ;;  %v4962_v57 = vld [vmem:[#allocation3 + $0x49f] ss:$144 sm:$0xc0]  ;;  %v4973_v55 = vld [vmem:[#allocation3 + $0x4ab] ss:$144 sm:$0x3]  ;;  %v4955_v30 = vor.u32 %v4954_v5, %v4953_v54 }
 0x424   :  { %10576 = vmatpush3.bf16.msra.mxu1 %v11178_v38  ;;  %v4822_v38 = vmax.f32 %v4818_v25, %v4820_v10  ;;  %v4974_v9 = vld [vmem:[#allocation3 + $0x4ab] ss:$144 sm:$0xc]  ;;  %v4969_v17 = vor.u32 %v4968_v41, %v4967_v15  ;;  %v4981_v61 = vld [vmem:[#allocation3 + $0x2c] ss:$144 sm:$0x3]  ;;  %v4963_v28 = vor.u32 %v4962_v57, %v4961_v27 }
 0x425   :  { %10577 = vmatprep.subr.bf16.mxu1 %v11340_v24  ;;  %v4970_v47 = vld [vmem:[#allocation3 + $0x2b] ss:$144 sm:$0xc0]  ;;  %v4975_v18 = vor.u32 %v4974_v9, %v4973_v55  ;;  %v4982_v59 = vld [vmem:[#allocation3 + $0x2c] ss:$144 sm:$0xc]  ;;  %v4939_v13 = vor.u32 %v4938_v29, %v4937_v7 }
 0x426   :  { %v4823_v53 = vpack.c.bf16 %v4822_v38, %v4821_v37  ;;  %v4976_v22 = vld [vmem:[#allocation3 + $0x4ab] ss:$144 sm:$0x30]  ;;  %v4983_v43 = vor.u32 %v4982_v59, %v4981_v61  ;;  %v4984_v34 = vld [vmem:[#allocation3 + $0x2c] ss:$144 sm:$0x30]  ;;  %v4971_v33 = vor.u32 %v4970_v47, %v4969_v17 }
 0x427   :  { %v4978_v60 = vld [vmem:[#allocation3 + $0x4ab] ss:$144 sm:$0xc0]  ;;  %v4977_v31 = vor.u32 %v4976_v22, %v4975_v18  ;;  %v4986_v62 = vld [vmem:[#allocation3 + $0x2c] ss:$144 sm:$0xc0]  ;;  %v4996_v21 = vmax.f32 %v4939_v13, %v4955_v30 }
 0x428   :  { %10578 = vmatpush3.bf16.msra.mxu1 %v11180_v14  ;;  %10564 = vmatmul.mubr.bf16.vlgmr.msra.gmra.mxu0 %v4823_v53  ;;  %v4945_v14 = vor.u32 %v4944_v39, %v4943_v40  ;;  %v4989_v48 = vld [vmem:[#allocation3 + $0x4ac] ss:$144 sm:$0x3]  ;;  %v4985_v45 = vor.u32 %v4984_v34, %v4983_v43  ;;  %v11193_v3 = vld [vmem:[%s13854_s5 + $0x218] sm:$0xff]   ;;  %v11190_v20 = vld [vmem:[%s13854_s5 + $0x268] sm:$0xff]  }
 0x429   :  { %10579 = vmatprep.subr.bf16.mxu1 %v11340_v24  ;;  %10588 = vmatpush3.bf16.msra.mxu0 %v11185_v2  ;;  %v4990_v52 = vld [vmem:[#allocation3 + $0x4ac] ss:$144 sm:$0xc]  ;;  %v4979_v56 = vor.u32 %v4978_v60, %v4977_v31  ;;  %v11197_v38 = vld [vmem:[%s13854_s5 + $0x208] sm:$0xff]   ;;  %v11194_v41 = vld [vmem:[%s13854_s5 + $0x258] sm:$0xff]  }
 0x42a   :  { %10589 = vmatprep.subr.bf16.mxu0 %v11340_v24  ;;  %10603 = vmatprep.mubr.msk.bf16.mxu0 %vm11341_vm10, %v11340_v24  ;;  %v4947_v49 = vor.u32 %v4946_v36, %v4945_v14  ;;  %v4992_v46 = vld [vmem:[#allocation3 + $0x4ac] ss:$144 sm:$0x30]  ;;  %v4987_v16 = vor.u32 %v4986_v62, %v4985_v45  ;;  %v5112_v40 = vld [vmem:[#allocation3 + $0x20] ss:$144 sm:$0x3] }
 0x42b   :  { %v4994_v35 = vld [vmem:[#allocation3 + $0x4ac] ss:$144 sm:$0xc0]  ;;  %v5113_v26 = vld [vmem:[#allocation3 + $0x20] ss:$144 sm:$0xc] }
 0x42c   :  { %10580 = vmatpush3.bf16.msra.mxu1 %v11182_v12  ;;  %v4991_v12 = vor.u32 %v4990_v52, %v4989_v48  ;;  %v11187_v25 = vld [vmem:[%s13854_s5 + $0x230] sm:$0xff]   ;;  %v4997_v4 = vmax.f32 %v4947_v49, %v4963_v28  ;;  %v4998_v32 = vmax.f32 %v4971_v33, %v4987_v16  ;;  %v11191_v0 = vld [vmem:[%s13854_s5 + $0x220] sm:$0xff]   ;;  %v5120_v39 = vld [vmem:[#allocation3 + $0x4a0] ss:$144 sm:$0x3]  ;;  %v5114_v29 = vor.u32 %v5113_v26, %v5112_v40 }
 0x42d   :  { %10581 = vmatprep.subr.bf16.mxu1 %v11340_v24  ;;  %10590 = vmatpush3.bf16.msra.mxu0 %v11187_v25  ;;  %v11188_v44 = vld [vmem:[%s13854_s5 + $0x270] sm:$0xff]   ;;  %v11192_v23 = vld [vmem:[%s13854_s5 + $0x260] sm:$0xff]   ;;  %v5121_v11 = vld [vmem:[#allocation3 + $0x4a0] ss:$144 sm:$0xc] }
 0x42e   :  { %10591 = vmatprep.subr.bf16.mxu0 %v11340_v24  ;;  %v5000_v10 = vmax.f32 %v4996_v21, %v4998_v32  ;;  %v11195_v19 = vld [vmem:[%s13854_s5 + $0x210] sm:$0xff]   ;;  %v5128_v51 = vld [vmem:[#allocation3 + $0x21] ss:$144 sm:$0x3]  ;;  %v11199_v36 = vld [vmem:[%s13854_s5 + $0x200] sm:$0xff]   ;;  %v5122_v54 = vor.u32 %v5121_v11, %v5120_v39 }
 0x42f   :  { %v5129_v53 = vld [vmem:[#allocation3 + $0x21] ss:$144 sm:$0xc]  ;;  %v5115_v42 = vld [vmem:[#allocation3 + $0x20] ss:$144 sm:$0x30] }
 0x430   :  { %10582 = vmatpush3.bf16.msra.mxu1 %v11184_v6  ;;  %v4993_v6 = vor.u32 %v4992_v46, %v4991_v12  ;;  %v5130_v63 = vor.u32 %v5129_v53, %v5128_v51  ;;  %v5131_v7 = vld [vmem:[#allocation3 + $0x21] ss:$144 sm:$0x30]  ;;  %v5123_v14 = vld [vmem:[#allocation3 + $0x4a0] ss:$144 sm:$0x30]  ;;  %v5116_v47 = vor.u32 %v5115_v42, %v5114_v29 }
 0x431   :  { %10607 = vmatprep.subr.bf16.mxu1 %v11340_v24  ;;  %10592 = vmatpush3.bf16.msra.mxu0 %v11189_v8  ;;  %v5136_v5 = vld [vmem:[#allocation3 + $0x4a1] ss:$144 sm:$0x3]  ;;  %v5117_v9 = vld [vmem:[#allocation3 + $0x20] ss:$144 sm:$0xc0]  ;;  %v5124_v13 = vor.u32 %v5123_v14, %v5122_v54 }
 0x432   :  { %v4995_v58 = vor.u32 %v4994_v35, %v4993_v6  ;;  %10593 = vmatprep.subr.bf16.mxu0 %v11340_v24  ;;  %v5137_v15 = vld [vmem:[#allocation3 + $0x4a1] ss:$144 sm:$0xc]  ;;  %v5144_v27 = vld [vmem:[#allocation3 + $0x2d] ss:$144 sm:$0x3]  ;;  %v5132_v22 = vor.u32 %v5131_v7, %v5130_v63  ;;  %v5118_v46 = vor.u32 %v5117_v9, %v5116_v47 }
 0x433   :  { %v5138_v57 = vor.u32 %v5137_v15, %v5136_v5  ;;  %v5139_v55 = vld [vmem:[#allocation3 + $0x4a1] ss:$144 sm:$0x30]  ;;  %v5145_v17 = vld [vmem:[#allocation3 + $0x2d] ss:$144 sm:$0xc] }
 0x434   :  { %v4999_v50 = vmax.f32 %v4979_v56, %v4995_v58  ;;  %v5125_v18 = vld [vmem:[#allocation3 + $0x4a0] ss:$144 sm:$0xc0]  ;;  %v5133_v60 = vld [vmem:[#allocation3 + $0x21] ss:$144 sm:$0xc0]  ;;  %v5146_v61 = vor.u32 %v5145_v17, %v5144_v27 }
 0x435   :  { %10594 = vmatpush3.bf16.msra.mxu0 %v11191_v0  ;;  %v5147_v59 = vld [vmem:[#allocation3 + $0x2d] ss:$144 sm:$0x30]  ;;  %v5141_v30 = vld [vmem:[#allocation3 + $0x4a1] ss:$144 sm:$0xc0]  ;;  %v5140_v62 = vor.u32 %v5139_v55, %v5138_v57  ;;  %v5134_v35 = vor.u32 %v5133_v60, %v5132_v22  ;;  %v5126_v25 = vor.u32 %v5125_v18, %v5124_v13 }
 0x436   :  { %v5001_v37 = vmax.f32 %v4997_v4, %v4999_v50  ;;  %10595 = vmatprep.subr.bf16.mxu0 %v11340_v24  ;;  %v5152_v31 = vld [vmem:[#allocation3 + $0x4ad] ss:$144 sm:$0x3]  ;;  %v5148_v49 = vor.u32 %v5147_v59, %v5146_v61  ;;  %v5160_v45 = vld [vmem:[#allocation3 + $0x2e] ss:$144 sm:$0x3] }
 0x437   :  { %v5153_v43 = vld [vmem:[#allocation3 + $0x4ad] ss:$144 sm:$0xc]  ;;  %v5161_v12 = vld [vmem:[#allocation3 + $0x2e] ss:$144 sm:$0xc]  ;;  %v5142_v32 = vor.u32 %v5141_v30, %v5140_v62 }
 0x438   :  { %v5002_v2 = vpack.c.bf16 %v5001_v37, %v5000_v10  ;;  %v11196_v34 = vld [vmem:[%s13854_s5 + $0x250] sm:$0xff]   ;;  %v5154_v52 = vor.u32 %v5153_v43, %v5152_v31  ;;  %v5162_v16 = vor.u32 %v5161_v12, %v5160_v45  ;;  %v5292_v39 = vld [vmem:[#allocation3 + $0x22] ss:$144 sm:$0xc] }
 0x439   :  { %10596 = vmatpush3.bf16.msra.mxu0 %v11193_v3  ;;  %v5149_v48 = vld [vmem:[#allocation3 + $0x2d] ss:$144 sm:$0xc0]  ;;  %v5163_v6 = vld [vmem:[#allocation3 + $0x2e] ss:$144 sm:$0x30]  ;;  %v5176_v40 = vmax.f32 %v5126_v25, %v5142_v32 }
 0x43a   :  { %10584 = vmatmul.mubr.bf16.vlgmr.msra.gmra.mxu1 %v5002_v2  ;;  %10597 = vmatprep.subr.bf16.mxu0 %v11340_v24  ;;  %v5155_v28 = vld [vmem:[#allocation3 + $0x4ad] ss:$144 sm:$0x30]  ;;  %v5165_v21 = vld [vmem:[#allocation3 + $0x2e] ss:$144 sm:$0xc0]  ;;  %v5150_v8 = vor.u32 %v5149_v48, %v5148_v49  ;;  %v5164_v50 = vor.u32 %v5163_v6, %v5162_v16 }
 0x43b   :  { %10608 = vmatpush3.bf16.msra.mxu1 %v11186_v1  ;;  %10623 = vmatprep.mubr.msk.bf16.mxu1 %vm11341_vm10, %v11340_v24  ;;  %v5157_v33 = vld [vmem:[#allocation3 + $0x4ad] ss:$144 sm:$0xc0]  ;;  %v5156_v56 = vor.u32 %v5155_v28, %v5154_v52  ;;  %v5168_v58 = vld [vmem:[#allocation3 + $0x4ae] ss:$144 sm:$0x3] }
 0x43c   :  { %10609 = vmatprep.subr.bf16.mxu1 %v11340_v24  ;;  %v5169_v4 = vld [vmem:[#allocation3 + $0x4ae] ss:$144 sm:$0xc]  ;;  %v11198_v1 = vld [vmem:[%s13854_s5 + $0x248] sm:$0xff]   ;;  %v5166_v3 = vor.u32 %v5165_v21, %v5164_v50  ;;  %v11201_v7 = vld [vmem:[%s13854_s5 + $0x2b8] sm:$0xff]  }
 0x43d   :  { %10598 = vmatpush3.bf16.msra.mxu0 %v11195_v19  ;;  %v5170_v10 = vor.u32 %v5169_v4, %v5168_v58  ;;  %v5171_v37 = vld [vmem:[#allocation3 + $0x4ae] ss:$144 sm:$0x30]  ;;  %v5158_v2 = vor.u32 %v5157_v33, %v5156_v56  ;;  %v5175_v19 = vmax.f32 %v5118_v46, %v5134_v35  ;;  %v5299_v11 = vld [vmem:[#allocation3 + $0x4a2] ss:$144 sm:$0x3] }
 0x43e   :  { %10599 = vmatprep.subr.bf16.mxu0 %v11340_v24  ;;  %v5173_v0 = vld [vmem:[#allocation3 + $0x4ae] ss:$144 sm:$0xc0]  ;;  %v5177_v26 = vmax.f32 %v5150_v8, %v5166_v3  ;;  %v5300_v51 = vld [vmem:[#allocation3 + $0x4a2] ss:$144 sm:$0xc] }
 0x43f   :  { %10610 = vmatpush3.bf16.msra.mxu1 %v11188_v44  ;;  %v5172_v44 = vor.u32 %v5171_v37, %v5170_v10  ;;  %v5307_v42 = vld [vmem:[#allocation3 + $0x23] ss:$144 sm:$0x3]  ;;  %v5294_v54 = vld [vmem:[#allocation3 + $0x22] ss:$144 sm:$0x30]  ;;  %v5301_v14 = vor.u32 %v5300_v51, %v5299_v11 }
 0x440   :  { %10611 = vmatprep.subr.bf16.mxu1 %v11340_v24  ;;  %v5179_v29 = vmax.f32 %v5175_v19, %v5177_v26  ;;  %v5308_v63 = vld [vmem:[#allocation3 + $0x23] ss:$144 sm:$0xc]  ;;  %v5302_v9 = vld [vmem:[#allocation3 + $0x4a2] ss:$144 sm:$0x30] }
 0x441   :  { %10600 = vmatpush3.bf16.msra.mxu0 %v11197_v38  ;;  %v5174_v38 = vor.u32 %v5173_v0, %v5172_v44  ;;  %v5309_v5 = vor.u32 %v5308_v63, %v5307_v42  ;;  %v5310_v15 = vld [vmem:[#allocation3 + $0x23] ss:$144 sm:$0x30]  ;;  %v5296_v18 = vld [vmem:[#allocation3 + $0x22] ss:$144 sm:$0xc0] }
 0x442   :  { %10601 = vmatprep.subr.bf16.mxu0 %v11340_v24  ;;  %v5315_v57 = vld [vmem:[#allocation3 + $0x4a3] ss:$144 sm:$0x3]  ;;  %v5323_v22 = vld [vmem:[#allocation3 + $0x2f] ss:$144 sm:$0x3] }
 0x443   :  { %10612 = vmatpush3.bf16.msra.mxu1 %v11190_v20  ;;  %v11200_v20 = vld [vmem:[%s13854_s5 + $0x240] sm:$0xff]   ;;  %v5178_v53 = vmax.f32 %v5158_v2, %v5174_v38  ;;  %v5316_v55 = vld [vmem:[#allocation3 + $0x4a3] ss:$144 sm:$0xc]  ;;  %v5311_v13 = vor.u32 %v5310_v15, %v5309_v5  ;;  %v11203_v11 = vld [vmem:[%s13854_s5 + $0x2b0] sm:$0xff]  }
 0x444   :  { %10613 = vmatprep.subr.bf16.mxu1 %v11340_v24  ;;  %v5317_v27 = vor.u32 %v5316_v55, %v5315_v57  ;;  %v5318_v17 = vld [vmem:[#allocation3 + $0x4a3] ss:$144 sm:$0x30]  ;;  %v5324_v60 = vld [vmem:[#allocation3 + $0x2f] ss:$144 sm:$0xc] }
 0x445   :  { %10602 = vmatpush3.bf16.msra.mxu0 %v11199_v36  ;;  %v5304_v59 = vld [vmem:[#allocation3 + $0x4a2] ss:$144 sm:$0xc0]  ;;  %v5312_v30 = vld [vmem:[#allocation3 + $0x23] ss:$144 sm:$0xc0]  ;;  %v5325_v31 = vor.u32 %v5324_v60, %v5323_v22 }
 0x446   :  { %10627 = vmatprep.subr.bf16.mxu0 %v11340_v24  ;;  %v5326_v43 = vld [vmem:[#allocation3 + $0x2f] ss:$144 sm:$0x30]  ;;  %v5320_v62 = vld [vmem:[#allocation3 + $0x4a3] ss:$144 sm:$0xc0]  ;;  %v5319_v28 = vor.u32 %v5318_v17, %v5317_v27  ;;  %v5313_v25 = vor.u32 %v5312_v30, %v5311_v13 }
 0x447   :  { %10614 = vmatpush3.bf16.msra.mxu1 %v11192_v23  ;;  %v5291_v23 = vld [vmem:[#allocation3 + $0x22] ss:$144 sm:$0x3]  ;;  %v5331_v49 = vld [vmem:[#allocation3 + $0x4af] ss:$144 sm:$0x3]  ;;  %v5327_v33 = vor.u32 %v5326_v43, %v5325_v31 }
 0x448   :  { %10615 = vmatprep.subr.bf16.mxu1 %v11340_v24  ;;  %v5293_v36 = vor.u32 %v5292_v39, %v5291_v23  ;;  %v5332_v48 = vld [vmem:[#allocation3 + $0x4af] ss:$144 sm:$0xc]  ;;  %v5339_v56 = vld [vmem:[#allocation3 + $0x30] ss:$144 sm:$0x3] }
 0x449   :  { %v5328_v45 = vld [vmem:[#allocation3 + $0x2f] ss:$144 sm:$0xc0]  ;;  %v5333_v12 = vor.u32 %v5332_v48, %v5331_v49  ;;  %v5340_v16 = vld [vmem:[#allocation3 + $0x30] ss:$144 sm:$0xc] }
 0x44a   :  { %v5295_v61 = vor.u32 %v5294_v54, %v5293_v36  ;;  %v5334_v46 = vld [vmem:[#allocation3 + $0x4af] ss:$144 sm:$0x30]  ;;  %v5341_v4 = vor.u32 %v5340_v16, %v5339_v56  ;;  %v5342_v32 = vld [vmem:[#allocation3 + $0x30] ss:$144 sm:$0x30]  ;;  %v5329_v2 = vor.u32 %v5328_v45, %v5327_v33 }
 0x44b   :  { %10616 = vmatpush3.bf16.msra.mxu1 %v11194_v41  ;;  %v5180_v41 = vmax.f32 %v5176_v40, %v5178_v53  ;;  %v5336_v35 = vld [vmem:[#allocation3 + $0x4af] ss:$144 sm:$0xc0]  ;;  %v5335_v58 = vor.u32 %v5334_v46, %v5333_v12  ;;  %v5344_v8 = vld [vmem:[#allocation3 + $0x30] ss:$144 sm:$0xc0] }
 0x44c   :  { %10617 = vmatprep.subr.bf16.mxu1 %v11340_v24  ;;  %v5297_v21 = vor.u32 %v5296_v18, %v5295_v61  ;;  %v5347_v10 = vld [vmem:[#allocation3 + $0x4b0] ss:$144 sm:$0x3]  ;;  %v5343_v3 = vor.u32 %v5342_v32, %v5341_v4  ;;  %v11207_v54 = vld [vmem:[%s13854_s5 + $0x2a0] sm:$0xff]   ;;  %v11204_v55 = vld [vmem:[%s13854_s5 + $0x2f0] sm:$0xff]  }
 0x44d   :  { %v5181_v47 = vpack.c.bf16 %v5180_v41, %v5179_v29  ;;  %v5348_v37 = vld [vmem:[#allocation3 + $0x4b0] ss:$144 sm:$0xc]  ;;  %v5337_v40 = vor.u32 %v5336_v35, %v5335_v58  ;;  %v11211_v17 = vld [vmem:[%s13854_s5 + $0x290] sm:$0xff]   ;;  %v11208_v13 = vld [vmem:[%s13854_s5 + $0x2e0] sm:$0xff]  }
 0x44e   :  { %v5349_v44 = vor.u32 %v5348_v37, %v5347_v10  ;;  %v5350_v19 = vld [vmem:[#allocation3 + $0x4b0] ss:$144 sm:$0x30]  ;;  %v5345_v26 = vor.u32 %v5344_v8, %v5343_v3  ;;  %v5354_v39 = vmax.f32 %v5297_v21, %v5313_v25  ;;  %v5470_v61 = vld [vmem:[#allocation3 + $0x34] ss:$144 sm:$0x3] }
 0x44f   :  { %10618 = vmatpush3.bf16.msra.mxu1 %v11196_v34  ;;  %10604 = vmatmul.mubr.bf16.vlgmr.msra.gmra.mxu0 %v5181_v47  ;;  %v5303_v34 = vor.u32 %v5302_v9, %v5301_v14  ;;  %v11205_v42 = vld [vmem:[%s13854_s5 + $0x2a8] sm:$0xff]   ;;  %v11202_v5 = vld [vmem:[%s13854_s5 + $0x2f8] sm:$0xff]   ;;  %v11212_v3 = vld [vmem:[%s13854_s5 + $0x2d0] sm:$0xff]  }
 0x450   :  { %10619 = vmatprep.subr.bf16.mxu1 %v11340_v24  ;;  %10628 = vmatpush3.bf16.msra.mxu0 %v11201_v7  ;;  %v5351_v23 = vor.u32 %v5350_v19, %v5349_v44  ;;  %v5356_v29 = vmax.f32 %v5329_v2, %v5345_v26  ;;  %v11209_v14 = vld [vmem:[%s13854_s5 + $0x298] sm:$0xff]   ;;  %v11206_v18 = vld [vmem:[%s13854_s5 + $0x2e8] sm:$0xff]  }
 0x451   :  { %10629 = vmatprep.subr.bf16.mxu0 %v11340_v24  ;;  %10643 = vmatprep.mubr.msk.bf16.mxu0 %vm11341_vm10, %v11340_v24  ;;  %v5305_v50 = vor.u32 %v5304_v59, %v5303_v34  ;;  %v11213_v60 = vld [vmem:[%s13854_s5 + $0x288] sm:$0xff]   ;;  %v11210_v46 = vld [vmem:[%s13854_s5 + $0x2d8] sm:$0xff]  }
 0x452   :  { %v5358_v7 = vmax.f32 %v5354_v39, %v5356_v29  ;;  %v5471_v59 = vld [vmem:[#allocation3 + $0x34] ss:$144 sm:$0xc]  ;;  %v5486_v43 = vld [vmem:[#allocation3 + $0x35] ss:$144 sm:$0x3] }
 0x453   :  { %10620 = vmatpush3.bf16.msra.mxu1 %v11198_v1  ;;  %v5321_v1 = vor.u32 %v5320_v62, %v5319_v28  ;;  %v5478_v30 = vld [vmem:[#allocation3 + $0x4b4] ss:$144 sm:$0x3]  ;;  %v5487_v34 = vld [vmem:[#allocation3 + $0x35] ss:$144 sm:$0xc]  ;;  %v5472_v62 = vor.u32 %v5471_v59, %v5470_v61 }
 0x454   :  { %10621 = vmatprep.subr.bf16.mxu1 %v11340_v24  ;;  %10630 = vmatpush3.bf16.msra.mxu0 %v11203_v11  ;;  %v5479_v31 = vld [vmem:[#allocation3 + $0x4b4] ss:$144 sm:$0xc]  ;;  %v5488_v48 = vor.u32 %v5487_v34, %v5486_v43  ;;  %v11215_v28 = vld [vmem:[%s13854_s5 + $0x280] sm:$0xff]  }
 0x455   :  { %v5355_v53 = vmax.f32 %v5305_v50, %v5321_v1  ;;  %10631 = vmatprep.subr.bf16.mxu0 %v11340_v24  ;;  %v5473_v49 = vld [vmem:[#allocation3 + $0x34] ss:$144 sm:$0x30]  ;;  %v5480_v33 = vor.u32 %v5479_v31, %v5478_v30  ;;  %v5494_v45 = vld [vmem:[#allocation3 + $0x4b5] ss:$144 sm:$0x3] }
 0x456   :  { %v5495_v12 = vld [vmem:[#allocation3 + $0x4b5] ss:$144 sm:$0xc]  ;;  %v5481_v35 = vld [vmem:[#allocation3 + $0x4b4] ss:$144 sm:$0x30]  ;;  %v5474_v58 = vor.u32 %v5473_v49, %v5472_v62 }
 0x457   :  { %10622 = vmatpush3.bf16.msra.mxu1 %v11200_v20  ;;  %v5352_v20 = vld [vmem:[#allocation3 + $0x4b0] ss:$144 sm:$0xc0]  ;;  %v5496_v56 = vor.u32 %v5495_v12, %v5494_v45  ;;  %v5497_v16 = vld [vmem:[#allocation3 + $0x4b5] ss:$144 sm:$0x30]  ;;  %v5482_v37 = vor.u32 %v5481_v35, %v5480_v33 }
 0x458   :  { %10647 = vmatprep.subr.bf16.mxu1 %v11340_v24  ;;  %v5353_v51 = vor.u32 %v5352_v20, %v5351_v23  ;;  %10632 = vmatpush3.bf16.msra.mxu0 %v11205_v42  ;;  %v5502_v21 = vld [vmem:[#allocation3 + $0x41] ss:$144 sm:$0x3]  ;;  %v5483_v4 = vld [vmem:[#allocation3 + $0x4b4] ss:$144 sm:$0xc0] }
 0x459   :  { %10633 = vmatprep.subr.bf16.mxu0 %v11340_v24  ;;  %v5503_v25 = vld [vmem:[#allocation3 + $0x41] ss:$144 sm:$0xc]  ;;  %v5491_v8 = vld [vmem:[#allocation3 + $0x35] ss:$144 sm:$0xc0]  ;;  %v5498_v44 = vor.u32 %v5497_v16, %v5496_v56 }
 0x45a   :  { %v5357_v63 = vmax.f32 %v5337_v40, %v5353_v51  ;;  %v5504_v50 = vor.u32 %v5503_v25, %v5502_v21  ;;  %v5505_v10 = vld [vmem:[#allocation3 + $0x41] ss:$144 sm:$0x30]  ;;  %v5518_v23 = vld [vmem:[#allocation3 + $0x42] ss:$144 sm:$0x3] }
 0x45b   :  { %v5510_v1 = vld [vmem:[#allocation3 + $0x4c1] ss:$144 sm:$0x3]  ;;  %v5519_v39 = vld [vmem:[#allocation3 + $0x42] ss:$144 sm:$0xc] }
 0x45c   :  { %v5359_v36 = vmax.f32 %v5355_v53, %v5357_v63  ;;  %10634 = vmatpush3.bf16.msra.mxu0 %v11207_v54  ;;  %v5511_v2 = vld [vmem:[#allocation3 + $0x4c1] ss:$144 sm:$0xc]  ;;  %v5506_v19 = vor.u32 %v5505_v10, %v5504_v50  ;;  %v5520_v29 = vor.u32 %v5519_v39, %v5518_v23  ;;  %v5521_v42 = vld [vmem:[#allocation3 + $0x42] ss:$144 sm:$0x30] }
 0x45d   :  { %10635 = vmatprep.subr.bf16.mxu0 %v11340_v24  ;;  %v5507_v20 = vld [vmem:[#allocation3 + $0x41] ss:$144 sm:$0xc0]  ;;  %v5523_v63 = vld [vmem:[#allocation3 + $0x42] ss:$144 sm:$0xc0] }
 0x45e   :  { %v5360_v15 = vpack.c.bf16 %v5359_v36, %v5358_v7  ;;  %v5513_v40 = vld [vmem:[#allocation3 + $0x4c1] ss:$144 sm:$0x30]  ;;  %v5484_v7 = vor.u32 %v5483_v4, %v5482_v37  ;;  %v5526_v36 = vld [vmem:[#allocation3 + $0x4c2] ss:$144 sm:$0x3] }
 0x45f   :  { %v5515_v26 = vld [vmem:[#allocation3 + $0x4c1] ss:$144 sm:$0xc0]  ;;  %v5527_v54 = vld [vmem:[#allocation3 + $0x4c2] ss:$144 sm:$0xc] }
 0x460   :  { %10624 = vmatmul.mubr.bf16.vlgmr.msra.gmra.mxu1 %v5360_v15  ;;  %10636 = vmatpush3.bf16.msra.mxu0 %v11209_v14  ;;  %v5508_v15 = vor.u32 %v5507_v20, %v5506_v19  ;;  %v5528_v14 = vor.u32 %v5527_v54, %v5526_v36  ;;  %v11216_v61 = vld [vmem:[%s13854_s5 + $0x2c0] sm:$0xff]   ;;  %v5649_v31 = vld [vmem:[#allocation3 + $0x36] ss:$144 sm:$0x3] }
 0x461   :  { %10648 = vmatpush3.bf16.msra.mxu1 %v11202_v5  ;;  %10663 = vmatprep.mubr.msk.bf16.mxu1 %vm11341_vm10, %v11340_v24  ;;  %v5650_v43 = vld [vmem:[#allocation3 + $0x36] ss:$144 sm:$0xc]  ;;  %v5668_v35 = vld [vmem:[#allocation3 + $0x37] ss:$144 sm:$0x30] }
 0x462   :  { %10649 = vmatprep.subr.bf16.mxu1 %v11340_v24  ;;  %10637 = vmatprep.subr.bf16.mxu0 %v11340_v24  ;;  %v5657_v34 = vld [vmem:[#allocation3 + $0x4b6] ss:$144 sm:$0x3]  ;;  %v5651_v45 = vor.u32 %v5650_v43, %v5649_v31  ;;  %v5674_v21 = vld [vmem:[#allocation3 + $0x4b7] ss:$144 sm:$0xc] }
 0x463   :  { %v5658_v62 = vld [vmem:[#allocation3 + $0x4b6] ss:$144 sm:$0xc]  ;;  %v5676_v4 = vld [vmem:[#allocation3 + $0x4b7] ss:$144 sm:$0x30] }
 0x464   :  { %10638 = vmatpush3.bf16.msra.mxu0 %v11211_v17  ;;  %v11217_v33 = vld [vmem:[%s13854_s5 + $0x338] sm:$0xff]   ;;  %v5659_v16 = vor.u32 %v5658_v62, %v5657_v34 }
 0x465   :  { %10650 = vmatpush3.bf16.msra.mxu1 %v11204_v55  ;;  %10639 = vmatprep.subr.bf16.mxu0 %v11340_v24  ;;  %v5529_v55 = vld [vmem:[#allocation3 + $0x4c2] ss:$144 sm:$0x30]  ;;  %v5652_v12 = vld [vmem:[#allocation3 + $0x36] ss:$144 sm:$0x30] }
 0x466   :  { %10651 = vmatprep.subr.bf16.mxu1 %v11340_v24  ;;  %v5660_v25 = vld [vmem:[#allocation3 + $0x4b6] ss:$144 sm:$0x30]  ;;  %v5670_v50 = vld [vmem:[#allocation3 + $0x37] ss:$144 sm:$0xc0] }
 0x467   :  { %v5681_v10 = vld [vmem:[#allocation3 + $0x43] ss:$144 sm:$0x3]  ;;  %v5661_v20 = vor.u32 %v5660_v25, %v5659_v16  ;;  %v11220_v25 = vld [vmem:[%s13854_s5 + $0x370] sm:$0xff]  }
 0x468   :  { %10640 = vmatpush3.bf16.msra.mxu0 %v11213_v60  ;;  %v5682_v37 = vld [vmem:[#allocation3 + $0x43] ss:$144 sm:$0xc] }
 0x469   :  { %10652 = vmatpush3.bf16.msra.mxu1 %v11206_v18  ;;  %10641 = vmatprep.subr.bf16.mxu0 %v11340_v24  ;;  %v5684_v19 = vld [vmem:[#allocation3 + $0x43] ss:$144 sm:$0x30] }
 0x46a   :  { %10653 = vmatprep.subr.bf16.mxu1 %v11340_v24 }
 0x46c   :  { %10642 = vmatpush3.bf16.msra.mxu0 %v11215_v28  ;;  %v5666_v28 = vld [vmem:[#allocation3 + $0x37] ss:$144 sm:$0xc] }
 0x46d   :  { %10654 = vmatpush3.bf16.msra.mxu1 %v11208_v13  ;;  %10667 = vmatprep.subr.bf16.mxu0 %v11340_v24 }
 0x46e   :  { %10655 = vmatprep.subr.bf16.mxu1 %v11340_v24 }
 0x471   :  { %10656 = vmatpush3.bf16.msra.mxu1 %v11210_v46 }
 0x472   :  { %10657 = vmatprep.subr.bf16.mxu1 %v11340_v24 }
 0x474   :  { %v3941_v52 = vpop.f32.mrf.mxu0 }
 0x475   :  { %10658 = vmatpush3.bf16.msra.mxu1 %v11212_v3  ;;  %v5678_v3 = vld [vmem:[#allocation3 + $0x4b7] ss:$144 sm:$0xc0] }
 0x476   :  { %v10445_v6 = vpop.f32.mrf.mxu0  ;;  %10659 = vmatprep.subr.bf16.mxu1 %v11340_v24 }
 0x477   :  { %v5475_v6 = vld [vmem:[#allocation3 + $0x34] ss:$144 sm:$0xc0] }
 0x478   :  { %v3944_v0 = vpop.f32.mrf.mxu0  ;;  %v5476_v11 = vor.u32 %v5475_v6, %v5474_v58  ;;  %v5673_v6 = vld [vmem:[#allocation3 + $0x4b7] ss:$144 sm:$0x3] }
 0x479   :  { %v5675_v58 = vor.u32 %v5674_v21, %v5673_v6  ;;  %v11225_v6 = vld [vmem:[%s13854_s5 + $0x318] sm:$0xff]  }
 0x47a   :  { %v10446_v38 = vpop.f32.mrf.mxu0 }
 0x47b   :  { %v5512_v38 = vor.u32 %v5511_v2, %v5510_v1  ;;  %v5662_v1 = vld [vmem:[#allocation3 + $0x4b6] ss:$144 sm:$0xc0] }
 0x47d   :  { %v5514_v53 = vor.u32 %v5513_v40, %v5512_v38  ;;  %v5677_v38 = vor.u32 %v5676_v4, %v5675_v58  ;;  %v5689_v40 = vld [vmem:[#allocation3 + $0x4c3] ss:$144 sm:$0x3] }
 0x47f   :  { %v5516_v17 = vor.u32 %v5515_v26, %v5514_v53  ;;  %v5690_v26 = vld [vmem:[#allocation3 + $0x4c3] ss:$144 sm:$0xc] }
 0x480   :  { %v5692_v53 = vld [vmem:[#allocation3 + $0x4c3] ss:$144 sm:$0x30] }
 0x485   :  { %v4030_v41 = vpop.f32.mrf.mxu1 }
 0x486   :  { %v13273_v57 = vadd.f32 %v4030_v41, %v3941_v52  ;;  %v5489_v52 = vld [vmem:[#allocation3 + $0x35] ss:$144 sm:$0x30]  ;;  %v5522_v41 = vor.u32 %v5521_v42, %v5520_v29  ;;  %v5694_v29 = vld [vmem:[#allocation3 + $0x4c3] ss:$144 sm:$0xc0] }
 0x487   :  { %v10465_v9 = vpop.f32.mrf.mxu1  ;;  %v5490_v32 = vor.u32 %v5489_v52, %v5488_v48  ;;  %v5665_v52 = vld [vmem:[#allocation3 + $0x37] ss:$144 sm:$0x3]  ;;  %v5697_v42 = vld [vmem:[#allocation3 + $0x44] ss:$144 sm:$0x3] }
 0x488   :  { %v5531_v9 = vld [vmem:[#allocation3 + $0x4c2] ss:$144 sm:$0xc0]  ;;  %v5524_v18 = vor.u32 %v5523_v63, %v5522_v41  ;;  %v5667_v46 = vor.u32 %v5666_v28, %v5665_v52  ;;  %v5698_v63 = vld [vmem:[#allocation3 + $0x44] ss:$144 sm:$0xc] }
 0x489   :  { %v4033_v27 = vpop.f32.mrf.mxu1  ;;  %v5492_v51 = vor.u32 %v5491_v8, %v5490_v32  ;;  %v5654_v8 = vld [vmem:[#allocation3 + $0x36] ss:$144 sm:$0xc0]  ;;  %v5699_v41 = vor.u32 %v5698_v63, %v5697_v42  ;;  %v5839_v63 = vld [vmem:[#allocation3 + $0x4b8] ss:$144 sm:$0x30] }
 0x48a   :  { %v13285_v47 = vadd.f32 %v4033_v27, %v3944_v0  ;;  %v5499_v0 = vld [vmem:[#allocation3 + $0x4b5] ss:$144 sm:$0xc0]  ;;  %v5535_v30 = vmax.f32 %v5508_v15, %v5524_v18  ;;  %v5669_v2 = vor.u32 %v5668_v35, %v5667_v46  ;;  %v5706_v18 = vld [vmem:[#allocation3 + $0x4c4] ss:$144 sm:$0xc] }
 0x48b   :  { %v10466_v22 = vpop.f32.mrf.mxu1  ;;  %v5500_v5 = vor.u32 %v5499_v0, %v5498_v44  ;;  %v11214_v27 = vld [vmem:[%s13854_s5 + $0x2c8] sm:$0xff]   ;;  %v5533_v60 = vmax.f32 %v5476_v11, %v5492_v51  ;;  %v5653_v0 = vor.u32 %v5652_v12, %v5651_v45  ;;  %v5683_v44 = vor.u32 %v5682_v37, %v5681_v10  ;;  %v11223_v35 = vld [vmem:[%s13854_s5 + $0x320] sm:$0xff]   ;;  %v11226_v42 = vld [vmem:[%s13854_s5 + $0x358] sm:$0xff]  }
 0x48c   :  { %v5530_v22 = vor.u32 %v5529_v55, %v5528_v14  ;;  %10660 = vmatpush3.bf16.msra.mxu1 %v11214_v27  ;;  %v5686_v11 = vld [vmem:[#allocation3 + $0x43] ss:$144 sm:$0xc0]  ;;  %v5691_v51 = vor.u32 %v5690_v26, %v5689_v40  ;;  %v5700_v14 = vld [vmem:[#allocation3 + $0x44] ss:$144 sm:$0x30]  ;;  %v5679_v27 = vor.u32 %v5678_v3, %v5677_v38 }
 0x48d   :  { %v5534_v13 = vmax.f32 %v5484_v7, %v5500_v5  ;;  %v5537_v48 = vmax.f32 %v5533_v60, %v5535_v30  ;;  %10661 = vmatprep.subr.bf16.mxu1 %v11340_v24  ;;  %v5685_v39 = vor.u32 %v5684_v19, %v5683_v44  ;;  %v5655_v54 = vor.u32 %v5654_v8, %v5653_v0  ;;  %v5702_v55 = vld [vmem:[#allocation3 + $0x44] ss:$144 sm:$0xc0]  ;;  %v5828_v0 = vld [vmem:[#allocation3 + $0x38] ss:$144 sm:$0x3] }
 0x48e   :  { %v5532_v59 = vor.u32 %v5531_v9, %v5530_v22  ;;  %v5671_v5 = vor.u32 %v5670_v50, %v5669_v2  ;;  %v5693_v15 = vor.u32 %v5692_v53, %v5691_v51  ;;  %v5663_v9 = vor.u32 %v5662_v1, %v5661_v20  ;;  %v5710_v30 = vld [vmem:[#allocation3 + $0x4c4] ss:$144 sm:$0xc0]  ;;  %v5829_v1 = vld [vmem:[#allocation3 + $0x38] ss:$144 sm:$0xc] }
 0x48f   :  { %v5687_v60 = vor.u32 %v5686_v11, %v5685_v39  ;;  %v11221_v45 = vld [vmem:[%s13854_s5 + $0x328] sm:$0xff]   ;;  %v11224_v3 = vld [vmem:[%s13854_s5 + $0x360] sm:$0xff]   ;;  %v5830_v40 = vor.u32 %v5829_v1, %v5828_v0 }
 0x490   :  { %v5536_v49 = vmax.f32 %v5516_v17, %v5532_v59  ;;  %10662 = vmatpush3.bf16.msra.mxu1 %v11216_v61  ;;  %v5705_v17 = vld [vmem:[#allocation3 + $0x4c4] ss:$144 sm:$0x3]  ;;  %v5701_v61 = vor.u32 %v5700_v14, %v5699_v41  ;;  %v5695_v43 = vor.u32 %v5694_v29, %v5693_v15  ;;  %v5713_v28 = vmax.f32 %v5663_v9, %v5679_v27  ;;  %v5836_v44 = vld [vmem:[#allocation3 + $0x4b8] ss:$144 sm:$0x3] }
 0x491   :  { %10687 = vmatprep.subr.bf16.mxu1 %v11340_v24  ;;  %v5707_v59 = vor.u32 %v5706_v18, %v5705_v17  ;;  %v11222_v50 = vld [vmem:[%s13854_s5 + $0x368] sm:$0xff]   ;;  %v5837_v19 = vld [vmem:[#allocation3 + $0x4b8] ss:$144 sm:$0xc] }
 0x492   :  { %v5538_v56 = vmax.f32 %v5534_v13, %v5536_v49  ;;  %v5708_v13 = vld [vmem:[#allocation3 + $0x4c4] ss:$144 sm:$0x30]  ;;  %v5703_v34 = vor.u32 %v5702_v55, %v5701_v61  ;;  %v5712_v49 = vmax.f32 %v5655_v54, %v5671_v5  ;;  %v5844_v20 = vld [vmem:[#allocation3 + $0x39] ss:$144 sm:$0x3]  ;;  %v5838_v51 = vor.u32 %v5837_v19, %v5836_v44 }
 0x493   :  { %v5709_v62 = vor.u32 %v5708_v13, %v5707_v59  ;;  %v11229_v37 = vld [vmem:[%s13854_s5 + $0x308] sm:$0xff]   ;;  %v5845_v38 = vld [vmem:[#allocation3 + $0x39] ss:$144 sm:$0xc] }
 0x494   :  { %v5539_v32 = vpack.c.bf16 %v5538_v56, %v5537_v48  ;;  %v11219_v48 = vld [vmem:[%s13854_s5 + $0x330] sm:$0xff]   ;;  %v11218_v56 = vld [vmem:[%s13854_s5 + $0x378] sm:$0xff]   ;;  %v11231_v11 = vld [vmem:[%s13854_s5 + $0x300] sm:$0xff]   ;;  %v5840_v18 = vor.u32 %v5839_v63, %v5838_v51 }
 0x495   :  { %v5711_v52 = vor.u32 %v5710_v30, %v5709_v62  ;;  %v5831_v26 = vld [vmem:[#allocation3 + $0x38] ss:$144 sm:$0x30]  ;;  %v5847_v39 = vld [vmem:[#allocation3 + $0x39] ss:$144 sm:$0x30] }
 0x496   :  { %10644 = vmatmul.mubr.bf16.vlgmr.msra.gmra.mxu0 %v5539_v32  ;;  %v11227_v32 = vld [vmem:[%s13854_s5 + $0x310] sm:$0xff]   ;;  %v5860_v5 = vld [vmem:[#allocation3 + $0x45] ss:$144 sm:$0x3]  ;;  %v5832_v41 = vor.u32 %v5831_v26, %v5830_v40  ;;  %v11232_v1 = vld [vmem:[%s13854_s5 + $0x340] sm:$0xff]  }
 0x497   :  { %10668 = vmatpush3.bf16.msra.mxu0 %v11217_v33  ;;  %10683 = vmatprep.mubr.msk.bf16.mxu0 %vm11341_vm10, %v11340_v24  ;;  %v5714_v33 = vmax.f32 %v5687_v60, %v5703_v34  ;;  %v5852_v53 = vld [vmem:[#allocation3 + $0x4b9] ss:$144 sm:$0x3]  ;;  %v5833_v54 = vld [vmem:[#allocation3 + $0x38] ss:$144 sm:$0xc0] }
 0x498   :  { %10669 = vmatprep.subr.bf16.mxu0 %v11340_v24  ;;  %v5853_v29 = vld [vmem:[#allocation3 + $0x4b9] ss:$144 sm:$0xc]  ;;  %v5861_v15 = vld [vmem:[#allocation3 + $0x45] ss:$144 sm:$0xc] }
 0x499   :  { %v5716_v12 = vmax.f32 %v5712_v49, %v5714_v33  ;;  %v5841_v14 = vld [vmem:[#allocation3 + $0x4b8] ss:$144 sm:$0xc0]  ;;  %v5849_v9 = vld [vmem:[#allocation3 + $0x39] ss:$144 sm:$0xc0]  ;;  %v5862_v27 = vor.u32 %v5861_v15, %v5860_v5 }
 0x49a   :  { %v4207_v23 = vpop.f32.mrf.mxu0  ;;  %v5863_v17 = vld [vmem:[#allocation3 + $0x45] ss:$144 sm:$0x30]  ;;  %v11228_v59 = vld [vmem:[%s13854_s5 + $0x350] sm:$0xff]  }
 0x49b   :  { %v4214_v7 = vadd.f32 %v4207_v23, %v13273_v57  ;;  %10670 = vmatpush3.bf16.msra.mxu0 %v11219_v48  ;;  %v5846_v23 = vor.u32 %v5845_v38, %v5844_v20  ;;  %v5868_v60 = vld [vmem:[#allocation3 + $0x4c5] ss:$144 sm:$0x3]  ;;  %v5864_v30 = vor.u32 %v5863_v17, %v5862_v27  ;;  %v5876_v62 = vld [vmem:[#allocation3 + $0x46] ss:$144 sm:$0x3]  ;;  %v5834_v48 = vor.u32 %v5833_v54, %v5832_v41 }
 0x49c   :  { %v10485_v36 = vpop.f32.mrf.mxu0  ;;  %10671 = vmatprep.subr.bf16.mxu0 %v11340_v24  ;;  %v5869_v61 = vld [vmem:[#allocation3 + $0x4c5] ss:$144 sm:$0xc]  ;;  %v5877_v49 = vld [vmem:[#allocation3 + $0x46] ss:$144 sm:$0xc] }
 0x49d   :  { %v5855_v36 = vld [vmem:[#allocation3 + $0x4b9] ss:$144 sm:$0x30]  ;;  %v5848_v55 = vor.u32 %v5847_v39, %v5846_v23  ;;  %v5873_v34 = vld [vmem:[#allocation3 + $0x4c5] ss:$144 sm:$0xc0]  ;;  %v5878_v33 = vor.u32 %v5877_v49, %v5876_v62 }
 0x49e   :  { %v4210_v22 = vpop.f32.mrf.mxu0  ;;  %v6007_v19 = vld [vmem:[#allocation3 + $0x3a] ss:$144 sm:$0x3]  ;;  %v6023_v39 = vld [vmem:[#allocation3 + $0x3b] ss:$144 sm:$0x3] }
 0x49f   :  { %v4215_v31 = vadd.f32 %v4210_v22, %v13285_v47  ;;  %v5715_v47 = vmax.f32 %v5695_v43, %v5711_v52  ;;  %10672 = vmatpush3.bf16.msra.mxu0 %v11221_v45  ;;  %v5857_v22 = vld [vmem:[#allocation3 + $0x4b9] ss:$144 sm:$0xc0]  ;;  %v5871_v43 = vld [vmem:[#allocation3 + $0x4c5] ss:$144 sm:$0x30]  ;;  %v5850_v52 = vor.u32 %v5849_v9, %v5848_v55 }
 0x4a0   :  { %v10486_v57 = vpop.f32.mrf.mxu0  ;;  %10673 = vmatprep.subr.bf16.mxu0 %v11340_v24  ;;  %v5879_v45 = vld [vmem:[#allocation3 + $0x46] ss:$144 sm:$0x30]  ;;  %v6008_v20 = vld [vmem:[#allocation3 + $0x3a] ss:$144 sm:$0xc] }
 0x4a1   :  { %v5717_v46 = vmax.f32 %v5713_v28, %v5715_v47  ;;  %v5870_v57 = vor.u32 %v5869_v61, %v5868_v60  ;;  %v5881_v47 = vld [vmem:[#allocation3 + $0x46] ss:$144 sm:$0xc0]  ;;  %v5891_v0 = vmax.f32 %v5834_v48, %v5850_v52  ;;  %v6015_v38 = vld [vmem:[#allocation3 + $0x4ba] ss:$144 sm:$0x3] }
 0x4a2   :  { %v6016_v40 = vld [vmem:[#allocation3 + $0x4ba] ss:$144 sm:$0xc]  ;;  %v11233_v51 = vld [vmem:[%s13854_s5 + $0x3b8] sm:$0xff]  }
 0x4a3   :  { %v5718_v16 = vpack.c.bf16 %v5717_v46, %v5716_v12  ;;  %10674 = vmatpush3.bf16.msra.mxu0 %v11223_v35  ;;  %v5872_v28 = vor.u32 %v5871_v43, %v5870_v57  ;;  %v5842_v12 = vor.u32 %v5841_v14, %v5840_v18  ;;  %v5884_v46 = vld [vmem:[#allocation3 + $0x4c6] ss:$144 sm:$0x3]  ;;  %v6026_v63 = vld [vmem:[#allocation3 + $0x3b] ss:$144 sm:$0x30] }
 0x4a4   :  { %10675 = vmatprep.subr.bf16.mxu0 %v11340_v24  ;;  %v5885_v35 = vld [vmem:[#allocation3 + $0x4c6] ss:$144 sm:$0xc]  ;;  %v6031_v54 = vld [vmem:[#allocation3 + $0x4bb] ss:$144 sm:$0x3] }
 0x4a5   :  { %10664 = vmatmul.mubr.bf16.vlgmr.msra.gmra.mxu1 %v5718_v16  ;;  %v6032_v5 = vld [vmem:[#allocation3 + $0x4bb] ss:$144 sm:$0xc]  ;;  %v6018_v15 = vld [vmem:[#allocation3 + $0x4ba] ss:$144 sm:$0x30] }
 0x4a6   :  { %10688 = vmatpush3.bf16.msra.mxu1 %v11218_v56  ;;  %10703 = vmatprep.mubr.msk.bf16.mxu1 %vm11341_vm10, %v11340_v24  ;;  %v6033_v41 = vor.u32 %v6032_v5, %v6031_v54  ;;  %v6034_v14 = vld [vmem:[#allocation3 + $0x4bb] ss:$144 sm:$0x30]  ;;  %v6012_v9 = vld [vmem:[#allocation3 + $0x3a] ss:$144 sm:$0xc0] }
 0x4a7   :  { %10689 = vmatprep.subr.bf16.mxu1 %v11340_v24  ;;  %10676 = vmatpush3.bf16.msra.mxu0 %v11225_v6  ;;  %v5880_v6 = vor.u32 %v5879_v45, %v5878_v33  ;;  %v6028_v27 = vld [vmem:[#allocation3 + $0x3b] ss:$144 sm:$0xc0]  ;;  %v6039_v17 = vld [vmem:[#allocation3 + $0x47] ss:$144 sm:$0x3] }
 0x4a8   :  { %10677 = vmatprep.subr.bf16.mxu0 %v11340_v24  ;;  %v6040_v18 = vld [vmem:[#allocation3 + $0x47] ss:$144 sm:$0xc]  ;;  %v6020_v60 = vld [vmem:[#allocation3 + $0x4ba] ss:$144 sm:$0xc0]  ;;  %v6035_v57 = vor.u32 %v6034_v14, %v6033_v41 }
 0x4a9   :  { %v6047_v43 = vld [vmem:[#allocation3 + $0x4c7] ss:$144 sm:$0x3]  ;;  %v6055_v45 = vld [vmem:[#allocation3 + $0x48] ss:$144 sm:$0x3] }
 0x4aa   :  { %10690 = vmatpush3.bf16.msra.mxu1 %v11220_v25  ;;  %v5887_v25 = vld [vmem:[#allocation3 + $0x4c6] ss:$144 sm:$0x30]  ;;  %v6044_v48 = vld [vmem:[#allocation3 + $0x47] ss:$144 sm:$0xc0] }
 0x4ab   :  { %10691 = vmatprep.subr.bf16.mxu1 %v11340_v24  ;;  %10678 = vmatpush3.bf16.msra.mxu0 %v11227_v32  ;;  %v11230_v32 = vld [vmem:[%s13854_s5 + $0x348] sm:$0xff]   ;;  %v11241_v54 = vld [vmem:[%s13854_s5 + $0x398] sm:$0xff]  }
 0x4ac   :  { %v4386_v21 = vpop.f32.mrf.mxu1  ;;  %10679 = vmatprep.subr.bf16.mxu0 %v11340_v24  ;;  %v6052_v33 = vld [vmem:[#allocation3 + $0x4c7] ss:$144 sm:$0xc0] }
 0x4ad   :  { %v13351_v58 = vadd.f32 %v4386_v21, %v4214_v7  ;;  %v5854_v7 = vor.u32 %v5853_v29, %v5852_v53  ;;  %v5886_v21 = vor.u32 %v5885_v35, %v5884_v46  ;;  %v6009_v53 = vor.u32 %v6008_v20, %v6007_v19  ;;  %v6010_v29 = vld [vmem:[#allocation3 + $0x3a] ss:$144 sm:$0x30] }
 0x4ae   :  { %v10505_v4 = vpop.f32.mrf.mxu1  ;;  %10692 = vmatpush3.bf16.msra.mxu1 %v11222_v50  ;;  %v5882_v50 = vor.u32 %v5881_v47, %v5880_v6  ;;  %v6056_v47 = vld [vmem:[#allocation3 + $0x48] ss:$144 sm:$0xc] }
 0x4af   :  { %10693 = vmatprep.subr.bf16.mxu1 %v11340_v24  ;;  %10680 = vmatpush3.bf16.msra.mxu0 %v11229_v37  ;;  %v5856_v13 = vor.u32 %v5855_v36, %v5854_v7  ;;  %v5889_v4 = vld [vmem:[#allocation3 + $0x4c6] ss:$144 sm:$0xc0]  ;;  %v5888_v37 = vor.u32 %v5887_v25, %v5886_v21  ;;  %v6017_v36 = vor.u32 %v6016_v40, %v6015_v38  ;;  %v6058_v21 = vld [vmem:[#allocation3 + $0x48] ss:$144 sm:$0x30] }
 0x4b0   :  { %v4389_v8 = vpop.f32.mrf.mxu1  ;;  %10681 = vmatprep.subr.bf16.mxu0 %v11340_v24  ;;  %v6057_v6 = vor.u32 %v6056_v47, %v6055_v45  ;;  %v6060_v25 = vld [vmem:[#allocation3 + $0x48] ss:$144 sm:$0xc0]  ;;  %v11242_v45 = vld [vmem:[%s13854_s5 + $0x3d8] sm:$0xff]  }
 0x4b1   :  { %v13363_v10 = vadd.f32 %v4389_v8, %v4215_v31  ;;  %v5865_v31 = vld [vmem:[#allocation3 + $0x45] ss:$144 sm:$0xc0]  ;;  %v5858_v56 = vor.u32 %v5857_v22, %v5856_v13  ;;  %v5874_v8 = vor.u32 %v5873_v34, %v5872_v28  ;;  %v6011_v22 = vor.u32 %v6010_v29, %v6009_v53  ;;  %v6048_v34 = vld [vmem:[#allocation3 + $0x4c7] ss:$144 sm:$0xc] }
 0x4b2   :  { %v10506_v2 = vpop.f32.mrf.mxu1  ;;  %10694 = vmatpush3.bf16.msra.mxu1 %v11224_v3  ;;  %v5866_v16 = vor.u32 %v5865_v31, %v5864_v30  ;;  %v6041_v13 = vor.u32 %v6040_v18, %v6039_v17  ;;  %v6042_v30 = vld [vmem:[#allocation3 + $0x47] ss:$144 sm:$0x30]  ;;  %v6019_v31 = vor.u32 %v6018_v15, %v6017_v36  ;;  %v6049_v52 = vor.u32 %v6048_v34, %v6047_v43  ;;  %v11236_v15 = vld [vmem:[%s13854_s5 + $0x3f0] sm:$0xff]  }
 0x4b3   :  { %10695 = vmatprep.subr.bf16.mxu1 %v11340_v24  ;;  %10682 = vmatpush3.bf16.msra.mxu0 %v11231_v11  ;;  %v5890_v2 = vor.u32 %v5889_v4, %v5888_v37  ;;  %v5892_v3 = vmax.f32 %v5842_v12, %v5858_v56  ;;  %v6024_v11 = vld [vmem:[#allocation3 + $0x3b] ss:$144 sm:$0xc]  ;;  %v6050_v28 = vld [vmem:[#allocation3 + $0x4c7] ss:$144 sm:$0x30]  ;;  %v6013_v35 = vor.u32 %v6012_v9, %v6011_v22 }
 0x4b4   :  { %10707 = vmatprep.subr.bf16.mxu0 %v11340_v24  ;;  %v5893_v44 = vmax.f32 %v5866_v16, %v5882_v50  ;;  %v6043_v49 = vor.u32 %v6042_v30, %v6041_v13  ;;  %v6051_v16 = vor.u32 %v6050_v28, %v6049_v52  ;;  %v6021_v4 = vor.u32 %v6020_v60, %v6019_v31  ;;  %v6064_v50 = vld [vmem:[#allocation3 + $0x4c8] ss:$144 sm:$0xc]  ;;  %v11237_v53 = vld [vmem:[%s13854_s5 + $0x3a8] sm:$0xff]  }
 0x4b5   :  { %v5894_v26 = vmax.f32 %v5874_v8, %v5890_v2  ;;  %v6063_v8 = vld [vmem:[#allocation3 + $0x4c8] ss:$144 sm:$0x3]  ;;  %v11245_v18 = vld [vmem:[%s13854_s5 + $0x388] sm:$0xff]  }
 0x4b6   :  { %10696 = vmatpush3.bf16.msra.mxu1 %v11226_v42  ;;  %v5895_v23 = vmax.f32 %v5891_v0, %v5893_v44  ;;  %v6025_v42 = vor.u32 %v6024_v11, %v6023_v39  ;;  %v6045_v0 = vor.u32 %v6044_v48, %v6043_v49  ;;  %v6065_v2 = vor.u32 %v6064_v50, %v6063_v8  ;;  %v6068_v44 = vld [vmem:[#allocation3 + $0x4c8] ss:$144 sm:$0xc0]  ;;  %v6186_v22 = vld [vmem:[#allocation3 + $0x3c] ss:$144 sm:$0x3] }
 0x4b7   :  { %10697 = vmatprep.subr.bf16.mxu1 %v11340_v24  ;;  %v5896_v7 = vmax.f32 %v5892_v3, %v5894_v26  ;;  %v6066_v3 = vld [vmem:[#allocation3 + $0x4c8] ss:$144 sm:$0x30]  ;;  %v6053_v20 = vor.u32 %v6052_v33, %v6051_v16  ;;  %v6187_v60 = vld [vmem:[#allocation3 + $0x3c] ss:$144 sm:$0xc] }
 0x4b8   :  { %v6027_v61 = vor.u32 %v6026_v63, %v6025_v42  ;;  %v6067_v40 = vor.u32 %v6066_v3, %v6065_v2  ;;  %v11239_v63 = vld [vmem:[%s13854_s5 + $0x3a0] sm:$0xff]   ;;  %v6188_v43 = vor.u32 %v6187_v60, %v6186_v22  ;;  %v11244_v2 = vld [vmem:[%s13854_s5 + $0x3d0] sm:$0xff]  }
 0x4b9   :  { %v5897_v55 = vpack.c.bf16 %v5896_v7, %v5895_v23  ;;  %v11235_v23 = vld [vmem:[%s13854_s5 + $0x3b0] sm:$0xff]   ;;  %v11234_v7 = vld [vmem:[%s13854_s5 + $0x3f8] sm:$0xff]   ;;  %v11247_v48 = vld [vmem:[%s13854_s5 + $0x380] sm:$0xff]  }
 0x4ba   :  { %10698 = vmatpush3.bf16.msra.mxu1 %v11228_v59  ;;  %v6036_v59 = vld [vmem:[#allocation3 + $0x4bb] ss:$144 sm:$0xc0]  ;;  %v6029_v56 = vor.u32 %v6028_v27, %v6027_v61  ;;  %v6069_v39 = vor.u32 %v6068_v44, %v6067_v40  ;;  %v11238_v27 = vld [vmem:[%s13854_s5 + $0x3e8] sm:$0xff]  }
 0x4bb   :  { %10699 = vmatprep.subr.bf16.mxu1 %v11340_v24  ;;  %10684 = vmatmul.mubr.bf16.vlgmr.msra.gmra.mxu0 %v5897_v55  ;;  %v11243_v55 = vld [vmem:[%s13854_s5 + $0x390] sm:$0xff]   ;;  %v11248_v60 = vld [vmem:[%s13854_s5 + $0x3c0] sm:$0xff]  }
 0x4bc   :  { %10708 = vmatpush3.bf16.msra.mxu0 %v11233_v51  ;;  %10723 = vmatprep.mubr.msk.bf16.mxu0 %vm11341_vm10, %v11340_v24  ;;  %v6070_v26 = vmax.f32 %v6013_v35, %v6029_v56  ;;  %v6194_v13 = vld [vmem:[#allocation3 + $0x4bc] ss:$144 sm:$0x3]  ;;  %v6202_v31 = vld [vmem:[#allocation3 + $0x3d] ss:$144 sm:$0x3] }
 0x4bd   :  { %10709 = vmatprep.subr.bf16.mxu0 %v11340_v24  ;;  %v6195_v30 = vld [vmem:[#allocation3 + $0x4bc] ss:$144 sm:$0xc]  ;;  %v6205_v49 = vld [vmem:[#allocation3 + $0x3d] ss:$144 sm:$0x30] }
 0x4be   :  { %10700 = vmatpush3.bf16.msra.mxu1 %v11230_v32  ;;  %v6037_v32 = vor.u32 %v6036_v59, %v6035_v57  ;;  %v11240_v59 = vld [vmem:[%s13854_s5 + $0x3e0] sm:$0xff]   ;;  %v6196_v52 = vor.u32 %v6195_v30, %v6194_v13 }
 0x4bf   :  { %10701 = vmatprep.subr.bf16.mxu1 %v11340_v24  ;;  %v6203_v57 = vld [vmem:[#allocation3 + $0x3d] ss:$144 sm:$0xc]  ;;  %v6189_v34 = vld [vmem:[#allocation3 + $0x3c] ss:$144 sm:$0x30] }
 0x4c0   :  { %v6071_v11 = vmax.f32 %v6021_v4, %v6037_v32  ;;  %10710 = vmatpush3.bf16.msra.mxu0 %v11235_v23  ;;  %v6210_v28 = vld [vmem:[#allocation3 + $0x4bd] ss:$144 sm:$0x3]  ;;  %v6197_v47 = vld [vmem:[#allocation3 + $0x4bc] ss:$144 sm:$0x30] }
 0x4c1   :  { %v4565_v62 = vpop.f32.mrf.mxu0  ;;  %10711 = vmatprep.subr.bf16.mxu0 %v11340_v24  ;;  %v6211_v33 = vld [vmem:[#allocation3 + $0x4bd] ss:$144 sm:$0xc]  ;;  %v6191_v35 = vld [vmem:[#allocation3 + $0x3c] ss:$144 sm:$0xc0]  ;;  %v6198_v50 = vor.u32 %v6197_v47, %v6196_v52 }
 0x4c2   :  { %10702 = vmatpush3.bf16.msra.mxu1 %v11232_v1  ;;  %v4572_v12 = vadd.f32 %v4565_v62, %v13351_v58  ;;  %v6059_v1 = vor.u32 %v6058_v21, %v6057_v6  ;;  %v6204_v62 = vor.u32 %v6203_v57, %v6202_v31  ;;  %v6218_v56 = vld [vmem:[#allocation3 + $0x49] ss:$144 sm:$0x3]  ;;  %v6190_v6 = vor.u32 %v6189_v34, %v6188_v43  ;;  %v6199_v21 = vld [vmem:[#allocation3 + $0x4bc] ss:$144 sm:$0xc0] }
 0x4c3   :  { %10727 = vmatprep.subr.bf16.mxu1 %v11340_v24  ;;  %v10525_v46 = vpop.f32.mrf.mxu0  ;;  %v6219_v16 = vld [vmem:[#allocation3 + $0x49] ss:$144 sm:$0xc]  ;;  %v6207_v4 = vld [vmem:[#allocation3 + $0x3d] ss:$144 sm:$0xc0] }
 0x4c4   :  { %v6061_v38 = vor.u32 %v6060_v25, %v6059_v1  ;;  %10712 = vmatpush3.bf16.msra.mxu0 %v11237_v53  ;;  %v6213_v46 = vld [vmem:[#allocation3 + $0x4bd] ss:$144 sm:$0x30]  ;;  %v6206_v25 = vor.u32 %v6205_v49, %v6204_v62  ;;  %v6220_v32 = vor.u32 %v6219_v16, %v6218_v56  ;;  %v6221_v8 = vld [vmem:[#allocation3 + $0x49] ss:$144 sm:$0x30]  ;;  %v6192_v23 = vor.u32 %v6191_v35, %v6190_v6 }
 0x4c5   :  { %v4568_v37 = vpop.f32.mrf.mxu0  ;;  %10713 = vmatprep.subr.bf16.mxu0 %v11340_v24  ;;  %v6227_v1 = vld [vmem:[#allocation3 + $0x4c9] ss:$144 sm:$0xc]  ;;  %v6234_v40 = vld [vmem:[#allocation3 + $0x4a] ss:$144 sm:$0x3] }
 0x4c6   :  { %v4573_v19 = vadd.f32 %v4568_v37, %v13363_v10  ;;  %v6072_v51 = vmax.f32 %v6045_v0, %v6061_v38  ;;  %v6073_v10 = vmax.f32 %v6053_v20, %v6069_v39  ;;  %v6215_v37 = vld [vmem:[#allocation3 + $0x4bd] ss:$144 sm:$0xc0]  ;;  %v6226_v0 = vld [vmem:[#allocation3 + $0x4c9] ss:$144 sm:$0x3]  ;;  %v6222_v44 = vor.u32 %v6221_v8, %v6220_v32 }
 0x4c7   :  { %v10526_v58 = vpop.f32.mrf.mxu0  ;;  %v6229_v20 = vld [vmem:[#allocation3 + $0x4c9] ss:$144 sm:$0x30]  ;;  %v6208_v39 = vor.u32 %v6207_v4, %v6206_v25  ;;  %v6237_v53 = vld [vmem:[#allocation3 + $0x4a] ss:$144 sm:$0x30] }
 0x4c8   :  { %v6074_v29 = vmax.f32 %v6070_v26, %v6072_v51  ;;  %v6075_v42 = vmax.f32 %v6071_v11, %v6073_v10  ;;  %10714 = vmatpush3.bf16.msra.mxu0 %v11239_v63  ;;  %v6228_v58 = vor.u32 %v6227_v1, %v6226_v0  ;;  %v6231_v38 = vld [vmem:[#allocation3 + $0x4c9] ss:$144 sm:$0xc0]  ;;  %v6235_v26 = vld [vmem:[#allocation3 + $0x4a] ss:$144 sm:$0xc] }
 0x4c9   :  { %10715 = vmatprep.subr.bf16.mxu0 %v11340_v24  ;;  %v6236_v51 = vor.u32 %v6235_v26, %v6234_v40  ;;  %v6239_v10 = vld [vmem:[#allocation3 + $0x4a] ss:$144 sm:$0xc0]  ;;  %v6249_v22 = vmax.f32 %v6192_v23, %v6208_v39  ;;  %v6365_v30 = vld [vmem:[#allocation3 + $0x4e] ss:$144 sm:$0x3] }
 0x4ca   :  { %v6076_v36 = vpack.c.bf16 %v6075_v42, %v6074_v29  ;;  %v6230_v11 = vor.u32 %v6229_v20, %v6228_v58  ;;  %v6200_v29 = vor.u32 %v6199_v21, %v6198_v50  ;;  %v6242_v42 = vld [vmem:[#allocation3 + $0x4ca] ss:$144 sm:$0x3]  ;;  %v6366_v31 = vld [vmem:[#allocation3 + $0x4e] ss:$144 sm:$0xc] }
 0x4cb   :  { %v6243_v63 = vld [vmem:[#allocation3 + $0x4ca] ss:$144 sm:$0xc]  ;;  %v6373_v57 = vld [vmem:[#allocation3 + $0x4ce] ss:$144 sm:$0x3] }
 0x4cc   :  { %10704 = vmatmul.mubr.bf16.vlgmr.msra.gmra.mxu1 %v6076_v36  ;;  %10716 = vmatpush3.bf16.msra.mxu0 %v11241_v54  ;;  %v6238_v54 = vor.u32 %v6237_v53, %v6236_v51  ;;  %v6374_v43 = vld [vmem:[#allocation3 + $0x4ce] ss:$144 sm:$0xc]  ;;  %v6381_v49 = vld [vmem:[#allocation3 + $0x4f] ss:$144 sm:$0x3] }
 0x4cd   :  { %10728 = vmatpush3.bf16.msra.mxu1 %v11234_v7  ;;  %10743 = vmatprep.mubr.msk.bf16.mxu1 %vm11341_vm10, %v11340_v24  ;;  %v11249_v52 = vld [vmem:[%s13854_s5 + $0x438] sm:$0xff]   ;;  %v6384_v47 = vld [vmem:[#allocation3 + $0x4f] ss:$144 sm:$0x30] }
 0x4ce   :  { %10729 = vmatprep.subr.bf16.mxu1 %v11340_v24  ;;  %10717 = vmatprep.subr.bf16.mxu0 %v11340_v24  ;;  %v6389_v35 = vld [vmem:[#allocation3 + $0x4cf] ss:$144 sm:$0x3]  ;;  %v6376_v16 = vld [vmem:[#allocation3 + $0x4ce] ss:$144 sm:$0x30] }
 0x4cf   :  { %v6390_v56 = vld [vmem:[#allocation3 + $0x4cf] ss:$144 sm:$0xc]  ;;  %v6370_v4 = vld [vmem:[#allocation3 + $0x4e] ss:$144 sm:$0xc0] }
 0x4d0   :  { %10718 = vmatpush3.bf16.msra.mxu0 %v11243_v55  ;;  %v11246_v55 = vld [vmem:[%s13854_s5 + $0x3c8] sm:$0xff]   ;;  %v6391_v6 = vor.u32 %v6390_v56, %v6389_v35  ;;  %v6392_v21 = vld [vmem:[#allocation3 + $0x4cf] ss:$144 sm:$0x30]  ;;  %v11257_v35 = vld [vmem:[%s13854_s5 + $0x418] sm:$0xff]  }
 0x4d1   :  { %10730 = vmatpush3.bf16.msra.mxu1 %v11236_v15  ;;  %10719 = vmatprep.subr.bf16.mxu0 %v11340_v24  ;;  %v6245_v15 = vld [vmem:[#allocation3 + $0x4ca] ss:$144 sm:$0x30]  ;;  %v6386_v32 = vld [vmem:[#allocation3 + $0x4f] ss:$144 sm:$0xc0] }
 0x4d2   :  { %10731 = vmatprep.subr.bf16.mxu1 %v11340_v24  ;;  %v6397_v8 = vld [vmem:[#allocation3 + $0x5b] ss:$144 sm:$0x3]  ;;  %v6378_v0 = vld [vmem:[#allocation3 + $0x4ce] ss:$144 sm:$0xc0]  ;;  %v6393_v58 = vor.u32 %v6392_v21, %v6391_v6 }
 0x4d3   :  { %v4744_v5 = vpop.f32.mrf.mxu1  ;;  %v6398_v50 = vld [vmem:[#allocation3 + $0x5b] ss:$144 sm:$0xc]  ;;  %v6413_v53 = vld [vmem:[#allocation3 + $0x5c] ss:$144 sm:$0x3] }
 0x4d4   :  { %v13425_v41 = vadd.f32 %v4744_v5, %v4572_v12  ;;  %v6212_v12 = vor.u32 %v6211_v33, %v6210_v28  ;;  %10720 = vmatpush3.bf16.msra.mxu0 %v11245_v18  ;;  %v6244_v5 = vor.u32 %v6243_v63, %v6242_v42  ;;  %v6367_v28 = vor.u32 %v6366_v31, %v6365_v30  ;;  %v6368_v33 = vld [vmem:[#allocation3 + $0x4e] ss:$144 sm:$0x30]  ;;  %v6405_v20 = vld [vmem:[#allocation3 + $0x4db] ss:$144 sm:$0x3] }
 0x4d5   :  { %v10545_v14 = vpop.f32.mrf.mxu1  ;;  %10732 = vmatpush3.bf16.msra.mxu1 %v11238_v27  ;;  %10721 = vmatprep.subr.bf16.mxu0 %v11340_v24  ;;  %v6240_v27 = vor.u32 %v6239_v10, %v6238_v54  ;;  %v6402_v23 = vld [vmem:[#allocation3 + $0x5b] ss:$144 sm:$0xc0]  ;;  %v6414_v10 = vld [vmem:[#allocation3 + $0x5c] ss:$144 sm:$0xc] }
 0x4d6   :  { %10733 = vmatprep.subr.bf16.mxu1 %v11340_v24  ;;  %v6214_v3 = vor.u32 %v6213_v46, %v6212_v12  ;;  %v6247_v14 = vld [vmem:[#allocation3 + $0x4ca] ss:$144 sm:$0xc0]  ;;  %v6246_v18 = vor.u32 %v6245_v15, %v6244_v5  ;;  %v6375_v46 = vor.u32 %v6374_v43, %v6373_v57  ;;  %v6410_v51 = vld [vmem:[#allocation3 + $0x4db] ss:$144 sm:$0xc0]  ;;  %v6415_v54 = vor.u32 %v6414_v10, %v6413_v53 }
 0x4d7   :  { %v4747_v9 = vpop.f32.mrf.mxu1  ;;  %v6416_v5 = vld [vmem:[#allocation3 + $0x5c] ss:$144 sm:$0x30]  ;;  %v11258_v53 = vld [vmem:[%s13854_s5 + $0x458] sm:$0xff]  }
 0x4d8   :  { %v13437_v17 = vadd.f32 %v4747_v9, %v4573_v19  ;;  %v6223_v19 = vld [vmem:[#allocation3 + $0x49] ss:$144 sm:$0xc0]  ;;  %10722 = vmatpush3.bf16.msra.mxu0 %v11247_v48  ;;  %v6216_v7 = vor.u32 %v6215_v37, %v6214_v3  ;;  %v6232_v9 = vor.u32 %v6231_v38, %v6230_v11  ;;  %v6382_v48 = vld [vmem:[#allocation3 + $0x4f] ss:$144 sm:$0xc]  ;;  %v6369_v37 = vor.u32 %v6368_v33, %v6367_v28 }
 0x4d9   :  { %v10546_v61 = vpop.f32.mrf.mxu1  ;;  %10734 = vmatpush3.bf16.msra.mxu1 %v11240_v59  ;;  %10747 = vmatprep.subr.bf16.mxu0 %v11340_v24  ;;  %v6224_v36 = vor.u32 %v6223_v19, %v6222_v44  ;;  %v6399_v3 = vor.u32 %v6398_v50, %v6397_v8  ;;  %v6400_v44 = vld [vmem:[#allocation3 + $0x5b] ss:$144 sm:$0x30]  ;;  %v6377_v19 = vor.u32 %v6376_v16, %v6375_v46  ;;  %v6418_v15 = vld [vmem:[#allocation3 + $0x5c] ss:$144 sm:$0xc0] }
 0x4da   :  { %10735 = vmatprep.subr.bf16.mxu1 %v11340_v24  ;;  %v6248_v61 = vor.u32 %v6247_v14, %v6246_v18  ;;  %v6250_v59 = vmax.f32 %v6200_v29, %v6216_v7  ;;  %v6406_v38 = vld [vmem:[#allocation3 + $0x4db] ss:$144 sm:$0xc]  ;;  %v6371_v63 = vor.u32 %v6370_v4, %v6369_v37  ;;  %v11253_v28 = vld [vmem:[%s13854_s5 + $0x428] sm:$0xff]  }
 0x4db   :  { %v6251_v13 = vmax.f32 %v6224_v36, %v6240_v27  ;;  %v6401_v26 = vor.u32 %v6400_v44, %v6399_v3  ;;  %v6407_v39 = vor.u32 %v6406_v38, %v6405_v20  ;;  %v6408_v11 = vld [vmem:[#allocation3 + $0x4db] ss:$144 sm:$0x30]  ;;  %v6379_v14 = vor.u32 %v6378_v0, %v6377_v19  ;;  %v6422_v27 = vld [vmem:[#allocation3 + $0x4dc] ss:$144 sm:$0xc] }
 0x4dc   :  { %v6252_v34 = vmax.f32 %v6232_v9, %v6248_v61  ;;  %v6421_v9 = vld [vmem:[#allocation3 + $0x4dc] ss:$144 sm:$0x3]  ;;  %v11261_v50 = vld [vmem:[%s13854_s5 + $0x408] sm:$0xff]  }
 0x4dd   :  { %10736 = vmatpush3.bf16.msra.mxu1 %v11242_v45  ;;  %v6253_v62 = vmax.f32 %v6249_v22, %v6251_v13  ;;  %v6383_v45 = vor.u32 %v6382_v48, %v6381_v49  ;;  %v6409_v36 = vor.u32 %v6408_v11, %v6407_v39  ;;  %v6403_v22 = vor.u32 %v6402_v23, %v6401_v26  ;;  %v6426_v13 = vld [vmem:[#allocation3 + $0x4dc] ss:$144 sm:$0xc0]  ;;  %v6544_v37 = vld [vmem:[#allocation3 + $0x50] ss:$144 sm:$0x3] }
 0x4de   :  { %10737 = vmatprep.subr.bf16.mxu1 %v11340_v24  ;;  %v6254_v12 = vmax.f32 %v6250_v59, %v6252_v34  ;;  %v6423_v61 = vor.u32 %v6422_v27, %v6421_v9  ;;  %v6424_v59 = vld [vmem:[#allocation3 + $0x4dc] ss:$144 sm:$0x30]  ;;  %v6545_v0 = vld [vmem:[#allocation3 + $0x50] ss:$144 sm:$0xc] }
 0x4df   :  { %v6385_v1 = vor.u32 %v6384_v47, %v6383_v45  ;;  %v6411_v31 = vor.u32 %v6410_v51, %v6409_v36  ;;  %v11255_v47 = vld [vmem:[%s13854_s5 + $0x420] sm:$0xff]   ;;  %v11252_v16 = vld [vmem:[%s13854_s5 + $0x470] sm:$0xff]   ;;  %v6552_v3 = vld [vmem:[#allocation3 + $0x4d0] ss:$144 sm:$0x3]  ;;  %v6546_v20 = vor.u32 %v6545_v0, %v6544_v37 }
 0x4e0   :  { %v6255_v25 = vpack.c.bf16 %v6254_v12, %v6253_v62  ;;  %v6425_v43 = vor.u32 %v6424_v59, %v6423_v61  ;;  %v11251_v62 = vld [vmem:[%s13854_s5 + $0x430] sm:$0xff]   ;;  %v11250_v12 = vld [vmem:[%s13854_s5 + $0x478] sm:$0xff]   ;;  %v11263_v23 = vld [vmem:[%s13854_s5 + $0x400] sm:$0xff]  }
 0x4e1   :  { %10738 = vmatpush3.bf16.msra.mxu1 %v11244_v2  ;;  %v6394_v2 = vld [vmem:[#allocation3 + $0x4cf] ss:$144 sm:$0xc0]  ;;  %v6387_v7 = vor.u32 %v6386_v32, %v6385_v1  ;;  %v11254_v32 = vld [vmem:[%s13854_s5 + $0x468] sm:$0xff]  }
 0x4e2   :  { %10739 = vmatprep.subr.bf16.mxu1 %v11340_v24  ;;  %10724 = vmatmul.mubr.bf16.vlgmr.msra.gmra.mxu0 %v6255_v25  ;;  %v6427_v49 = vor.u32 %v6426_v13, %v6425_v43  ;;  %v11259_v25 = vld [vmem:[%s13854_s5 + $0x410] sm:$0xff]   ;;  %v6553_v44 = vld [vmem:[#allocation3 + $0x4d0] ss:$144 sm:$0xc]  ;;  %v11264_v0 = vld [vmem:[%s13854_s5 + $0x440] sm:$0xff]  }
 0x4e3   :  { %10748 = vmatpush3.bf16.msra.mxu0 %v11249_v52  ;;  %10763 = vmatprep.mubr.msk.bf16.mxu0 %vm11341_vm10, %v11340_v24  ;;  %v6428_v34 = vmax.f32 %v6371_v63, %v6387_v7  ;;  %v6560_v19 = vld [vmem:[#allocation3 + $0x51] ss:$144 sm:$0x3]  ;;  %v6547_v38 = vld [vmem:[#allocation3 + $0x50] ss:$144 sm:$0x30]  ;;  %v6554_v39 = vor.u32 %v6553_v44, %v6552_v3 }
 0x4e4   :  { %10749 = vmatprep.subr.bf16.mxu0 %v11340_v24  ;;  %v6563_v26 = vld [vmem:[#allocation3 + $0x51] ss:$144 sm:$0x30]  ;;  %v6555_v10 = vld [vmem:[#allocation3 + $0x4d0] ss:$144 sm:$0x30] }
 0x4e5   :  { %10740 = vmatpush3.bf16.msra.mxu1 %v11246_v55  ;;  %v6395_v55 = vor.u32 %v6394_v2, %v6393_v58  ;;  %v11256_v2 = vld [vmem:[%s13854_s5 + $0x460] sm:$0xff]   ;;  %v6561_v58 = vld [vmem:[#allocation3 + $0x51] ss:$144 sm:$0xc]  ;;  %v6556_v27 = vor.u32 %v6555_v10, %v6554_v39  ;;  %v11260_v61 = vld [vmem:[%s13854_s5 + $0x450] sm:$0xff]  }
 0x4e6   :  { %10741 = vmatprep.subr.bf16.mxu1 %v11340_v24  ;;  %v6568_v11 = vld [vmem:[#allocation3 + $0x4d1] ss:$144 sm:$0x3]  ;;  %v6549_v63 = vld [vmem:[#allocation3 + $0x50] ss:$144 sm:$0xc0] }
 0x4e7   :  { %v6429_v48 = vmax.f32 %v6379_v14, %v6395_v55  ;;  %10750 = vmatpush3.bf16.msra.mxu0 %v11251_v62  ;;  %v6569_v51 = vld [vmem:[#allocation3 + $0x4d1] ss:$144 sm:$0xc]  ;;  %v6576_v7 = vld [vmem:[#allocation3 + $0x5d] ss:$144 sm:$0x3] }
 0x4e8   :  { %v4923_v40 = vpop.f32.mrf.mxu0  ;;  %10751 = vmatprep.subr.bf16.mxu0 %v11340_v24  ;;  %v6577_v36 = vld [vmem:[#allocation3 + $0x5d] ss:$144 sm:$0xc]  ;;  %v6565_v14 = vld [vmem:[#allocation3 + $0x51] ss:$144 sm:$0xc0] }
 0x4e9   :  { %10742 = vmatpush3.bf16.msra.mxu1 %v11248_v60  ;;  %v4930_v29 = vadd.f32 %v4923_v40, %v13425_v41  ;;  %v6417_v60 = vor.u32 %v6416_v5, %v6415_v54  ;;  %v6562_v40 = vor.u32 %v6561_v58, %v6560_v19  ;;  %v6548_v54 = vor.u32 %v6547_v38, %v6546_v20  ;;  %v6557_v5 = vld [vmem:[#allocation3 + $0x4d0] ss:$144 sm:$0xc0]  ;;  %v6579_v9 = vld [vmem:[#allocation3 + $0x5d] ss:$144 sm:$0x30] }
 0x4ea   :  { %10767 = vmatprep.subr.bf16.mxu1 %v11340_v24  ;;  %v10565_v42 = vpop.f32.mrf.mxu0  ;;  %v6578_v55 = vor.u32 %v6577_v36, %v6576_v7  ;;  %v6592_v43 = vld [vmem:[#allocation3 + $0x5e] ss:$144 sm:$0x3]  ;;  %v6723_v44 = vld [vmem:[#allocation3 + $0x52] ss:$144 sm:$0x3] }
 0x4eb   :  { %v6419_v57 = vor.u32 %v6418_v15, %v6417_v60  ;;  %10752 = vmatpush3.bf16.msra.mxu0 %v11253_v28  ;;  %v6571_v42 = vld [vmem:[#allocation3 + $0x4d1] ss:$144 sm:$0x30]  ;;  %v6564_v15 = vor.u32 %v6563_v26, %v6562_v40  ;;  %v6585_v60 = vld [vmem:[#allocation3 + $0x4dd] ss:$144 sm:$0xc]  ;;  %v6550_v62 = vor.u32 %v6549_v63, %v6548_v54 }
 0x4ec   :  { %v4926_v18 = vpop.f32.mrf.mxu0  ;;  %10753 = vmatprep.subr.bf16.mxu0 %v11340_v24  ;;  %v6580_v13 = vor.u32 %v6579_v9, %v6578_v55  ;;  %v6595_v28 = vld [vmem:[#allocation3 + $0x5e] ss:$144 sm:$0x30]  ;;  %v6724_v19 = vld [vmem:[#allocation3 + $0x52] ss:$144 sm:$0xc] }
 0x4ed   :  { %v4931_v30 = vadd.f32 %v4926_v18, %v13437_v17  ;;  %v6430_v52 = vmax.f32 %v6403_v22, %v6419_v57  ;;  %v6431_v17 = vmax.f32 %v6411_v31, %v6427_v49  ;;  %v6573_v18 = vld [vmem:[#allocation3 + $0x4d1] ss:$144 sm:$0xc0]  ;;  %v6584_v22 = vld [vmem:[#allocation3 + $0x4dd] ss:$144 sm:$0x3]  ;;  %v6566_v49 = vor.u32 %v6565_v14, %v6564_v15 }
 0x4ee   :  { %v10566_v41 = vpop.f32.mrf.mxu0  ;;  %v6587_v31 = vld [vmem:[#allocation3 + $0x4dd] ss:$144 sm:$0x30]  ;;  %v6731_v58 = vld [vmem:[#allocation3 + $0x4d2] ss:$144 sm:$0x3] }
 0x4ef   :  { %v6432_v33 = vmax.f32 %v6428_v34, %v6430_v52  ;;  %v6433_v45 = vmax.f32 %v6429_v48, %v6431_v17  ;;  %10754 = vmatpush3.bf16.msra.mxu0 %v11255_v47  ;;  %v6586_v41 = vor.u32 %v6585_v60, %v6584_v22  ;;  %v6589_v57 = vld [vmem:[#allocation3 + $0x4dd] ss:$144 sm:$0xc0]  ;;  %v6593_v34 = vld [vmem:[#allocation3 + $0x5e] ss:$144 sm:$0xc]  ;;  %v6607_v37 = vmax.f32 %v6550_v62, %v6566_v49 }
 0x4f0   :  { %10755 = vmatprep.subr.bf16.mxu0 %v11340_v24  ;;  %v6594_v52 = vor.u32 %v6593_v34, %v6592_v43  ;;  %v6597_v17 = vld [vmem:[#allocation3 + $0x5e] ss:$144 sm:$0xc0]  ;;  %v6732_v20 = vld [vmem:[#allocation3 + $0x4d2] ss:$144 sm:$0xc] }
 0x4f1   :  { %v6434_v46 = vpack.c.bf16 %v6433_v45, %v6432_v33  ;;  %v6588_v48 = vor.u32 %v6587_v31, %v6586_v41  ;;  %v6558_v33 = vor.u32 %v6557_v5, %v6556_v27  ;;  %v6600_v45 = vld [vmem:[#allocation3 + $0x4de] ss:$144 sm:$0x3]  ;;  %v6739_v26 = vld [vmem:[#allocation3 + $0x53] ss:$144 sm:$0x3] }
 0x4f2   :  { %v6601_v47 = vld [vmem:[#allocation3 + $0x4de] ss:$144 sm:$0xc]  ;;  %v11265_v39 = vld [vmem:[%s13854_s5 + $0x4b8] sm:$0xff]  }
 0x4f3   :  { %10744 = vmatmul.mubr.bf16.vlgmr.msra.gmra.mxu1 %v6434_v46  ;;  %10756 = vmatpush3.bf16.msra.mxu0 %v11257_v35  ;;  %v6596_v35 = vor.u32 %v6595_v28, %v6594_v52  ;;  %v6742_v10 = vld [vmem:[#allocation3 + $0x53] ss:$144 sm:$0x30]  ;;  %v6734_v36 = vld [vmem:[#allocation3 + $0x4d2] ss:$144 sm:$0x30] }
 0x4f4   :  { %10768 = vmatpush3.bf16.msra.mxu1 %v11250_v12  ;;  %10783 = vmatprep.mubr.msk.bf16.mxu1 %vm11341_vm10, %v11340_v24  ;;  %v6747_v63 = vld [vmem:[#allocation3 + $0x4d3] ss:$144 sm:$0x3]  ;;  %v6728_v14 = vld [vmem:[#allocation3 + $0x52] ss:$144 sm:$0xc0] }
 0x4f5   :  { %10769 = vmatprep.subr.bf16.mxu1 %v11340_v24  ;;  %10757 = vmatprep.subr.bf16.mxu0 %v11340_v24  ;;  %v6748_v7 = vld [vmem:[#allocation3 + $0x4d3] ss:$144 sm:$0xc]  ;;  %v6755_v9 = vld [vmem:[#allocation3 + $0x5f] ss:$144 sm:$0x3] }
 0x4f6   :  { %v6749_v54 = vor.u32 %v6748_v7, %v6747_v63  ;;  %v6750_v5 = vld [vmem:[#allocation3 + $0x4d3] ss:$144 sm:$0x30]  ;;  %v6756_v27 = vld [vmem:[#allocation3 + $0x5f] ss:$144 sm:$0xc] }
 0x4f7   :  { %10758 = vmatpush3.bf16.msra.mxu0 %v11259_v25  ;;  %v11262_v25 = vld [vmem:[%s13854_s5 + $0x448] sm:$0xff]   ;;  %v6763_v31 = vld [vmem:[#allocation3 + $0x4df] ss:$144 sm:$0x3]  ;;  %v11273_v63 = vld [vmem:[%s13854_s5 + $0x498] sm:$0xff]  }
 0x4f8   :  { %10770 = vmatpush3.bf16.msra.mxu1 %v11252_v16  ;;  %10759 = vmatprep.subr.bf16.mxu0 %v11340_v24  ;;  %v6603_v16 = vld [vmem:[#allocation3 + $0x4de] ss:$144 sm:$0x30]  ;;  %v6744_v55 = vld [vmem:[#allocation3 + $0x53] ss:$144 sm:$0xc0]  ;;  %v6751_v41 = vor.u32 %v6750_v5, %v6749_v54 }
 0x4f9   :  { %10771 = vmatprep.subr.bf16.mxu1 %v11340_v24  ;;  %v6736_v22 = vld [vmem:[#allocation3 + $0x4d2] ss:$144 sm:$0xc0]  ;;  %v6760_v62 = vld [vmem:[#allocation3 + $0x5f] ss:$144 sm:$0xc0] }
 0x4fa   :  { %v5102_v56 = vpop.f32.mrf.mxu1  ;;  %v6768_v52 = vld [vmem:[#allocation3 + $0x4df] ss:$144 sm:$0xc0]  ;;  %v6771_v28 = vld [vmem:[#allocation3 + $0x60] ss:$144 sm:$0x3] }
 0x4fb   :  { %v13499_v6 = vadd.f32 %v5102_v56, %v4930_v29  ;;  %v6570_v29 = vor.u32 %v6569_v51, %v6568_v11  ;;  %10760 = vmatpush3.bf16.msra.mxu0 %v11261_v50  ;;  %v6602_v56 = vor.u32 %v6601_v47, %v6600_v45  ;;  %v6725_v11 = vor.u32 %v6724_v19, %v6723_v44  ;;  %v6726_v51 = vld [vmem:[#allocation3 + $0x52] ss:$144 sm:$0x30] }
 0x4fc   :  { %v10585_v21 = vpop.f32.mrf.mxu1  ;;  %10772 = vmatpush3.bf16.msra.mxu1 %v11254_v32  ;;  %10761 = vmatprep.subr.bf16.mxu0 %v11340_v24  ;;  %v6598_v32 = vor.u32 %v6597_v17, %v6596_v35  ;;  %v6772_v17 = vld [vmem:[#allocation3 + $0x60] ss:$144 sm:$0xc] }
 0x4fd   :  { %10773 = vmatprep.subr.bf16.mxu1 %v11340_v24  ;;  %v6572_v59 = vor.u32 %v6571_v42, %v6570_v29  ;;  %v6605_v21 = vld [vmem:[#allocation3 + $0x4de] ss:$144 sm:$0xc0]  ;;  %v6604_v50 = vor.u32 %v6603_v16, %v6602_v56  ;;  %v6733_v42 = vor.u32 %v6732_v20, %v6731_v58  ;;  %v6773_v35 = vor.u32 %v6772_v17, %v6771_v28  ;;  %v6774_v56 = vld [vmem:[#allocation3 + $0x60] ss:$144 sm:$0x30] }
 0x4fe   :  { %v5105_v4 = vpop.f32.mrf.mxu1  ;;  %v6776_v16 = vld [vmem:[#allocation3 + $0x60] ss:$144 sm:$0xc0]  ;;  %v6913_v17 = vld [vmem:[#allocation3 + $0x4d4] ss:$144 sm:$0x30] }
 0x4ff   :  { %v13511_v8 = vadd.f32 %v5105_v4, %v4931_v30  ;;  %v6581_v30 = vld [vmem:[#allocation3 + $0x5d] ss:$144 sm:$0xc0]  ;;  %10762 = vmatpush3.bf16.msra.mxu0 %v11263_v23  ;;  %v6574_v12 = vor.u32 %v6573_v18, %v6572_v59  ;;  %v6590_v4 = vor.u32 %v6589_v57, %v6588_v48  ;;  %v6740_v23 = vld [vmem:[#allocation3 + $0x53] ss:$144 sm:$0xc]  ;;  %v6727_v18 = vor.u32 %v6726_v51, %v6725_v11 }
 0x500   :  { %v10586_v1 = vpop.f32.mrf.mxu1  ;;  %10774 = vmatpush3.bf16.msra.mxu1 %v11256_v2  ;;  %10787 = vmatprep.subr.bf16.mxu0 %v11340_v24  ;;  %v6582_v46 = vor.u32 %v6581_v30, %v6580_v13  ;;  %v6757_v59 = vor.u32 %v6756_v27, %v6755_v9  ;;  %v6758_v13 = vld [vmem:[#allocation3 + $0x5f] ss:$144 sm:$0x30]  ;;  %v6735_v30 = vor.u32 %v6734_v36, %v6733_v42  ;;  %v11269_v11 = vld [vmem:[%s13854_s5 + $0x4a8] sm:$0xff]   ;;  %v11274_v28 = vld [vmem:[%s13854_s5 + $0x4d8] sm:$0xff]  }
 0x501   :  { %10775 = vmatprep.subr.bf16.mxu1 %v11340_v24  ;;  %v6606_v1 = vor.u32 %v6605_v21, %v6604_v50  ;;  %v6608_v2 = vmax.f32 %v6558_v33, %v6574_v12  ;;  %v6764_v57 = vld [vmem:[#allocation3 + $0x4df] ss:$144 sm:$0xc]  ;;  %v6729_v47 = vor.u32 %v6728_v14, %v6727_v18  ;;  %v11277_v27 = vld [vmem:[%s13854_s5 + $0x488] sm:$0xff]  }
 0x502   :  { %v6609_v3 = vmax.f32 %v6582_v46, %v6598_v32  ;;  %v6759_v34 = vor.u32 %v6758_v13, %v6757_v59  ;;  %v6765_v49 = vor.u32 %v6764_v57, %v6763_v31  ;;  %v6766_v48 = vld [vmem:[#allocation3 + $0x4df] ss:$144 sm:$0x30]  ;;  %v6737_v21 = vor.u32 %v6736_v22, %v6735_v30  ;;  %v6780_v32 = vld [vmem:[#allocation3 + $0x4e0] ss:$144 sm:$0xc] }
 0x503   :  { %v6610_v38 = vmax.f32 %v6590_v4, %v6606_v1  ;;  %v6779_v4 = vld [vmem:[#allocation3 + $0x4e0] ss:$144 sm:$0x3]  ;;  %v11268_v36 = vld [vmem:[%s13854_s5 + $0x4f0] sm:$0xff]  }
 0x504   :  { %10776 = vmatpush3.bf16.msra.mxu1 %v11258_v53  ;;  %v6611_v40 = vmax.f32 %v6607_v37, %v6609_v3  ;;  %v6741_v53 = vor.u32 %v6740_v23, %v6739_v26  ;;  %v6767_v46 = vor.u32 %v6766_v48, %v6765_v49  ;;  %v6761_v37 = vor.u32 %v6760_v62, %v6759_v34  ;;  %v6784_v3 = vld [vmem:[#allocation3 + $0x4e0] ss:$144 sm:$0xc0]  ;;  %v6902_v18 = vld [vmem:[#allocation3 + $0x54] ss:$144 sm:$0x3] }
 0x505   :  { %10777 = vmatprep.subr.bf16.mxu1 %v11340_v24  ;;  %v6612_v29 = vmax.f32 %v6608_v2, %v6610_v38  ;;  %v6781_v1 = vor.u32 %v6780_v32, %v6779_v4  ;;  %v6782_v2 = vld [vmem:[#allocation3 + $0x4e0] ss:$144 sm:$0x30]  ;;  %v6903_v22 = vld [vmem:[#allocation3 + $0x54] ss:$144 sm:$0xc] }
 0x506   :  { %v6743_v60 = vor.u32 %v6742_v10, %v6741_v53  ;;  %v6769_v19 = vor.u32 %v6768_v52, %v6767_v46  ;;  %v11271_v10 = vld [vmem:[%s13854_s5 + $0x4a0] sm:$0xff]   ;;  %v6910_v59 = vld [vmem:[#allocation3 + $0x4d4] ss:$144 sm:$0x3]  ;;  %v6904_v31 = vor.u32 %v6903_v22, %v6902_v18 }
 0x507   :  { %v6613_v15 = vpack.c.bf16 %v6612_v29, %v6611_v40  ;;  %v6783_v20 = vor.u32 %v6782_v2, %v6781_v1  ;;  %v11267_v40 = vld [vmem:[%s13854_s5 + $0x4b0] sm:$0xff]   ;;  %v11266_v29 = vld [vmem:[%s13854_s5 + $0x4f8] sm:$0xff]   ;;  %v11279_v62 = vld [vmem:[%s13854_s5 + $0x480] sm:$0xff]  }
 0x508   :  { %10778 = vmatpush3.bf16.msra.mxu1 %v11260_v61  ;;  %v6752_v61 = vld [vmem:[#allocation3 + $0x4d3] ss:$144 sm:$0xc0]  ;;  %v6745_v12 = vor.u32 %v6744_v55, %v6743_v60  ;;  %v6911_v13 = vld [vmem:[#allocation3 + $0x4d4] ss:$144 sm:$0xc] }
 0x509   :  { %10779 = vmatprep.subr.bf16.mxu1 %v11340_v24  ;;  %10764 = vmatmul.mubr.bf16.vlgmr.msra.gmra.mxu0 %v6613_v15  ;;  %v6785_v26 = vor.u32 %v6784_v3, %v6783_v20  ;;  %v11275_v15 = vld [vmem:[%s13854_s5 + $0x490] sm:$0xff]   ;;  %v11270_v55 = vld [vmem:[%s13854_s5 + $0x4e8] sm:$0xff]   ;;  %v6912_v49 = vor.u32 %v6911_v13, %v6910_v59  ;;  %v11280_v22 = vld [vmem:[%s13854_s5 + $0x4c0] sm:$0xff]  }
 0x50a   :  { %10788 = vmatpush3.bf16.msra.mxu0 %v11265_v39  ;;  %10803 = vmatprep.mubr.msk.bf16.mxu0 %vm11341_vm10, %v11340_v24  ;;  %v6786_v38 = vmax.f32 %v6729_v47, %v6745_v12  ;;  %v6918_v30 = vld [vmem:[#allocation3 + $0x55] ss:$144 sm:$0x3]  ;;  %v6905_v57 = vld [vmem:[#allocation3 + $0x54] ss:$144 sm:$0x30] }
 0x50b   :  { %10789 = vmatprep.subr.bf16.mxu0 %v11340_v24  ;;  %v6921_v34 = vld [vmem:[#allocation3 + $0x55] ss:$144 sm:$0x30]  ;;  %v6907_v47 = vld [vmem:[#allocation3 + $0x54] ss:$144 sm:$0xc0]  ;;  %v6914_v32 = vor.u32 %v6913_v17, %v6912_v49 }
 0x50c   :  { %10780 = vmatpush3.bf16.msra.mxu1 %v11262_v25  ;;  %v6753_v25 = vor.u32 %v6752_v61, %v6751_v41  ;;  %v11272_v61 = vld [vmem:[%s13854_s5 + $0x4e0] sm:$0xff]   ;;  %v6919_v41 = vld [vmem:[#allocation3 + $0x55] ss:$144 sm:$0xc]  ;;  %v11276_v1 = vld [vmem:[%s13854_s5 + $0x4d0] sm:$0xff]  }
 0x50d   :  { %10781 = vmatprep.subr.bf16.mxu1 %v11340_v24  ;;  %v6926_v48 = vld [vmem:[#allocation3 + $0x4d5] ss:$144 sm:$0x3]  ;;  %v6934_v12 = vld [vmem:[#allocation3 + $0x61] ss:$144 sm:$0x3] }
 0x50e   :  { %v6787_v23 = vmax.f32 %v6737_v21, %v6753_v25  ;;  %10790 = vmatpush3.bf16.msra.mxu0 %v11267_v40  ;;  %v6927_v52 = vld [vmem:[#allocation3 + $0x4d5] ss:$144 sm:$0xc]  ;;  %v6935_v46 = vld [vmem:[#allocation3 + $0x61] ss:$144 sm:$0xc] }
 0x50f   :  { %v5281_v43 = vpop.f32.mrf.mxu0  ;;  %10791 = vmatprep.subr.bf16.mxu0 %v11340_v24  ;;  %v6923_v21 = vld [vmem:[#allocation3 + $0x55] ss:$144 sm:$0xc0]  ;;  %v6936_v25 = vor.u32 %v6935_v46, %v6934_v12  ;;  %v6937_v4 = vld [vmem:[#allocation3 + $0x61] ss:$144 sm:$0x30] }
 0x510   :  { %10782 = vmatpush3.bf16.msra.mxu1 %v11264_v0  ;;  %v5288_v33 = vadd.f32 %v5281_v43, %v13499_v6  ;;  %v6775_v0 = vor.u32 %v6774_v56, %v6773_v35  ;;  %v6920_v43 = vor.u32 %v6919_v41, %v6918_v30  ;;  %v6906_v35 = vor.u32 %v6905_v57, %v6904_v31  ;;  %v6915_v56 = vld [vmem:[#allocation3 + $0x4d4] ss:$144 sm:$0xc0]  ;;  %v6950_v20 = vld [vmem:[#allocation3 + $0x62] ss:$144 sm:$0x3] }
 0x511   :  { %10807 = vmatprep.subr.bf16.mxu1 %v11340_v24  ;;  %v10605_v45 = vpop.f32.mrf.mxu0  ;;  %v6938_v3 = vor.u32 %v6937_v4, %v6936_v25  ;;  %v7081_v13 = vld [vmem:[#allocation3 + $0x56] ss:$144 sm:$0x3]  ;;  %v7100_v17 = vld [vmem:[#allocation3 + $0x57] ss:$144 sm:$0x30] }
 0x512   :  { %v6777_v58 = vor.u32 %v6776_v16, %v6775_v0  ;;  %10792 = vmatpush3.bf16.msra.mxu0 %v11269_v11  ;;  %v6929_v45 = vld [vmem:[#allocation3 + $0x4d5] ss:$144 sm:$0x30]  ;;  %v6922_v16 = vor.u32 %v6921_v34, %v6920_v43  ;;  %v6943_v0 = vld [vmem:[#allocation3 + $0x4e1] ss:$144 sm:$0xc]  ;;  %v6908_v40 = vor.u32 %v6907_v47, %v6906_v35 }
 0x513   :  { %v5284_v50 = vpop.f32.mrf.mxu0  ;;  %10793 = vmatprep.subr.bf16.mxu0 %v11340_v24  ;;  %v6953_v11 = vld [vmem:[#allocation3 + $0x62] ss:$144 sm:$0x30]  ;;  %v7082_v30 = vld [vmem:[#allocation3 + $0x56] ss:$144 sm:$0xc] }
 0x514   :  { %v5289_v44 = vadd.f32 %v5284_v50, %v13511_v8  ;;  %v6788_v39 = vmax.f32 %v6761_v37, %v6777_v58  ;;  %v6789_v8 = vmax.f32 %v6769_v19, %v6785_v26  ;;  %v6931_v50 = vld [vmem:[#allocation3 + $0x4d5] ss:$144 sm:$0xc0]  ;;  %v6942_v37 = vld [vmem:[#allocation3 + $0x4e1] ss:$144 sm:$0x3]  ;;  %v6924_v26 = vor.u32 %v6923_v21, %v6922_v16 }
 0x515   :  { %v10606_v6 = vpop.f32.mrf.mxu0  ;;  %v6945_v19 = vld [vmem:[#allocation3 + $0x4e1] ss:$144 sm:$0x30]  ;;  %v7089_v41 = vld [vmem:[#allocation3 + $0x4d6] ss:$144 sm:$0x3] }
 0x516   :  { %v6790_v51 = vmax.f32 %v6786_v38, %v6788_v39  ;;  %v6791_v53 = vmax.f32 %v6787_v23, %v6789_v8  ;;  %10794 = vmatpush3.bf16.msra.mxu0 %v11271_v10  ;;  %v6944_v6 = vor.u32 %v6943_v0, %v6942_v37  ;;  %v6947_v58 = vld [vmem:[#allocation3 + $0x4e1] ss:$144 sm:$0xc0]  ;;  %v6951_v38 = vld [vmem:[#allocation3 + $0x62] ss:$144 sm:$0xc]  ;;  %v6965_v18 = vmax.f32 %v6908_v40, %v6924_v26 }
 0x517   :  { %10795 = vmatprep.subr.bf16.mxu0 %v11340_v24  ;;  %v6952_v39 = vor.u32 %v6951_v38, %v6950_v20  ;;  %v6955_v8 = vld [vmem:[#allocation3 + $0x62] ss:$144 sm:$0xc0]  ;;  %v7090_v31 = vld [vmem:[#allocation3 + $0x4d6] ss:$144 sm:$0xc] }
 0x518   :  { %v6792_v42 = vpack.c.bf16 %v6791_v53, %v6790_v51  ;;  %v6946_v23 = vor.u32 %v6945_v19, %v6944_v6  ;;  %v6916_v51 = vor.u32 %v6915_v56, %v6914_v32  ;;  %v6958_v53 = vld [vmem:[#allocation3 + $0x4e2] ss:$144 sm:$0x3]  ;;  %v7097_v34 = vld [vmem:[#allocation3 + $0x57] ss:$144 sm:$0x3] }
 0x519   :  { %v6959_v10 = vld [vmem:[#allocation3 + $0x4e2] ss:$144 sm:$0xc]  ;;  %v7105_v47 = vld [vmem:[#allocation3 + $0x4d7] ss:$144 sm:$0x3] }
 0x51a   :  { %10784 = vmatmul.mubr.bf16.vlgmr.msra.gmra.mxu1 %v6792_v42  ;;  %10796 = vmatpush3.bf16.msra.mxu0 %v11273_v63  ;;  %v6954_v63 = vor.u32 %v6953_v11, %v6952_v39  ;;  %v11281_v49 = vld [vmem:[%s13854_s5 + $0x538] sm:$0xff]  }
 0x51b   :  { %10808 = vmatpush3.bf16.msra.mxu1 %v11266_v29  ;;  %10823 = vmatprep.mubr.msk.bf16.mxu1 %vm11341_vm10, %v11340_v24  ;;  %v7106_v12 = vld [vmem:[#allocation3 + $0x4d7] ss:$144 sm:$0xc]  ;;  %v7092_v46 = vld [vmem:[#allocation3 + $0x4d6] ss:$144 sm:$0x30] }
 0x51c   :  { %10809 = vmatprep.subr.bf16.mxu1 %v11340_v24  ;;  %10797 = vmatprep.subr.bf16.mxu0 %v11340_v24  ;;  %v7107_v35 = vor.u32 %v7106_v12, %v7105_v47  ;;  %v7108_v56 = vld [vmem:[#allocation3 + $0x4d7] ss:$144 sm:$0x30]  ;;  %v7086_v21 = vld [vmem:[#allocation3 + $0x56] ss:$144 sm:$0xc0] }
 0x51d   :  { %v7102_v25 = vld [vmem:[#allocation3 + $0x57] ss:$144 sm:$0xc0]  ;;  %v7113_v4 = vld [vmem:[#allocation3 + $0x63] ss:$144 sm:$0x3] }
 0x51e   :  { %10798 = vmatpush3.bf16.msra.mxu0 %v11275_v15  ;;  %v11278_v15 = vld [vmem:[%s13854_s5 + $0x4c8] sm:$0xff]   ;;  %v7109_v6 = vor.u32 %v7108_v56, %v7107_v35  ;;  %v11289_v47 = vld [vmem:[%s13854_s5 + $0x518] sm:$0xff]  }
 0x51f   :  { %10810 = vmatpush3.bf16.msra.mxu1 %v11268_v36  ;;  %10799 = vmatprep.subr.bf16.mxu0 %v11340_v24  ;;  %v6961_v36 = vld [vmem:[#allocation3 + $0x4e2] ss:$144 sm:$0x30]  ;;  %v7114_v32 = vld [vmem:[#allocation3 + $0x63] ss:$144 sm:$0xc] }
 0x520   :  { %v5460_v7 = vpop.f32.mrf.mxu1  ;;  %10811 = vmatprep.subr.bf16.mxu1 %v11340_v24  ;;  %v7094_v37 = vld [vmem:[#allocation3 + $0x4d6] ss:$144 sm:$0xc0]  ;;  %v7121_v19 = vld [vmem:[#allocation3 + $0x4e3] ss:$144 sm:$0x3] }
 0x521   :  { %v13573_v54 = vadd.f32 %v5460_v7, %v5288_v33  ;;  %v6928_v33 = vor.u32 %v6927_v52, %v6926_v48  ;;  %v6960_v7 = vor.u32 %v6959_v10, %v6958_v53  ;;  %v7083_v48 = vor.u32 %v7082_v30, %v7081_v13  ;;  %v7084_v52 = vld [vmem:[#allocation3 + $0x56] ss:$144 sm:$0x30]  ;;  %v7118_v40 = vld [vmem:[#allocation3 + $0x63] ss:$144 sm:$0xc0] }
 0x522   :  { %v10625_v5 = vpop.f32.mrf.mxu1  ;;  %10800 = vmatpush3.bf16.msra.mxu0 %v11277_v27  ;;  %v7126_v39 = vld [vmem:[#allocation3 + $0x4e3] ss:$144 sm:$0xc0]  ;;  %v7129_v11 = vld [vmem:[#allocation3 + $0x64] ss:$144 sm:$0x3] }
 0x523   :  { %10812 = vmatpush3.bf16.msra.mxu1 %v11270_v55  ;;  %10801 = vmatprep.subr.bf16.mxu0 %v11340_v24  ;;  %v6930_v2 = vor.u32 %v6929_v45, %v6928_v33  ;;  %v6963_v5 = vld [vmem:[#allocation3 + $0x4e2] ss:$144 sm:$0xc0]  ;;  %v6956_v55 = vor.u32 %v6955_v8, %v6954_v63  ;;  %v6962_v27 = vor.u32 %v6961_v36, %v6960_v7  ;;  %v7130_v8 = vld [vmem:[#allocation3 + $0x64] ss:$144 sm:$0xc] }
 0x524   :  { %v5463_v14 = vpop.f32.mrf.mxu1  ;;  %10813 = vmatprep.subr.bf16.mxu1 %v11340_v24  ;;  %v7091_v45 = vor.u32 %v7090_v31, %v7089_v41  ;;  %v7131_v63 = vor.u32 %v7130_v8, %v7129_v11  ;;  %v7132_v7 = vld [vmem:[#allocation3 + $0x64] ss:$144 sm:$0x30]  ;;  %v7271_v8 = vld [vmem:[#allocation3 + $0x4e8] ss:$144 sm:$0x30] }
 0x525   :  { %v13585_v9 = vadd.f32 %v5463_v14, %v5289_v44  ;;  %v6939_v44 = vld [vmem:[#allocation3 + $0x61] ss:$144 sm:$0xc0]  ;;  %v6932_v29 = vor.u32 %v6931_v50, %v6930_v2  ;;  %v6948_v14 = vor.u32 %v6947_v58, %v6946_v23  ;;  %v7085_v50 = vor.u32 %v7084_v52, %v7083_v48  ;;  %v7122_v58 = vld [vmem:[#allocation3 + $0x4e3] ss:$144 sm:$0xc] }
 0x526   :  { %v10626_v60 = vpop.f32.mrf.mxu1  ;;  %10802 = vmatpush3.bf16.msra.mxu0 %v11279_v62  ;;  %v6940_v42 = vor.u32 %v6939_v44, %v6938_v3  ;;  %v7098_v62 = vld [vmem:[#allocation3 + $0x57] ss:$144 sm:$0xc]  ;;  %v7115_v2 = vor.u32 %v7114_v32, %v7113_v4  ;;  %v7116_v3 = vld [vmem:[#allocation3 + $0x63] ss:$144 sm:$0x30]  ;;  %v7093_v44 = vor.u32 %v7092_v46, %v7091_v45  ;;  %v7123_v26 = vor.u32 %v7122_v58, %v7121_v19 }
 0x527   :  { %10814 = vmatpush3.bf16.msra.mxu1 %v11272_v61  ;;  %10827 = vmatprep.subr.bf16.mxu0 %v11340_v24  ;;  %v6964_v60 = vor.u32 %v6963_v5, %v6962_v27  ;;  %v6966_v61 = vmax.f32 %v6916_v51, %v6932_v29  ;;  %v7124_v23 = vld [vmem:[#allocation3 + $0x4e3] ss:$144 sm:$0x30]  ;;  %v7087_v10 = vor.u32 %v7086_v21, %v7085_v50  ;;  %v7134_v36 = vld [vmem:[#allocation3 + $0x64] ss:$144 sm:$0xc0] }
 0x528   :  { %10815 = vmatprep.subr.bf16.mxu1 %v11340_v24  ;;  %v6967_v59 = vmax.f32 %v6940_v42, %v6956_v55  ;;  %v7117_v38 = vor.u32 %v7116_v3, %v7115_v2  ;;  %v7125_v42 = vor.u32 %v7124_v23, %v7123_v26  ;;  %v7095_v5 = vor.u32 %v7094_v37, %v7093_v44  ;;  %v7138_v55 = vld [vmem:[#allocation3 + $0x4e4] ss:$144 sm:$0xc]  ;;  %v11284_v46 = vld [vmem:[%s13854_s5 + $0x570] sm:$0xff]  }
 0x529   :  { %v6968_v57 = vmax.f32 %v6948_v14, %v6964_v60  ;;  %v7137_v14 = vld [vmem:[#allocation3 + $0x4e4] ss:$144 sm:$0x3]  ;;  %v7260_v50 = vld [vmem:[#allocation3 + $0x68] ss:$144 sm:$0x3] }
 0x52a   :  { %v6969_v43 = vmax.f32 %v6965_v18, %v6967_v59  ;;  %v7119_v18 = vor.u32 %v7118_v40, %v7117_v38  ;;  %v7139_v60 = vor.u32 %v7138_v55, %v7137_v14  ;;  %v7142_v59 = vld [vmem:[#allocation3 + $0x4e4] ss:$144 sm:$0xc0]  ;;  %v7127_v30 = vor.u32 %v7126_v39, %v7125_v42  ;;  %v7261_v37 = vld [vmem:[#allocation3 + $0x68] ss:$144 sm:$0xc] }
 0x52b   :  { %10816 = vmatpush3.bf16.msra.mxu1 %v11274_v28  ;;  %v7099_v28 = vor.u32 %v7098_v62, %v7097_v34  ;;  %v6970_v33 = vmax.f32 %v6966_v61, %v6968_v57  ;;  %v7140_v61 = vld [vmem:[#allocation3 + $0x4e4] ss:$144 sm:$0x30]  ;;  %v7268_v2 = vld [vmem:[#allocation3 + $0x4e8] ss:$144 sm:$0x3]  ;;  %v7262_v19 = vor.u32 %v7261_v37, %v7260_v50 }
 0x52c   :  { %10817 = vmatprep.subr.bf16.mxu1 %v11340_v24  ;;  %v7141_v31 = vor.u32 %v7140_v61, %v7139_v60  ;;  %v11285_v48 = vld [vmem:[%s13854_s5 + $0x528] sm:$0xff]   ;;  %v7269_v3 = vld [vmem:[#allocation3 + $0x4e8] ss:$144 sm:$0xc]  ;;  %v11290_v11 = vld [vmem:[%s13854_s5 + $0x558] sm:$0xff]  }
 0x52d   :  { %v6971_v16 = vpack.c.bf16 %v6970_v33, %v6969_v43  ;;  %v7101_v0 = vor.u32 %v7100_v17, %v7099_v28  ;;  %v11283_v43 = vld [vmem:[%s13854_s5 + $0x530] sm:$0xff]   ;;  %v11287_v17 = vld [vmem:[%s13854_s5 + $0x520] sm:$0xff]   ;;  %v11282_v33 = vld [vmem:[%s13854_s5 + $0x578] sm:$0xff]   ;;  %v7270_v26 = vor.u32 %v7269_v3, %v7268_v2 }
 0x52e   :  { %v7143_v34 = vor.u32 %v7142_v59, %v7141_v31  ;;  %v11293_v32 = vld [vmem:[%s13854_s5 + $0x508] sm:$0xff]   ;;  %v7276_v44 = vld [vmem:[#allocation3 + $0x69] ss:$144 sm:$0x3] }
 0x52f   :  { %10818 = vmatpush3.bf16.msra.mxu1 %v11276_v1  ;;  %v7110_v1 = vld [vmem:[#allocation3 + $0x4d7] ss:$144 sm:$0xc0]  ;;  %10804 = vmatmul.mubr.bf16.vlgmr.msra.gmra.mxu0 %v6971_v16  ;;  %v7103_v29 = vor.u32 %v7102_v25, %v7101_v0  ;;  %v11291_v16 = vld [vmem:[%s13854_s5 + $0x510] sm:$0xff]   ;;  %v11295_v40 = vld [vmem:[%s13854_s5 + $0x500] sm:$0xff]   ;;  %v7272_v55 = vor.u32 %v7271_v8, %v7270_v26 }
 0x530   :  { %10819 = vmatprep.subr.bf16.mxu1 %v11340_v24  ;;  %10828 = vmatpush3.bf16.msra.mxu0 %v11281_v49  ;;  %v11286_v25 = vld [vmem:[%s13854_s5 + $0x568] sm:$0xff]   ;;  %v7263_v58 = vld [vmem:[#allocation3 + $0x68] ss:$144 sm:$0x30]  ;;  %v11297_v26 = vld [vmem:[%s13854_s5 + $0x5b8] sm:$0xff]  }
 0x531   :  { %10829 = vmatprep.subr.bf16.mxu0 %v11340_v24  ;;  %10843 = vmatprep.mubr.msk.bf16.mxu0 %vm11341_vm10, %v11340_v24  ;;  %v7144_v57 = vmax.f32 %v7087_v10, %v7103_v29  ;;  %v7279_v38 = vld [vmem:[#allocation3 + $0x69] ss:$144 sm:$0x30]  ;;  %v7265_v10 = vld [vmem:[#allocation3 + $0x68] ss:$144 sm:$0xc0] }
 0x532   :  { %v7284_v23 = vld [vmem:[#allocation3 + $0x4e9] ss:$144 sm:$0x3]  ;;  %v7292_v29 = vld [vmem:[#allocation3 + $0x75] ss:$144 sm:$0x3] }
 0x533   :  { %10820 = vmatpush3.bf16.msra.mxu1 %v11278_v15  ;;  %v7111_v15 = vor.u32 %v7110_v1, %v7109_v6  ;;  %v11288_v1 = vld [vmem:[%s13854_s5 + $0x560] sm:$0xff]   ;;  %v7293_v42 = vld [vmem:[#allocation3 + $0x75] ss:$144 sm:$0xc]  ;;  %v11292_v60 = vld [vmem:[%s13854_s5 + $0x550] sm:$0xff]  }
 0x534   :  { %10821 = vmatprep.subr.bf16.mxu1 %v11340_v24  ;;  %10830 = vmatpush3.bf16.msra.mxu0 %v11283_v43  ;;  %v7277_v6 = vld [vmem:[#allocation3 + $0x69] ss:$144 sm:$0xc]  ;;  %v7295_v14 = vld [vmem:[#allocation3 + $0x75] ss:$144 sm:$0x30] }
 0x535   :  { %v7145_v62 = vmax.f32 %v7095_v5, %v7111_v15  ;;  %10831 = vmatprep.subr.bf16.mxu0 %v11340_v24  ;;  %v7285_v39 = vld [vmem:[#allocation3 + $0x4e9] ss:$144 sm:$0xc]  ;;  %v7294_v15 = vor.u32 %v7293_v42, %v7292_v29  ;;  %v7308_v31 = vld [vmem:[#allocation3 + $0x76] ss:$144 sm:$0x3] }
 0x536   :  { %v7281_v5 = vld [vmem:[#allocation3 + $0x69] ss:$144 sm:$0xc0]  ;;  %v7439_v3 = vld [vmem:[#allocation3 + $0x6a] ss:$144 sm:$0x3] }
 0x537   :  { %10822 = vmatpush3.bf16.msra.mxu1 %v11280_v22  ;;  %v7133_v22 = vor.u32 %v7132_v7, %v7131_v63  ;;  %v7264_v63 = vor.u32 %v7263_v58, %v7262_v19  ;;  %v7273_v7 = vld [vmem:[#allocation3 + $0x4e8] ss:$144 sm:$0xc0]  ;;  %v7296_v59 = vor.u32 %v7295_v14, %v7294_v15  ;;  %v7448_v19 = vld [vmem:[#allocation3 + $0x4ea] ss:$144 sm:$0xc] }
 0x538   :  { %10847 = vmatprep.subr.bf16.mxu1 %v11340_v24  ;;  %10832 = vmatpush3.bf16.msra.mxu0 %v11285_v48  ;;  %v7311_v48 = vld [vmem:[#allocation3 + $0x76] ss:$144 sm:$0x30]  ;;  %v11296_v37 = vld [vmem:[%s13854_s5 + $0x540] sm:$0xff]  }
 0x539   :  { %v7135_v41 = vor.u32 %v7134_v36, %v7133_v22  ;;  %10833 = vmatprep.subr.bf16.mxu0 %v11340_v24  ;;  %v7301_v22 = vld [vmem:[#allocation3 + $0x4f5] ss:$144 sm:$0xc]  ;;  %v7266_v43 = vor.u32 %v7265_v10, %v7264_v63  ;;  %v7458_v8 = vld [vmem:[#allocation3 + $0x6b] ss:$144 sm:$0x30] }
 0x53a   :  { %v7463_v10 = vld [vmem:[#allocation3 + $0x4eb] ss:$144 sm:$0x3]  ;;  %v7450_v42 = vld [vmem:[#allocation3 + $0x4ea] ss:$144 sm:$0x30] }
 0x53b   :  { %v7146_v49 = vmax.f32 %v7119_v18, %v7135_v41  ;;  %v7300_v18 = vld [vmem:[#allocation3 + $0x4f5] ss:$144 sm:$0x3]  ;;  %v7464_v29 = vld [vmem:[#allocation3 + $0x4eb] ss:$144 sm:$0xc] }
 0x53c   :  { %10834 = vmatpush3.bf16.msra.mxu0 %v11287_v17  ;;  %v7305_v41 = vld [vmem:[#allocation3 + $0x4f5] ss:$144 sm:$0xc0]  ;;  %v7317_v17 = vld [vmem:[#allocation3 + $0x4f6] ss:$144 sm:$0xc]  ;;  %v7465_v63 = vor.u32 %v7464_v29, %v7463_v10 }
 0x53d   :  { %v7148_v52 = vmax.f32 %v7144_v57, %v7146_v49  ;;  %10835 = vmatprep.subr.bf16.mxu0 %v11340_v24  ;;  %v7309_v57 = vld [vmem:[#allocation3 + $0x76] ss:$144 sm:$0xc]  ;;  %v7460_v15 = vld [vmem:[#allocation3 + $0x6b] ss:$144 sm:$0xc0] }
 0x53e   :  { %v7310_v49 = vor.u32 %v7309_v57, %v7308_v31  ;;  %v7471_v14 = vld [vmem:[#allocation3 + $0x77] ss:$144 sm:$0x3] }
 0x53f   :  { %v11305_v10 = vld [vmem:[%s13854_s5 + $0x598] sm:$0xff]  }
 0x540   :  { %10836 = vmatpush3.bf16.msra.mxu0 %v11289_v47  ;;  %v7312_v47 = vor.u32 %v7311_v48, %v7310_v49  ;;  %v7484_v49 = vld [vmem:[#allocation3 + $0x4f7] ss:$144 sm:$0xc0]  ;;  %v7487_v48 = vld [vmem:[#allocation3 + $0x78] ss:$144 sm:$0x3] }
 0x541   :  { %10837 = vmatprep.subr.bf16.mxu0 %v11340_v24 }
 0x544   :  { %10838 = vmatpush3.bf16.msra.mxu0 %v11291_v16  ;;  %v11294_v16 = vld [vmem:[%s13854_s5 + $0x548] sm:$0xff]  }
 0x545   :  { %10839 = vmatprep.subr.bf16.mxu0 %v11340_v24 }
 0x548   :  { %10840 = vmatpush3.bf16.msra.mxu0 %v11293_v32 }
 0x549   :  { %10841 = vmatprep.subr.bf16.mxu0 %v11340_v24 }
 0x54c   :  { %10842 = vmatpush3.bf16.msra.mxu0 %v11295_v40  ;;  %v7456_v40 = vld [vmem:[#allocation3 + $0x6b] ss:$144 sm:$0xc] }
 0x54d   :  { %10867 = vmatprep.subr.bf16.mxu0 %v11340_v24 }
 0x556   :  { %v5639_v20 = vpop.f32.mrf.mxu0 }
 0x557   :  { %v5646_v51 = vadd.f32 %v5639_v20, %v13573_v54  ;;  %v7278_v20 = vor.u32 %v7277_v6, %v7276_v44  ;;  %v7440_v44 = vld [vmem:[#allocation3 + $0x6a] ss:$144 sm:$0xc] }
 0x558   :  { %v10645_v53 = vpop.f32.mrf.mxu0  ;;  %v7447_v6 = vld [vmem:[#allocation3 + $0x4ea] ss:$144 sm:$0x3] }
 0x559   :  { %v7287_v53 = vld [vmem:[#allocation3 + $0x4e9] ss:$144 sm:$0x30]  ;;  %v7280_v36 = vor.u32 %v7279_v38, %v7278_v20  ;;  %v7455_v38 = vld [vmem:[#allocation3 + $0x6b] ss:$144 sm:$0x3] }
 0x55a   :  { %v5642_v27 = vpop.f32.mrf.mxu0 }
 0x55b   :  { %v5647_v13 = vadd.f32 %v5642_v27, %v13585_v9  ;;  %v7147_v9 = vmax.f32 %v7127_v30, %v7143_v34  ;;  %v7289_v27 = vld [vmem:[#allocation3 + $0x4e9] ss:$144 sm:$0xc0]  ;;  %v7303_v30 = vld [vmem:[#allocation3 + $0x4f5] ss:$144 sm:$0x30]  ;;  %v7282_v34 = vor.u32 %v7281_v5, %v7280_v36 }
 0x55c   :  { %v10646_v54 = vpop.f32.mrf.mxu0  ;;  %v7444_v5 = vld [vmem:[#allocation3 + $0x6a] ss:$144 sm:$0xc0] }
 0x55d   :  { %v7149_v28 = vmax.f32 %v7145_v62, %v7147_v9  ;;  %v7302_v54 = vor.u32 %v7301_v22, %v7300_v18  ;;  %v7313_v9 = vld [vmem:[#allocation3 + $0x76] ss:$144 sm:$0xc0]  ;;  %v7323_v50 = vmax.f32 %v7266_v43, %v7282_v34  ;;  %v7452_v18 = vld [vmem:[#allocation3 + $0x4ea] ss:$144 sm:$0xc0] }
 0x55e   :  { %v7476_v43 = vld [vmem:[#allocation3 + $0x77] ss:$144 sm:$0xc0] }
 0x55f   :  { %v7150_v45 = vpack.c.bf16 %v7149_v28, %v7148_v52  ;;  %v7304_v62 = vor.u32 %v7303_v30, %v7302_v54  ;;  %v7274_v52 = vor.u32 %v7273_v7, %v7272_v55  ;;  %v7316_v28 = vld [vmem:[#allocation3 + $0x4f6] ss:$144 sm:$0x3]  ;;  %v7466_v7 = vld [vmem:[#allocation3 + $0x4eb] ss:$144 sm:$0x30] }
 0x560   :  { %v7472_v55 = vld [vmem:[#allocation3 + $0x77] ss:$144 sm:$0xc]  ;;  %v7467_v54 = vor.u32 %v7466_v7, %v7465_v63 }
 0x561   :  { %10824 = vmatmul.mubr.bf16.vlgmr.msra.gmra.mxu1 %v7150_v45  ;;  %v7479_v30 = vld [vmem:[#allocation3 + $0x4f7] ss:$144 sm:$0x3] }
 0x562   :  { %10848 = vmatpush3.bf16.msra.mxu1 %v11282_v33  ;;  %10863 = vmatprep.mubr.msk.bf16.mxu1 %vm11341_vm10, %v11340_v24 }
 0x563   :  { %10849 = vmatprep.subr.bf16.mxu1 %v11340_v24 }
 0x565   :  { %v5818_v12 = vpop.f32.mrf.mxu1 }
 0x566   :  { %v13647_v35 = vadd.f32 %v5818_v12, %v5646_v51  ;;  %10850 = vmatpush3.bf16.msra.mxu1 %v11284_v46  ;;  %v7286_v51 = vor.u32 %v7285_v39, %v7284_v23  ;;  %v7318_v12 = vor.u32 %v7317_v17, %v7316_v28  ;;  %v7319_v46 = vld [vmem:[#allocation3 + $0x4f6] ss:$144 sm:$0x30]  ;;  %v7441_v23 = vor.u32 %v7440_v44, %v7439_v3  ;;  %v7442_v39 = vld [vmem:[#allocation3 + $0x6a] ss:$144 sm:$0x30] }
 0x567   :  { %v10665_v56 = vpop.f32.mrf.mxu1  ;;  %10851 = vmatprep.subr.bf16.mxu1 %v11340_v24 }
 0x568   :  { %v7288_v61 = vor.u32 %v7287_v53, %v7286_v51  ;;  %v7321_v56 = vld [vmem:[#allocation3 + $0x4f6] ss:$144 sm:$0xc0]  ;;  %v7320_v32 = vor.u32 %v7319_v46, %v7318_v12  ;;  %v7449_v53 = vor.u32 %v7448_v19, %v7447_v6  ;;  %v7490_v12 = vld [vmem:[#allocation3 + $0x78] ss:$144 sm:$0x30] }
 0x569   :  { %v5821_v21 = vpop.f32.mrf.mxu1  ;;  %v7492_v46 = vld [vmem:[#allocation3 + $0x78] ss:$144 sm:$0xc0] }
 0x56a   :  { %v13659_v4 = vadd.f32 %v5821_v21, %v5647_v13  ;;  %10852 = vmatpush3.bf16.msra.mxu1 %v11286_v25  ;;  %v7297_v13 = vld [vmem:[#allocation3 + $0x75] ss:$144 sm:$0xc0]  ;;  %v7290_v33 = vor.u32 %v7289_v27, %v7288_v61  ;;  %v7306_v21 = vor.u32 %v7305_v41, %v7304_v62  ;;  %v7314_v25 = vor.u32 %v7313_v9, %v7312_v47  ;;  %v7480_v41 = vld [vmem:[#allocation3 + $0x4f7] ss:$144 sm:$0xc] }
 0x56b   :  { %v10666_v0 = vpop.f32.mrf.mxu1  ;;  %10853 = vmatprep.subr.bf16.mxu1 %v11340_v24  ;;  %v7298_v45 = vor.u32 %v7297_v13, %v7296_v59  ;;  %v7443_v27 = vor.u32 %v7442_v39, %v7441_v23  ;;  %v7473_v61 = vor.u32 %v7472_v55, %v7471_v14  ;;  %v7474_v59 = vld [vmem:[#allocation3 + $0x77] ss:$144 sm:$0x30]  ;;  %v7451_v13 = vor.u32 %v7450_v42, %v7449_v53  ;;  %v7488_v9 = vld [vmem:[#allocation3 + $0x78] ss:$144 sm:$0xc] }
 0x56c   :  { %v7322_v0 = vor.u32 %v7321_v56, %v7320_v32  ;;  %v7481_v34 = vor.u32 %v7480_v41, %v7479_v30  ;;  %v7482_v62 = vld [vmem:[#allocation3 + $0x4f7] ss:$144 sm:$0x30]  ;;  %v7489_v47 = vor.u32 %v7488_v9, %v7487_v48  ;;  %v11300_v42 = vld [vmem:[%s13854_s5 + $0x5f0] sm:$0xff]  }
 0x56d   :  { %v7325_v2 = vmax.f32 %v7298_v45, %v7314_v25  ;;  %v7475_v57 = vor.u32 %v7474_v59, %v7473_v61  ;;  %v7445_v17 = vor.u32 %v7444_v5, %v7443_v27  ;;  %v7453_v56 = vor.u32 %v7452_v18, %v7451_v13  ;;  %v7496_v25 = vld [vmem:[#allocation3 + $0x4f8] ss:$144 sm:$0xc]  ;;  %v11301_v23 = vld [vmem:[%s13854_s5 + $0x5a8] sm:$0xff]   ;;  %v11306_v48 = vld [vmem:[%s13854_s5 + $0x5d8] sm:$0xff]  }
 0x56e   :  { %10854 = vmatpush3.bf16.msra.mxu1 %v11288_v1  ;;  %v7324_v1 = vmax.f32 %v7274_v52, %v7290_v33  ;;  %v7326_v58 = vmax.f32 %v7306_v21, %v7322_v0  ;;  %v7483_v45 = vor.u32 %v7482_v62, %v7481_v34  ;;  %v7495_v21 = vld [vmem:[#allocation3 + $0x4f8] ss:$144 sm:$0x3]  ;;  %v11309_v55 = vld [vmem:[%s13854_s5 + $0x588] sm:$0xff]  }
 0x56f   :  { %10855 = vmatprep.subr.bf16.mxu1 %v11340_v24  ;;  %v7327_v20 = vmax.f32 %v7323_v50, %v7325_v2  ;;  %v7477_v50 = vor.u32 %v7476_v43, %v7475_v57  ;;  %v7497_v0 = vor.u32 %v7496_v25, %v7495_v21  ;;  %v7500_v2 = vld [vmem:[#allocation3 + $0x4f8] ss:$144 sm:$0xc0]  ;;  %v7618_v27 = vld [vmem:[#allocation3 + $0x6c] ss:$144 sm:$0x3] }
 0x570   :  { %v7328_v51 = vmax.f32 %v7324_v1, %v7326_v58  ;;  %v7498_v1 = vld [vmem:[#allocation3 + $0x4f8] ss:$144 sm:$0x30]  ;;  %v7485_v44 = vor.u32 %v7484_v49, %v7483_v45  ;;  %v7619_v18 = vld [vmem:[#allocation3 + $0x6c] ss:$144 sm:$0xc] }
 0x571   :  { %v7499_v19 = vor.u32 %v7498_v1, %v7497_v0  ;;  %v7626_v61 = vld [vmem:[#allocation3 + $0x4ec] ss:$144 sm:$0x3]  ;;  %v7634_v13 = vld [vmem:[#allocation3 + $0x6d] ss:$144 sm:$0x3]  ;;  %v7620_v30 = vor.u32 %v7619_v18, %v7618_v27 }
 0x572   :  { %10856 = vmatpush3.bf16.msra.mxu1 %v11290_v11  ;;  %v7457_v11 = vor.u32 %v7456_v40, %v7455_v38  ;;  %v7329_v36 = vpack.c.bf16 %v7328_v51, %v7327_v20  ;;  %v11299_v20 = vld [vmem:[%s13854_s5 + $0x5b0] sm:$0xff]   ;;  %v11298_v51 = vld [vmem:[%s13854_s5 + $0x5f8] sm:$0xff]   ;;  %v11311_v43 = vld [vmem:[%s13854_s5 + $0x580] sm:$0xff]  }
 0x573   :  { %10857 = vmatprep.subr.bf16.mxu1 %v11340_v24  ;;  %v7501_v38 = vor.u32 %v7500_v2, %v7499_v19  ;;  %v7627_v59 = vld [vmem:[#allocation3 + $0x4ec] ss:$144 sm:$0xc]  ;;  %v7637_v57 = vld [vmem:[#allocation3 + $0x6d] ss:$144 sm:$0x30] }
 0x574   :  { %v7459_v22 = vor.u32 %v7458_v8, %v7457_v11  ;;  %10844 = vmatmul.mubr.bf16.vlgmr.msra.gmra.mxu0 %v7329_v36  ;;  %v11303_v8 = vld [vmem:[%s13854_s5 + $0x5a0] sm:$0xff]   ;;  %v11307_v36 = vld [vmem:[%s13854_s5 + $0x590] sm:$0xff]   ;;  %v7628_v34 = vor.u32 %v7627_v59, %v7626_v61 }
 0x575   :  { %10868 = vmatpush3.bf16.msra.mxu0 %v11297_v26  ;;  %10883 = vmatprep.mubr.msk.bf16.mxu0 %vm11341_vm10, %v11340_v24  ;;  %v7621_v41 = vld [vmem:[#allocation3 + $0x6c] ss:$144 sm:$0x30]  ;;  %v7642_v62 = vld [vmem:[#allocation3 + $0x4ed] ss:$144 sm:$0x3] }
 0x576   :  { %10858 = vmatpush3.bf16.msra.mxu1 %v11292_v60  ;;  %v7468_v60 = vld [vmem:[#allocation3 + $0x4eb] ss:$144 sm:$0xc0]  ;;  %10869 = vmatprep.subr.bf16.mxu0 %v11340_v24  ;;  %v7461_v33 = vor.u32 %v7460_v15, %v7459_v22  ;;  %v11302_v15 = vld [vmem:[%s13854_s5 + $0x5e8] sm:$0xff]  }
 0x577   :  { %10859 = vmatprep.subr.bf16.mxu1 %v11340_v24  ;;  %v7643_v49 = vld [vmem:[#allocation3 + $0x4ed] ss:$144 sm:$0xc]  ;;  %v7629_v9 = vld [vmem:[#allocation3 + $0x4ec] ss:$144 sm:$0x30] }
 0x578   :  { %v7502_v58 = vmax.f32 %v7445_v17, %v7461_v33  ;;  %v7623_v17 = vld [vmem:[#allocation3 + $0x6c] ss:$144 sm:$0xc0]  ;;  %v7650_v33 = vld [vmem:[#allocation3 + $0x79] ss:$144 sm:$0x3]  ;;  %v7630_v25 = vor.u32 %v7629_v9, %v7628_v34 }
 0x579   :  { %10870 = vmatpush3.bf16.msra.mxu0 %v11299_v20  ;;  %v7651_v45 = vld [vmem:[#allocation3 + $0x79] ss:$144 sm:$0xc]  ;;  %v7666_v19 = vld [vmem:[#allocation3 + $0x7a] ss:$144 sm:$0x3] }
 0x57a   :  { %10860 = vmatpush3.bf16.msra.mxu1 %v11294_v16  ;;  %v7469_v16 = vor.u32 %v7468_v60, %v7467_v54  ;;  %10871 = vmatprep.subr.bf16.mxu0 %v11340_v24  ;;  %v11304_v60 = vld [vmem:[%s13854_s5 + $0x5e0] sm:$0xff]   ;;  %v11308_v0 = vld [vmem:[%s13854_s5 + $0x5d0] sm:$0xff]   ;;  %v11313_v34 = vld [vmem:[%s13854_s5 + $0x638] sm:$0xff]  }
 0x57b   :  { %10861 = vmatprep.subr.bf16.mxu1 %v11340_v24  ;;  %v5997_v31 = vpop.f32.mrf.mxu0  ;;  %v7635_v54 = vld [vmem:[#allocation3 + $0x6d] ss:$144 sm:$0xc]  ;;  %v7653_v21 = vld [vmem:[#allocation3 + $0x79] ss:$144 sm:$0x30] }
 0x57c   :  { %v6004_v52 = vadd.f32 %v5997_v31, %v13647_v35  ;;  %v7503_v40 = vmax.f32 %v7453_v56, %v7469_v16  ;;  %v7636_v31 = vor.u32 %v7635_v54, %v7634_v13  ;;  %v7639_v56 = vld [vmem:[#allocation3 + $0x6d] ss:$144 sm:$0xc0]  ;;  %v7652_v16 = vor.u32 %v7651_v45, %v7650_v33  ;;  %v7797_v59 = vld [vmem:[#allocation3 + $0x6e] ss:$144 sm:$0x3] }
 0x57d   :  { %v10685_v28 = vpop.f32.mrf.mxu0  ;;  %10872 = vmatpush3.bf16.msra.mxu0 %v11301_v23  ;;  %v7669_v23 = vld [vmem:[#allocation3 + $0x7a] ss:$144 sm:$0x30]  ;;  %v7798_v13 = vld [vmem:[#allocation3 + $0x6e] ss:$144 sm:$0xc] }
 0x57e   :  { %10862 = vmatpush3.bf16.msra.mxu1 %v11296_v37  ;;  %v7491_v37 = vor.u32 %v7490_v12, %v7489_v47  ;;  %10873 = vmatprep.subr.bf16.mxu0 %v11340_v24  ;;  %v7645_v28 = vld [vmem:[#allocation3 + $0x4ed] ss:$144 sm:$0x30]  ;;  %v7622_v47 = vor.u32 %v7621_v41, %v7620_v30  ;;  %v7631_v12 = vld [vmem:[#allocation3 + $0x4ec] ss:$144 sm:$0xc0]  ;;  %v7654_v2 = vor.u32 %v7653_v21, %v7652_v16 }
 0x57f   :  { %10887 = vmatprep.subr.bf16.mxu1 %v11340_v24  ;;  %v6000_v32 = vpop.f32.mrf.mxu0  ;;  %v11312_v18 = vld [vmem:[%s13854_s5 + $0x5c0] sm:$0xff]  }
 0x580   :  { %v6005_v3 = vadd.f32 %v6000_v32, %v13659_v4  ;;  %v7493_v6 = vor.u32 %v7492_v46, %v7491_v37  ;;  %v7505_v4 = vmax.f32 %v7485_v44, %v7501_v38  ;;  %v7638_v46 = vor.u32 %v7637_v57, %v7636_v31  ;;  %v7647_v32 = vld [vmem:[#allocation3 + $0x4ed] ss:$144 sm:$0xc0]  ;;  %v7659_v37 = vld [vmem:[#allocation3 + $0x4f9] ss:$144 sm:$0xc] }
 0x581   :  { %v10686_v35 = vpop.f32.mrf.mxu0  ;;  %10874 = vmatpush3.bf16.msra.mxu0 %v11303_v8  ;;  %v7661_v44 = vld [vmem:[#allocation3 + $0x4f9] ss:$144 sm:$0x30]  ;;  %v7624_v20 = vor.u32 %v7623_v17, %v7622_v47  ;;  %v7675_v8 = vld [vmem:[#allocation3 + $0x4fa] ss:$144 sm:$0xc] }
 0x582   :  { %v7504_v26 = vmax.f32 %v7477_v50, %v7493_v6  ;;  %v7507_v11 = vmax.f32 %v7503_v40, %v7505_v4  ;;  %10875 = vmatprep.subr.bf16.mxu0 %v11340_v24  ;;  %v7658_v50 = vld [vmem:[#allocation3 + $0x4f9] ss:$144 sm:$0x3]  ;;  %v7640_v38 = vor.u32 %v7639_v56, %v7638_v46  ;;  %v7671_v4 = vld [vmem:[#allocation3 + $0x7a] ss:$144 sm:$0xc0] }
 0x583   :  { %v7660_v35 = vor.u32 %v7659_v37, %v7658_v50  ;;  %v7663_v6 = vld [vmem:[#allocation3 + $0x4f9] ss:$144 sm:$0xc0]  ;;  %v7805_v54 = vld [vmem:[#allocation3 + $0x4ee] ss:$144 sm:$0x3] }
 0x584   :  { %v7506_v39 = vmax.f32 %v7502_v58, %v7504_v26  ;;  %v7667_v58 = vld [vmem:[#allocation3 + $0x7a] ss:$144 sm:$0xc]  ;;  %v7681_v27 = vmax.f32 %v7624_v20, %v7640_v38  ;;  %v7806_v30 = vld [vmem:[#allocation3 + $0x4ee] ss:$144 sm:$0xc] }
 0x585   :  { %10876 = vmatpush3.bf16.msra.mxu0 %v11305_v10  ;;  %v7662_v40 = vor.u32 %v7661_v44, %v7660_v35  ;;  %v7668_v26 = vor.u32 %v7667_v58, %v7666_v19  ;;  %v7813_v57 = vld [vmem:[#allocation3 + $0x6f] ss:$144 sm:$0x3]  ;;  %v7808_v45 = vld [vmem:[#allocation3 + $0x4ee] ss:$144 sm:$0x30] }
 0x586   :  { %v7508_v53 = vpack.c.bf16 %v7507_v11, %v7506_v39  ;;  %10877 = vmatprep.subr.bf16.mxu0 %v11340_v24  ;;  %v7632_v39 = vor.u32 %v7631_v12, %v7630_v25  ;;  %v7674_v11 = vld [vmem:[#allocation3 + $0x4fa] ss:$144 sm:$0x3]  ;;  %v7816_v9 = vld [vmem:[#allocation3 + $0x6f] ss:$144 sm:$0x30] }
 0x587   :  { %v7670_v10 = vor.u32 %v7669_v23, %v7668_v26  ;;  %v7821_v17 = vld [vmem:[#allocation3 + $0x4ef] ss:$144 sm:$0x3]  ;;  %v7802_v56 = vld [vmem:[#allocation3 + $0x6e] ss:$144 sm:$0xc0] }
 0x588   :  { %10864 = vmatmul.mubr.bf16.vlgmr.msra.gmra.mxu1 %v7508_v53  ;;  %v7822_v33 = vld [vmem:[#allocation3 + $0x4ef] ss:$144 sm:$0xc]  ;;  %v7829_v21 = vld [vmem:[#allocation3 + $0x7b] ss:$144 sm:$0x3] }
 0x589   :  { %10888 = vmatpush3.bf16.msra.mxu1 %v11298_v51  ;;  %10903 = vmatprep.mubr.msk.bf16.mxu1 %vm11341_vm10, %v11340_v24  ;;  %v7823_v47 = vor.u32 %v7822_v33, %v7821_v17  ;;  %v7824_v12 = vld [vmem:[#allocation3 + $0x4ef] ss:$144 sm:$0x30]  ;;  %v7830_v25 = vld [vmem:[#allocation3 + $0x7b] ss:$144 sm:$0xc] }
 0x58a   :  { %10889 = vmatprep.subr.bf16.mxu1 %v11340_v24  ;;  %10878 = vmatpush3.bf16.msra.mxu0 %v11307_v36  ;;  %v11310_v36 = vld [vmem:[%s13854_s5 + $0x5c8] sm:$0xff]   ;;  %v7818_v16 = vld [vmem:[#allocation3 + $0x6f] ss:$144 sm:$0xc0] }
 0x58b   :  { %10879 = vmatprep.subr.bf16.mxu0 %v11340_v24  ;;  %v7810_v50 = vld [vmem:[#allocation3 + $0x4ee] ss:$144 sm:$0xc0]  ;;  %v7825_v35 = vor.u32 %v7824_v12, %v7823_v47  ;;  %v7837_v44 = vld [vmem:[#allocation3 + $0x4fb] ss:$144 sm:$0x3] }
 0x58c   :  { %v6176_v29 = vpop.f32.mrf.mxu1  ;;  %v7834_v20 = vld [vmem:[#allocation3 + $0x7b] ss:$144 sm:$0xc0]  ;;  %v7845_v23 = vld [vmem:[#allocation3 + $0x7c] ss:$144 sm:$0x3] }
 0x58d   :  { %v13721_v63 = vadd.f32 %v6176_v29, %v6004_v52  ;;  %10890 = vmatpush3.bf16.msra.mxu1 %v11300_v42  ;;  %v7644_v52 = vor.u32 %v7643_v49, %v7642_v62  ;;  %v7676_v29 = vor.u32 %v7675_v8, %v7674_v11  ;;  %v7677_v42 = vld [vmem:[#allocation3 + $0x4fa] ss:$144 sm:$0x30]  ;;  %v7799_v62 = vor.u32 %v7798_v13, %v7797_v59  ;;  %v7800_v49 = vld [vmem:[#allocation3 + $0x6e] ss:$144 sm:$0x30] }
 0x58e   :  { %v10705_v7 = vpop.f32.mrf.mxu1  ;;  %10891 = vmatprep.subr.bf16.mxu1 %v11340_v24  ;;  %10880 = vmatpush3.bf16.msra.mxu0 %v11309_v55  ;;  %v7842_v26 = vld [vmem:[#allocation3 + $0x4fb] ss:$144 sm:$0xc0]  ;;  %v7976_v17 = vld [vmem:[#allocation3 + $0x70] ss:$144 sm:$0x3] }
 0x58f   :  { %10881 = vmatprep.subr.bf16.mxu0 %v11340_v24  ;;  %v7646_v1 = vor.u32 %v7645_v28, %v7644_v52  ;;  %v7679_v7 = vld [vmem:[#allocation3 + $0x4fa] ss:$144 sm:$0xc0]  ;;  %v7678_v55 = vor.u32 %v7677_v42, %v7676_v29  ;;  %v7807_v28 = vor.u32 %v7806_v30, %v7805_v54  ;;  %v7848_v29 = vld [vmem:[#allocation3 + $0x7c] ss:$144 sm:$0x30] }
 0x590   :  { %v6179_v5 = vpop.f32.mrf.mxu1  ;;  %v7850_v42 = vld [vmem:[#allocation3 + $0x7c] ss:$144 sm:$0xc0]  ;;  %v7977_v33 = vld [vmem:[#allocation3 + $0x70] ss:$144 sm:$0xc] }
 0x591   :  { %v13733_v14 = vadd.f32 %v6179_v5, %v6005_v3  ;;  %10892 = vmatpush3.bf16.msra.mxu1 %v11302_v15  ;;  %v7655_v3 = vld [vmem:[#allocation3 + $0x79] ss:$144 sm:$0xc0]  ;;  %v7648_v51 = vor.u32 %v7647_v32, %v7646_v1  ;;  %v7664_v5 = vor.u32 %v7663_v6, %v7662_v40  ;;  %v7672_v15 = vor.u32 %v7671_v4, %v7670_v10  ;;  %v7838_v6 = vld [vmem:[#allocation3 + $0x4fb] ss:$144 sm:$0xc] }
 0x592   :  { %v10706_v22 = vpop.f32.mrf.mxu1  ;;  %10893 = vmatprep.subr.bf16.mxu1 %v11340_v24  ;;  %10882 = vmatpush3.bf16.msra.mxu0 %v11311_v43  ;;  %v7656_v53 = vor.u32 %v7655_v3, %v7654_v2  ;;  %v7814_v43 = vld [vmem:[#allocation3 + $0x6f] ss:$144 sm:$0xc]  ;;  %v7801_v32 = vor.u32 %v7800_v49, %v7799_v62  ;;  %v7831_v1 = vor.u32 %v7830_v25, %v7829_v21  ;;  %v7832_v2 = vld [vmem:[#allocation3 + $0x7b] ss:$144 sm:$0x30] }
 0x593   :  { %10907 = vmatprep.subr.bf16.mxu0 %v11340_v24  ;;  %v7680_v22 = vor.u32 %v7679_v7, %v7678_v55  ;;  %v7809_v3 = vor.u32 %v7808_v45, %v7807_v28  ;;  %v7839_v38 = vor.u32 %v7838_v6, %v7837_v44  ;;  %v7840_v40 = vld [vmem:[#allocation3 + $0x4fb] ss:$144 sm:$0x30]  ;;  %v7846_v4 = vld [vmem:[#allocation3 + $0x7c] ss:$144 sm:$0xc]  ;;  %v7978_v21 = vor.u32 %v7977_v33, %v7976_v17 }
 0x594   :  { %v7683_v61 = vmax.f32 %v7656_v53, %v7672_v15  ;;  %v7833_v58 = vor.u32 %v7832_v2, %v7831_v1  ;;  %v7803_v8 = vor.u32 %v7802_v56, %v7801_v32  ;;  %v7847_v10 = vor.u32 %v7846_v4, %v7845_v23  ;;  %v7854_v15 = vld [vmem:[#allocation3 + $0x4fc] ss:$144 sm:$0xc]  ;;  %v7984_v45 = vld [vmem:[#allocation3 + $0x4f0] ss:$144 sm:$0x3] }
 0x595   :  { %10894 = vmatpush3.bf16.msra.mxu1 %v11304_v60  ;;  %v7682_v60 = vmax.f32 %v7632_v39, %v7648_v51  ;;  %v7684_v41 = vmax.f32 %v7664_v5, %v7680_v22  ;;  %v7841_v53 = vor.u32 %v7840_v40, %v7839_v38  ;;  %v7811_v7 = vor.u32 %v7810_v50, %v7809_v3  ;;  %v7853_v5 = vld [vmem:[#allocation3 + $0x4fc] ss:$144 sm:$0x3]  ;;  %v7985_v47 = vld [vmem:[#allocation3 + $0x4f0] ss:$144 sm:$0xc] }
 0x596   :  { %10895 = vmatprep.subr.bf16.mxu1 %v11340_v24  ;;  %v7685_v31 = vmax.f32 %v7681_v27, %v7683_v61  ;;  %v7835_v27 = vor.u32 %v7834_v20, %v7833_v58  ;;  %v7855_v22 = vor.u32 %v7854_v15, %v7853_v5  ;;  %v7858_v61 = vld [vmem:[#allocation3 + $0x4fc] ss:$144 sm:$0xc0]  ;;  %v7992_v12 = vld [vmem:[#allocation3 + $0x71] ss:$144 sm:$0x3] }
 0x597   :  { %v7686_v52 = vmax.f32 %v7682_v60, %v7684_v41  ;;  %v7856_v60 = vld [vmem:[#allocation3 + $0x4fc] ss:$144 sm:$0x30]  ;;  %v7843_v54 = vor.u32 %v7842_v26, %v7841_v53  ;;  %v7979_v25 = vld [vmem:[#allocation3 + $0x70] ss:$144 sm:$0x30] }
 0x598   :  { %v7857_v41 = vor.u32 %v7856_v60, %v7855_v22  ;;  %v7995_v50 = vld [vmem:[#allocation3 + $0x71] ss:$144 sm:$0x30]  ;;  %v8008_v58 = vld [vmem:[#allocation3 + $0x7d] ss:$144 sm:$0x3]  ;;  %v7980_v26 = vor.u32 %v7979_v25, %v7978_v21 }
 0x599   :  { %10896 = vmatpush3.bf16.msra.mxu1 %v11306_v48  ;;  %v7815_v48 = vor.u32 %v7814_v43, %v7813_v57  ;;  %v7687_v46 = vpack.c.bf16 %v7686_v52, %v7685_v31  ;;  %v11315_v57 = vld [vmem:[%s13854_s5 + $0x628] sm:$0xff]   ;;  %v11317_v52 = vld [vmem:[%s13854_s5 + $0x618] sm:$0xff]   ;;  %v8009_v20 = vld [vmem:[#allocation3 + $0x7d] ss:$144 sm:$0xc] }
 0x59a   :  { %10897 = vmatprep.subr.bf16.mxu1 %v11340_v24  ;;  %v7859_v43 = vor.u32 %v7858_v61, %v7857_v41  ;;  %v8000_v1 = vld [vmem:[#allocation3 + $0x4f1] ss:$144 sm:$0x3]  ;;  %v7989_v23 = vld [vmem:[#allocation3 + $0x4f0] ss:$144 sm:$0xc0] }
 0x59b   :  { %v7817_v37 = vor.u32 %v7816_v9, %v7815_v48  ;;  %10884 = vmatmul.mubr.bf16.vlgmr.msra.gmra.mxu0 %v7687_v46  ;;  %v11316_v48 = vld [vmem:[%s13854_s5 + $0x620] sm:$0xff]   ;;  %v7993_v46 = vld [vmem:[#allocation3 + $0x71] ss:$144 sm:$0xc] }
 0x59c   :  { %10908 = vmatpush3.bf16.msra.mxu0 %v11313_v34  ;;  %10923 = vmatprep.mubr.msk.bf16.mxu0 %vm11341_vm10, %v11340_v24  ;;  %v7994_v32 = vor.u32 %v7993_v46, %v7992_v12  ;;  %v8001_v2 = vld [vmem:[#allocation3 + $0x4f1] ss:$144 sm:$0xc]  ;;  %v8013_v15 = vld [vmem:[#allocation3 + $0x7d] ss:$144 sm:$0xc0] }
 0x59d   :  { %10898 = vmatpush3.bf16.msra.mxu1 %v11308_v0  ;;  %v7826_v0 = vld [vmem:[#allocation3 + $0x4ef] ss:$144 sm:$0xc0]  ;;  %10909 = vmatprep.subr.bf16.mxu0 %v11340_v24  ;;  %v7819_v51 = vor.u32 %v7818_v16, %v7817_v37  ;;  %v8002_v44 = vor.u32 %v8001_v2, %v8000_v1  ;;  %v8003_v6 = vld [vmem:[#allocation3 + $0x4f1] ss:$144 sm:$0x30] }
 0x59e   :  { %10899 = vmatprep.subr.bf16.mxu1 %v11340_v24  ;;  %v11318_v16 = vld [vmem:[%s13854_s5 + $0x610] sm:$0xff]   ;;  %v11319_v40 = vld [vmem:[%s13854_s5 + $0x608] sm:$0xff]   ;;  %v7996_v4 = vor.u32 %v7995_v50, %v7994_v32  ;;  %v11320_v61 = vld [vmem:[%s13854_s5 + $0x600] sm:$0xff]  }
 0x59f   :  { %v7860_v31 = vmax.f32 %v7803_v8, %v7819_v51  ;;  %v8011_v8 = vld [vmem:[#allocation3 + $0x7d] ss:$144 sm:$0x30]  ;;  %v8024_v22 = vld [vmem:[#allocation3 + $0x7e] ss:$144 sm:$0x3] }
 0x5a0   :  { %v8025_v60 = vld [vmem:[#allocation3 + $0x7e] ss:$144 sm:$0xc] }
 0x5a1   :  { %10900 = vmatpush3.bf16.msra.mxu1 %v11310_v36  ;;  %v7827_v36 = vor.u32 %v7826_v0, %v7825_v35  ;;  %v7986_v0 = vor.u32 %v7985_v47, %v7984_v45  ;;  %v7987_v35 = vld [vmem:[#allocation3 + $0x4f0] ss:$144 sm:$0x30]  ;;  %v8029_v41 = vld [vmem:[#allocation3 + $0x7e] ss:$144 sm:$0xc0] }
 0x5a2   :  { %10901 = vmatprep.subr.bf16.mxu1 %v11340_v24  ;;  %v6355_v19 = vpop.f32.mrf.mxu0 }
 0x5a3   :  { %v6362_v39 = vadd.f32 %v6355_v19, %v13721_v63  ;;  %v11314_v63 = vld [vmem:[%s13854_s5 + $0x630] sm:$0xff]   ;;  %v7861_v34 = vmax.f32 %v7811_v7, %v7827_v36  ;;  %v7981_v19 = vld [vmem:[#allocation3 + $0x70] ss:$144 sm:$0xc0]  ;;  %v7988_v53 = vor.u32 %v7987_v35, %v7986_v0  ;;  %v8004_v36 = vor.u32 %v8003_v6, %v8002_v44 }
 0x5a4   :  { %v10725_v11 = vpop.f32.mrf.mxu0  ;;  %10910 = vmatpush3.bf16.msra.mxu0 %v11314_v63 }
 0x5a5   :  { %10902 = vmatpush3.bf16.msra.mxu1 %v11312_v18  ;;  %v7849_v18 = vor.u32 %v7848_v29, %v7847_v10  ;;  %10911 = vmatprep.subr.bf16.mxu0 %v11340_v24  ;;  %v8010_v11 = vor.u32 %v8009_v20, %v8008_v58  ;;  %v8005_v10 = vld [vmem:[#allocation3 + $0x4f1] ss:$144 sm:$0xc0]  ;;  %v8016_v29 = vld [vmem:[#allocation3 + $0x4fd] ss:$144 sm:$0x3] }
 0x5a6   :  { %10927 = vmatprep.subr.bf16.mxu1 %v11340_v24  ;;  %v6358_v55 = vpop.f32.mrf.mxu0  ;;  %v11321_v20 = vld [vmem:[%s13856_s7 + $0x38] sm:$0xff]  }
 0x5a7   :  { %v6363_v59 = vadd.f32 %v6358_v55, %v13733_v14  ;;  %v7851_v30 = vor.u32 %v7850_v42, %v7849_v18  ;;  %v7863_v14 = vmax.f32 %v7843_v54, %v7859_v43  ;;  %v8017_v42 = vld [vmem:[#allocation3 + $0x4fd] ss:$144 sm:$0xc]  ;;  %v8012_v5 = vor.u32 %v8011_v8, %v8010_v11  ;;  %v8033_v43 = vld [vmem:[#allocation3 + $0x4fe] ss:$144 sm:$0xc] }
 0x5a8   :  { %v10726_v13 = vpop.f32.mrf.mxu0  ;;  %10912 = vmatpush3.bf16.msra.mxu0 %v11315_v57  ;;  %v8018_v55 = vor.u32 %v8017_v42, %v8016_v29  ;;  %v8021_v18 = vld [vmem:[#allocation3 + $0x4fd] ss:$144 sm:$0xc0]  ;;  %v8026_v54 = vor.u32 %v8025_v60, %v8024_v22  ;;  %v8032_v57 = vld [vmem:[#allocation3 + $0x4fe] ss:$144 sm:$0x3] }
 0x5a9   :  { %v7862_v62 = vmax.f32 %v7835_v27, %v7851_v30  ;;  %v7865_v9 = vmax.f32 %v7861_v34, %v7863_v14  ;;  %10913 = vmatprep.subr.bf16.mxu0 %v11340_v24  ;;  %v8019_v27 = vld [vmem:[#allocation3 + $0x4fd] ss:$144 sm:$0x30]  ;;  %v8027_v30 = vld [vmem:[#allocation3 + $0x7e] ss:$144 sm:$0x30]  ;;  %v8006_v34 = vor.u32 %v8005_v10, %v8004_v36 }
 0x5aa   :  { %v8020_v13 = vor.u32 %v8019_v27, %v8018_v55  ;;  %v8028_v14 = vor.u32 %v8027_v30, %v8026_v54  ;;  %v11325_v11 = vld [vmem:[%s13856_s7 + $0x18] sm:$0xff]  }
 0x5ab   :  { %v7864_v49 = vmax.f32 %v7860_v31, %v7862_v62  ;;  %v7990_v31 = vor.u32 %v7989_v23, %v7988_v53  ;;  %v8014_v62 = vor.u32 %v8013_v15, %v8012_v5  ;;  %v11326_v53 = vld [vmem:[%s13856_s7 + $0x10] sm:$0xff]   ;;  %v11328_v5 = vld [vmem:[%s13856_s7] sm:$0xff]  }
 0x5ac   :  { %10914 = vmatpush3.bf16.msra.mxu0 %v11316_v48  ;;  %v8035_v48 = vld [vmem:[#allocation3 + $0x4fe] ss:$144 sm:$0x30] }
 0x5ad   :  { %v7866_v28 = vpack.c.bf16 %v7865_v9, %v7864_v49  ;;  %10915 = vmatprep.subr.bf16.mxu0 %v11340_v24  ;;  %v8034_v49 = vor.u32 %v8033_v43, %v8032_v57  ;;  %v8037_v9 = vld [vmem:[#allocation3 + $0x4fe] ss:$144 sm:$0xc0]  ;;  %v8040_v47 = vmax.f32 %v7990_v31, %v8006_v34 }
 0x5af   :  { %10904 = vmatmul.mubr.bf16.vlgmr.msra.gmra.mxu1 %v7866_v28  ;;  %v8030_v28 = vor.u32 %v8029_v41, %v8028_v14  ;;  %v8036_v17 = vor.u32 %v8035_v48, %v8034_v49 }
 0x5b0   :  { %10943 = vmatprep.mubr.msk.bf16.mxu1 %vm11341_vm10, %v11340_v24  ;;  %10916 = vmatpush3.bf16.msra.mxu0 %v11317_v52  ;;  %v8022_v52 = vor.u32 %v8021_v18, %v8020_v13 }
 0x5b1   :  { %10917 = vmatprep.subr.bf16.mxu0 %v11340_v24  ;;  %v8038_v45 = vor.u32 %v8037_v9, %v8036_v17  ;;  %v8041_v12 = vmax.f32 %v8014_v62, %v8030_v28  ;;  %10928 = vmatpush3.bf16.msra.mxu1 %v11321_v20 }
 0x5b2   :  { %10929 = vmatprep.subr.bf16.mxu1 %v11340_v24 }
 0x5b3   :  { %v6534_v56 = vpop.f32.mrf.mxu1  ;;  %v8042_v46 = vmax.f32 %v8022_v52, %v8038_v45  ;;  %v9243_v45 = vld [vmem:[%s13855_s6] ss:$0 sm:$0xff] }
 0x5b4   :  { %v13792_v37 = vadd.f32 %v6534_v56, %v6362_v39  ;;  %v7997_v39 = vld [vmem:[#allocation3 + $0x71] ss:$144 sm:$0xc0]  ;;  %10918 = vmatpush3.bf16.msra.mxu0 %v11318_v16 }
 0x5b5   :  { %v10745_v3 = vpop.f32.mrf.mxu1  ;;  %10919 = vmatprep.subr.bf16.mxu0 %v11340_v24  ;;  %v7998_v63 = vor.u32 %v7997_v39, %v7996_v4  ;;  %v8044_v16 = vmax.f32 %v8040_v47, %v8042_v46 }
 0x5b7   :  { %v6537_v38 = vpop.f32.mrf.mxu1 }
 0x5b8   :  { %v6542_v51 = vadd.f32 %v6537_v38, %v6363_v59  ;;  %v7982_v59 = vor.u32 %v7981_v19, %v7980_v26  ;;  %10920 = vmatpush3.bf16.msra.mxu0 %v11319_v40  ;;  %v11322_v38 = vld [vmem:[%s13856_s7 + $0x30] sm:$0xff]   ;;  %v11324_v26 = vld [vmem:[%s13856_s7 + $0x20] sm:$0xff]  }
 0x5b9   :  { %v10746_v7 = vpop.f32.mrf.mxu1  ;;  %10921 = vmatprep.subr.bf16.mxu0 %v11340_v24  ;;  %10930 = vmatpush3.bf16.msra.mxu1 %v11322_v38 }
 0x5ba   :  { %v8039_v33 = vmax.f32 %v7982_v59, %v7998_v63  ;;  %10931 = vmatprep.subr.bf16.mxu1 %v11340_v24  ;;  %v11327_v7 = vld [vmem:[%s13856_s7 + $0x8] sm:$0xff]  }
 0x5bc   :  { %10922 = vmatpush3.bf16.msra.mxu0 %v11320_v61  ;;  %v8043_v56 = vmax.f32 %v8039_v33, %v8041_v12 }
 0x5be   :  { %v8045_v21 = vpack.c.bf16 %v8044_v16, %v8043_v56 }
 0x5c0   :  { %10924 = vmatmul.mubr.bf16.vlgmr.msra.gmra.mxu0 %v8045_v21 }
 0x5c9   :  { %v6713_v25 = vpop.f32.mrf.mxu0 }
 0x5ca   :  { %v6720_v32 = vadd.f32 %v6713_v25, %v13792_v37  ;;  %v11323_v37 = vld [vmem:[%s13856_s7 + $0x28] sm:$0xff]  }
 0x5cb   :  { %v10765_v50 = vpop.f32.mrf.mxu0  ;;  %10932 = vmatpush3.bf16.msra.mxu1 %v11323_v37 }
 0x5cc   :  { %10933 = vmatprep.subr.bf16.mxu1 %v11340_v24 }
 0x5cd   :  { %v6716_v0 = vpop.f32.mrf.mxu0 }
 0x5ce   :  { %v6721_v1 = vadd.f32 %v6716_v0, %v6542_v51 }
 0x5cf   :  { %v10766_v2 = vpop.f32.mrf.mxu0  ;;  %10934 = vmatpush3.bf16.msra.mxu1 %v11324_v26 }
 0x5d0   :  { %10935 = vmatprep.subr.bf16.mxu1 %v11340_v24 }
 0x5d3   :  { %10936 = vmatpush3.bf16.msra.mxu1 %v11325_v11 }
 0x5d4   :  { %10937 = vmatprep.subr.bf16.mxu1 %v11340_v24 }
 0x5d7   :  { %10938 = vmatpush3.bf16.msra.mxu1 %v11326_v53 }
 0x5d8   :  { %10939 = vmatprep.subr.bf16.mxu1 %v11340_v24 }
 0x5da   :  { %v6892_v3 = vpop.f32.mrf.mxu1 }
 0x5db   :  { %v6899_v35 = vadd.f32 %v6892_v3, %v6720_v32  ;;  %10940 = vmatpush3.bf16.msra.mxu1 %v11327_v7 }
 0x5dc   :  { %v10785_v44 = vpop.f32.mrf.mxu1  ;;  %10941 = vmatprep.subr.bf16.mxu1 %v11340_v24 }
 0x5de   :  { %v6895_v6 = vpop.f32.mrf.mxu1 }
 0x5df   :  { %v6900_v19 = vadd.f32 %v6895_v6, %v6721_v1  ;;  %10942 = vmatpush3.bf16.msra.mxu1 %v11328_v5  ;;  %v9244_v1 = vld [vmem:[%s13857_s8] ss:$0 sm:$0xff] }
 0x5e0   :  { %v10786_v58 = vpop.f32.mrf.mxu1 }
 0x5ef   :  { %v7071_v40 = vpop.f32.mrf.mxu0 }
 0x5f0   :  { %v7078_v23 = vadd.f32 %v7071_v40, %v6899_v35 }
 0x5f1   :  { %v10805_v4 = vpop.f32.mrf.mxu0 }
 0x5f3   :  { %v7074_v39 = vpop.f32.mrf.mxu0 }
 0x5f4   :  { %v7079_v8 = vadd.f32 %v7074_v39, %v6900_v19 }
 0x5f5   :  { %v10806_v51 = vpop.f32.mrf.mxu0 }
 0x621   :  { %v7250_v10 = vpop.f32.mrf.mxu1 }
 0x622   :  { %v7257_v29 = vadd.f32 %v7250_v10, %v7078_v23 }
 0x623   :  { %v10825_v42 = vpop.f32.mrf.mxu1 }
 0x625   :  { %v7253_v36 = vpop.f32.mrf.mxu1 }
 0x626   :  { %v7258_v15 = vadd.f32 %v7253_v36, %v7079_v8 }
 0x627   :  { %v10826_v55 = vpop.f32.mrf.mxu1 }
 0x634   :  { %v7429_v27 = vpop.f32.mrf.mxu0 }
 0x635   :  { %v7436_v18 = vadd.f32 %v7429_v27, %v7257_v29 }
 0x636   :  { %v10845_v22 = vpop.f32.mrf.mxu0 }
 0x638   :  { %v7432_v60 = vpop.f32.mrf.mxu0 }
 0x639   :  { %v7437_v61 = vadd.f32 %v7432_v60, %v7258_v15 }
 0x63a   :  { %v10846_v59 = vpop.f32.mrf.mxu0 }
 0x648   :  { %v7608_v63 = vpop.f32.mrf.mxu1 }
 0x649   :  { %v7615_v13 = vadd.f32 %v7608_v63, %v7436_v18 }
 0x64a   :  { %v10865_v54 = vpop.f32.mrf.mxu1 }
 0x64c   :  { %v7611_v30 = vpop.f32.mrf.mxu1 }
 0x64d   :  { %v7616_v41 = vadd.f32 %v7611_v30, %v7437_v61 }
 0x64e   :  { %v10866_v31 = vpop.f32.mrf.mxu1 }
 0x65b   :  { %v7787_v57 = vpop.f32.mrf.mxu0 }
 0x65c   :  { %v7794_v9 = vadd.f32 %v7787_v57, %v7615_v13 }
 0x65d   :  { %v10885_v43 = vpop.f32.mrf.mxu0 }
 0x65f   :  { %v7790_v34 = vpop.f32.mrf.mxu0 }
 0x660   :  { %v7795_v28 = vadd.f32 %v7790_v34, %v7616_v41 }
 0x661   :  { %v10886_v62 = vpop.f32.mrf.mxu0 }
 0x66f   :  { %v7966_v14 = vpop.f32.mrf.mxu1 }
 0x670   :  { %v7973_v52 = vadd.f32 %v7966_v14, %v7794_v9 }
 0x671   :  { %v10905_v24 = vpop.f32.mrf.mxu1 }
 0x673   :  { %v7969_v49 = vpop.f32.mrf.mxu1 }
 0x674   :  { %v7974_v12 = vadd.f32 %v7969_v49, %v7795_v28 }
 0x675   :  { %v10906_v48 = vpop.f32.mrf.mxu1 }
 0x680   :  { %v8145_v17 = vpop.f32.mrf.mxu0 }
 0x681   :  { %v8152_v33 = vadd.f32 %v8145_v17, %v7973_v52 }
 0x682   :  { %v10925_v47 = vpop.f32.mrf.mxu0 }
 0x683   :  { %v8161_v56 = vadd.f32 %v9243_v45, %v8152_v33 }
 0x684   :  { %v8148_v46 = vpop.f32.mrf.mxu0 }
 0x685   :  { %v8153_v16 = vadd.f32 %v8148_v46, %v7974_v12  ;;  %v8163_v32 = vmax.f32 %v8161_v56, 0.0 }
 0x686   :  { %v10926_v21 = vpop.f32.mrf.mxu0 }
 0x687   :  { %v8162_v25 = vadd.f32 %v9243_v45, %v8153_v16 }
 0x689   :  { %v8164_v50 = vmax.f32 %v8162_v25, 0.0 }
 0x68b   :  { %v8165_v0 = vpack.c.bf16 %v8164_v50, %v8163_v32 }
 0x68d   :  { %10944 = vmatmul.mubr.bf16.vlgmr.msra.gmra.mxu1 %v8165_v0 }
 0x74d   :  { %v8271_v2 = vpop.f32.mrf.mxu1 }
 0x74e   :  { %v8272_v3 = vadd.f32 %v9244_v1, %v8271_v2 }
 0x74f   :  { %v10945_v35 = vpop.f32.mrf.mxu1 }
 0x750   :  { %8278 = vst [vmem:[%s13858_s9] sm:$0xff] %v8272_v3 }
 0x751   :  { %v8274_v44 = vpop.f32.mrf.mxu1 }
 0x752   :  { %v8275_v6 = vadd.f32 %v9244_v1, %v8274_v44 }
 0x753   :  { %v10946_v19 = vpop.f32.mrf.mxu1 }
 0x754   :  { %8279 = vst [vmem:[%s13858_s9 + $0x8] sm:$0xff] %v8275_v6 }

</bundles_post_ra>
